<compile_context>
chip_gen: v6e
topology: v6e:2x2x1
jax: 0.10.0
libtpu: 0.0.40
codegen_flags: <defaults>
</compile_context>

<pallas_src>
import numpy as np
import jax
import jax.numpy as jnp
from jax.experimental import pallas as pl
from jax.experimental.pallas import tpu as pltpu

EPS = 1e-5

# (Cin, Cout, K, stride, padding) for the 5 ConvTranspose1d layers.
LAYER_CFG = [
    (1, 64, 4, 2, 3),
    (64, 32, 4, 2, 1),
    (32, 16, 4, 2, 1),
    (16, 8, 4, 2, 1),
    (8, 1, 4, 2, 1),
]
N_LAYERS = len(LAYER_CFG)
N_BN = N_LAYERS - 1

# Packed-slab geometry (static): max cout = 64, max 2*cin = 128.
W_PAD_C, W_PAD_K = 64, 128

_DOT_KW = dict(preferred_element_type=jnp.float32,
               precision=jax.lax.Precision.HIGHEST)


def _out_len(L, K, s, p):
    return (L - 1) * s - 2 * p + K


def _phase_taps(p, K=4):
    """Polyphase decomposition of a stride-2 ConvTranspose1d.

    Output index o = 2*i + k - p.  For output parity r (o = 2m + r) only taps
    with k == (r + p) (mod 2) contribute, each reading input i = m + delta,
    delta = (r + p - k) // 2.  Returns [[(k, delta), (k, delta)] for r in 0,1]
    with taps in ascending k (must match the weight packing below).
    """
    phases = []
    for r in (0, 1):
        phases.append([(k, (r + p - k) // 2)
                       for k in range(K) if (k % 2) == ((r + p) % 2)])
    return phases


# ----------------------------- Pallas kernel --------------------------------

def _generator_kernel(x_ref, w_ref, s_ref, gb_ref, out_ref):
    """Fully fused Generator forward (single grid-less invocation).

    x_ref  : (N, L0)                input noise (channel dim == 1 squeezed)
    w_ref  : (2*N_LAYERS, 64, 128)  per-(layer, parity) packed weights
                                    [:cout, :2*cin] = [W_ka^T | W_kb^T]
    s_ref  : (2*N_LAYERS, 96, 192)  0/1 even/odd interleave matrices
    gb_ref : (N_BN, 64, 2)          BatchNorm gamma / beta columns
    out_ref: (1, N*192)             Tanh output, n-major along lanes

    Activations live as (C, N*L) f32: channels on sublanes, length on lanes.
    Everything stays in VMEM; no intermediate touches HBM.
    """
    N, L = x_ref.shape
    x = x_ref[...].astype(jnp.float32)
    acts = [x[n:n + 1, :] for n in range(N)]              # per-sample (1, L0)

    for li, (cin, cout, K, s, p) in enumerate(LAYER_CFG):
        Lout = _out_len(L, K, s, p)
        Lh = Lout // 2
        taps = _phase_taps(p, K)
        all_d = [d for ph in taps for (_k, d) in ph]
        pad_lo = max(0, -min(all_d))
        pad_hi = max(0, (Lh - 1) + max(all_d) - (L - 1))

        # Zero-pad each sample once so every shifted view is a static slice.
        padded = []
        for n in range(N):
            a = acts[n]                                    # (cin, L)
            parts = []
            if pad_lo:
                parts.append(jnp.zeros((cin, pad_lo), jnp.float32))
            parts.append(a)
            if pad_hi:
                parts.append(jnp.zeros((cin, pad_hi), jnp.float32))
            padded.append(parts[0] if len(parts) == 1
                          else jnp.concatenate(parts, axis=1))

        # --- polyphase channel contraction: ONE dot per output parity -------
        phase_out = []
        for r in (0, 1):
            xs_parts = []
            for n in range(N):
                ap = padded[n]
                rows = [ap[:, pad_lo + d: pad_lo + d + Lh]
                        for (_k, d) in taps[r]]
                xs_parts.append(jnp.concatenate(rows, axis=0))   # (2*cin, Lh)
            xs = (xs_parts[0] if N == 1
                  else jnp.concatenate(xs_parts, axis=1))        # (2*cin, N*Lh)
            wp = w_ref[2 * li + r][:cout, :2 * cin]              # (cout, 2*cin)
            if cin == 1:
                # degenerate contraction depth 2 -> keep it on the VPU
                ph = wp[:, 0:1] * xs[0:1, :] + wp[:, 1:2] * xs[1:2, :]
            else:
                ph = jnp.dot(wp, xs, **_DOT_KW)
            phase_out.append(ph)                                 # (cout, N*Lh)

        # --- even/odd interleave via tiny per-sample 0/1 matmuls (MXU) ------
        s_e = s_ref[2 * li + 0][:Lh, :Lout]                      # (Lh, Lout)
        s_o = s_ref[2 * li + 1][:Lh, :Lout]
        ys = []
        for n in range(N):
            e_n = phase_out[0][:, n * Lh:(n + 1) * Lh]
            o_n = phase_out[1][:, n * Lh:(n + 1) * Lh]
            ys.append(jnp.dot(e_n, s_e, **_DOT_KW)
                      + jnp.dot(o_n, s_o, **_DOT_KW))            # (cout, Lout)
        acc = ys[0] if N == 1 else jnp.concatenate(ys, axis=1)   # (cout, N*Lout)

        if li < N_LAYERS - 1:
            # BatchNorm1d (training-mode batch stats) folded into one affine.
            inv = 1.0 / float(N * Lout)
            mean = jnp.sum(acc, axis=1, keepdims=True) * inv
            ex2 = jnp.sum(acc * acc, axis=1, keepdims=True) * inv
            var = jnp.maximum(ex2 - mean * mean, 0.0)
            rstd = jax.lax.rsqrt(var + EPS)
            gamma = gb_ref[li][:cout, 0:1]
            beta = gb_ref[li][:cout, 1:2]
            scale = gamma * rstd
            shift = beta - mean * scale
            y = jnp.maximum(acc * scale + shift, 0.0)            # BN + ReLU
            acts = [y[:, n * Lout:(n + 1) * Lout] for n in range(N)]
        else:
            out_ref[...] = jnp.tanh(acc)                         # (1, N*192)
        L = Lout


# ------------------------------- JAX glue ------------------------------------

def _pack_weights(params):
    """Per-(layer, parity) weight blocks [W_ka^T | W_kb^T], padded & stacked."""
    blocks = []
    for li, (w, _g, _b) in enumerate(params):
        cin, cout, K, s, p = LAYER_CFG[li]
        for ph in _phase_taps(p, K):
            wp = jnp.concatenate([jnp.transpose(w[:, :, k]) for (k, _d) in ph],
                                 axis=1)                          # (cout, 2*cin)
            blocks.append(jnp.pad(wp, ((0, W_PAD_C - cout),
                                       (0, W_PAD_K - 2 * cin))))
    return jnp.stack(blocks, axis=0).astype(jnp.float32)          # (10, 64, 128)


def _pack_bn(params):
    blocks = []
    for li in range(N_BN):
        cout = LAYER_CFG[li][1]
        g = params[li][1].reshape(cout, 1)
        b = params[li][2].reshape(cout, 1)
        gb = jnp.concatenate([g, b], axis=1)                      # (cout, 2)
        blocks.append(jnp.pad(gb, ((0, W_PAD_C - cout), (0, 0))))
    return jnp.stack(blocks, axis=0).astype(jnp.float32)          # (4, 64, 2)


def _build_interleave_slab(L0):
    """Constant per-layer 0/1 matrices placing phase r at output lanes 2m+r."""
    L = L0
    sizes = []
    for (_cin, _cout, K, s, p) in LAYER_CFG:
        Lout = _out_len(L, K, s, p)
        sizes.append((Lout // 2, Lout))
        L = Lout
    max_h = max(h for h, _ in sizes)
    max_o = max(o for _, o in sizes)
    slab = np.zeros((2 * N_LAYERS, max_h, max_o), np.float32)
    for li, (Lh, Lout) in enumerate(sizes):
        m = np.arange(Lh)
        slab[2 * li + 0, m, 2 * m + 0] = 1.0
        slab[2 * li + 1, m, 2 * m + 1] = 1.0
    return slab, L


def generator_forward(params, x_ncl):
    """x_ncl: (N, 1, L0) -> (N, 1, L_final), matching the PyTorch forward."""
    N, _c, L0 = x_ncl.shape
    s_slab_np, L_final = _build_interleave_slab(L0)

    x2d = x_ncl.reshape(N, L0).astype(jnp.float32)
    w_slab = _pack_weights(params)
    gb_slab = _pack_bn(params)
    s_slab = jnp.asarray(s_slab_np)

    out2d = pl.pallas_call(
        _generator_kernel,
        out_shape=jax.ShapeDtypeStruct((1, N * L_final), jnp.float32),
        in_specs=[pl.BlockSpec(memory_space=pltpu.MemorySpace.VMEM)] * 4,
        out_specs=pl.BlockSpec(memory_space=pltpu.MemorySpace.VMEM),
    )(x2d, w_slab, s_slab, gb_slab)

    return out2d.reshape(N, L_final)[:, None, :]                  # back to NCL


def init_params(key):
    """Deterministic synthetic parameters matching the PyTorch module shapes."""
    params = []
    for (cin, cout, k, _s, _p) in LAYER_CFG:
        key, wk = jax.random.split(key)
        w = jax.random.normal(wk, (cin, cout, k), jnp.float32) * 0.2
        gamma = jnp.ones((cout,), jnp.float32)   # BatchNorm1d default weight
        beta = jnp.zeros((cout,), jnp.float32)   # BatchNorm1d default bias
        params.append((w, gamma, beta))
    return params


# --------------------------- NumPy reference ---------------------------------

def ref_forward(params, x):
    x = np.asarray(x, np.float64)
    for li, ((_cin, cout, k, s, p), (w, gamma, beta)) in enumerate(
            zip(LAYER_CFG, params)):
        w = np.asarray(w, np.float64)
        N, _Cin, L = x.shape
        Lout = (L - 1) * s - 2 * p + k
        y = np.zeros((N, cout, Lout))
        for i in range(L):
            for kk in range(k):
                o = i * s + kk - p
                if 0 <= o < Lout:
                    y[:, :, o] += x[:, :, i] @ w[:, :, kk]
        if li == N_LAYERS - 1:
            x = np.tanh(y)
        else:
            mean = y.mean(axis=(0, 2), keepdims=True)
            var = y.var(axis=(0, 2), keepdims=True)
            yhat = (y - mean) / np.sqrt(var + EPS)
            yhat = (yhat * np.asarray(gamma)[None, :, None]
                    + np.asarray(beta)[None, :, None])
            x = np.maximum(yhat, 0.0)
    return x


# --------------------------------- main ---------------------------------------

if __name__ == "__main__":
    key = jax.random.PRNGKey(0)
    pkey, xkey = jax.random.split(key)
    params = init_params(pkey)

    N, L = 2, 8                                   # small shapes; nc=1 per module
    x = jax.random.normal(xkey, (N, 1, L), jnp.float32)

    fwd = jax.jit(generator_forward)
    out = fwd(params, x)
    out = jax.block_until_ready(out)

    assert out.shape == (N, 1, 192), out.shape    # 8 -> 12 -> 24 -> 48 -> 96 -> 192

    ref = ref_forward(params, np.asarray(x))
    np.testing.assert_allclose(np.asarray(out), ref, rtol=2e-3, atol=2e-3)

    print("KERNEL_OK")
</pallas_src>

<mosaic_0001>
module attributes {stable_mosaic.version = 11 : i64} {
  func.func @_generator_kernel(%arg0: memref<2x8xf32, #tpu.memory_space<vmem>>, %arg1: memref<10x64x128xf32, #tpu.memory_space<vmem>>, %arg2: memref<10x96x192xf32, #tpu.memory_space<vmem>>, %arg3: memref<4x64x2xf32, #tpu.memory_space<vmem>>, %arg4: memref<1x384xf32, #tpu.memory_space<vmem>>) attributes {dimension_semantics = [], scalar_prefetch = 0 : i64, scratch_operands = 0 : i64, tpu.core_type = #tpu.core_type<tc>} {
    %c0 = arith.constant 0 : index
    %c0_0 = arith.constant 0 : index
    %0 = vector.load %arg0[%c0, %c0_0] : memref<2x8xf32, #tpu.memory_space<vmem>>, vector<2x8xf32>
    %1 = vector.extract_strided_slice %0 {offsets = [0, 0], sizes = [1, 8], strides = [1, 1]} : vector<2x8xf32> to vector<1x8xf32>
    %2 = vector.extract_strided_slice %0 {offsets = [1, 0], sizes = [1, 8], strides = [1, 1]} : vector<2x8xf32> to vector<1x8xf32>
    %3 = vector.extract_strided_slice %1 {offsets = [0, 1], sizes = [1, 6], strides = [1, 1]} : vector<1x8xf32> to vector<1x6xf32>
    %4 = vector.extract_strided_slice %1 {offsets = [0, 0], sizes = [1, 6], strides = [1, 1]} : vector<1x8xf32> to vector<1x6xf32>
    %5 = tpu.concatenate %3, %4 in 0 : vector<1x6xf32>, vector<1x6xf32> -> vector<2x6xf32>
    %6 = vector.extract_strided_slice %2 {offsets = [0, 1], sizes = [1, 6], strides = [1, 1]} : vector<1x8xf32> to vector<1x6xf32>
    %7 = vector.extract_strided_slice %2 {offsets = [0, 0], sizes = [1, 6], strides = [1, 1]} : vector<1x8xf32> to vector<1x6xf32>
    %8 = tpu.concatenate %6, %7 in 0 : vector<1x6xf32>, vector<1x6xf32> -> vector<2x6xf32>
    %9 = tpu.concatenate %5, %8 in 1 : vector<2x6xf32>, vector<2x6xf32> -> vector<2x12xf32>
    %c0_1 = arith.constant 0 : index
    %c0_2 = arith.constant 0 : index
    %c0_3 = arith.constant 0 : index
    %10 = vector.load %arg1[%c0_1, %c0_2, %c0_3] : memref<10x64x128xf32, #tpu.memory_space<vmem>>, vector<1x64x128xf32>
    %11 = vector.shape_cast %10 : vector<1x64x128xf32> to vector<64x128xf32>
    %12 = vector.extract_strided_slice %11 {offsets = [0, 0], sizes = [64, 2], strides = [1, 1]} : vector<64x128xf32> to vector<64x2xf32>
    %13 = vector.extract_strided_slice %12 {offsets = [0, 0], sizes = [64, 1], strides = [1, 1]} : vector<64x2xf32> to vector<64x1xf32>
    %14 = vector.extract_strided_slice %9 {offsets = [0, 0], sizes = [1, 12], strides = [1, 1]} : vector<2x12xf32> to vector<1x12xf32>
    %15 = vector.broadcast %13 : vector<64x1xf32> to vector<64x12xf32>
    %16 = vector.broadcast %14 : vector<1x12xf32> to vector<64x12xf32>
    %17 = arith.mulf %15, %16 : vector<64x12xf32>
    %18 = vector.extract_strided_slice %12 {offsets = [0, 1], sizes = [64, 1], strides = [1, 1]} : vector<64x2xf32> to vector<64x1xf32>
    %19 = vector.extract_strided_slice %9 {offsets = [1, 0], sizes = [1, 12], strides = [1, 1]} : vector<2x12xf32> to vector<1x12xf32>
    %20 = vector.broadcast %18 : vector<64x1xf32> to vector<64x12xf32>
    %21 = vector.broadcast %19 : vector<1x12xf32> to vector<64x12xf32>
    %22 = arith.mulf %20, %21 : vector<64x12xf32>
    %23 = arith.addf %17, %22 : vector<64x12xf32>
    %24 = vector.extract_strided_slice %1 {offsets = [0, 2], sizes = [1, 6], strides = [1, 1]} : vector<1x8xf32> to vector<1x6xf32>
    %25 = vector.extract_strided_slice %1 {offsets = [0, 1], sizes = [1, 6], strides = [1, 1]} : vector<1x8xf32> to vector<1x6xf32>
    %26 = tpu.concatenate %24, %25 in 0 : vector<1x6xf32>, vector<1x6xf32> -> vector<2x6xf32>
    %27 = vector.extract_strided_slice %2 {offsets = [0, 2], sizes = [1, 6], strides = [1, 1]} : vector<1x8xf32> to vector<1x6xf32>
    %28 = vector.extract_strided_slice %2 {offsets = [0, 1], sizes = [1, 6], strides = [1, 1]} : vector<1x8xf32> to vector<1x6xf32>
    %29 = tpu.concatenate %27, %28 in 0 : vector<1x6xf32>, vector<1x6xf32> -> vector<2x6xf32>
    %30 = tpu.concatenate %26, %29 in 1 : vector<2x6xf32>, vector<2x6xf32> -> vector<2x12xf32>
    %c1 = arith.constant 1 : index
    %c0_4 = arith.constant 0 : index
    %c0_5 = arith.constant 0 : index
    %31 = vector.load %arg1[%c1, %c0_4, %c0_5] : memref<10x64x128xf32, #tpu.memory_space<vmem>>, vector<1x64x128xf32>
    %32 = vector.shape_cast %31 : vector<1x64x128xf32> to vector<64x128xf32>
    %33 = vector.extract_strided_slice %32 {offsets = [0, 0], sizes = [64, 2], strides = [1, 1]} : vector<64x128xf32> to vector<64x2xf32>
    %34 = vector.extract_strided_slice %33 {offsets = [0, 0], sizes = [64, 1], strides = [1, 1]} : vector<64x2xf32> to vector<64x1xf32>
    %35 = vector.extract_strided_slice %30 {offsets = [0, 0], sizes = [1, 12], strides = [1, 1]} : vector<2x12xf32> to vector<1x12xf32>
    %36 = vector.broadcast %34 : vector<64x1xf32> to vector<64x12xf32>
    %37 = vector.broadcast %35 : vector<1x12xf32> to vector<64x12xf32>
    %38 = arith.mulf %36, %37 : vector<64x12xf32>
    %39 = vector.extract_strided_slice %33 {offsets = [0, 1], sizes = [64, 1], strides = [1, 1]} : vector<64x2xf32> to vector<64x1xf32>
    %40 = vector.extract_strided_slice %30 {offsets = [1, 0], sizes = [1, 12], strides = [1, 1]} : vector<2x12xf32> to vector<1x12xf32>
    %41 = vector.broadcast %39 : vector<64x1xf32> to vector<64x12xf32>
    %42 = vector.broadcast %40 : vector<1x12xf32> to vector<64x12xf32>
    %43 = arith.mulf %41, %42 : vector<64x12xf32>
    %44 = arith.addf %38, %43 : vector<64x12xf32>
    %c0_6 = arith.constant 0 : index
    %c0_7 = arith.constant 0 : index
    %c0_8 = arith.constant 0 : index
    %45 = vector.load %arg2[%c0_6, %c0_7, %c0_8] : memref<10x96x192xf32, #tpu.memory_space<vmem>>, vector<1x96x192xf32>
    %46 = vector.shape_cast %45 : vector<1x96x192xf32> to vector<96x192xf32>
    %47 = vector.extract_strided_slice %46 {offsets = [0, 0], sizes = [6, 12], strides = [1, 1]} : vector<96x192xf32> to vector<6x12xf32>
    %c1_9 = arith.constant 1 : index
    %c0_10 = arith.constant 0 : index
    %c0_11 = arith.constant 0 : index
    %48 = vector.load %arg2[%c1_9, %c0_10, %c0_11] : memref<10x96x192xf32, #tpu.memory_space<vmem>>, vector<1x96x192xf32>
    %49 = vector.shape_cast %48 : vector<1x96x192xf32> to vector<96x192xf32>
    %50 = vector.extract_strided_slice %49 {offsets = [0, 0], sizes = [6, 12], strides = [1, 1]} : vector<96x192xf32> to vector<6x12xf32>
    %51 = vector.extract_strided_slice %23 {offsets = [0, 0], sizes = [64, 6], strides = [1, 1]} : vector<64x12xf32> to vector<64x6xf32>
    %52 = vector.extract_strided_slice %44 {offsets = [0, 0], sizes = [64, 6], strides = [1, 1]} : vector<64x12xf32> to vector<64x6xf32>
    %cst = arith.constant dense<0.000000e+00> : vector<64x12xf32>
    %53 = tpu.matmul %51, %47, %cst {dimension_numbers = #tpu.dot_dimension_numbers<[1], [0], [0], [1], [0, 0, 1, 1], [], []>, precision = #tpu.contract_precision<fp32>} : vector<64x6xf32>, vector<6x12xf32>, vector<64x12xf32> -> vector<64x12xf32>
    %cst_12 = arith.constant dense<0.000000e+00> : vector<64x12xf32>
    %54 = tpu.matmul %52, %50, %cst_12 {dimension_numbers = #tpu.dot_dimension_numbers<[1], [0], [0], [1], [0, 0, 1, 1], [], []>, precision = #tpu.contract_precision<fp32>} : vector<64x6xf32>, vector<6x12xf32>, vector<64x12xf32> -> vector<64x12xf32>
    %55 = arith.addf %53, %54 : vector<64x12xf32>
    %56 = vector.extract_strided_slice %23 {offsets = [0, 6], sizes = [64, 6], strides = [1, 1]} : vector<64x12xf32> to vector<64x6xf32>
    %57 = vector.extract_strided_slice %44 {offsets = [0, 6], sizes = [64, 6], strides = [1, 1]} : vector<64x12xf32> to vector<64x6xf32>
    %cst_13 = arith.constant dense<0.000000e+00> : vector<64x12xf32>
    %58 = tpu.matmul %56, %47, %cst_13 {dimension_numbers = #tpu.dot_dimension_numbers<[1], [0], [0], [1], [0, 0, 1, 1], [], []>, precision = #tpu.contract_precision<fp32>} : vector<64x6xf32>, vector<6x12xf32>, vector<64x12xf32> -> vector<64x12xf32>
    %cst_14 = arith.constant dense<0.000000e+00> : vector<64x12xf32>
    %59 = tpu.matmul %57, %50, %cst_14 {dimension_numbers = #tpu.dot_dimension_numbers<[1], [0], [0], [1], [0, 0, 1, 1], [], []>, precision = #tpu.contract_precision<fp32>} : vector<64x6xf32>, vector<6x12xf32>, vector<64x12xf32> -> vector<64x12xf32>
    %60 = arith.addf %58, %59 : vector<64x12xf32>
    %61 = tpu.concatenate %55, %60 in 1 : vector<64x12xf32>, vector<64x12xf32> -> vector<64x24xf32>
    %cst_15 = arith.constant dense<0.000000e+00> : vector<64xf32>
    %62 = vector.multi_reduction <add>, %61, %cst_15 [1] : vector<64x24xf32> to vector<64xf32>
    %63 = vector.shape_cast %62 : vector<64xf32> to vector<64x1xf32>
    %cst_16 = arith.constant 0.0416666679 : f32
    %64 = vector.broadcast %cst_16 : f32 to vector<64x1xf32>
    %65 = arith.mulf %63, %64 : vector<64x1xf32>
    %66 = arith.mulf %61, %61 : vector<64x24xf32>
    %cst_17 = arith.constant dense<0.000000e+00> : vector<64xf32>
    %67 = vector.multi_reduction <add>, %66, %cst_17 [1] : vector<64x24xf32> to vector<64xf32>
    %68 = vector.shape_cast %67 : vector<64xf32> to vector<64x1xf32>
    %cst_18 = arith.constant 0.0416666679 : f32
    %69 = vector.broadcast %cst_18 : f32 to vector<64x1xf32>
    %70 = arith.mulf %68, %69 : vector<64x1xf32>
    %71 = arith.mulf %65, %65 : vector<64x1xf32>
    %72 = arith.subf %70, %71 : vector<64x1xf32>
    %cst_19 = arith.constant 0.000000e+00 : f32
    %73 = vector.broadcast %cst_19 : f32 to vector<64x1xf32>
    %74 = arith.maximumf %72, %73 : vector<64x1xf32>
    %cst_20 = arith.constant 9.99999974E-6 : f32
    %75 = vector.broadcast %cst_20 : f32 to vector<64x1xf32>
    %76 = arith.addf %74, %75 : vector<64x1xf32>
    %77 = math.rsqrt %76 : vector<64x1xf32>
    %c0_21 = arith.constant 0 : index
    %c0_22 = arith.constant 0 : index
    %c0_23 = arith.constant 0 : index
    %78 = vector.load %arg3[%c0_21, %c0_22, %c0_23] : memref<4x64x2xf32, #tpu.memory_space<vmem>>, vector<1x64x2xf32>
    %79 = vector.shape_cast %78 : vector<1x64x2xf32> to vector<64x2xf32>
    %80 = vector.extract_strided_slice %79 {offsets = [0, 0], sizes = [64, 1], strides = [1, 1]} : vector<64x2xf32> to vector<64x1xf32>
    %c0_24 = arith.constant 0 : index
    %c0_25 = arith.constant 0 : index
    %c0_26 = arith.constant 0 : index
    %81 = vector.load %arg3[%c0_24, %c0_25, %c0_26] : memref<4x64x2xf32, #tpu.memory_space<vmem>>, vector<1x64x2xf32>
    %82 = vector.shape_cast %81 : vector<1x64x2xf32> to vector<64x2xf32>
    %83 = vector.extract_strided_slice %82 {offsets = [0, 1], sizes = [64, 1], strides = [1, 1]} : vector<64x2xf32> to vector<64x1xf32>
    %84 = arith.mulf %80, %77 : vector<64x1xf32>
    %85 = arith.mulf %65, %84 : vector<64x1xf32>
    %86 = arith.subf %83, %85 : vector<64x1xf32>
    %87 = vector.broadcast %84 : vector<64x1xf32> to vector<64x24xf32>
    %88 = arith.mulf %61, %87 : vector<64x24xf32>
    %89 = vector.broadcast %86 : vector<64x1xf32> to vector<64x24xf32>
    %90 = arith.addf %88, %89 : vector<64x24xf32>
    %cst_27 = arith.constant 0.000000e+00 : f32
    %91 = vector.broadcast %cst_27 : f32 to vector<64x24xf32>
    %92 = arith.maximumf %90, %91 : vector<64x24xf32>
    %93 = vector.extract_strided_slice %92 {offsets = [0, 0], sizes = [64, 12], strides = [1, 1]} : vector<64x24xf32> to vector<64x12xf32>
    %94 = vector.extract_strided_slice %92 {offsets = [0, 12], sizes = [64, 12], strides = [1, 1]} : vector<64x24xf32> to vector<64x12xf32>
    %cst_28 = arith.constant 0.000000e+00 : f32
    %95 = vector.broadcast %cst_28 : f32 to vector<64x1xf32>
    %cst_29 = arith.constant 0.000000e+00 : f32
    %96 = vector.broadcast %cst_29 : f32 to vector<64x1xf32>
    %97 = tpu.concatenate %95, %93, %96 in 1 : vector<64x1xf32>, vector<64x12xf32>, vector<64x1xf32> -> vector<64x14xf32>
    %cst_30 = arith.constant 0.000000e+00 : f32
    %98 = vector.broadcast %cst_30 : f32 to vector<64x1xf32>
    %cst_31 = arith.constant 0.000000e+00 : f32
    %99 = vector.broadcast %cst_31 : f32 to vector<64x1xf32>
    %100 = tpu.concatenate %98, %94, %99 in 1 : vector<64x1xf32>, vector<64x12xf32>, vector<64x1xf32> -> vector<64x14xf32>
    %101 = vector.extract_strided_slice %97 {offsets = [0, 1], sizes = [64, 12], strides = [1, 1]} : vector<64x14xf32> to vector<64x12xf32>
    %102 = vector.extract_strided_slice %97 {offsets = [0, 0], sizes = [64, 12], strides = [1, 1]} : vector<64x14xf32> to vector<64x12xf32>
    %103 = tpu.concatenate %101, %102 in 0 : vector<64x12xf32>, vector<64x12xf32> -> vector<128x12xf32>
    %104 = vector.extract_strided_slice %100 {offsets = [0, 1], sizes = [64, 12], strides = [1, 1]} : vector<64x14xf32> to vector<64x12xf32>
    %105 = vector.extract_strided_slice %100 {offsets = [0, 0], sizes = [64, 12], strides = [1, 1]} : vector<64x14xf32> to vector<64x12xf32>
    %106 = tpu.concatenate %104, %105 in 0 : vector<64x12xf32>, vector<64x12xf32> -> vector<128x12xf32>
    %107 = tpu.concatenate %103, %106 in 1 : vector<128x12xf32>, vector<128x12xf32> -> vector<128x24xf32>
    %c2 = arith.constant 2 : index
    %c0_32 = arith.constant 0 : index
    %c0_33 = arith.constant 0 : index
    %108 = vector.load %arg1[%c2, %c0_32, %c0_33] : memref<10x64x128xf32, #tpu.memory_space<vmem>>, vector<1x64x128xf32>
    %109 = vector.shape_cast %108 : vector<1x64x128xf32> to vector<64x128xf32>
    %110 = vector.extract_strided_slice %109 {offsets = [0, 0], sizes = [32, 128], strides = [1, 1]} : vector<64x128xf32> to vector<32x128xf32>
    %cst_34 = arith.constant dense<0.000000e+00> : vector<32x24xf32>
    %111 = tpu.matmul %110, %107, %cst_34 {dimension_numbers = #tpu.dot_dimension_numbers<[1], [0], [0], [1], [0, 0, 1, 1], [], []>, precision = #tpu.contract_precision<fp32>} : vector<32x128xf32>, vector<128x24xf32>, vector<32x24xf32> -> vector<32x24xf32>
    %112 = vector.extract_strided_slice %97 {offsets = [0, 2], sizes = [64, 12], strides = [1, 1]} : vector<64x14xf32> to vector<64x12xf32>
    %113 = vector.extract_strided_slice %97 {offsets = [0, 1], sizes = [64, 12], strides = [1, 1]} : vector<64x14xf32> to vector<64x12xf32>
    %114 = tpu.concatenate %112, %113 in 0 : vector<64x12xf32>, vector<64x12xf32> -> vector<128x12xf32>
    %115 = vector.extract_strided_slice %100 {offsets = [0, 2], sizes = [64, 12], strides = [1, 1]} : vector<64x14xf32> to vector<64x12xf32>
    %116 = vector.extract_strided_slice %100 {offsets = [0, 1], sizes = [64, 12], strides = [1, 1]} : vector<64x14xf32> to vector<64x12xf32>
    %117 = tpu.concatenate %115, %116 in 0 : vector<64x12xf32>, vector<64x12xf32> -> vector<128x12xf32>
    %118 = tpu.concatenate %114, %117 in 1 : vector<128x12xf32>, vector<128x12xf32> -> vector<128x24xf32>
    %c3 = arith.constant 3 : index
    %c0_35 = arith.constant 0 : index
    %c0_36 = arith.constant 0 : index
    %119 = vector.load %arg1[%c3, %c0_35, %c0_36] : memref<10x64x128xf32, #tpu.memory_space<vmem>>, vector<1x64x128xf32>
    %120 = vector.shape_cast %119 : vector<1x64x128xf32> to vector<64x128xf32>
    %121 = vector.extract_strided_slice %120 {offsets = [0, 0], sizes = [32, 128], strides = [1, 1]} : vector<64x128xf32> to vector<32x128xf32>
    %cst_37 = arith.constant dense<0.000000e+00> : vector<32x24xf32>
    %122 = tpu.matmul %121, %118, %cst_37 {dimension_numbers = #tpu.dot_dimension_numbers<[1], [0], [0], [1], [0, 0, 1, 1], [], []>, precision = #tpu.contract_precision<fp32>} : vector<32x128xf32>, vector<128x24xf32>, vector<32x24xf32> -> vector<32x24xf32>
    %c2_38 = arith.constant 2 : index
    %c0_39 = arith.constant 0 : index
    %c0_40 = arith.constant 0 : index
    %123 = vector.load %arg2[%c2_38, %c0_39, %c0_40] : memref<10x96x192xf32, #tpu.memory_space<vmem>>, vector<1x96x192xf32>
    %124 = vector.shape_cast %123 : vector<1x96x192xf32> to vector<96x192xf32>
    %125 = vector.extract_strided_slice %124 {offsets = [0, 0], sizes = [12, 24], strides = [1, 1]} : vector<96x192xf32> to vector<12x24xf32>
    %c3_41 = arith.constant 3 : index
    %c0_42 = arith.constant 0 : index
    %c0_43 = arith.constant 0 : index
    %126 = vector.load %arg2[%c3_41, %c0_42, %c0_43] : memref<10x96x192xf32, #tpu.memory_space<vmem>>, vector<1x96x192xf32>
    %127 = vector.shape_cast %126 : vector<1x96x192xf32> to vector<96x192xf32>
    %128 = vector.extract_strided_slice %127 {offsets = [0, 0], sizes = [12, 24], strides = [1, 1]} : vector<96x192xf32> to vector<12x24xf32>
    %129 = vector.extract_strided_slice %111 {offsets = [0, 0], sizes = [32, 12], strides = [1, 1]} : vector<32x24xf32> to vector<32x12xf32>
    %130 = vector.extract_strided_slice %122 {offsets = [0, 0], sizes = [32, 12], strides = [1, 1]} : vector<32x24xf32> to vector<32x12xf32>
    %cst_44 = arith.constant dense<0.000000e+00> : vector<32x24xf32>
    %131 = tpu.matmul %129, %125, %cst_44 {dimension_numbers = #tpu.dot_dimension_numbers<[1], [0], [0], [1], [0, 0, 1, 1], [], []>, precision = #tpu.contract_precision<fp32>} : vector<32x12xf32>, vector<12x24xf32>, vector<32x24xf32> -> vector<32x24xf32>
    %cst_45 = arith.constant dense<0.000000e+00> : vector<32x24xf32>
    %132 = tpu.matmul %130, %128, %cst_45 {dimension_numbers = #tpu.dot_dimension_numbers<[1], [0], [0], [1], [0, 0, 1, 1], [], []>, precision = #tpu.contract_precision<fp32>} : vector<32x12xf32>, vector<12x24xf32>, vector<32x24xf32> -> vector<32x24xf32>
    %133 = arith.addf %131, %132 : vector<32x24xf32>
    %134 = vector.extract_strided_slice %111 {offsets = [0, 12], sizes = [32, 12], strides = [1, 1]} : vector<32x24xf32> to vector<32x12xf32>
    %135 = vector.extract_strided_slice %122 {offsets = [0, 12], sizes = [32, 12], strides = [1, 1]} : vector<32x24xf32> to vector<32x12xf32>
    %cst_46 = arith.constant dense<0.000000e+00> : vector<32x24xf32>
    %136 = tpu.matmul %134, %125, %cst_46 {dimension_numbers = #tpu.dot_dimension_numbers<[1], [0], [0], [1], [0, 0, 1, 1], [], []>, precision = #tpu.contract_precision<fp32>} : vector<32x12xf32>, vector<12x24xf32>, vector<32x24xf32> -> vector<32x24xf32>
    %cst_47 = arith.constant dense<0.000000e+00> : vector<32x24xf32>
    %137 = tpu.matmul %135, %128, %cst_47 {dimension_numbers = #tpu.dot_dimension_numbers<[1], [0], [0], [1], [0, 0, 1, 1], [], []>, precision = #tpu.contract_precision<fp32>} : vector<32x12xf32>, vector<12x24xf32>, vector<32x24xf32> -> vector<32x24xf32>
    %138 = arith.addf %136, %137 : vector<32x24xf32>
    %139 = tpu.concatenate %133, %138 in 1 : vector<32x24xf32>, vector<32x24xf32> -> vector<32x48xf32>
    %cst_48 = arith.constant dense<0.000000e+00> : vector<32xf32>
    %140 = vector.multi_reduction <add>, %139, %cst_48 [1] : vector<32x48xf32> to vector<32xf32>
    %141 = vector.shape_cast %140 : vector<32xf32> to vector<32x1xf32>
    %cst_49 = arith.constant 0.020833334 : f32
    %142 = vector.broadcast %cst_49 : f32 to vector<32x1xf32>
    %143 = arith.mulf %141, %142 : vector<32x1xf32>
    %144 = arith.mulf %139, %139 : vector<32x48xf32>
    %cst_50 = arith.constant dense<0.000000e+00> : vector<32xf32>
    %145 = vector.multi_reduction <add>, %144, %cst_50 [1] : vector<32x48xf32> to vector<32xf32>
    %146 = vector.shape_cast %145 : vector<32xf32> to vector<32x1xf32>
    %cst_51 = arith.constant 0.020833334 : f32
    %147 = vector.broadcast %cst_51 : f32 to vector<32x1xf32>
    %148 = arith.mulf %146, %147 : vector<32x1xf32>
    %149 = arith.mulf %143, %143 : vector<32x1xf32>
    %150 = arith.subf %148, %149 : vector<32x1xf32>
    %cst_52 = arith.constant 0.000000e+00 : f32
    %151 = vector.broadcast %cst_52 : f32 to vector<32x1xf32>
    %152 = arith.maximumf %150, %151 : vector<32x1xf32>
    %cst_53 = arith.constant 9.99999974E-6 : f32
    %153 = vector.broadcast %cst_53 : f32 to vector<32x1xf32>
    %154 = arith.addf %152, %153 : vector<32x1xf32>
    %155 = math.rsqrt %154 : vector<32x1xf32>
    %c1_54 = arith.constant 1 : index
    %c0_55 = arith.constant 0 : index
    %c0_56 = arith.constant 0 : index
    %156 = vector.load %arg3[%c1_54, %c0_55, %c0_56] : memref<4x64x2xf32, #tpu.memory_space<vmem>>, vector<1x64x2xf32>
    %157 = vector.shape_cast %156 : vector<1x64x2xf32> to vector<64x2xf32>
    %158 = vector.extract_strided_slice %157 {offsets = [0, 0], sizes = [32, 1], strides = [1, 1]} : vector<64x2xf32> to vector<32x1xf32>
    %c1_57 = arith.constant 1 : index
    %c0_58 = arith.constant 0 : index
    %c0_59 = arith.constant 0 : index
    %159 = vector.load %arg3[%c1_57, %c0_58, %c0_59] : memref<4x64x2xf32, #tpu.memory_space<vmem>>, vector<1x64x2xf32>
    %160 = vector.shape_cast %159 : vector<1x64x2xf32> to vector<64x2xf32>
    %161 = vector.extract_strided_slice %160 {offsets = [0, 1], sizes = [32, 1], strides = [1, 1]} : vector<64x2xf32> to vector<32x1xf32>
    %162 = arith.mulf %158, %155 : vector<32x1xf32>
    %163 = arith.mulf %143, %162 : vector<32x1xf32>
    %164 = arith.subf %161, %163 : vector<32x1xf32>
    %165 = vector.broadcast %162 : vector<32x1xf32> to vector<32x48xf32>
    %166 = arith.mulf %139, %165 : vector<32x48xf32>
    %167 = vector.broadcast %164 : vector<32x1xf32> to vector<32x48xf32>
    %168 = arith.addf %166, %167 : vector<32x48xf32>
    %cst_60 = arith.constant 0.000000e+00 : f32
    %169 = vector.broadcast %cst_60 : f32 to vector<32x48xf32>
    %170 = arith.maximumf %168, %169 : vector<32x48xf32>
    %171 = vector.extract_strided_slice %170 {offsets = [0, 0], sizes = [32, 24], strides = [1, 1]} : vector<32x48xf32> to vector<32x24xf32>
    %172 = vector.extract_strided_slice %170 {offsets = [0, 24], sizes = [32, 24], strides = [1, 1]} : vector<32x48xf32> to vector<32x24xf32>
    %cst_61 = arith.constant 0.000000e+00 : f32
    %173 = vector.broadcast %cst_61 : f32 to vector<32x1xf32>
    %cst_62 = arith.constant 0.000000e+00 : f32
    %174 = vector.broadcast %cst_62 : f32 to vector<32x1xf32>
    %175 = tpu.concatenate %173, %171, %174 in 1 : vector<32x1xf32>, vector<32x24xf32>, vector<32x1xf32> -> vector<32x26xf32>
    %cst_63 = arith.constant 0.000000e+00 : f32
    %176 = vector.broadcast %cst_63 : f32 to vector<32x1xf32>
    %cst_64 = arith.constant 0.000000e+00 : f32
    %177 = vector.broadcast %cst_64 : f32 to vector<32x1xf32>
    %178 = tpu.concatenate %176, %172, %177 in 1 : vector<32x1xf32>, vector<32x24xf32>, vector<32x1xf32> -> vector<32x26xf32>
    %179 = vector.extract_strided_slice %175 {offsets = [0, 1], sizes = [32, 24], strides = [1, 1]} : vector<32x26xf32> to vector<32x24xf32>
    %180 = vector.extract_strided_slice %175 {offsets = [0, 0], sizes = [32, 24], strides = [1, 1]} : vector<32x26xf32> to vector<32x24xf32>
    %181 = tpu.concatenate %179, %180 in 0 : vector<32x24xf32>, vector<32x24xf32> -> vector<64x24xf32>
    %182 = vector.extract_strided_slice %178 {offsets = [0, 1], sizes = [32, 24], strides = [1, 1]} : vector<32x26xf32> to vector<32x24xf32>
    %183 = vector.extract_strided_slice %178 {offsets = [0, 0], sizes = [32, 24], strides = [1, 1]} : vector<32x26xf32> to vector<32x24xf32>
    %184 = tpu.concatenate %182, %183 in 0 : vector<32x24xf32>, vector<32x24xf32> -> vector<64x24xf32>
    %185 = tpu.concatenate %181, %184 in 1 : vector<64x24xf32>, vector<64x24xf32> -> vector<64x48xf32>
    %c4 = arith.constant 4 : index
    %c0_65 = arith.constant 0 : index
    %c0_66 = arith.constant 0 : index
    %186 = vector.load %arg1[%c4, %c0_65, %c0_66] : memref<10x64x128xf32, #tpu.memory_space<vmem>>, vector<1x64x128xf32>
    %187 = vector.shape_cast %186 : vector<1x64x128xf32> to vector<64x128xf32>
    %188 = vector.extract_strided_slice %187 {offsets = [0, 0], sizes = [16, 64], strides = [1, 1]} : vector<64x128xf32> to vector<16x64xf32>
    %cst_67 = arith.constant dense<0.000000e+00> : vector<16x48xf32>
    %189 = tpu.matmul %188, %185, %cst_67 {dimension_numbers = #tpu.dot_dimension_numbers<[1], [0], [0], [1], [0, 0, 1, 1], [], []>, precision = #tpu.contract_precision<fp32>} : vector<16x64xf32>, vector<64x48xf32>, vector<16x48xf32> -> vector<16x48xf32>
    %190 = vector.extract_strided_slice %175 {offsets = [0, 2], sizes = [32, 24], strides = [1, 1]} : vector<32x26xf32> to vector<32x24xf32>
    %191 = vector.extract_strided_slice %175 {offsets = [0, 1], sizes = [32, 24], strides = [1, 1]} : vector<32x26xf32> to vector<32x24xf32>
    %192 = tpu.concatenate %190, %191 in 0 : vector<32x24xf32>, vector<32x24xf32> -> vector<64x24xf32>
    %193 = vector.extract_strided_slice %178 {offsets = [0, 2], sizes = [32, 24], strides = [1, 1]} : vector<32x26xf32> to vector<32x24xf32>
    %194 = vector.extract_strided_slice %178 {offsets = [0, 1], sizes = [32, 24], strides = [1, 1]} : vector<32x26xf32> to vector<32x24xf32>
    %195 = tpu.concatenate %193, %194 in 0 : vector<32x24xf32>, vector<32x24xf32> -> vector<64x24xf32>
    %196 = tpu.concatenate %192, %195 in 1 : vector<64x24xf32>, vector<64x24xf32> -> vector<64x48xf32>
    %c5 = arith.constant 5 : index
    %c0_68 = arith.constant 0 : index
    %c0_69 = arith.constant 0 : index
    %197 = vector.load %arg1[%c5, %c0_68, %c0_69] : memref<10x64x128xf32, #tpu.memory_space<vmem>>, vector<1x64x128xf32>
    %198 = vector.shape_cast %197 : vector<1x64x128xf32> to vector<64x128xf32>
    %199 = vector.extract_strided_slice %198 {offsets = [0, 0], sizes = [16, 64], strides = [1, 1]} : vector<64x128xf32> to vector<16x64xf32>
    %cst_70 = arith.constant dense<0.000000e+00> : vector<16x48xf32>
    %200 = tpu.matmul %199, %196, %cst_70 {dimension_numbers = #tpu.dot_dimension_numbers<[1], [0], [0], [1], [0, 0, 1, 1], [], []>, precision = #tpu.contract_precision<fp32>} : vector<16x64xf32>, vector<64x48xf32>, vector<16x48xf32> -> vector<16x48xf32>
    %c4_71 = arith.constant 4 : index
    %c0_72 = arith.constant 0 : index
    %c0_73 = arith.constant 0 : index
    %201 = vector.load %arg2[%c4_71, %c0_72, %c0_73] : memref<10x96x192xf32, #tpu.memory_space<vmem>>, vector<1x96x192xf32>
    %202 = vector.shape_cast %201 : vector<1x96x192xf32> to vector<96x192xf32>
    %203 = vector.extract_strided_slice %202 {offsets = [0, 0], sizes = [24, 48], strides = [1, 1]} : vector<96x192xf32> to vector<24x48xf32>
    %c5_74 = arith.constant 5 : index
    %c0_75 = arith.constant 0 : index
    %c0_76 = arith.constant 0 : index
    %204 = vector.load %arg2[%c5_74, %c0_75, %c0_76] : memref<10x96x192xf32, #tpu.memory_space<vmem>>, vector<1x96x192xf32>
    %205 = vector.shape_cast %204 : vector<1x96x192xf32> to vector<96x192xf32>
    %206 = vector.extract_strided_slice %205 {offsets = [0, 0], sizes = [24, 48], strides = [1, 1]} : vector<96x192xf32> to vector<24x48xf32>
    %207 = vector.extract_strided_slice %189 {offsets = [0, 0], sizes = [16, 24], strides = [1, 1]} : vector<16x48xf32> to vector<16x24xf32>
    %208 = vector.extract_strided_slice %200 {offsets = [0, 0], sizes = [16, 24], strides = [1, 1]} : vector<16x48xf32> to vector<16x24xf32>
    %cst_77 = arith.constant dense<0.000000e+00> : vector<16x48xf32>
    %209 = tpu.matmul %207, %203, %cst_77 {dimension_numbers = #tpu.dot_dimension_numbers<[1], [0], [0], [1], [0, 0, 1, 1], [], []>, precision = #tpu.contract_precision<fp32>} : vector<16x24xf32>, vector<24x48xf32>, vector<16x48xf32> -> vector<16x48xf32>
    %cst_78 = arith.constant dense<0.000000e+00> : vector<16x48xf32>
    %210 = tpu.matmul %208, %206, %cst_78 {dimension_numbers = #tpu.dot_dimension_numbers<[1], [0], [0], [1], [0, 0, 1, 1], [], []>, precision = #tpu.contract_precision<fp32>} : vector<16x24xf32>, vector<24x48xf32>, vector<16x48xf32> -> vector<16x48xf32>
    %211 = arith.addf %209, %210 : vector<16x48xf32>
    %212 = vector.extract_strided_slice %189 {offsets = [0, 24], sizes = [16, 24], strides = [1, 1]} : vector<16x48xf32> to vector<16x24xf32>
    %213 = vector.extract_strided_slice %200 {offsets = [0, 24], sizes = [16, 24], strides = [1, 1]} : vector<16x48xf32> to vector<16x24xf32>
    %cst_79 = arith.constant dense<0.000000e+00> : vector<16x48xf32>
    %214 = tpu.matmul %212, %203, %cst_79 {dimension_numbers = #tpu.dot_dimension_numbers<[1], [0], [0], [1], [0, 0, 1, 1], [], []>, precision = #tpu.contract_precision<fp32>} : vector<16x24xf32>, vector<24x48xf32>, vector<16x48xf32> -> vector<16x48xf32>
    %cst_80 = arith.constant dense<0.000000e+00> : vector<16x48xf32>
    %215 = tpu.matmul %213, %206, %cst_80 {dimension_numbers = #tpu.dot_dimension_numbers<[1], [0], [0], [1], [0, 0, 1, 1], [], []>, precision = #tpu.contract_precision<fp32>} : vector<16x24xf32>, vector<24x48xf32>, vector<16x48xf32> -> vector<16x48xf32>
    %216 = arith.addf %214, %215 : vector<16x48xf32>
    %217 = tpu.concatenate %211, %216 in 1 : vector<16x48xf32>, vector<16x48xf32> -> vector<16x96xf32>
    %cst_81 = arith.constant dense<0.000000e+00> : vector<16xf32>
    %218 = vector.multi_reduction <add>, %217, %cst_81 [1] : vector<16x96xf32> to vector<16xf32>
    %219 = vector.shape_cast %218 : vector<16xf32> to vector<16x1xf32>
    %cst_82 = arith.constant 0.010416667 : f32
    %220 = vector.broadcast %cst_82 : f32 to vector<16x1xf32>
    %221 = arith.mulf %219, %220 : vector<16x1xf32>
    %222 = arith.mulf %217, %217 : vector<16x96xf32>
    %cst_83 = arith.constant dense<0.000000e+00> : vector<16xf32>
    %223 = vector.multi_reduction <add>, %222, %cst_83 [1] : vector<16x96xf32> to vector<16xf32>
    %224 = vector.shape_cast %223 : vector<16xf32> to vector<16x1xf32>
    %cst_84 = arith.constant 0.010416667 : f32
    %225 = vector.broadcast %cst_84 : f32 to vector<16x1xf32>
    %226 = arith.mulf %224, %225 : vector<16x1xf32>
    %227 = arith.mulf %221, %221 : vector<16x1xf32>
    %228 = arith.subf %226, %227 : vector<16x1xf32>
    %cst_85 = arith.constant 0.000000e+00 : f32
    %229 = vector.broadcast %cst_85 : f32 to vector<16x1xf32>
    %230 = arith.maximumf %228, %229 : vector<16x1xf32>
    %cst_86 = arith.constant 9.99999974E-6 : f32
    %231 = vector.broadcast %cst_86 : f32 to vector<16x1xf32>
    %232 = arith.addf %230, %231 : vector<16x1xf32>
    %233 = math.rsqrt %232 : vector<16x1xf32>
    %c2_87 = arith.constant 2 : index
    %c0_88 = arith.constant 0 : index
    %c0_89 = arith.constant 0 : index
    %234 = vector.load %arg3[%c2_87, %c0_88, %c0_89] : memref<4x64x2xf32, #tpu.memory_space<vmem>>, vector<1x64x2xf32>
    %235 = vector.shape_cast %234 : vector<1x64x2xf32> to vector<64x2xf32>
    %236 = vector.extract_strided_slice %235 {offsets = [0, 0], sizes = [16, 1], strides = [1, 1]} : vector<64x2xf32> to vector<16x1xf32>
    %c2_90 = arith.constant 2 : index
    %c0_91 = arith.constant 0 : index
    %c0_92 = arith.constant 0 : index
    %237 = vector.load %arg3[%c2_90, %c0_91, %c0_92] : memref<4x64x2xf32, #tpu.memory_space<vmem>>, vector<1x64x2xf32>
    %238 = vector.shape_cast %237 : vector<1x64x2xf32> to vector<64x2xf32>
    %239 = vector.extract_strided_slice %238 {offsets = [0, 1], sizes = [16, 1], strides = [1, 1]} : vector<64x2xf32> to vector<16x1xf32>
    %240 = arith.mulf %236, %233 : vector<16x1xf32>
    %241 = arith.mulf %221, %240 : vector<16x1xf32>
    %242 = arith.subf %239, %241 : vector<16x1xf32>
    %243 = vector.broadcast %240 : vector<16x1xf32> to vector<16x96xf32>
    %244 = arith.mulf %217, %243 : vector<16x96xf32>
    %245 = vector.broadcast %242 : vector<16x1xf32> to vector<16x96xf32>
    %246 = arith.addf %244, %245 : vector<16x96xf32>
    %cst_93 = arith.constant 0.000000e+00 : f32
    %247 = vector.broadcast %cst_93 : f32 to vector<16x96xf32>
    %248 = arith.maximumf %246, %247 : vector<16x96xf32>
    %249 = vector.extract_strided_slice %248 {offsets = [0, 0], sizes = [16, 48], strides = [1, 1]} : vector<16x96xf32> to vector<16x48xf32>
    %250 = vector.extract_strided_slice %248 {offsets = [0, 48], sizes = [16, 48], strides = [1, 1]} : vector<16x96xf32> to vector<16x48xf32>
    %cst_94 = arith.constant 0.000000e+00 : f32
    %251 = vector.broadcast %cst_94 : f32 to vector<16x1xf32>
    %cst_95 = arith.constant 0.000000e+00 : f32
    %252 = vector.broadcast %cst_95 : f32 to vector<16x1xf32>
    %253 = tpu.concatenate %251, %249, %252 in 1 : vector<16x1xf32>, vector<16x48xf32>, vector<16x1xf32> -> vector<16x50xf32>
    %cst_96 = arith.constant 0.000000e+00 : f32
    %254 = vector.broadcast %cst_96 : f32 to vector<16x1xf32>
    %cst_97 = arith.constant 0.000000e+00 : f32
    %255 = vector.broadcast %cst_97 : f32 to vector<16x1xf32>
    %256 = tpu.concatenate %254, %250, %255 in 1 : vector<16x1xf32>, vector<16x48xf32>, vector<16x1xf32> -> vector<16x50xf32>
    %257 = vector.extract_strided_slice %253 {offsets = [0, 1], sizes = [16, 48], strides = [1, 1]} : vector<16x50xf32> to vector<16x48xf32>
    %258 = vector.extract_strided_slice %253 {offsets = [0, 0], sizes = [16, 48], strides = [1, 1]} : vector<16x50xf32> to vector<16x48xf32>
    %259 = tpu.concatenate %257, %258 in 0 : vector<16x48xf32>, vector<16x48xf32> -> vector<32x48xf32>
    %260 = vector.extract_strided_slice %256 {offsets = [0, 1], sizes = [16, 48], strides = [1, 1]} : vector<16x50xf32> to vector<16x48xf32>
    %261 = vector.extract_strided_slice %256 {offsets = [0, 0], sizes = [16, 48], strides = [1, 1]} : vector<16x50xf32> to vector<16x48xf32>
    %262 = tpu.concatenate %260, %261 in 0 : vector<16x48xf32>, vector<16x48xf32> -> vector<32x48xf32>
    %263 = tpu.concatenate %259, %262 in 1 : vector<32x48xf32>, vector<32x48xf32> -> vector<32x96xf32>
    %c6 = arith.constant 6 : index
    %c0_98 = arith.constant 0 : index
    %c0_99 = arith.constant 0 : index
    %264 = vector.load %arg1[%c6, %c0_98, %c0_99] : memref<10x64x128xf32, #tpu.memory_space<vmem>>, vector<1x64x128xf32>
    %265 = vector.shape_cast %264 : vector<1x64x128xf32> to vector<64x128xf32>
    %266 = vector.extract_strided_slice %265 {offsets = [0, 0], sizes = [8, 32], strides = [1, 1]} : vector<64x128xf32> to vector<8x32xf32>
    %cst_100 = arith.constant dense<0.000000e+00> : vector<8x96xf32>
    %267 = tpu.matmul %266, %263, %cst_100 {dimension_numbers = #tpu.dot_dimension_numbers<[1], [0], [0], [1], [0, 0, 1, 1], [], []>, precision = #tpu.contract_precision<fp32>} : vector<8x32xf32>, vector<32x96xf32>, vector<8x96xf32> -> vector<8x96xf32>
    %268 = vector.extract_strided_slice %253 {offsets = [0, 2], sizes = [16, 48], strides = [1, 1]} : vector<16x50xf32> to vector<16x48xf32>
    %269 = vector.extract_strided_slice %253 {offsets = [0, 1], sizes = [16, 48], strides = [1, 1]} : vector<16x50xf32> to vector<16x48xf32>
    %270 = tpu.concatenate %268, %269 in 0 : vector<16x48xf32>, vector<16x48xf32> -> vector<32x48xf32>
    %271 = vector.extract_strided_slice %256 {offsets = [0, 2], sizes = [16, 48], strides = [1, 1]} : vector<16x50xf32> to vector<16x48xf32>
    %272 = vector.extract_strided_slice %256 {offsets = [0, 1], sizes = [16, 48], strides = [1, 1]} : vector<16x50xf32> to vector<16x48xf32>
    %273 = tpu.concatenate %271, %272 in 0 : vector<16x48xf32>, vector<16x48xf32> -> vector<32x48xf32>
    %274 = tpu.concatenate %270, %273 in 1 : vector<32x48xf32>, vector<32x48xf32> -> vector<32x96xf32>
    %c7 = arith.constant 7 : index
    %c0_101 = arith.constant 0 : index
    %c0_102 = arith.constant 0 : index
    %275 = vector.load %arg1[%c7, %c0_101, %c0_102] : memref<10x64x128xf32, #tpu.memory_space<vmem>>, vector<1x64x128xf32>
    %276 = vector.shape_cast %275 : vector<1x64x128xf32> to vector<64x128xf32>
    %277 = vector.extract_strided_slice %276 {offsets = [0, 0], sizes = [8, 32], strides = [1, 1]} : vector<64x128xf32> to vector<8x32xf32>
    %cst_103 = arith.constant dense<0.000000e+00> : vector<8x96xf32>
    %278 = tpu.matmul %277, %274, %cst_103 {dimension_numbers = #tpu.dot_dimension_numbers<[1], [0], [0], [1], [0, 0, 1, 1], [], []>, precision = #tpu.contract_precision<fp32>} : vector<8x32xf32>, vector<32x96xf32>, vector<8x96xf32> -> vector<8x96xf32>
    %c6_104 = arith.constant 6 : index
    %c0_105 = arith.constant 0 : index
    %c0_106 = arith.constant 0 : index
    %279 = vector.load %arg2[%c6_104, %c0_105, %c0_106] : memref<10x96x192xf32, #tpu.memory_space<vmem>>, vector<1x96x192xf32>
    %280 = vector.shape_cast %279 : vector<1x96x192xf32> to vector<96x192xf32>
    %281 = vector.extract_strided_slice %280 {offsets = [0, 0], sizes = [48, 96], strides = [1, 1]} : vector<96x192xf32> to vector<48x96xf32>
    %c7_107 = arith.constant 7 : index
    %c0_108 = arith.constant 0 : index
    %c0_109 = arith.constant 0 : index
    %282 = vector.load %arg2[%c7_107, %c0_108, %c0_109] : memref<10x96x192xf32, #tpu.memory_space<vmem>>, vector<1x96x192xf32>
    %283 = vector.shape_cast %282 : vector<1x96x192xf32> to vector<96x192xf32>
    %284 = vector.extract_strided_slice %283 {offsets = [0, 0], sizes = [48, 96], strides = [1, 1]} : vector<96x192xf32> to vector<48x96xf32>
    %285 = vector.extract_strided_slice %267 {offsets = [0, 0], sizes = [8, 48], strides = [1, 1]} : vector<8x96xf32> to vector<8x48xf32>
    %286 = vector.extract_strided_slice %278 {offsets = [0, 0], sizes = [8, 48], strides = [1, 1]} : vector<8x96xf32> to vector<8x48xf32>
    %cst_110 = arith.constant dense<0.000000e+00> : vector<8x96xf32>
    %287 = tpu.matmul %285, %281, %cst_110 {dimension_numbers = #tpu.dot_dimension_numbers<[1], [0], [0], [1], [0, 0, 1, 1], [], []>, precision = #tpu.contract_precision<fp32>} : vector<8x48xf32>, vector<48x96xf32>, vector<8x96xf32> -> vector<8x96xf32>
    %cst_111 = arith.constant dense<0.000000e+00> : vector<8x96xf32>
    %288 = tpu.matmul %286, %284, %cst_111 {dimension_numbers = #tpu.dot_dimension_numbers<[1], [0], [0], [1], [0, 0, 1, 1], [], []>, precision = #tpu.contract_precision<fp32>} : vector<8x48xf32>, vector<48x96xf32>, vector<8x96xf32> -> vector<8x96xf32>
    %289 = arith.addf %287, %288 : vector<8x96xf32>
    %290 = vector.extract_strided_slice %267 {offsets = [0, 48], sizes = [8, 48], strides = [1, 1]} : vector<8x96xf32> to vector<8x48xf32>
    %291 = vector.extract_strided_slice %278 {offsets = [0, 48], sizes = [8, 48], strides = [1, 1]} : vector<8x96xf32> to vector<8x48xf32>
    %cst_112 = arith.constant dense<0.000000e+00> : vector<8x96xf32>
    %292 = tpu.matmul %290, %281, %cst_112 {dimension_numbers = #tpu.dot_dimension_numbers<[1], [0], [0], [1], [0, 0, 1, 1], [], []>, precision = #tpu.contract_precision<fp32>} : vector<8x48xf32>, vector<48x96xf32>, vector<8x96xf32> -> vector<8x96xf32>
    %cst_113 = arith.constant dense<0.000000e+00> : vector<8x96xf32>
    %293 = tpu.matmul %291, %284, %cst_113 {dimension_numbers = #tpu.dot_dimension_numbers<[1], [0], [0], [1], [0, 0, 1, 1], [], []>, precision = #tpu.contract_precision<fp32>} : vector<8x48xf32>, vector<48x96xf32>, vector<8x96xf32> -> vector<8x96xf32>
    %294 = arith.addf %292, %293 : vector<8x96xf32>
    %295 = tpu.concatenate %289, %294 in 1 : vector<8x96xf32>, vector<8x96xf32> -> vector<8x192xf32>
    %cst_114 = arith.constant dense<0.000000e+00> : vector<8xf32>
    %296 = vector.multi_reduction <add>, %295, %cst_114 [1] : vector<8x192xf32> to vector<8xf32>
    %297 = vector.shape_cast %296 : vector<8xf32> to vector<8x1xf32>
    %cst_115 = arith.constant 0.00520833349 : f32
    %298 = vector.broadcast %cst_115 : f32 to vector<8x1xf32>
    %299 = arith.mulf %297, %298 : vector<8x1xf32>
    %300 = arith.mulf %295, %295 : vector<8x192xf32>
    %cst_116 = arith.constant dense<0.000000e+00> : vector<8xf32>
    %301 = vector.multi_reduction <add>, %300, %cst_116 [1] : vector<8x192xf32> to vector<8xf32>
    %302 = vector.shape_cast %301 : vector<8xf32> to vector<8x1xf32>
    %cst_117 = arith.constant 0.00520833349 : f32
    %303 = vector.broadcast %cst_117 : f32 to vector<8x1xf32>
    %304 = arith.mulf %302, %303 : vector<8x1xf32>
    %305 = arith.mulf %299, %299 : vector<8x1xf32>
    %306 = arith.subf %304, %305 : vector<8x1xf32>
    %cst_118 = arith.constant 0.000000e+00 : f32
    %307 = vector.broadcast %cst_118 : f32 to vector<8x1xf32>
    %308 = arith.maximumf %306, %307 : vector<8x1xf32>
    %cst_119 = arith.constant 9.99999974E-6 : f32
    %309 = vector.broadcast %cst_119 : f32 to vector<8x1xf32>
    %310 = arith.addf %308, %309 : vector<8x1xf32>
    %311 = math.rsqrt %310 : vector<8x1xf32>
    %c3_120 = arith.constant 3 : index
    %c0_121 = arith.constant 0 : index
    %c0_122 = arith.constant 0 : index
    %312 = vector.load %arg3[%c3_120, %c0_121, %c0_122] : memref<4x64x2xf32, #tpu.memory_space<vmem>>, vector<1x64x2xf32>
    %313 = vector.shape_cast %312 : vector<1x64x2xf32> to vector<64x2xf32>
    %314 = vector.extract_strided_slice %313 {offsets = [0, 0], sizes = [8, 1], strides = [1, 1]} : vector<64x2xf32> to vector<8x1xf32>
    %c3_123 = arith.constant 3 : index
    %c0_124 = arith.constant 0 : index
    %c0_125 = arith.constant 0 : index
    %315 = vector.load %arg3[%c3_123, %c0_124, %c0_125] : memref<4x64x2xf32, #tpu.memory_space<vmem>>, vector<1x64x2xf32>
    %316 = vector.shape_cast %315 : vector<1x64x2xf32> to vector<64x2xf32>
    %317 = vector.extract_strided_slice %316 {offsets = [0, 1], sizes = [8, 1], strides = [1, 1]} : vector<64x2xf32> to vector<8x1xf32>
    %318 = arith.mulf %314, %311 : vector<8x1xf32>
    %319 = arith.mulf %299, %318 : vector<8x1xf32>
    %320 = arith.subf %317, %319 : vector<8x1xf32>
    %321 = vector.broadcast %318 : vector<8x1xf32> to vector<8x192xf32>
    %322 = arith.mulf %295, %321 : vector<8x192xf32>
    %323 = vector.broadcast %320 : vector<8x1xf32> to vector<8x192xf32>
    %324 = arith.addf %322, %323 : vector<8x192xf32>
    %cst_126 = arith.constant 0.000000e+00 : f32
    %325 = vector.broadcast %cst_126 : f32 to vector<8x192xf32>
    %326 = arith.maximumf %324, %325 : vector<8x192xf32>
    %327 = vector.extract_strided_slice %326 {offsets = [0, 0], sizes = [8, 96], strides = [1, 1]} : vector<8x192xf32> to vector<8x96xf32>
    %328 = vector.extract_strided_slice %326 {offsets = [0, 96], sizes = [8, 96], strides = [1, 1]} : vector<8x192xf32> to vector<8x96xf32>
    %cst_127 = arith.constant 0.000000e+00 : f32
    %329 = vector.broadcast %cst_127 : f32 to vector<8x1xf32>
    %cst_128 = arith.constant 0.000000e+00 : f32
    %330 = vector.broadcast %cst_128 : f32 to vector<8x1xf32>
    %331 = tpu.concatenate %329, %327, %330 in 1 : vector<8x1xf32>, vector<8x96xf32>, vector<8x1xf32> -> vector<8x98xf32>
    %cst_129 = arith.constant 0.000000e+00 : f32
    %332 = vector.broadcast %cst_129 : f32 to vector<8x1xf32>
    %cst_130 = arith.constant 0.000000e+00 : f32
    %333 = vector.broadcast %cst_130 : f32 to vector<8x1xf32>
    %334 = tpu.concatenate %332, %328, %333 in 1 : vector<8x1xf32>, vector<8x96xf32>, vector<8x1xf32> -> vector<8x98xf32>
    %335 = vector.extract_strided_slice %331 {offsets = [0, 1], sizes = [8, 96], strides = [1, 1]} : vector<8x98xf32> to vector<8x96xf32>
    %336 = vector.extract_strided_slice %331 {offsets = [0, 0], sizes = [8, 96], strides = [1, 1]} : vector<8x98xf32> to vector<8x96xf32>
    %337 = tpu.concatenate %335, %336 in 0 : vector<8x96xf32>, vector<8x96xf32> -> vector<16x96xf32>
    %338 = vector.extract_strided_slice %334 {offsets = [0, 1], sizes = [8, 96], strides = [1, 1]} : vector<8x98xf32> to vector<8x96xf32>
    %339 = vector.extract_strided_slice %334 {offsets = [0, 0], sizes = [8, 96], strides = [1, 1]} : vector<8x98xf32> to vector<8x96xf32>
    %340 = tpu.concatenate %338, %339 in 0 : vector<8x96xf32>, vector<8x96xf32> -> vector<16x96xf32>
    %341 = tpu.concatenate %337, %340 in 1 : vector<16x96xf32>, vector<16x96xf32> -> vector<16x192xf32>
    %c8 = arith.constant 8 : index
    %c0_131 = arith.constant 0 : index
    %c0_132 = arith.constant 0 : index
    %342 = vector.load %arg1[%c8, %c0_131, %c0_132] : memref<10x64x128xf32, #tpu.memory_space<vmem>>, vector<1x64x128xf32>
    %343 = vector.shape_cast %342 : vector<1x64x128xf32> to vector<64x128xf32>
    %344 = vector.extract_strided_slice %343 {offsets = [0, 0], sizes = [1, 16], strides = [1, 1]} : vector<64x128xf32> to vector<1x16xf32>
    %cst_133 = arith.constant dense<0.000000e+00> : vector<1x192xf32>
    %345 = tpu.matmul %344, %341, %cst_133 {dimension_numbers = #tpu.dot_dimension_numbers<[1], [0], [0], [1], [0, 0, 1, 1], [], []>, precision = #tpu.contract_precision<fp32>} : vector<1x16xf32>, vector<16x192xf32>, vector<1x192xf32> -> vector<1x192xf32>
    %346 = vector.extract_strided_slice %331 {offsets = [0, 2], sizes = [8, 96], strides = [1, 1]} : vector<8x98xf32> to vector<8x96xf32>
    %347 = vector.extract_strided_slice %331 {offsets = [0, 1], sizes = [8, 96], strides = [1, 1]} : vector<8x98xf32> to vector<8x96xf32>
    %348 = tpu.concatenate %346, %347 in 0 : vector<8x96xf32>, vector<8x96xf32> -> vector<16x96xf32>
    %349 = vector.extract_strided_slice %334 {offsets = [0, 2], sizes = [8, 96], strides = [1, 1]} : vector<8x98xf32> to vector<8x96xf32>
    %350 = vector.extract_strided_slice %334 {offsets = [0, 1], sizes = [8, 96], strides = [1, 1]} : vector<8x98xf32> to vector<8x96xf32>
    %351 = tpu.concatenate %349, %350 in 0 : vector<8x96xf32>, vector<8x96xf32> -> vector<16x96xf32>
    %352 = tpu.concatenate %348, %351 in 1 : vector<16x96xf32>, vector<16x96xf32> -> vector<16x192xf32>
    %c9 = arith.constant 9 : index
    %c0_134 = arith.constant 0 : index
    %c0_135 = arith.constant 0 : index
    %353 = vector.load %arg1[%c9, %c0_134, %c0_135] : memref<10x64x128xf32, #tpu.memory_space<vmem>>, vector<1x64x128xf32>
    %354 = vector.shape_cast %353 : vector<1x64x128xf32> to vector<64x128xf32>
    %355 = vector.extract_strided_slice %354 {offsets = [0, 0], sizes = [1, 16], strides = [1, 1]} : vector<64x128xf32> to vector<1x16xf32>
    %cst_136 = arith.constant dense<0.000000e+00> : vector<1x192xf32>
    %356 = tpu.matmul %355, %352, %cst_136 {dimension_numbers = #tpu.dot_dimension_numbers<[1], [0], [0], [1], [0, 0, 1, 1], [], []>, precision = #tpu.contract_precision<fp32>} : vector<1x16xf32>, vector<16x192xf32>, vector<1x192xf32> -> vector<1x192xf32>
    %c8_137 = arith.constant 8 : index
    %c0_138 = arith.constant 0 : index
    %c0_139 = arith.constant 0 : index
    %357 = vector.load %arg2[%c8_137, %c0_138, %c0_139] : memref<10x96x192xf32, #tpu.memory_space<vmem>>, vector<1x96x192xf32>
    %358 = vector.shape_cast %357 : vector<1x96x192xf32> to vector<96x192xf32>
    %c9_140 = arith.constant 9 : index
    %c0_141 = arith.constant 0 : index
    %c0_142 = arith.constant 0 : index
    %359 = vector.load %arg2[%c9_140, %c0_141, %c0_142] : memref<10x96x192xf32, #tpu.memory_space<vmem>>, vector<1x96x192xf32>
    %360 = vector.shape_cast %359 : vector<1x96x192xf32> to vector<96x192xf32>
    %361 = vector.extract_strided_slice %345 {offsets = [0, 0], sizes = [1, 96], strides = [1, 1]} : vector<1x192xf32> to vector<1x96xf32>
    %362 = vector.extract_strided_slice %356 {offsets = [0, 0], sizes = [1, 96], strides = [1, 1]} : vector<1x192xf32> to vector<1x96xf32>
    %cst_143 = arith.constant dense<0.000000e+00> : vector<1x192xf32>
    %363 = tpu.matmul %361, %358, %cst_143 {dimension_numbers = #tpu.dot_dimension_numbers<[1], [0], [0], [1], [0, 0, 1, 1], [], []>, precision = #tpu.contract_precision<fp32>} : vector<1x96xf32>, vector<96x192xf32>, vector<1x192xf32> -> vector<1x192xf32>
    %cst_144 = arith.constant dense<0.000000e+00> : vector<1x192xf32>
    %364 = tpu.matmul %362, %360, %cst_144 {dimension_numbers = #tpu.dot_dimension_numbers<[1], [0], [0], [1], [0, 0, 1, 1], [], []>, precision = #tpu.contract_precision<fp32>} : vector<1x96xf32>, vector<96x192xf32>, vector<1x192xf32> -> vector<1x192xf32>
    %365 = arith.addf %363, %364 : vector<1x192xf32>
    %366 = vector.extract_strided_slice %345 {offsets = [0, 96], sizes = [1, 96], strides = [1, 1]} : vector<1x192xf32> to vector<1x96xf32>
    %367 = vector.extract_strided_slice %356 {offsets = [0, 96], sizes = [1, 96], strides = [1, 1]} : vector<1x192xf32> to vector<1x96xf32>
    %cst_145 = arith.constant dense<0.000000e+00> : vector<1x192xf32>
    %368 = tpu.matmul %366, %358, %cst_145 {dimension_numbers = #tpu.dot_dimension_numbers<[1], [0], [0], [1], [0, 0, 1, 1], [], []>, precision = #tpu.contract_precision<fp32>} : vector<1x96xf32>, vector<96x192xf32>, vector<1x192xf32> -> vector<1x192xf32>
    %cst_146 = arith.constant dense<0.000000e+00> : vector<1x192xf32>
    %369 = tpu.matmul %367, %360, %cst_146 {dimension_numbers = #tpu.dot_dimension_numbers<[1], [0], [0], [1], [0, 0, 1, 1], [], []>, precision = #tpu.contract_precision<fp32>} : vector<1x96xf32>, vector<96x192xf32>, vector<1x192xf32> -> vector<1x192xf32>
    %370 = arith.addf %368, %369 : vector<1x192xf32>
    %371 = tpu.concatenate %365, %370 in 1 : vector<1x192xf32>, vector<1x192xf32> -> vector<1x384xf32>
    %372 = math.tanh %371 : vector<1x384xf32>
    %c0_147 = arith.constant 0 : index
    %c0_148 = arith.constant 0 : index
    %373 = vector.load %arg4[%c0_147, %c0_148] : memref<1x384xf32, #tpu.memory_space<vmem>>, vector<1x384xf32>
    tpu.vector_store %arg4[%c0_147, %c0_148], %372 {strides = array<i32>} : memref<1x384xf32, #tpu.memory_space<vmem>>, vector<1x384xf32>,
    return
  }
}

</mosaic_0001>

<bundles_post_ra>
// kernel: generator_forward.1
= control target key start
LH: loop header
LB: loop body
LE: loop exit
PB: predicated region body
PF: predicated region fallthrough
CT: control target
= control target key end

     0   :  { %v28079_v1 = vmov 0   ;;  %s22335_s19 = smov 1   ;;  %v28081_v4 = vmov 1   ;;  %vm300_vm0 = vcmask 1045504   ;;  %vm23_vm1 = vcmask 1040384   ;;  %s22337_s5 = smov 126   ;;  %s28073_s0 = inlined_call_operand.vmem [shape: f32[2,8], index: 0, kind: input, shape index: {}]   ;;  %s28074_s1 = inlined_call_operand.vmem [shape: f32[10,64,128], index: 1, kind: input, shape index: {}]   ;;  %s28075_s2 = inlined_call_operand.vmem [shape: f32[10,96,192], index: 2, kind: input, shape index: {}]   ;;  %s28076_s3 = inlined_call_operand.vmem [shape: f32[4,64,2], index: 3, kind: input, shape index: {}]   ;;  %s28077_s4 = inlined_call_operand.vmem [shape: f32[1,384], index: 4, kind: output, shape index: {}]  }
   0x1   :  { %v17_v0 = vld [vmem:[%s28073_s0] sm:$0x3]  ;;  %22268 = vset.pattern.permute.xlu1 %v28079_v1  ;;  %22270 = vset.pattern.permute.xlu0 %v28079_v1  ;;  %v19099_v5 = vld [vmem:[%s28074_s1 + $0x48] sm:$0xff]  ;;  %v19100_v6 = vld [vmem:[%s28074_s1 + $0x50] sm:$0xff]  ;;  %s22338_s8 = smov 4   ;;  %s22339_s0 = smov 5   ;;  %v28078_v41 = vlaneseq }
   0x2   :  { %v19098_v2 = vld [vmem:[%s28074_s1 + $0x40] sm:$0xff]  ;;  %v19_v3 = vrot.slane %v17_v0, 7  ;;  %v19101_v8 = vld [vmem:[%s28074_s1 + $0x58] sm:$0xff]  ;;  %v19103_v9 = vld [vmem:[%s28074_s1 + $0x68] sm:$0xff]  ;;  %v25_v19 = vrot.slane %v17_v0, 1  ;;  %s22340_s20 = smov 127  }
   0x3   :  { %171 = vperm.xlu1 %22268, %v19098_v2   ;;  %v19102_v7 = vld [vmem:[%s28074_s1 + $0x60] sm:$0xff]  ;;  %v19104_v20 = vld [vmem:[%s28074_s1 + $0x70] sm:$0xff]  ;;  %v19105_v23 = vld [vmem:[%s28074_s1 + $0x78] sm:$0xff]  ;;  %v22489_v44 = vshrl.u32 %v28078_v41, 7  ;;  %vm39_vm2 = vcmask 48128   ;;  %s22341_s6 = smov 122  }
   0x4   :  { %20 = vrot.lane.b32.xlu0 %v19_v3, %s22335_s19  ;;  %v19106_v10 = vld [vmem:[%s28075_s2 + $0xc0] sm:$0xff]  ;;  %v42_v25 = vld [vmem:[%s28074_s1 + $0x8] sm:$0xff]  ;;  %v44_v26 = vld [vmem:[%s28074_s1 + $0x18] sm:$0xff]  ;;  %s22342_s7 = smov 12   ;;  %vm3415_vm3 = vcmask 97280   ;;  %vm3424_vm4 = vcmask 195584  }
   0x5   :  { %v302_v11 = vsel %vm300_vm0, %v19106_v10, 0  ;;  %v41_v24 = vld [vmem:[%s28074_s1] sm:$0xff]  ;;  %v43_v27 = vld [vmem:[%s28074_s1 + $0x10] sm:$0xff]  ;;  %v46_v28 = vld [vmem:[%s28074_s1 + $0x28] sm:$0xff]  ;;  %28346 = vst [vmem:[#allocation2_spill] sm:$0xff] %v22489_v44  ;;  %v91_v45 = vsub.s32 0, %v22489_v44 }
   0x6   :  { %v22425_v12 = vand.u32 4294901760, %v302_v11  ;;  %v47_v29 = vld [vmem:[%s28074_s1 + $0x30] sm:$0xff]  ;;  %v45_v30 = vld [vmem:[%s28074_s1 + $0x20] sm:$0xff]  ;;  %v48_v31 = vld [vmem:[%s28074_s1 + $0x38] sm:$0xff]  ;;  %v135_v46 = vsub.s32 1, %v22489_v44  ;;  %s22343_s25 = smov 117  }
   0x7   :  { %22269 = vset.pattern.permute.xlu1 %v28081_v4  ;;  %v273_v60 = vld [vmem:[%s28075_s2] sm:$0xff]  ;;  %vm3737_vm5 = vcmask 7168   ;;  %vm3746_vm6 = vcmask 105472   ;;  %s22344_s26 = smov 11   ;;  %s22345_s29 = smov 10   ;;  %vm5635_vm7 = vcmask 1043456  }
   0x8   :  { %222 = vperm.xlu1 %22269, %v19098_v2   ;;  %27 = vrot.lane.b32.xlu0 %v17_v0, %s22335_s19  ;;  %v22428_v13 = vsub.f32 %v302_v11, %v22425_v12  ;;  %vm8058_vm8 = vcmask 392192   ;;  %s22348_s13 = smov 105   ;;  %vm8220_vm9 = vcmask 203776   ;;  %s22349_s14 = smov 23   ;;  %vm8328_vm10 = vcmask 523264  }
   0x9   :  { %20268 = vmatprep.subr.mxu0 %v22425_v12  ;;  %s22350_s17 = smov 22   ;;  %vm11666_vm11 = vcmask 785408   ;;  %s22353_s18 = smov 81   ;;  %vm11748_vm12 = vcmask 400384   ;;  %vm22356_vm13 = vmmov 0   ;;  %vm11803_vm14 = vcmask 261120  }
   0xa   :  { %20269 = vmatpush3.msra.mxu0 %v22425_v12  ;;  %v22433_v14 = vand.u32 4294901760, %v22428_v13  ;;  %s22357_s21 = smov 46   ;;  %s22359_s27 = smov 96   ;;  %vm14941_vm15 = vcmask 269312  }
   0xb   :  { %20296 = vmatprep.subr.mxu0 %v22428_v13  ;;  %s22361_s30 = smov 95  }
   0xc   :  { %226 = vperm.xlu1 %22269, %v19099_v5   ;;  %176 = vperm.xlu0 %22270, %v19099_v5   ;;  %v484_v15 = vsub.f32 %v22428_v13, %v22433_v14 }
   0xe   :  { %v22438_v17 = vand.u32 4294901760, %v484_v15 }
  0x10   :  { %22271 = vset.pattern.permute.xlu1 %v28079_v1  ;;  %191 = vperm.xlu0 %22270, %v19102_v7  }
  0x11   :  { %181 = vperm.xlu1 %22271, %v19100_v6   ;;  %20282 = vmatprep.subr.mxu1 %v22438_v17 }
  0x12   :  { %20283 = vmatpush3.msra.mxu1 %v22438_v17 }
  0x13   :  { %20310 = vmatprep.subr.mxu1 %v22425_v12 }
  0x14   :  { %22273 = vset.pattern.permute.xlu0 %v28081_v4 }
  0x15   :  { %186 = vperm.xlu1 %22271, %v19101_v8   ;;  %230 = vperm.xlu0 %22273, %v19100_v6  }
  0x19   :  { %22272 = vset.pattern.permute.xlu1 %v28081_v4 }
  0x1a   :  { %234 = vperm.xlu1 %22272, %v19101_v8  }
  0x1e   :  { %238 = vperm.xlu1 %22272, %v19102_v7   ;;  %v1076_v7 = vsel %vm300_vm0, %v273_v60, 0  ;;  %vm14934_vm0 = vcmask 793600  }
  0x22   :  { %22274 = vset.pattern.permute.xlu1 %v28079_v1 }
  0x23   :  { %196 = vperm.xlu1 %22274, %v19103_v9  }
  0x76   :  { %v21_v16 = vpop.permute.xlu0 %20 }
  0x77   :  { %v24_v18 = vsel %vm23_vm1, %v17_v0, %v21_v16 }
  0x78   :  { %153 = vrot.lane.b32.xlu1 %v24_v18, %s22337_s5 }
  0x7a   :  { %v28_v21 = vpop.permute.xlu0 %27 }
  0x7b   :  { %v30_v22 = vsel %vm23_vm1, %v25_v19, %v28_v21  ;;  %vm14968_vm1 = vcmask 130048  }
  0x7c   :  { %201 = vperm.xlu1 %22274, %v19104_v20   ;;  %156 = vrot.lane.b32.xlu0 %v30_v22, %s22338_s8  ;;  %s22351_s8 = smov 104  }
  0x7e   :  { %v172_v32 = vpop.permute.xlu1 %171 }
  0x80   :  { %22275 = vset.pattern.permute.xlu1 %v28081_v4  ;;  %242 = vperm.xlu0 %22273, %v19103_v9  }
  0x81   :  { %246 = vperm.xlu1 %22275, %v19104_v20  }
  0x83   :  { %v223_v33 = vpop.permute.xlu1 %222 }
  0x84   :  { %22276 = vset.pattern.permute.xlu0 %v28079_v1 }
  0x85   :  { %250 = vperm.xlu1 %22275, %v19105_v23   ;;  %206 = vperm.xlu0 %22276, %v19105_v23  }
  0x87   :  { %v227_v34 = vpop.permute.xlu1 %226  ;;  %v177_v38 = vpop.permute.xlu0 %176 }
  0x89   :  { %22277 = vset.pattern.permute.xlu1 %v28079_v1  ;;  %22278 = vset.pattern.permute.xlu0 %v28081_v4 }
  0x8a   :  { %51 = vperm.xlu1 %22277, %v41_v24   ;;  %102 = vperm.xlu0 %22278, %v41_v24  }
  0x8b   :  { %v192_v40 = vpop.permute.xlu0 %191 }
  0x8c   :  { %v182_v35 = vpop.permute.xlu1 %181 }
  0x8e   :  { %56 = vperm.xlu1 %22277, %v42_v25   ;;  %114 = vperm.xlu0 %22278, %v44_v26  }
  0x90   :  { %v187_v36 = vpop.permute.xlu1 %186  ;;  %v231_v43 = vpop.permute.xlu0 %230 }
  0x92   :  { %22279 = vset.pattern.permute.xlu1 %v28081_v4  ;;  %22281 = vset.pattern.permute.xlu0 %v28079_v1 }
  0x93   :  { %106 = vperm.xlu1 %22279, %v42_v25   ;;  %61 = vperm.xlu0 %22281, %v43_v27   ;;  %v22546_v25 = vand.u32 4294901760, %v1076_v7 }
  0x95   :  { %v235_v37 = vpop.permute.xlu1 %234 }
  0x97   :  { %36 = vrot.lane.b32.xlu1 %v30_v22, %s22339_s0  ;;  %32 = vrot.lane.b32.xlu0 %v24_v18, %s22340_s20  ;;  %s22354_s0 = smov 47  }
  0x99   :  { %v239_v39 = vpop.permute.xlu1 %238 }
  0x9b   :  { %110 = vperm.xlu1 %22279, %v43_v27   ;;  %76 = vperm.xlu0 %22281, %v46_v28  }
  0x9e   :  { %v197_v42 = vpop.permute.xlu1 %196 }
  0x9f   :  { %22280 = vset.pattern.permute.xlu1 %v28079_v1  ;;  %22284 = vset.pattern.permute.xlu0 %v28081_v4 }
  0xa0   :  { %66 = vperm.xlu1 %22280, %v44_v26   ;;  %126 = vperm.xlu0 %22284, %v47_v29  }
  0xa4   :  { %71 = vperm.xlu1 %22280, %v45_v30   ;;  %22286 = vset.pattern.permute.xlu0 %v28079_v1 }
  0xa8   :  { %22282 = vset.pattern.permute.xlu1 %v28081_v4 }
  0xa9   :  { %118 = vperm.xlu1 %22282, %v45_v30  }
  0xad   :  { %122 = vperm.xlu1 %22282, %v46_v28  }
  0xb1   :  { %22283 = vset.pattern.permute.xlu1 %v28079_v1 }
  0xb2   :  { %81 = vperm.xlu1 %22283, %v47_v29  }
  0xb6   :  { %86 = vperm.xlu1 %22283, %v48_v31  }
  0xba   :  { %22285 = vset.pattern.permute.xlu1 %v28081_v4 }
  0xbb   :  { %130 = vperm.xlu1 %22285, %v48_v31  }
  0xbf   :  { %22287 = vset.pattern.permute.xlu1 %v28079_v1 }
  0xea   :  { %v154_v47 = vpop.permute.xlu1 %153 }
  0xee   :  { %v157_v48 = vpop.permute.xlu0 %156 }
  0xef   :  { %v159_v49 = vsel %vm39_vm2, %v154_v47, %v157_v48 }
  0xf0   :  { %v22496_v50 = vrot.slane %v159_v49, %v91_v45  ;;  %v22500_v51 = vrot.slane %v159_v49, %v135_v46 }
  0xf2   :  { %v214_v52 = vmul.f32 %v22496_v50, %v177_v38  ;;  %v258_v53 = vmul.f32 %v22500_v51, %v227_v34  ;;  %v213_v54 = vmul.f32 %v22496_v50, %v172_v32  ;;  %v257_v55 = vmul.f32 %v22500_v51, %v223_v33 }
  0xf3   :  { %v216_v56 = vmul.f32 %v22496_v50, %v187_v36  ;;  %v260_v57 = vmul.f32 %v22500_v51, %v235_v37  ;;  %v215_v58 = vmul.f32 %v22496_v50, %v182_v35  ;;  %v259_v59 = vmul.f32 %v22500_v51, %v231_v43 }
  0xf4   :  { %v266_v61 = vadd.f32 %v258_v53, %v214_v52  ;;  %v265_v62 = vadd.f32 %v257_v55, %v213_v54  ;;  %v217_v63 = vmul.f32 %v22496_v50, %v192_v40  ;;  %v261_v3 = vmul.f32 %v22500_v51, %v239_v39 }
  0xf5   :  { %v268_v0 = vadd.f32 %v260_v57, %v216_v56  ;;  %v267_v2 = vadd.f32 %v259_v59, %v215_v58  ;;  %v218_v26 = vmul.f32 %v22496_v50, %v197_v42  ;;  %v22576_v43 = vsub.f32 %v1076_v7, %v22546_v25 }
  0xf6   :  { %1827 = vrot.lane.b32.xlu1 %v266_v61, %s22341_s6  ;;  %v280_v5 = vsel %vm39_vm2, %v266_v61, 0  ;;  %1825 = vrot.lane.b32.xlu0 %v265_v62, %s22341_s6  ;;  %v277_v6 = vsel %vm39_vm2, %v265_v62, 0  ;;  %v269_v19 = vadd.f32 %v261_v3, %v217_v63 }
  0xf7   :  { %v22520_v8 = vand.u32 4294901760, %v280_v5  ;;  %v22522_v9 = vand.u32 4294901760, %v277_v6  ;;  %v202_v10 = vpop.permute.xlu1 %201  ;;  %v286_v11 = vsel %vm39_vm2, %v268_v0, 0  ;;  %v283_v15 = vsel %vm39_vm2, %v267_v2, 0 }
  0xf8   :  { %v22526_v16 = vand.u32 4294901760, %v286_v11  ;;  %v22528_v18 = vand.u32 4294901760, %v283_v15  ;;  %v289_v24 = vsel %vm39_vm2, %v269_v19, 0  ;;  %v219_v31 = vmul.f32 %v22496_v50, %v202_v10 }
  0xf9   :  { %v22531_v20 = vsub.f32 %v280_v5, %v22520_v8  ;;  %20284 = vmatprep.mubr.f32.mxu1 %v22522_v9  ;;  %v22535_v21 = vsub.f32 %v277_v6, %v22522_v9  ;;  %v22550_v28 = vand.u32 4294901760, %v289_v24 }
  0xfa   :  { %v22538_v22 = vsub.f32 %v286_v11, %v22526_v16  ;;  %1831 = vrot.lane.b32.xlu1 %v268_v0, %s22341_s6  ;;  %v22542_v23 = vsub.f32 %v283_v15, %v22528_v18  ;;  %1829 = vrot.lane.b32.xlu0 %v267_v2, %s22341_s6  ;;  %v22596_v0 = vand.u32 4294901760, %v22576_v43 }
  0xfb   :  { %20285 = vmatmul.mubr.f32.vlgmr.msra.gmra.mxu1 %v22520_v8  ;;  %v243_v27 = vpop.permute.xlu0 %242  ;;  %v372_v29 = vand.u32 4294901760, %v22535_v21  ;;  %v382_v30 = vand.u32 4294901760, %v22531_v20  ;;  %v22562_v37 = vsub.f32 %v289_v24, %v22550_v28 }
  0xfc   :  { %20287 = vmatprep.mubr.f32.mxu1 %v22528_v18  ;;  %v262_v32 = vmul.f32 %v22500_v51, %v243_v27  ;;  %v247_v33 = vpop.permute.xlu1 %246  ;;  %v392_v34 = vand.u32 4294901760, %v22542_v23  ;;  %v402_v35 = vand.u32 4294901760, %v22538_v22  ;;  %20311 = vmatpush3.msra.mxu1 %v22425_v12  ;;  %v1258_v24 = vsub.f32 %v22576_v43, %v22596_v0 }
  0xfd   :  { %v263_v36 = vmul.f32 %v22500_v51, %v247_v33  ;;  %v373_v38 = vsub.f32 %v22535_v21, %v372_v29  ;;  %v383_v39 = vsub.f32 %v22531_v20, %v382_v30  ;;  %20338 = vmatprep.subr.mxu1 %v22425_v12  ;;  %v412_v52 = vand.u32 4294901760, %v22562_v37 }
  0xfe   :  { %v270_v40 = vadd.f32 %v262_v32, %v218_v26  ;;  %1833 = vrot.lane.b32.xlu0 %v269_v19, %s22341_s6  ;;  %v393_v42 = vsub.f32 %v22542_v23, %v392_v34  ;;  %v403_v57 = vsub.f32 %v22538_v22, %v402_v35 }
  0xff   :  { %v271_v47 = vadd.f32 %v263_v36, %v219_v31  ;;  %20288 = vmatmul.mubr.f32.gmra.mxu1 %v22526_v16  ;;  %v374_v48 = vand.u32 4294901760, %v373_v38  ;;  %v384_v49 = vand.u32 4294901760, %v383_v39  ;;  %v413_v63 = vsub.f32 %v22562_v37, %v412_v52 }
 0x100   :  { %v292_v53 = vsel %vm39_vm2, %v270_v40, 0  ;;  %20290 = vmatprep.mubr.f32.mxu1 %v22550_v28  ;;  %v251_v54 = vpop.permute.xlu1 %250  ;;  %1835 = vrot.lane.b32.xlu1 %v270_v40, %s22341_s6  ;;  %v207_v55 = vpop.permute.xlu0 %206  ;;  %v394_v56 = vand.u32 4294901760, %v393_v42  ;;  %v22625_v40 = vand.u32 4294901760, %v1258_v24 }
 0x101   :  { %v22586_v58 = vand.u32 4294901760, %v292_v53  ;;  %v295_v59 = vsel %vm39_vm2, %v271_v47, 0  ;;  %v264_v60 = vmul.f32 %v22500_v51, %v251_v54  ;;  %v220_v61 = vmul.f32 %v22496_v50, %v207_v55  ;;  %20270 = vmatprep.mubr.f32.mxu0 %v374_v48 }
 0x102   :  { %v22591_v62 = vand.u32 4294901760, %v295_v59  ;;  %1837 = vrot.lane.b32.xlu0 %v271_v47, %s22341_s6  ;;  %20271 = vmatmul.mubr.f32.vlgmr.msra.gmra.mxu0 %v384_v49  ;;  %v404_v51 = vand.u32 4294901760, %v403_v57  ;;  %v414_v10 = vand.u32 4294901760, %v413_v63 }
 0x103   :  { %v22599_v2 = vsub.f32 %v292_v53, %v22586_v58  ;;  %v272_v3 = vadd.f32 %v264_v60, %v220_v61  ;;  %20273 = vmatprep.mubr.f32.mxu0 %v394_v56  ;;  %20291 = vmatmul.mubr.f32.gmra.mxu1 %v22586_v58 }
 0x104   :  { %v22603_v50 = vsub.f32 %v295_v59, %v22591_v62  ;;  %20293 = vmatprep.mubr.f32.mxu1 %v22591_v62  ;;  %20297 = vmatpush3.msra.mxu0 %v22428_v13 }
 0x105   :  { %v298_v5 = vsel %vm39_vm2, %v272_v3, 0  ;;  %v52_v6 = vpop.permute.xlu1 %51  ;;  %1839 = vrot.lane.b32.xlu1 %v272_v3, %s22341_s6  ;;  %v103_v7 = vpop.permute.xlu0 %102  ;;  %v422_v11 = vand.u32 4294901760, %v22599_v2  ;;  %20324 = vmatprep.subr.mxu0 %v22433_v14 }
 0x106   :  { %v22611_v15 = vand.u32 4294901760, %v298_v5  ;;  %20274 = vmatmul.mubr.f32.gmra.mxu0 %v404_v51  ;;  %v432_v19 = vand.u32 4294901760, %v22603_v50 }
 0x107   :  { %20276 = vmatprep.mubr.f32.mxu0 %v414_v10  ;;  %v423_v26 = vsub.f32 %v22599_v2, %v422_v11 }
 0x108   :  { %v22618_v27 = vsub.f32 %v298_v5, %v22611_v15  ;;  %20294 = vmatmul.mubr.f32.gmra.mxu1 %v22611_v15  ;;  %v433_v31 = vsub.f32 %v22603_v50, %v432_v19 }
 0x109   :  { %v57_v32 = vpop.permute.xlu1 %56  ;;  %20312 = vmatprep.mubr.f32.mxu1 %v372_v29  ;;  %v115_v33 = vpop.permute.xlu0 %114  ;;  %v424_v36 = vand.u32 4294901760, %v423_v26 }
 0x10a   :  { %v434_v38 = vand.u32 4294901760, %v433_v31  ;;  %v442_v39 = vand.u32 4294901760, %v22618_v27 }
 0x10b   :  { %20277 = vmatmul.mubr.f32.gmra.mxu0 %v424_v36 }
 0x10c   :  { %20279 = vmatprep.mubr.f32.mxu0 %v434_v38  ;;  %20313 = vmatmul.mubr.f32.vlgmr.msra.gmra.mxu1 %v382_v30  ;;  %v443_v42 = vsub.f32 %v22618_v27, %v442_v39 }
 0x10d   :  { %20315 = vmatprep.mubr.f32.mxu1 %v392_v34  ;;  %20339 = vmatpush3.msra.mxu1 %v22425_v12 }
 0x10e   :  { %v107_v29 = vpop.permute.xlu1 %106  ;;  %v62_v47 = vpop.permute.xlu0 %61  ;;  %v444_v48 = vand.u32 4294901760, %v443_v42  ;;  %20366 = vmatprep.subr.mxu1 %v22625_v40 }
 0x110   :  { %20280 = vmatmul.mubr.f32.gmra.mxu0 %v444_v48  ;;  %20316 = vmatmul.mubr.f32.gmra.mxu1 %v402_v35 }
 0x111   :  { %20298 = vmatprep.mubr.f32.mxu0 %v22535_v21  ;;  %20318 = vmatprep.mubr.f32.mxu1 %v412_v52 }
 0x112   :  { %v37_v30 = vpop.permute.xlu1 %36  ;;  %v33_v49 = vpop.permute.xlu0 %32 }
 0x113   :  { %v40_v53 = vsel %vm39_vm2, %v33_v49, %v37_v30 }
 0x114   :  { %v22640_v34 = vrot.slane %v40_v53, %v91_v45  ;;  %v22644_v54 = vrot.slane %v40_v53, %v135_v46  ;;  %20299 = vmatmul.mubr.f32.vlgmr.msra.gmra.mxu0 %v22531_v20  ;;  %20319 = vmatmul.mubr.f32.gmra.mxu1 %v422_v11 }
 0x115   :  { %20301 = vmatprep.mubr.f32.mxu0 %v22542_v23  ;;  %20321 = vmatprep.mubr.f32.mxu1 %v432_v19 }
 0x116   :  { %v111_v21 = vpop.permute.xlu1 %110  ;;  %v94_v35 = vmul.f32 %v22640_v34, %v57_v32  ;;  %v138_v52 = vmul.f32 %v22644_v54, %v107_v29  ;;  %v93_v55 = vmul.f32 %v22640_v34, %v52_v6  ;;  %20325 = vmatpush3.msra.mxu0 %v22433_v14  ;;  %v137_v45 = vmul.f32 %v22644_v54, %v103_v7  ;;  %v77_v10 = vpop.permute.xlu0 %76 }
 0x117   :  { %20352 = vmatprep.subr.mxu0 %v22546_v25  ;;  %v95_v46 = vmul.f32 %v22640_v34, %v62_v47  ;;  %v139_v20 = vmul.f32 %v22644_v54, %v111_v21  ;;  %v140_v63 = vmul.f32 %v22644_v54, %v115_v33 }
 0x118   :  { %20302 = vmatmul.mubr.f32.gmra.mxu0 %v22538_v22  ;;  %20322 = vmatmul.mubr.f32.gmra.mxu1 %v442_v39  ;;  %v146_v23 = vadd.f32 %v138_v52, %v94_v35  ;;  %v145_v56 = vadd.f32 %v137_v45, %v93_v55 }
 0x119   :  { %20304 = vmatprep.mubr.f32.mxu0 %v22562_v37  ;;  %20340 = vmatprep.mubr.f32.mxu1 %v22522_v9  ;;  %v147_v59 = vadd.f32 %v139_v20, %v95_v46 }
 0x11a   :  { %2606 = vrot.lane.b32.xlu1 %v146_v23, %s22341_s6  ;;  %2604 = vrot.lane.b32.xlu0 %v145_v56, %s22341_s6  ;;  %v1052_v60 = vsel %vm39_vm2, %v145_v56, 0  ;;  %v1055_v37 = vsel %vm39_vm2, %v146_v23, 0 }
 0x11b   :  { %v67_v57 = vpop.permute.xlu1 %66  ;;  %v22670_v3 = vand.u32 4294901760, %v1052_v60  ;;  %v127_v42 = vpop.permute.xlu0 %126 }
 0x11c   :  { %v96_v61 = vmul.f32 %v22640_v34, %v67_v57  ;;  %20305 = vmatmul.mubr.f32.gmra.mxu0 %v22599_v2  ;;  %20341 = vmatmul.mubr.f32.vlgmr.msra.gmra.mxu1 %v22520_v8  ;;  %v1058_v2 = vsel %vm39_vm2, %v147_v59, 0  ;;  %v143_v30 = vmul.f32 %v22644_v54, %v127_v42 }
 0x11d   :  { %20307 = vmatprep.mubr.f32.mxu0 %v22603_v50  ;;  %20343 = vmatprep.mubr.f32.mxu1 %v22528_v18  ;;  %v22679_v50 = vand.u32 4294901760, %v1055_v37  ;;  %v22682_v5 = vand.u32 4294901760, %v1058_v2  ;;  %v22685_v6 = vsub.f32 %v1052_v60, %v22670_v3 }
 0x11e   :  { %v148_v22 = vadd.f32 %v140_v63, %v96_v61  ;;  %20367 = vmatpush3.msra.mxu1 %v22625_v40  ;;  %2608 = vrot.lane.b32.xlu0 %v147_v59, %s22341_s6 }
 0x11f   :  { %v72_v51 = vpop.permute.xlu1 %71  ;;  %20394 = vmatprep.subr.mxu1 %v22546_v25  ;;  %v22695_v24 = vsub.f32 %v1055_v37, %v22679_v50  ;;  %v1146_v31 = vand.u32 4294901760, %v22685_v6 }
 0x120   :  { %20308 = vmatmul.mubr.f32.gmra.mxu0 %v22618_v27  ;;  %20344 = vmatmul.mubr.f32.gmra.mxu1 %v22526_v16  ;;  %v1061_v7 = vsel %vm39_vm2, %v148_v22, 0  ;;  %v97_v19 = vmul.f32 %v22640_v34, %v72_v51  ;;  %v22701_v27 = vsub.f32 %v1058_v2, %v22682_v5 }
 0x121   :  { %2610 = vrot.lane.b32.xlu1 %v148_v22, %s22341_s6  ;;  %20326 = vmatprep.mubr.f32.mxu0 %v22522_v9  ;;  %v22697_v26 = vand.u32 4294901760, %v1061_v7  ;;  %v1156_v38 = vand.u32 4294901760, %v22695_v24  ;;  %v1147_v47 = vsub.f32 %v22685_v6, %v1146_v31 }
 0x122   :  { %20346 = vmatprep.mubr.f32.mxu1 %v22550_v28  ;;  %v1166_v48 = vand.u32 4294901760, %v22701_v27 }
 0x123   :  { %v22714_v39 = vsub.f32 %v1061_v7, %v22697_v26  ;;  %v1157_v21 = vsub.f32 %v22695_v24, %v1156_v38  ;;  %v1148_v55 = vand.u32 4294901760, %v1147_v47 }
 0x124   :  { %v119_v11 = vpop.permute.xlu1 %118  ;;  %20327 = vmatmul.mubr.f32.vlgmr.msra.gmra.mxu0 %v22520_v8  ;;  %20347 = vmatmul.mubr.f32.gmra.mxu1 %v22586_v58 }
 0x125   :  { %v141_v9 = vmul.f32 %v22644_v54, %v119_v11  ;;  %20329 = vmatprep.mubr.f32.mxu0 %v22528_v18  ;;  %20349 = vmatprep.mubr.f32.mxu1 %v22591_v62  ;;  %v98_v18 = vmul.f32 %v22640_v34, %v77_v10  ;;  %v1158_v57 = vand.u32 4294901760, %v1157_v21 }
 0x126   :  { %20353 = vmatpush3.msra.mxu0 %v22546_v25 }
 0x127   :  { %v149_v8 = vadd.f32 %v141_v9, %v97_v19  ;;  %20380 = vmatprep.subr.mxu0 %v22576_v43 }
 0x128   :  { %v123_v32 = vpop.permute.xlu1 %122  ;;  %20330 = vmatmul.mubr.f32.gmra.mxu0 %v22526_v16  ;;  %20350 = vmatmul.mubr.f32.gmra.mxu1 %v22611_v15 }
 0x129   :  { %v1064_v33 = vsel %vm39_vm2, %v149_v8, 0  ;;  %v142_v36 = vmul.f32 %v22644_v54, %v123_v32  ;;  %20332 = vmatprep.mubr.f32.mxu0 %v22550_v28  ;;  %2612 = vrot.lane.b32.xlu0 %v149_v8, %s22341_s6 }
 0x12a   :  { %v22716_v29 = vand.u32 4294901760, %v1064_v33  ;;  %20368 = vmatprep.mubr.f32.mxu1 %v22670_v3 }
 0x12b   :  { %v150_v16 = vadd.f32 %v142_v36, %v98_v18 }
 0x12c   :  { %v22724_v28 = vsub.f32 %v1064_v33, %v22716_v29  ;;  %20333 = vmatmul.mubr.f32.gmra.mxu0 %v22586_v58  ;;  %20369 = vmatmul.mubr.f32.vlgmr.msra.gmra.mxu1 %v22679_v50  ;;  %v1176_v58 = vand.u32 4294901760, %v22714_v39 }
 0x12d   :  { %v1067_v49 = vsel %vm39_vm2, %v150_v16, 0  ;;  %v82_v53 = vpop.permute.xlu1 %81  ;;  %20335 = vmatprep.mubr.f32.mxu0 %v22591_v62  ;;  %20371 = vmatprep.mubr.f32.mxu1 %v22682_v5  ;;  %v1167_v62 = vsub.f32 %v22701_v27, %v1166_v48 }
 0x12e   :  { %v22735_v35 = vand.u32 4294901760, %v1067_v49  ;;  %v99_v52 = vmul.f32 %v22640_v34, %v82_v53  ;;  %2614 = vrot.lane.b32.xlu1 %v150_v16, %s22341_s6  ;;  %20395 = vmatpush3.msra.mxu1 %v22546_v25  ;;  %v1186_v45 = vand.u32 4294901760, %v22724_v28  ;;  %v1177_v59 = vsub.f32 %v22714_v39, %v1176_v58 }
 0x12f   :  { %20422 = vmatprep.subr.mxu1 %v22546_v25  ;;  %v1168_v63 = vand.u32 4294901760, %v1167_v62 }
 0x130   :  { %v22747_v46 = vsub.f32 %v1067_v49, %v22735_v35  ;;  %v151_v20 = vadd.f32 %v143_v30, %v99_v52  ;;  %20336 = vmatmul.mubr.f32.gmra.mxu0 %v22611_v15  ;;  %20372 = vmatmul.mubr.f32.gmra.mxu1 %v22697_v26  ;;  %v1187_v15 = vsub.f32 %v22724_v28, %v1186_v45  ;;  %v1178_v51 = vand.u32 4294901760, %v1177_v59 }
 0x131   :  { %v87_v23 = vpop.permute.xlu1 %86  ;;  %20354 = vmatprep.mubr.f32.mxu0 %v1148_v55  ;;  %20374 = vmatprep.mubr.f32.mxu1 %v22716_v29 }
 0x132   :  { %v1070_v56 = vsel %vm39_vm2, %v151_v20, 0  ;;  %2616 = vrot.lane.b32.xlu0 %v151_v20, %s22341_s6  ;;  %v1196_v60 = vand.u32 4294901760, %v22747_v46  ;;  %v100_v7 = vmul.f32 %v22640_v34, %v87_v23  ;;  %v1188_v11 = vand.u32 4294901760, %v1187_v15 }
 0x133   :  { %v22756_v61 = vand.u32 4294901760, %v1070_v56 }
 0x134   :  { %20355 = vmatmul.mubr.f32.vlgmr.msra.gmra.mxu0 %v1158_v57  ;;  %20375 = vmatmul.mubr.f32.gmra.mxu1 %v22735_v35  ;;  %v1197_v2 = vsub.f32 %v22747_v46, %v1196_v60 }
 0x135   :  { %v1205_v22 = vsub.f32 %v1070_v56, %v22756_v61  ;;  %20357 = vmatprep.mubr.f32.mxu0 %v1168_v63  ;;  %20377 = vmatprep.mubr.f32.mxu1 %v22756_v61 }
 0x136   :  { %v131_v37 = vpop.permute.xlu1 %130  ;;  %20381 = vmatpush3.msra.mxu0 %v22576_v43  ;;  %v1198_v32 = vand.u32 4294901760, %v1197_v2 }
 0x137   :  { %v144_v10 = vmul.f32 %v22644_v54, %v131_v37  ;;  %v1206_v19 = vand.u32 4294901760, %v1205_v22  ;;  %20408 = vmatprep.subr.mxu0 %v22596_v0 }
 0x138   :  { %20358 = vmatmul.mubr.f32.gmra.mxu0 %v1178_v51 }
 0x139   :  { %v152_v9 = vadd.f32 %v144_v10, %v100_v7  ;;  %20360 = vmatprep.mubr.f32.mxu0 %v1188_v11  ;;  %v1207_v8 = vsub.f32 %v1205_v22, %v1206_v19 }
 0x13b   :  { %v1073_v18 = vsel %vm39_vm2, %v152_v9, 0  ;;  %2618 = vrot.lane.b32.xlu1 %v152_v9, %s22341_s6  ;;  %v1208_v33 = vand.u32 4294901760, %v1207_v8  ;;  %s22362_s6 = smov 94  }
 0x13c   :  { %v1214_v36 = vand.u32 4294901760, %v1073_v18  ;;  %20361 = vmatmul.mubr.f32.gmra.mxu0 %v1198_v32 }
 0x13d   :  { %20363 = vmatprep.mubr.f32.mxu0 %v1208_v33 }
 0x13e   :  { %v1215_v34 = vsub.f32 %v1073_v18, %v1214_v36  ;;  %20378 = vmatmul.mubr.f32.gmra.mxu1 %v1214_v36 }
 0x13f   :  { %20396 = vmatprep.mubr.f32.mxu1 %v1146_v31 }
 0x140   :  { %v1216_v54 = vand.u32 4294901760, %v1215_v34 }
 0x142   :  { %20397 = vmatmul.mubr.f32.vlgmr.msra.gmra.mxu1 %v1156_v38  ;;  %v1217_v42 = vsub.f32 %v1215_v34, %v1216_v54 }
 0x143   :  { %20399 = vmatprep.mubr.f32.mxu1 %v1166_v48  ;;  %20423 = vmatpush3.msra.mxu1 %v22546_v25 }
 0x144   :  { %v1218_v16 = vand.u32 4294901760, %v1217_v42  ;;  %20450 = vmatprep.subr.mxu1 %v22438_v17 }
 0x146   :  { %20364 = vmatmul.mubr.f32.gmra.mxu0 %v1218_v16  ;;  %20400 = vmatmul.mubr.f32.gmra.mxu1 %v1176_v58 }
 0x147   :  { %20382 = vmatprep.mubr.f32.mxu0 %v22685_v6  ;;  %20402 = vmatprep.mubr.f32.mxu1 %v1186_v45 }
 0x14a   :  { %20383 = vmatmul.mubr.f32.vlgmr.msra.gmra.mxu0 %v22695_v24  ;;  %20403 = vmatmul.mubr.f32.gmra.mxu1 %v1196_v60 }
 0x14b   :  { %20385 = vmatprep.mubr.f32.mxu0 %v22701_v27  ;;  %20405 = vmatprep.mubr.f32.mxu1 %v1206_v19 }
 0x14c   :  { %20409 = vmatpush3.msra.mxu0 %v22596_v0 }
 0x14d   :  { %20436 = vmatprep.subr.mxu0 %v22425_v12 }
 0x14e   :  { %20386 = vmatmul.mubr.f32.gmra.mxu0 %v22714_v39  ;;  %20406 = vmatmul.mubr.f32.gmra.mxu1 %v1216_v54 }
 0x14f   :  { %20388 = vmatprep.mubr.f32.mxu0 %v22724_v28  ;;  %20424 = vmatprep.mubr.f32.mxu1 %v22670_v3 }
 0x152   :  { %20389 = vmatmul.mubr.f32.gmra.mxu0 %v22747_v46  ;;  %20425 = vmatmul.mubr.f32.vlgmr.msra.gmra.mxu1 %v22679_v50 }
 0x153   :  { %20391 = vmatprep.mubr.f32.mxu0 %v1205_v22  ;;  %20427 = vmatprep.mubr.f32.mxu1 %v22682_v5 }
 0x154   :  { %20451 = vmatpush3.msra.mxu1 %v22438_v17 }
 0x155   :  { %20478 = vmatprep.subr.mxu1 %v22425_v12 }
 0x156   :  { %20392 = vmatmul.mubr.f32.gmra.mxu0 %v1215_v34  ;;  %20428 = vmatmul.mubr.f32.gmra.mxu1 %v22697_v26 }
 0x157   :  { %20410 = vmatprep.mubr.f32.mxu0 %v22670_v3  ;;  %20430 = vmatprep.mubr.f32.mxu1 %v22716_v29 }
 0x15a   :  { %20411 = vmatmul.mubr.f32.vlgmr.msra.gmra.mxu0 %v22679_v50  ;;  %20431 = vmatmul.mubr.f32.gmra.mxu1 %v22735_v35 }
 0x15b   :  { %20413 = vmatprep.mubr.f32.mxu0 %v22682_v5  ;;  %20433 = vmatprep.mubr.f32.mxu1 %v22756_v61 }
 0x15c   :  { %20437 = vmatpush3.msra.mxu0 %v22425_v12 }
 0x15d   :  { %20464 = vmatprep.subr.mxu0 %v22428_v13 }
 0x15e   :  { %20414 = vmatmul.mubr.f32.gmra.mxu0 %v22697_v26  ;;  %20434 = vmatmul.mubr.f32.gmra.mxu1 %v1214_v36 }
 0x15f   :  { %20416 = vmatprep.mubr.f32.mxu0 %v22716_v29 }
 0x162   :  { %20417 = vmatmul.mubr.f32.gmra.mxu0 %v22735_v35 }
 0x163   :  { %20419 = vmatprep.mubr.f32.mxu0 %v22756_v61 }
 0x166   :  { %20420 = vmatmul.mubr.f32.gmra.mxu0 %v1214_v36 }
 0x168   :  { %v1828_v17 = vpop.permute.xlu1 %1827  ;;  %v1826_v3 = vpop.permute.xlu0 %1825 }
 0x169   :  { %v1843_v50 = vsel %vm39_vm2, %v1828_v17, 0  ;;  %v1841_v5 = vsel %vm39_vm2, %v1826_v3, 0 }
 0x16a   :  { %v22805_v6 = vand.u32 4294901760, %v1843_v50  ;;  %v22807_v24 = vand.u32 4294901760, %v1841_v5 }
 0x16c   :  { %v22810_v26 = vsub.f32 %v1843_v50, %v22805_v6  ;;  %v22813_v27 = vsub.f32 %v1841_v5, %v22807_v24  ;;  %v1832_v31 = vpop.permute.xlu1 %1831  ;;  %20452 = vmatprep.mubr.f32.mxu1 %v22807_v24  ;;  %v1830_v38 = vpop.permute.xlu0 %1829 }
 0x16d   :  { %v1847_v39 = vsel %vm39_vm2, %v1832_v31, 0  ;;  %v1845_v29 = vsel %vm39_vm2, %v1830_v38, 0  ;;  %20453 = vmatmul.mubr.f32.vlgmr.msra.gmra.mxu1 %v22805_v6 }
 0x16e   :  { %v1935_v47 = vand.u32 4294901760, %v22810_v26  ;;  %v22820_v48 = vand.u32 4294901760, %v1847_v39  ;;  %v22822_v28 = vand.u32 4294901760, %v1845_v29  ;;  %v1925_v30 = vand.u32 4294901760, %v22813_v27  ;;  %20479 = vmatpush3.msra.mxu1 %v22425_v12 }
 0x16f   :  { %20506 = vmatprep.subr.mxu1 %v22425_v12 }
 0x170   :  { %v1936_v49 = vsub.f32 %v22810_v26, %v1935_v47  ;;  %v22829_v53 = vsub.f32 %v1847_v39, %v22820_v48  ;;  %v22832_v21 = vsub.f32 %v1845_v29, %v22822_v28  ;;  %20455 = vmatprep.mubr.f32.mxu1 %v22822_v28  ;;  %v1834_v35 = vpop.permute.xlu0 %1833  ;;  %v1926_v52 = vsub.f32 %v22813_v27, %v1925_v30 }
 0x171   :  { %v1849_v58 = vsel %vm39_vm2, %v1834_v35, 0  ;;  %20456 = vmatmul.mubr.f32.gmra.mxu1 %v22820_v48 }
 0x172   :  { %v1937_v55 = vand.u32 4294901760, %v1936_v49  ;;  %v22838_v62 = vand.u32 4294901760, %v1849_v58  ;;  %v1836_v45 = vpop.permute.xlu1 %1835  ;;  %v1927_v46 = vand.u32 4294901760, %v1926_v52  ;;  %v1945_v20 = vand.u32 4294901760, %v22832_v21 }
 0x173   :  { %v1851_v23 = vsel %vm39_vm2, %v1836_v45, 0  ;;  %v1955_v56 = vand.u32 4294901760, %v22829_v53 }
 0x174   :  { %v1964_v57 = vsub.f32 %v1849_v58, %v22838_v62  ;;  %v22844_v59 = vand.u32 4294901760, %v1851_v23  ;;  %20438 = vmatprep.mubr.f32.mxu0 %v1927_v46  ;;  %20458 = vmatprep.mubr.f32.mxu1 %v22838_v62  ;;  %v1838_v60 = vpop.permute.xlu0 %1837  ;;  %v1946_v61 = vsub.f32 %v22832_v21, %v1945_v20 }
 0x175   :  { %v1853_v63 = vsel %vm39_vm2, %v1838_v60, 0  ;;  %20439 = vmatmul.mubr.f32.vlgmr.msra.gmra.mxu0 %v1937_v55  ;;  %v1956_v15 = vsub.f32 %v22829_v53, %v1955_v56 }
 0x176   :  { %v1974_v22 = vsub.f32 %v1851_v23, %v22844_v59  ;;  %v22851_v37 = vand.u32 4294901760, %v1853_v63  ;;  %20459 = vmatmul.mubr.f32.gmra.mxu1 %v22844_v59  ;;  %v1947_v51 = vand.u32 4294901760, %v1946_v61  ;;  %v1965_v2 = vand.u32 4294901760, %v1964_v57  ;;  %20465 = vmatpush3.msra.mxu0 %v22428_v13 }
 0x177   :  { %v1840_v7 = vpop.permute.xlu1 %1839  ;;  %v1957_v10 = vand.u32 4294901760, %v1956_v15  ;;  %20492 = vmatprep.subr.mxu0 %v22433_v14 }
 0x178   :  { %v1984_v11 = vsub.f32 %v1853_v63, %v22851_v37  ;;  %v1855_v19 = vsel %vm39_vm2, %v1840_v7, 0  ;;  %20441 = vmatprep.mubr.f32.mxu0 %v1947_v51  ;;  %20461 = vmatprep.mubr.f32.mxu1 %v22851_v37  ;;  %v1966_v9 = vsub.f32 %v1964_v57, %v1965_v2  ;;  %v1975_v8 = vand.u32 4294901760, %v1974_v22 }
 0x179   :  { %v22859_v32 = vand.u32 4294901760, %v1855_v19  ;;  %20442 = vmatmul.mubr.f32.gmra.mxu0 %v1957_v10 }
 0x17a   :  { %v1967_v18 = vand.u32 4294901760, %v1966_v9  ;;  %v1976_v33 = vsub.f32 %v1974_v22, %v1975_v8  ;;  %v1985_v36 = vand.u32 4294901760, %v1984_v11 }
 0x17b   :  { %v1994_v13 = vsub.f32 %v1855_v19, %v22859_v32  ;;  %20462 = vmatmul.mubr.f32.gmra.mxu1 %v22859_v32 }
 0x17c   :  { %20444 = vmatprep.mubr.f32.mxu0 %v1967_v18  ;;  %20480 = vmatprep.mubr.f32.mxu1 %v1925_v30  ;;  %v1977_v34 = vand.u32 4294901760, %v1976_v33  ;;  %v1986_v54 = vsub.f32 %v1984_v11, %v1985_v36 }
 0x17d   :  { %v1995_v42 = vand.u32 4294901760, %v1994_v13 }
 0x17e   :  { %20445 = vmatmul.mubr.f32.gmra.mxu0 %v1977_v34  ;;  %v1987_v16 = vand.u32 4294901760, %v1986_v54 }
 0x17f   :  { %20481 = vmatmul.mubr.f32.vlgmr.msra.gmra.mxu1 %v1935_v47  ;;  %v1996_v17 = vsub.f32 %v1994_v13, %v1995_v42 }
 0x180   :  { %20447 = vmatprep.mubr.f32.mxu0 %v1987_v16  ;;  %20483 = vmatprep.mubr.f32.mxu1 %v1945_v20 }
 0x181   :  { %v1997_v3 = vand.u32 4294901760, %v1996_v17  ;;  %20507 = vmatpush3.msra.mxu1 %v22425_v12 }
 0x182   :  { %20534 = vmatprep.subr.mxu1 %v22625_v40 }
 0x183   :  { %20448 = vmatmul.mubr.f32.gmra.mxu0 %v1997_v3  ;;  %20484 = vmatmul.mubr.f32.gmra.mxu1 %v1955_v56 }
 0x184   :  { %20466 = vmatprep.mubr.f32.mxu0 %v22813_v27  ;;  %20486 = vmatprep.mubr.f32.mxu1 %v1965_v2 }
 0x187   :  { %20467 = vmatmul.mubr.f32.vlgmr.msra.gmra.mxu0 %v22810_v26  ;;  %20487 = vmatmul.mubr.f32.gmra.mxu1 %v1975_v8 }
 0x188   :  { %20469 = vmatprep.mubr.f32.mxu0 %v22832_v21  ;;  %20489 = vmatprep.mubr.f32.mxu1 %v1985_v36 }
 0x189   :  { %20493 = vmatpush3.msra.mxu0 %v22433_v14 }
 0x18a   :  { %20520 = vmatprep.subr.mxu0 %v22546_v25 }
 0x18b   :  { %20470 = vmatmul.mubr.f32.gmra.mxu0 %v22829_v53  ;;  %20490 = vmatmul.mubr.f32.gmra.mxu1 %v1995_v42 }
 0x18c   :  { %20472 = vmatprep.mubr.f32.mxu0 %v1964_v57  ;;  %20508 = vmatprep.mubr.f32.mxu1 %v22807_v24  ;;  %v2605_v12 = vpop.permute.xlu0 %2604  ;;  %v2607_v50 = vpop.permute.xlu1 %2606 }
 0x18d   :  { %v2620_v5 = vsel %vm39_vm2, %v2605_v12, 0  ;;  %v2622_v14 = vsel %vm39_vm2, %v2607_v50, 0 }
 0x18e   :  { %v22877_v27 = vand.u32 4294901760, %v2620_v5  ;;  %v22884_v39 = vand.u32 4294901760, %v2622_v14 }
 0x18f   :  { %20473 = vmatmul.mubr.f32.gmra.mxu0 %v1974_v22  ;;  %20509 = vmatmul.mubr.f32.vlgmr.msra.gmra.mxu1 %v22805_v6 }
 0x190   :  { %20475 = vmatprep.mubr.f32.mxu0 %v1984_v11  ;;  %20511 = vmatprep.mubr.f32.mxu1 %v22822_v28  ;;  %v2609_v26 = vpop.permute.xlu0 %2608 }
 0x191   :  { %20535 = vmatpush3.msra.mxu1 %v22625_v40  ;;  %v2624_v31 = vsel %vm39_vm2, %v2609_v26, 0  ;;  %v22887_v40 = vsub.f32 %v2620_v5, %v22877_v27 }
 0x192   :  { %20562 = vmatprep.subr.mxu1 %v22546_v25  ;;  %v22889_v29 = vand.u32 4294901760, %v2624_v31 }
 0x193   :  { %v2611_v38 = vpop.permute.xlu1 %2610  ;;  %20476 = vmatmul.mubr.f32.gmra.mxu0 %v1994_v13  ;;  %20512 = vmatmul.mubr.f32.gmra.mxu1 %v22820_v48  ;;  %v2704_v53 = vand.u32 4294901760, %v22887_v40 }
 0x194   :  { %20494 = vmatprep.mubr.f32.mxu0 %v22807_v24  ;;  %20514 = vmatprep.mubr.f32.mxu1 %v22838_v62  ;;  %v2626_v47 = vsel %vm39_vm2, %v2611_v38, 0  ;;  %v22897_v24 = vsub.f32 %v2622_v14, %v22884_v39  ;;  %v22903_v49 = vsub.f32 %v2624_v31, %v22889_v29 }
 0x195   :  { %v22899_v30 = vand.u32 4294901760, %v2626_v47 }
 0x196   :  { %v2714_v21 = vand.u32 4294901760, %v22897_v24  ;;  %v2724_v58 = vand.u32 4294901760, %v22903_v49 }
 0x197   :  { %20495 = vmatmul.mubr.f32.vlgmr.msra.gmra.mxu0 %v22805_v6  ;;  %20515 = vmatmul.mubr.f32.gmra.mxu1 %v22844_v59  ;;  %v22914_v35 = vsub.f32 %v2626_v47, %v22899_v30 }
 0x198   :  { %20497 = vmatprep.mubr.f32.mxu0 %v22822_v28  ;;  %20517 = vmatprep.mubr.f32.mxu1 %v22851_v37  ;;  %v2715_v45 = vsub.f32 %v22897_v24, %v2714_v21  ;;  %v2725_v57 = vsub.f32 %v22903_v49, %v2724_v58 }
 0x199   :  { %20521 = vmatpush3.msra.mxu0 %v22546_v25  ;;  %v2734_v20 = vand.u32 4294901760, %v22914_v35 }
 0x19a   :  { %20548 = vmatprep.subr.mxu0 %v22576_v43  ;;  %v2716_v63 = vand.u32 4294901760, %v2715_v45  ;;  %v2726_v51 = vand.u32 4294901760, %v2725_v57 }
 0x19b   :  { %20498 = vmatmul.mubr.f32.gmra.mxu0 %v22820_v48  ;;  %20518 = vmatmul.mubr.f32.gmra.mxu1 %v22859_v32  ;;  %v2613_v6 = vpop.permute.xlu0 %2612  ;;  %v2705_v48 = vsub.f32 %v22887_v40, %v2704_v53  ;;  %v2735_v22 = vsub.f32 %v22914_v35, %v2734_v20 }
 0x19c   :  { %v2628_v28 = vsel %vm39_vm2, %v2613_v6, 0  ;;  %20500 = vmatprep.mubr.f32.mxu0 %v22838_v62  ;;  %20536 = vmatprep.mubr.f32.mxu1 %v22877_v27 }
 0x19d   :  { %v22916_v52 = vand.u32 4294901760, %v2628_v28  ;;  %v2706_v56 = vand.u32 4294901760, %v2705_v48  ;;  %v2736_v11 = vand.u32 4294901760, %v2735_v22 }
 0x19f   :  { %v22923_v55 = vsub.f32 %v2628_v28, %v22916_v52  ;;  %20501 = vmatmul.mubr.f32.gmra.mxu0 %v22844_v59  ;;  %20537 = vmatmul.mubr.f32.vlgmr.msra.gmra.mxu1 %v22884_v39 }
 0x1a0   :  { %v2615_v62 = vpop.permute.xlu1 %2614  ;;  %20503 = vmatprep.mubr.f32.mxu0 %v22851_v37  ;;  %20539 = vmatprep.mubr.f32.mxu1 %v22889_v29 }
 0x1a1   :  { %v2630_v46 = vsel %vm39_vm2, %v2615_v62, 0  ;;  %20563 = vmatpush3.msra.mxu1 %v22546_v25  ;;  %v2744_v59 = vand.u32 4294901760, %v22923_v55 }
 0x1a2   :  { %v22933_v23 = vand.u32 4294901760, %v2630_v46  ;;  %20590 = vmatprep.subr.mxu1 %v22546_v25 }
 0x1a3   :  { %20504 = vmatmul.mubr.f32.gmra.mxu0 %v22859_v32  ;;  %20540 = vmatmul.mubr.f32.gmra.mxu1 %v22899_v30  ;;  %v2745_v2 = vsub.f32 %v22923_v55, %v2744_v59 }
 0x1a4   :  { %v2753_v60 = vsub.f32 %v2630_v46, %v22933_v23  ;;  %20522 = vmatprep.mubr.f32.mxu0 %v2706_v56  ;;  %20542 = vmatprep.mubr.f32.mxu1 %v22916_v52  ;;  %v2617_v61 = vpop.permute.xlu0 %2616 }
 0x1a5   :  { %v2632_v15 = vsel %vm39_vm2, %v2617_v61, 0  ;;  %v2746_v9 = vand.u32 4294901760, %v2745_v2 }
 0x1a6   :  { %v22944_v37 = vand.u32 4294901760, %v2632_v15  ;;  %v2754_v7 = vand.u32 4294901760, %v2753_v60 }
 0x1a7   :  { %20523 = vmatmul.mubr.f32.vlgmr.msra.gmra.mxu0 %v2716_v63  ;;  %20543 = vmatmul.mubr.f32.gmra.mxu1 %v22933_v23 }
 0x1a8   :  { %v2763_v10 = vsub.f32 %v2632_v15, %v22944_v37  ;;  %20525 = vmatprep.mubr.f32.mxu0 %v2726_v51  ;;  %20545 = vmatprep.mubr.f32.mxu1 %v22944_v37  ;;  %v2755_v19 = vsub.f32 %v2753_v60, %v2754_v7 }
 0x1a9   :  { %20549 = vmatpush3.msra.mxu0 %v22576_v43 }
 0x1aa   :  { %v2764_v8 = vand.u32 4294901760, %v2763_v10  ;;  %20576 = vmatprep.subr.mxu0 %v22596_v0  ;;  %v2756_v33 = vand.u32 4294901760, %v2755_v19 }
 0x1ab   :  { %20526 = vmatmul.mubr.f32.gmra.mxu0 %v2736_v11 }
 0x1ac   :  { %20528 = vmatprep.mubr.f32.mxu0 %v2746_v9  ;;  %v2765_v32 = vsub.f32 %v2763_v10, %v2764_v8 }
 0x1ad   :  { %v2619_v18 = vpop.permute.xlu1 %2618 }
 0x1ae   :  { %v2634_v36 = vsel %vm39_vm2, %v2619_v18, 0  ;;  %v2766_v13 = vand.u32 4294901760, %v2765_v32 }
 0x1af   :  { %v22953_v34 = vand.u32 4294901760, %v2634_v36  ;;  %20529 = vmatmul.mubr.f32.gmra.mxu0 %v2756_v33 }
 0x1b0   :  { %20531 = vmatprep.mubr.f32.mxu0 %v2766_v13 }
 0x1b1   :  { %v2773_v54 = vsub.f32 %v2634_v36, %v22953_v34  ;;  %20546 = vmatmul.mubr.f32.gmra.mxu1 %v22953_v34 }
 0x1b2   :  { %20564 = vmatprep.mubr.f32.mxu1 %v2704_v53 }
 0x1b3   :  { %v2774_v43 = vand.u32 4294901760, %v2773_v54 }
 0x1b5   :  { %20565 = vmatmul.mubr.f32.vlgmr.msra.gmra.mxu1 %v2714_v21  ;;  %v2775_v42 = vsub.f32 %v2773_v54, %v2774_v43 }
 0x1b6   :  { %20567 = vmatprep.mubr.f32.mxu1 %v2724_v58  ;;  %20591 = vmatpush3.msra.mxu1 %v22546_v25 }
 0x1b7   :  { %v2776_v16 = vand.u32 4294901760, %v2775_v42 }
 0x1b9   :  { %20532 = vmatmul.mubr.f32.gmra.mxu0 %v2776_v16  ;;  %20568 = vmatmul.mubr.f32.gmra.mxu1 %v2734_v20 }
 0x1ba   :  { %20550 = vmatprep.mubr.f32.mxu0 %v22887_v40  ;;  %20570 = vmatprep.mubr.f32.mxu1 %v2744_v59 }
 0x1bb   :  { %v20286_v17 = vpop.f32.mrf.mxu1 }
 0x1bd   :  { %v22961_v3 = vpop.f32.mrf.mxu1  ;;  %20551 = vmatmul.mubr.f32.vlgmr.msra.gmra.mxu0 %v22897_v24  ;;  %20571 = vmatmul.mubr.f32.gmra.mxu1 %v2754_v7 }
 0x1be   :  { %28347 = vst [vmem:[#allocation3_spill] sm:$0xff] %v22961_v3  ;;  %20553 = vmatprep.mubr.f32.mxu0 %v22903_v49  ;;  %20573 = vmatprep.mubr.f32.mxu1 %v2764_v8 }
 0x1bf   :  { %v20289_v12 = vpop.f32.mrf.mxu1  ;;  %20577 = vmatpush3.msra.mxu0 %v22596_v0 }
 0x1c1   :  { %v22966_v50 = vpop.f32.mrf.mxu1  ;;  %20554 = vmatmul.mubr.f32.gmra.mxu0 %v22914_v35  ;;  %20574 = vmatmul.mubr.f32.gmra.mxu1 %v2774_v43 }
 0x1c2   :  { %28348 = vst [vmem:[#allocation4_spill] sm:$0xff] %v22966_v50  ;;  %v20272_v25 = vpop.f32.mrf.mxu0  ;;  %20556 = vmatprep.mubr.f32.mxu0 %v22923_v55  ;;  %20592 = vmatprep.mubr.f32.mxu1 %v22877_v27 }
 0x1c3   :  { %v529_v5 = vadd.f32 %v20286_v17, %v20272_v25  ;;  %v20292_v26 = vpop.f32.mrf.mxu1 }
 0x1c4   :  { %v22971_v14 = vpop.f32.mrf.mxu0 }
 0x1c5   :  { %28349 = vst [vmem:[#allocation5_spill] sm:$0xff] %v22971_v14  ;;  %v22973_v31 = vpop.f32.mrf.mxu1  ;;  %20557 = vmatmul.mubr.f32.gmra.mxu0 %v2753_v60  ;;  %20593 = vmatmul.mubr.f32.vlgmr.msra.gmra.mxu1 %v22884_v39 }
 0x1c6   :  { %28350 = vst [vmem:[#allocation6_spill] sm:$0xff] %v22973_v31  ;;  %v20275_v0 = vpop.f32.mrf.mxu0  ;;  %20559 = vmatprep.mubr.f32.mxu0 %v2763_v10  ;;  %20595 = vmatprep.mubr.f32.mxu1 %v22889_v29 }
 0x1c7   :  { %v541_v38 = vadd.f32 %v20289_v12, %v20275_v0 }
 0x1c8   :  { %v22977_v40 = vpop.f32.mrf.mxu0  ;;  %v20295_v47 = vpop.f32.mrf.mxu1 }
 0x1c9   :  { %28351 = vst [vmem:[#allocation7_spill] sm:$0xff] %v22977_v40  ;;  %20560 = vmatmul.mubr.f32.gmra.mxu0 %v2773_v54  ;;  %20596 = vmatmul.mubr.f32.gmra.mxu1 %v22899_v30 }
 0x1ca   :  { %v22980_v24 = vpop.f32.mrf.mxu1  ;;  %20578 = vmatprep.mubr.f32.mxu0 %v22877_v27  ;;  %20598 = vmatprep.mubr.f32.mxu1 %v22916_v52 }
 0x1cb   :  { %28352 = vst [vmem:[#allocation8_spill] sm:$0xff] %v22980_v24  ;;  %v20278_v49 = vpop.f32.mrf.mxu0 }
 0x1cc   :  { %v553_v53 = vadd.f32 %v20292_v26, %v20278_v49  ;;  %v20314_v6 = vpop.f32.mrf.mxu1 }
 0x1cd   :  { %v22984_v28 = vpop.f32.mrf.mxu0  ;;  %20579 = vmatmul.mubr.f32.vlgmr.msra.gmra.mxu0 %v22884_v39  ;;  %20599 = vmatmul.mubr.f32.gmra.mxu1 %v22933_v23 }
 0x1ce   :  { %28353 = vst [vmem:[#allocation9_spill] sm:$0xff] %v22984_v28  ;;  %v22988_v21 = vpop.f32.mrf.mxu1  ;;  %20581 = vmatprep.mubr.f32.mxu0 %v22889_v29  ;;  %20601 = vmatprep.mubr.f32.mxu1 %v22944_v37 }
 0x1cf   :  { %28354 = vst [vmem:[#allocation10_spill] sm:$0xff] %v22988_v21 }
 0x1d0   :  { %v20281_v35 = vpop.f32.mrf.mxu0  ;;  %v20317_v48 = vpop.f32.mrf.mxu1 }
 0x1d1   :  { %v565_v27 = vadd.f32 %v20295_v47, %v20281_v35  ;;  %20582 = vmatmul.mubr.f32.gmra.mxu0 %v22899_v30  ;;  %20602 = vmatmul.mubr.f32.gmra.mxu1 %v22953_v34 }
 0x1d2   :  { %v22994_v58 = vpop.f32.mrf.mxu0  ;;  %v22996_v55 = vpop.f32.mrf.mxu1  ;;  %20584 = vmatprep.mubr.f32.mxu0 %v22916_v52 }
 0x1d3   :  { %28355 = vst [vmem:[#allocation11_spill] sm:$0xff] %v22994_v58  ;;  %28356 = vst [vmem:[#allocation12_spill] sm:$0xff] %v22996_v55 }
 0x1d4   :  { %v20300_v39 = vpop.f32.mrf.mxu0  ;;  %v20320_v62 = vpop.f32.mrf.mxu1 }
 0x1d5   :  { %v646_v45 = vadd.f32 %v20300_v39, %v529_v5  ;;  %20585 = vmatmul.mubr.f32.gmra.mxu0 %v22933_v23 }
 0x1d6   :  { %v23000_v29 = vpop.f32.mrf.mxu0  ;;  %v23002_v46 = vpop.f32.mrf.mxu1  ;;  %20587 = vmatprep.mubr.f32.mxu0 %v22944_v37 }
 0x1d7   :  { %28357 = vst [vmem:[#allocation13_spill] sm:$0xff] %v23000_v29  ;;  %28358 = vst [vmem:[#allocation14_spill] sm:$0xff] %v23002_v46  ;;  %v770_v30 = vadd.f32 %v20314_v6, %v646_v45 }
 0x1d8   :  { %v20303_v20 = vpop.f32.mrf.mxu0  ;;  %v20323_v56 = vpop.f32.mrf.mxu1 }
 0x1d9   :  { %v660_v57 = vadd.f32 %v20303_v20, %v541_v38  ;;  %20588 = vmatmul.mubr.f32.gmra.mxu0 %v22953_v34 }
 0x1da   :  { %v23006_v59 = vpop.f32.mrf.mxu0  ;;  %v23008_v52 = vpop.f32.mrf.mxu1 }
 0x1db   :  { %28359 = vst [vmem:[#allocation15_spill] sm:$0xff] %v23006_v59  ;;  %28360 = vst [vmem:[#allocation16_spill] sm:$0xff] %v23008_v52  ;;  %v786_v60 = vadd.f32 %v20317_v48, %v660_v57 }
 0x1dc   :  { %v20306_v61 = vpop.f32.mrf.mxu0  ;;  %v20342_v63 = vpop.f32.mrf.mxu1 }
 0x1dd   :  { %v674_v23 = vadd.f32 %v20306_v61, %v553_v53 }
 0x1de   :  { %v23010_v15 = vpop.f32.mrf.mxu0  ;;  %v23012_v22 = vpop.f32.mrf.mxu1 }
 0x1df   :  { %28361 = vst [vmem:[#allocation17_spill] sm:$0xff] %v23010_v15  ;;  %28362 = vst [vmem:[#allocation18_spill] sm:$0xff] %v23012_v22  ;;  %v802_v51 = vadd.f32 %v20320_v62, %v674_v23 }
 0x1e0   :  { %v20309_v37 = vpop.f32.mrf.mxu0  ;;  %v20345_v2 = vpop.f32.mrf.mxu1 }
 0x1e1   :  { %v688_v7 = vadd.f32 %v20309_v37, %v565_v27 }
 0x1e2   :  { %v23014_v10 = vpop.f32.mrf.mxu0  ;;  %v23016_v11 = vpop.f32.mrf.mxu1 }
 0x1e3   :  { %28363 = vst [vmem:[#allocation19_spill] sm:$0xff] %v23014_v10  ;;  %28364 = vst [vmem:[#allocation20_spill] sm:$0xff] %v23016_v11  ;;  %v818_v19 = vadd.f32 %v20323_v56, %v688_v7 }
 0x1e4   :  { %v20328_v9 = vpop.f32.mrf.mxu0  ;;  %v20348_v8 = vpop.f32.mrf.mxu1 }
 0x1e5   :  { %v898_v32 = vadd.f32 %v20328_v9, %v770_v30 }
 0x1e6   :  { %v23018_v18 = vpop.f32.mrf.mxu0  ;;  %v23020_v33 = vpop.f32.mrf.mxu1 }
 0x1e7   :  { %28365 = vst [vmem:[#allocation21_spill] sm:$0xff] %v23018_v18  ;;  %28366 = vst [vmem:[#allocation22_spill] sm:$0xff] %v23020_v33  ;;  %v1012_v36 = vadd.f32 %v20342_v63, %v898_v32 }
 0x1e8   :  { %v20331_v13 = vpop.f32.mrf.mxu0  ;;  %v20351_v34 = vpop.f32.mrf.mxu1 }
 0x1e9   :  { %v910_v54 = vadd.f32 %v20331_v13, %v786_v60 }
 0x1ea   :  { %v23022_v43 = vpop.f32.mrf.mxu0  ;;  %v23024_v42 = vpop.f32.mrf.mxu1 }
 0x1eb   :  { %28367 = vst [vmem:[#allocation23_spill] sm:$0xff] %v23022_v43  ;;  %28368 = vst [vmem:[#allocation24_spill] sm:$0xff] %v23024_v42  ;;  %v1024_v16 = vadd.f32 %v20345_v2, %v910_v54 }
 0x1ec   :  { %v20334_v17 = vpop.f32.mrf.mxu0  ;;  %v20370_v12 = vpop.f32.mrf.mxu1 }
 0x1ed   :  { %v922_v25 = vadd.f32 %v20334_v17, %v802_v51 }
 0x1ee   :  { %v23026_v5 = vpop.f32.mrf.mxu0  ;;  %v23028_v26 = vpop.f32.mrf.mxu1 }
 0x1ef   :  { %28369 = vst [vmem:[#allocation25_spill] sm:$0xff] %v23026_v5  ;;  %28370 = vst [vmem:[#allocation26_spill] sm:$0xff] %v23028_v26  ;;  %v1036_v0 = vadd.f32 %v20348_v8, %v922_v25 }
 0x1f0   :  { %v20337_v38 = vpop.f32.mrf.mxu0  ;;  %v20373_v47 = vpop.f32.mrf.mxu1 }
 0x1f1   :  { %v934_v49 = vadd.f32 %v20337_v38, %v818_v19 }
 0x1f2   :  { %v23030_v53 = vpop.f32.mrf.mxu0  ;;  %v23032_v35 = vpop.f32.mrf.mxu1 }
 0x1f3   :  { %28371 = vst [vmem:[#allocation27_spill] sm:$0xff] %v23030_v53  ;;  %v1048_v6 = vadd.f32 %v20351_v34, %v934_v49  ;;  %28372 = vst [vmem:[#allocation28_spill] sm:$0xff] %v23032_v35 }
 0x1f4   :  { %v20356_v48 = vpop.f32.mrf.mxu0  ;;  %v20376_v45 = vpop.f32.mrf.mxu1 }
 0x1f5   :  { %v1161_v27 = vadd.f32 %v20356_v48, %v1012_v36 }
 0x1f6   :  { %v23034_v39 = vpop.f32.mrf.mxu0  ;;  %v23038_v60 = vpop.f32.mrf.mxu1 }
 0x1f7   :  { %28373 = vst [vmem:[#allocation29_spill] sm:$0xff] %v23034_v39  ;;  %v1303_v62 = vadd.f32 %v20370_v12, %v1161_v27  ;;  %28375 = vst [vmem:[#allocation31_spill] sm:$0xff] %v23038_v60 }
 0x1f8   :  { %v20359_v30 = vpop.f32.mrf.mxu0 }
 0x1f9   :  { %v1181_v20 = vadd.f32 %v20359_v30, %v1024_v16 }
 0x1fa   :  { %v23036_v56 = vpop.f32.mrf.mxu0 }
 0x1fb   :  { %28374 = vst [vmem:[#allocation30_spill] sm:$0xff] %v23036_v56  ;;  %v1315_v57 = vadd.f32 %v20373_v47, %v1181_v20 }
 0x1fc   :  { %v20362_v61 = vpop.f32.mrf.mxu0 }
 0x1fd   :  { %v1201_v63 = vadd.f32 %v20362_v61, %v1036_v0 }
 0x1fe   :  { %v20379_v23 = vpop.f32.mrf.mxu1  ;;  %v23042_v7 = vpop.f32.mrf.mxu0 }
 0x1ff   :  { %v1327_v51 = vadd.f32 %v20376_v45, %v1201_v63  ;;  %28377 = vst [vmem:[#allocation33_spill] sm:$0xff] %v23042_v7 }
 0x200   :  { %v23040_v37 = vpop.f32.mrf.mxu1 }
 0x201   :  { %28376 = vst [vmem:[#allocation32_spill] sm:$0xff] %v23040_v37 }
 0x202   :  { %v20398_v2 = vpop.f32.mrf.mxu1 }
 0x204   :  { %v23044_v19 = vpop.f32.mrf.mxu1 }
 0x205   :  { %28378 = vst [vmem:[#allocation34_spill] sm:$0xff] %v23044_v19 }
 0x206   :  { %v20365_v9 = vpop.f32.mrf.mxu0  ;;  %v20401_v8 = vpop.f32.mrf.mxu1 }
 0x207   :  { %v1221_v32 = vadd.f32 %v20365_v9, %v1048_v6 }
 0x208   :  { %v23046_v36 = vpop.f32.mrf.mxu0  ;;  %v23048_v13 = vpop.f32.mrf.mxu1 }
 0x209   :  { %28379 = vst [vmem:[#allocation35_spill] sm:$0xff] %v23046_v36  ;;  %28380 = vst [vmem:[#allocation36_spill] sm:$0xff] %v23048_v13  ;;  %v1339_v34 = vadd.f32 %v20379_v23, %v1221_v32 }
 0x20a   :  { %v20384_v54 = vpop.f32.mrf.mxu0  ;;  %v20404_v16 = vpop.f32.mrf.mxu1 }
 0x20b   :  { %v1420_v17 = vadd.f32 %v20384_v54, %v1303_v62 }
 0x20c   :  { %v23050_v12 = vpop.f32.mrf.mxu0  ;;  %v23052_v25 = vpop.f32.mrf.mxu1 }
 0x20d   :  { %28381 = vst [vmem:[#allocation37_spill] sm:$0xff] %v23050_v12  ;;  %28382 = vst [vmem:[#allocation38_spill] sm:$0xff] %v23052_v25  ;;  %v1544_v0 = vadd.f32 %v20398_v2, %v1420_v17 }
 0x20e   :  { %v20387_v38 = vpop.f32.mrf.mxu0  ;;  %v20407_v47 = vpop.f32.mrf.mxu1 }
 0x20f   :  { %v1434_v49 = vadd.f32 %v20387_v38, %v1315_v57 }
 0x210   :  { %v23054_v48 = vpop.f32.mrf.mxu0  ;;  %v23056_v27 = vpop.f32.mrf.mxu1 }
 0x211   :  { %28383 = vst [vmem:[#allocation39_spill] sm:$0xff] %v23054_v48  ;;  %28384 = vst [vmem:[#allocation40_spill] sm:$0xff] %v23056_v27  ;;  %v1560_v6 = vadd.f32 %v20401_v8, %v1434_v49 }
 0x212   :  { %v20390_v45 = vpop.f32.mrf.mxu0  ;;  %v20426_v30 = vpop.f32.mrf.mxu1 }
 0x213   :  { %v1448_v20 = vadd.f32 %v20390_v45, %v1327_v51 }
 0x214   :  { %v23058_v61 = vpop.f32.mrf.mxu0  ;;  %v23060_v63 = vpop.f32.mrf.mxu1 }
 0x215   :  { %28385 = vst [vmem:[#allocation41_spill] sm:$0xff] %v23058_v61  ;;  %28386 = vst [vmem:[#allocation42_spill] sm:$0xff] %v23060_v63  ;;  %v1576_v62 = vadd.f32 %v20404_v16, %v1448_v20 }
 0x216   :  { %v20393_v23 = vpop.f32.mrf.mxu0  ;;  %v20429_v32 = vpop.f32.mrf.mxu1 }
 0x217   :  { %v1462_v9 = vadd.f32 %v20393_v23, %v1339_v34 }
 0x218   :  { %v23062_v2 = vpop.f32.mrf.mxu0  ;;  %v23064_v17 = vpop.f32.mrf.mxu1 }
 0x219   :  { %28387 = vst [vmem:[#allocation43_spill] sm:$0xff] %v23062_v2  ;;  %v1592_v54 = vadd.f32 %v20407_v47, %v1462_v9  ;;  %28388 = vst [vmem:[#allocation44_spill] sm:$0xff] %v23064_v17 }
 0x21a   :  { %v20412_v57 = vpop.f32.mrf.mxu0  ;;  %v20432_v49 = vpop.f32.mrf.mxu1 }
 0x21b   :  { %v1672_v38 = vadd.f32 %v20412_v57, %v1544_v0 }
 0x21c   :  { %v23066_v41 = vpop.f32.mrf.mxu0  ;;  %v23074_v20 = vpop.f32.mrf.mxu1 }
 0x21d   :  { %28389 = vst [vmem:[#allocation45_spill] sm:$0xff] %v23066_v41  ;;  %v23068_v8 = vadd.f32 %v20426_v30, %v1672_v38  ;;  %28393 = vst [vmem:[#allocation49_spill] sm:$0xff] %v23074_v20 }
 0x21e   :  { %v20415_v51 = vpop.f32.mrf.mxu0  ;;  %v20435_v57 = vpop.f32.mrf.mxu1 }
 0x21f   :  { %28390 = vst [vmem:[#allocation46_spill] sm:$0xff] %v23068_v8  ;;  %v1684_v45 = vadd.f32 %v20415_v51, %v1560_v6 }
 0x220   :  { %v23070_v1 = vpop.f32.mrf.mxu0  ;;  %v23082_v38 = vpop.f32.mrf.mxu1 }
 0x221   :  { %28391 = vst [vmem:[#allocation47_spill] sm:$0xff] %v23070_v1  ;;  %v23072_v16 = vadd.f32 %v20429_v32, %v1684_v45  ;;  %28397 = vst [vmem:[#allocation53_spill] sm:$0xff] %v23082_v38 }
 0x222   :  { %v20418_v34 = vpop.f32.mrf.mxu0 }
 0x223   :  { %28392 = vst [vmem:[#allocation48_spill] sm:$0xff] %v23072_v16  ;;  %v1696_v23 = vadd.f32 %v20418_v34, %v1576_v62 }
 0x224   :  { %v23076_v47 = vpop.f32.mrf.mxu0 }
 0x225   :  { %28394 = vst [vmem:[#allocation50_spill] sm:$0xff] %v23076_v47  ;;  %v23078_v9 = vadd.f32 %v20432_v49, %v1696_v23 }
 0x226   :  { %v20421_v0 = vpop.f32.mrf.mxu0 }
 0x227   :  { %28395 = vst [vmem:[#allocation51_spill] sm:$0xff] %v23078_v9  ;;  %v1708_v4 = vadd.f32 %v20421_v0, %v1592_v54 }
 0x228   :  { %v23086_v45 = vpop.f32.mrf.mxu0 }
 0x229   :  { %v23080_v30 = vadd.f32 %v20435_v57, %v1708_v4  ;;  %28398 = vst [vmem:[#allocation54_spill] sm:$0xff] %v23086_v45 }
 0x22b   :  { %28396 = vst [vmem:[#allocation52_spill] sm:$0xff] %v23080_v30 }
 0x22d   :  { %v20454_v6 = vpop.f32.mrf.mxu1 }
 0x22f   :  { %v23084_v51 = vpop.f32.mrf.mxu1 }
 0x231   :  { %v20457_v32 = vpop.f32.mrf.mxu1 }
 0x233   :  { %v23088_v44 = vpop.f32.mrf.mxu1 }
 0x235   :  { %v20440_v62 = vpop.f32.mrf.mxu0 }
 0x236   :  { %v2082_v34 = vadd.f32 %v20454_v6, %v20440_v62  ;;  %v20460_v63 = vpop.f32.mrf.mxu1 }
 0x237   :  { %v23090_v49 = vpop.f32.mrf.mxu0 }
 0x238   :  { %v23092_v23 = vpop.f32.mrf.mxu1 }
 0x239   :  { %v20443_v54 = vpop.f32.mrf.mxu0 }
 0x23a   :  { %v2094_v4 = vadd.f32 %v20457_v32, %v20443_v54 }
 0x23b   :  { %v23094_v0 = vpop.f32.mrf.mxu0  ;;  %v23096_v57 = vpop.f32.mrf.mxu1 }
 0x23d   :  { %v23098_v41 = vpop.f32.mrf.mxu1 }
 0x23e   :  { %v20446_v19 = vpop.f32.mrf.mxu0 }
 0x23f   :  { %v23100_v8 = vadd.f32 %v20460_v63, %v20446_v19  ;;  %v20482_v12 = vpop.f32.mrf.mxu1 }
 0x240   :  { %v23102_v26 = vpop.f32.mrf.mxu0 }
 0x241   :  { %v23104_v6 = vpop.f32.mrf.mxu1 }
 0x243   :  { %v20449_v62 = vpop.f32.mrf.mxu0  ;;  %v20485_v30 = vpop.f32.mrf.mxu1 }
 0x245   :  { %v1989_v17 = vpop.f32.mrf.mxu0  ;;  %v23106_v39 = vpop.f32.mrf.mxu1 }
 0x247   :  { %v20468_v32 = vpop.f32.mrf.mxu0  ;;  %v23108_v54 = vpop.f32.mrf.mxu1 }
 0x248   :  { %v2199_v1 = vadd.f32 %v20468_v32, %v2082_v34 }
 0x249   :  { %v23110_v22 = vpop.f32.mrf.mxu0  ;;  %v23112_v13 = vpop.f32.mrf.mxu1 }
 0x24a   :  { %v23114_v19 = vadd.f32 %v20482_v12, %v2199_v1 }
 0x24b   :  { %v20471_v63 = vpop.f32.mrf.mxu0  ;;  %v20491_v38 = vpop.f32.mrf.mxu1 }
 0x24c   :  { %v2213_v18 = vadd.f32 %v20471_v63, %v2094_v4 }
 0x24d   :  { %v23116_v16 = vpop.f32.mrf.mxu0  ;;  %v23118_v48 = vpop.f32.mrf.mxu1 }
 0x24e   :  { %v23120_v21 = vadd.f32 %v20485_v30, %v2213_v18 }
 0x24f   :  { %v20474_v45 = vpop.f32.mrf.mxu0  ;;  %v23122_v35 = vpop.f32.mrf.mxu1 }
 0x251   :  { %v2219_v9 = vpop.f32.mrf.mxu0  ;;  %v23124_v34 = vpop.f32.mrf.mxu1 }
 0x253   :  { %v20477_v32 = vpop.f32.mrf.mxu0  ;;  %v23126_v27 = vpop.f32.mrf.mxu1 }
 0x255   :  { %v2233_v1 = vpop.f32.mrf.mxu0  ;;  %v23128_v12 = vpop.f32.mrf.mxu1 }
 0x257   :  { %v23130_v20 = vpop.f32.mrf.mxu0  ;;  %v23132_v4 = vpop.f32.mrf.mxu1 }
 0x259   :  { %v23134_v63 = vpop.f32.mrf.mxu0  ;;  %v23136_v18 = vpop.f32.mrf.mxu1 }
 0x25b   :  { %v23138_v30 = vpop.f32.mrf.mxu0  ;;  %v20519_v29 = vpop.f32.mrf.mxu1 }
 0x25d   :  { %v23140_v56 = vpop.f32.mrf.mxu0  ;;  %v23142_v3 = vpop.f32.mrf.mxu1 }
 0x25f   :  { %v20502_v14 = vpop.f32.mrf.mxu0  ;;  %v23144_v47 = vpop.f32.mrf.mxu1 }
 0x260   :  { %28399 = vst [vmem:[#allocation55_spill] sm:$0xff] %v23144_v47  ;;  %v2118_v47 = vadd.f32 %v23096_v57, %v20449_v62 }
 0x261   :  { %v2468_v2 = vpop.f32.mrf.mxu0  ;;  %v23146_v11 = vpop.f32.mrf.mxu1 }
 0x262   :  { %28400 = vst [vmem:[#allocation56_spill] sm:$0xff] %v23146_v11 }
 0x263   :  { %v20505_v25 = vpop.f32.mrf.mxu0  ;;  %v23148_v37 = vpop.f32.mrf.mxu1 }
 0x264   :  { %28401 = vst [vmem:[#allocation57_spill] sm:$0xff] %v23148_v37 }
 0x265   :  { %v2480_v43 = vpop.f32.mrf.mxu0  ;;  %v23150_v61 = vpop.f32.mrf.mxu1 }
 0x266   :  { %28402 = vst [vmem:[#allocation58_spill] sm:$0xff] %v23150_v61 }
 0x267   :  { %v23152_v36 = vpop.f32.mrf.mxu0  ;;  %v23156_v60 = vpop.f32.mrf.mxu1 }
 0x269   :  { %v23154_v55 = vpop.f32.mrf.mxu0  ;;  %v23160_v59 = vpop.f32.mrf.mxu1 }
 0x26a   :  { %28403 = vst [vmem:[#allocation59_spill] sm:$0xff] %v23154_v55 }
 0x26b   :  { %v23158_v42 = vpop.f32.mrf.mxu0 }
 0x26d   :  { %v23162_v7 = vpop.f32.mrf.mxu0 }
 0x26f   :  { %v20530_v50 = vpop.f32.mrf.mxu0 }
 0x271   :  { %v23164_v53 = vpop.f32.mrf.mxu1  ;;  %v2748_v52 = vpop.f32.mrf.mxu0 }
 0x273   :  { %v23166_v40 = vpop.f32.mrf.mxu1 }
 0x275   :  { %v23168_v33 = vpop.f32.mrf.mxu1 }
 0x276   :  { %28404 = vst [vmem:[#allocation60_spill] sm:$0xff] %v23168_v33 }
 0x277   :  { %v23170_v5 = vpop.f32.mrf.mxu1 }
 0x278   :  { %28405 = vst [vmem:[#allocation61_spill] sm:$0xff] %v23170_v5  ;;  %v2112_v5 = vadd.f32 %v23098_v41, %v1989_v17 }
 0x279   :  { %v20533_v10 = vpop.f32.mrf.mxu0  ;;  %v23172_v46 = vpop.f32.mrf.mxu1 }
 0x27a   :  { %28406 = vst [vmem:[#allocation62_spill] sm:$0xff] %v23172_v46  ;;  %v2241_v46 = vadd.f32 %v20477_v32, %v2118_v47 }
 0x27b   :  { %v2768_v24 = vpop.f32.mrf.mxu0  ;;  %v23174_v58 = vpop.f32.mrf.mxu1 }
 0x27c   :  { %28407 = vst [vmem:[#allocation63_spill] sm:$0xff] %v23174_v58  ;;  %v2371_v62 = vadd.f32 %v20491_v38, %v2241_v46 }
 0x27d   :  { %v23176_v15 = vpop.f32.mrf.mxu0  ;;  %v23178_v31 = vpop.f32.mrf.mxu1 }
 0x27e   :  { %28408 = vst [vmem:[#allocation64_spill] sm:$0xff] %v23176_v15  ;;  %28409 = vst [vmem:[#allocation65_spill] sm:$0xff] %v23178_v31  ;;  %v2100_v15 = vadd.f32 %v23092_v23, %v23102_v26  ;;  %v2234_v31 = vadd.f32 %v2233_v1, %v2112_v5  ;;  %v2487_v32 = vadd.f32 %v20505_v25, %v2371_v62 }
 0x27f   :  { %v23180_v28 = vpop.f32.mrf.mxu0  ;;  %v23182_v11 = vpop.f32.mrf.mxu1 }
 0x280   :  { %28410 = vst [vmem:[#allocation66_spill] sm:$0xff] %v23180_v28  ;;  %28411 = vst [vmem:[#allocation67_spill] sm:$0xff] %v23182_v11  ;;  %v2227_v28 = vadd.f32 %v20474_v45, %v23100_v8  ;;  %v2220_v57 = vadd.f32 %v2219_v9, %v2100_v15  ;;  %v2601_v23 = vadd.f32 %v20519_v29, %v2487_v32  ;;  %v28416_v32 = vld [vmem:[#allocation58_spill] sm:$0xff] }
 0x281   :  { %v23185_v33 = vpop.f32.mrf.mxu0  ;;  %v23187_v61 = vpop.f32.mrf.mxu1 }
 0x282   :  { %28412 = vst [vmem:[#allocation68_spill] sm:$0xff] %v23185_v33  ;;  %v2088_v33 = vadd.f32 %v23088_v44, %v23094_v0  ;;  %v2355_v47 = vadd.f32 %v23108_v54, %v2227_v28  ;;  %v2347_v15 = vadd.f32 %v23112_v13, %v2220_v57  ;;  %v2076_v44 = vadd.f32 %v23084_v51, %v23090_v49  ;;  %v28414_v57 = vld [vmem:[#allocation57_spill] sm:$0xff] }
 0x283   :  { %v23190_v55 = vpop.f32.mrf.mxu0  ;;  %v23192_v58 = vpop.f32.mrf.mxu1 }
 0x284   :  { %28413 = vst [vmem:[#allocation69_spill] sm:$0xff] %v23190_v55  ;;  %v2363_v55 = vadd.f32 %v23118_v48, %v2234_v31  ;;  %v2206_v26 = vadd.f32 %v23116_v16, %v2088_v33  ;;  %v2475_v45 = vadd.f32 %v20502_v14, %v2355_v47  ;;  %v2469_v38 = vadd.f32 %v2468_v2, %v2347_v15  ;;  %v28415_v47 = vld [vmem:[#allocation59_spill] sm:$0xff] }
 0x285   :  { %v20558_v11 = vpop.f32.mrf.mxu0  ;;  %v23197_v37 = vpop.f32.mrf.mxu1  ;;  %v2192_v28 = vadd.f32 %v23110_v22, %v2076_v44  ;;  %v2463_v14 = vadd.f32 %v23138_v30, %v23120_v21  ;;  %v2451_v16 = vadd.f32 %v23130_v20, %v23114_v19 }
 0x286   :  { %v2481_v46 = vadd.f32 %v2480_v43, %v2363_v55  ;;  %v2331_v25 = vadd.f32 %v23106_v39, %v2206_v26  ;;  %v2589_v13 = vadd.f32 %v23132_v4, %v2475_v45  ;;  %v2779_v55 = vadd.f32 %v20533_v10, %v2601_v23 }
 0x287   :  { %v2998_v41 = vpop.f32.mrf.mxu0  ;;  %v23201_v17 = vpop.f32.mrf.mxu1  ;;  %v2583_v22 = vadd.f32 %v23136_v18, %v2469_v38  ;;  %v2315_v51 = vadd.f32 %v23104_v6, %v2192_v28  ;;  %v2577_v0 = vadd.f32 %v23126_v27, %v2463_v14  ;;  %v2565_v6 = vadd.f32 %v23122_v35, %v2451_v16 }
 0x288   :  { %v2595_v43 = vadd.f32 %v23142_v3, %v2481_v46  ;;  %v2457_v48 = vadd.f32 %v23140_v56, %v2331_v25  ;;  %v2759_v29 = vadd.f32 %v20530_v50, %v2589_v13  ;;  %v2897_v3 = vadd.f32 %v23164_v53, %v2779_v55  ;;  %v28422_v13 = vld [vmem:[#allocation56_spill] sm:$0xff] }
 0x289   :  { %v20561_v8 = vpop.f32.mrf.mxu0  ;;  %v23206_v5 = vpop.f32.mrf.mxu1  ;;  %v2749_v10 = vadd.f32 %v2748_v52, %v2583_v22  ;;  %v2445_v56 = vadd.f32 %v23134_v63, %v2315_v51  ;;  %v2739_v1 = vadd.f32 %v23158_v42, %v2577_v0  ;;  %v28424_v22 = vld [vmem:[#allocation62_spill] sm:$0xff] }
 0x28a   :  { %v2769_v39 = vadd.f32 %v2768_v24, %v2595_v43  ;;  %v2571_v54 = vadd.f32 %v23128_v12, %v2457_v48  ;;  %v2885_v24 = vadd.f32 %v23156_v60, %v2759_v29  ;;  %v3020_v4 = vadd.f32 %v20561_v8, %v2897_v3  ;;  %v28423_v48 = vld [vmem:[#allocation64_spill] sm:$0xff]  ;;  %v28426_v3 = vld [vmem:[#allocation63_spill] sm:$0xff] }
 0x28b   :  { %v3012_v9 = vpop.f32.mrf.mxu0  ;;  %v23213_v31 = vpop.f32.mrf.mxu1  ;;  %v2879_v53 = vadd.f32 %v23160_v59, %v2749_v10  ;;  %v2719_v12 = vadd.f32 %v23152_v36, %v2565_v6  ;;  %v2559_v30 = vadd.f32 %v23124_v34, %v2445_v56  ;;  %v2873_v60 = vadd.f32 %v28414_v57, %v2739_v1  ;;  %v28418_v59 = vld [vmem:[#allocation65_spill] sm:$0xff]  ;;  %v28419_v34 = vld [vmem:[#allocation55_spill] sm:$0xff]  ;;  %v28427_v1 = vld [vmem:[#allocation60_spill] sm:$0xff] }
 0x28c   :  { %v2891_v20 = vadd.f32 %v23166_v40, %v2769_v39  ;;  %v2729_v19 = vadd.f32 %v23162_v7, %v2571_v54  ;;  %v3006_v18 = vadd.f32 %v20558_v11, %v2885_v24  ;;  %v3150_v40 = vadd.f32 %v23187_v61, %v3020_v4  ;;  %v28417_v11 = vld [vmem:[#allocation68_spill] sm:$0xff]  ;;  %v28421_v61 = vld [vmem:[#allocation67_spill] sm:$0xff] }
 0x28d   :  { %v23215_v33 = vpop.f32.mrf.mxu0  ;;  %v20600_v49 = vpop.f32.mrf.mxu1  ;;  %v2999_v62 = vadd.f32 %v2998_v41, %v2879_v53  ;;  %v2709_v35 = vadd.f32 %v28415_v47, %v2559_v30  ;;  %v2992_v45 = vadd.f32 %v28417_v11, %v2873_v60  ;;  %v2861_v44 = vadd.f32 %v28419_v34, %v2719_v12  ;;  %v28431_v12 = vld [vmem:[#allocation17_spill] sm:$0xff]  ;;  %v28434_v60 = vld [vmem:[#allocation14_spill] sm:$0xff]  ;;  %v28441_v11 = vld [vmem:[#allocation27_spill] sm:$0xff] }
 0x28e   :  { %v3013_v63 = vadd.f32 %v3012_v9, %v2891_v20  ;;  %v2867_v7 = vadd.f32 %v28416_v32, %v2729_v19  ;;  %v3134_v15 = vadd.f32 %v28418_v59, %v3006_v18  ;;  %v28420_v9 = vld [vmem:[#allocation69_spill] sm:$0xff]  ;;  %v28438_v32 = vld [vmem:[#allocation22_spill] sm:$0xff]  ;;  %v28444_v34 = vld [vmem:[#allocation24_spill] sm:$0xff] }
 0x28f   :  { %v23222_v2 = vpop.f32.mrf.mxu0  ;;  %v3361_v27 = vpop.f32.mrf.mxu1  ;;  %v3126_v28 = vadd.f32 %v28421_v61, %v2999_v62  ;;  %v2855_v55 = vadd.f32 %v28422_v13, %v2709_v35  ;;  %v2978_v29 = vadd.f32 %v28423_v48, %v2861_v44  ;;  %v3118_v39 = vadd.f32 %v28424_v22, %v2992_v45  ;;  %v28428_v19 = vld [vmem:[#allocation61_spill] sm:$0xff]  ;;  %v28435_v62 = vld [vmem:[#allocation19_spill] sm:$0xff] }
 0x290   :  { %v3142_v36 = vadd.f32 %v23192_v58, %v3013_v63  ;;  %v2985_v38 = vadd.f32 %v28420_v9, %v2867_v7  ;;  %v28425_v58 = vld [vmem:[#allocation66_spill] sm:$0xff]  ;;  %v28439_v7 = vld [vmem:[#allocation7_spill] sm:$0xff]  ;;  %v28442_v59 = vld [vmem:[#allocation33_spill] sm:$0xff] }
 0x291   :  { %v20583_v21 = vpop.f32.mrf.mxu0  ;;  %v20603_v26 = vpop.f32.mrf.mxu1  ;;  %v2971_v0 = vadd.f32 %v28425_v58, %v2855_v55  ;;  %v3102_v24 = vadd.f32 %v28427_v1, %v2978_v29  ;;  %v28445_v9 = vld [vmem:[#allocation31_spill] sm:$0xff]  ;;  %v28451_v29 = vld [vmem:[#allocation38_spill] sm:$0xff] }
 0x292   :  { %v3242_v10 = vadd.f32 %v20583_v21, %v3118_v39  ;;  %v3110_v56 = vadd.f32 %v28426_v3, %v2985_v38  ;;  %v28447_v61 = vld [vmem:[#allocation35_spill] sm:$0xff] }
 0x293   :  { %v3235_v50 = vpop.f32.mrf.mxu0  ;;  %v3373_v43 = vpop.f32.mrf.mxu1  ;;  %v3230_v6 = vadd.f32 %v23215_v33, %v3102_v24  ;;  %v28449_v13 = vld [vmem:[#allocation23_spill] sm:$0xff] }
 0x294   :  { %v3236_v4 = vadd.f32 %v3235_v50, %v3110_v56  ;;  %v3356_v18 = vadd.f32 %v23206_v5, %v3242_v10  ;;  %v28429_v50 = vld [vmem:[#allocation9_spill] sm:$0xff]  ;;  %v28433_v5 = vld [vmem:[#allocation8_spill] sm:$0xff]  ;;  %v28453_v58 = vld [vmem:[#allocation43_spill] sm:$0xff] }
 0x295   :  { %v20586_v52 = vpop.f32.mrf.mxu0  ;;  %v28454_v10 = vld [vmem:[#allocation50_spill] sm:$0xff]  ;;  %v28456_v1 = vld [vmem:[#allocation3_spill] sm:$0xff] }
 0x296   :  { %v3254_v23 = vadd.f32 %v20586_v52, %v3134_v15  ;;  %v3094_v52 = vadd.f32 %v28428_v19, %v2971_v0  ;;  %v3350_v21 = vadd.f32 %v23213_v31, %v3236_v4  ;;  %v28457_v4 = vld [vmem:[#allocation30_spill] sm:$0xff]  ;;  %v28458_v19 = vld [vmem:[#allocation13_spill] sm:$0xff] }
 0x297   :  { %v3247_v42 = vpop.f32.mrf.mxu0 }
 0x298   :  { %v3248_v16 = vadd.f32 %v3247_v42, %v3126_v28  ;;  %v3368_v54 = vadd.f32 %v20600_v49, %v3254_v23  ;;  %v3224_v53 = vadd.f32 %v23222_v2, %v3094_v52  ;;  %v3344_v49 = vadd.f32 %v23197_v37, %v3230_v6  ;;  %v28432_v42 = vld [vmem:[#allocation11_spill] sm:$0xff]  ;;  %v28437_v37 = vld [vmem:[#allocation16_spill] sm:$0xff] }
 0x299   :  { %v20589_v8 = vpop.f32.mrf.mxu0  ;;  %v559_v57 = vadd.f32 %v28433_v5, %v28432_v42  ;;  %v28463_v42 = vld [vmem:[#allocation54_spill] sm:$0xff] }
 0x29a   :  { %v3266_v46 = vadd.f32 %v20589_v8, %v3150_v40  ;;  %v3362_v20 = vadd.f32 %v3361_v27, %v3248_v16  ;;  %v3338_v63 = vadd.f32 %v23201_v17, %v3224_v53  ;;  %v28430_v27 = vld [vmem:[#allocation6_spill] sm:$0xff]  ;;  %v28436_v40 = vld [vmem:[#allocation25_spill] sm:$0xff]  ;;  %v28452_v16 = vld [vmem:[#allocation20_spill] sm:$0xff] }
 0x29b   :  { %v3259_v41 = vpop.f32.mrf.mxu0  ;;  %v547_v33 = vadd.f32 %v28430_v27, %v28429_v50  ;;  %v681_v31 = vadd.f32 %v28435_v62, %v559_v57 }
 0x29c   :  { %v3380_v25 = vadd.f32 %v20603_v26, %v3266_v46  ;;  %v3260_v14 = vadd.f32 %v3259_v41, %v3142_v36  ;;  %v28440_v26 = vld [vmem:[#allocation4_spill] sm:$0xff]  ;;  %v28443_v46 = vld [vmem:[#allocation15_spill] sm:$0xff] }
 0x29d   :  { %v667_v30 = vadd.f32 %v28431_v12, %v547_v33  ;;  %v810_v35 = vadd.f32 %v28437_v37, %v681_v31  ;;  %v535_v8 = vadd.f32 %v28440_v26, %v28439_v7  ;;  %v28446_v41 = vld [vmem:[#allocation12_spill] sm:$0xff]  ;;  %v28464_v31 = vld [vmem:[#allocation10_spill] sm:$0xff]  ;;  %v28467_v7 = vld [vmem:[#allocation21_spill] sm:$0xff] }
 0x29e   :  { %v3374_v51 = vadd.f32 %v3373_v43, %v3260_v14  ;;  %3405 = vrot.lane.b32.xlu0 %v3380_v25, %s22342_s7  ;;  %v28448_v25 = vld [vmem:[#allocation41_spill] sm:$0xff]  ;;  %v28450_v43 = vld [vmem:[#allocation32_spill] sm:$0xff] }
 0x29f   :  { %v794_v2 = vadd.f32 %v28434_v60, %v667_v30  ;;  %v928_v45 = vadd.f32 %v28441_v11, %v810_v35  ;;  %v653_v36 = vadd.f32 %v28443_v46, %v535_v8  ;;  %v28462_v12 = vld [vmem:[#allocation28_spill] sm:$0xff]  ;;  %v28468_v8 = vld [vmem:[#allocation53_spill] sm:$0xff] }
 0x2a0   :  { %3403 = vrot.lane.b32.xlu1 %v3374_v51, %s22342_s7  ;;  %v28466_v35 = vld [vmem:[#allocation48_spill] sm:$0xff] }
 0x2a1   :  { %v916_v47 = vadd.f32 %v28436_v40, %v794_v2  ;;  %v1042_v44 = vadd.f32 %v28444_v34, %v928_v45  ;;  %v778_v23 = vadd.f32 %v28446_v41, %v653_v36  ;;  %v28470_v34 = vld [vmem:[#allocation18_spill] sm:$0xff] }
 0x2a2   :  { %3401 = vrot.lane.b32.xlu0 %v3368_v54, %s22342_s7  ;;  %v28455_v54 = vld [vmem:[#allocation5_spill] sm:$0xff] }
 0x2a3   :  { %v1030_v17 = vadd.f32 %v28438_v32, %v916_v47  ;;  %v1211_v28 = vadd.f32 %v28447_v61, %v1042_v44  ;;  %v904_v55 = vadd.f32 %v28449_v13, %v778_v23  ;;  %v523_v24 = vadd.f32 %v28456_v1, %v28455_v54  ;;  %v28465_v47 = vld [vmem:[#allocation39_spill] sm:$0xff]  ;;  %v28472_v61 = vld [vmem:[#allocation29_spill] sm:$0xff]  ;;  %v28473_v13 = vld [vmem:[#allocation44_spill] sm:$0xff] }
 0x2a4   :  { %3399 = vrot.lane.b32.xlu1 %v3362_v20, %s22342_s7 }
 0x2a5   :  { %v1191_v15 = vadd.f32 %v28442_v59, %v1030_v17  ;;  %v1333_v48 = vadd.f32 %v28450_v43, %v1211_v28  ;;  %v1018_v51 = vadd.f32 %v28452_v16, %v904_v55  ;;  %v639_v52 = vadd.f32 %v28458_v19, %v523_v24  ;;  %v28469_v59 = vld [vmem:[#allocation36_spill] sm:$0xff]  ;;  %v28475_v16 = vld [vmem:[#allocation26_spill] sm:$0xff] }
 0x2a6   :  { %3397 = vrot.lane.b32.xlu0 %v3356_v18, %s22342_s7  ;;  %v28459_v18 = vld [vmem:[#allocation49_spill] sm:$0xff]  ;;  %v28474_v43 = vld [vmem:[#allocation52_spill] sm:$0xff]  ;;  %v28477_v24 = vld [vmem:[#allocation46_spill] sm:$0xff] }
 0x2a7   :  { %v1321_v38 = vadd.f32 %v28445_v9, %v1191_v15  ;;  %v1455_v0 = vadd.f32 %v28453_v58, %v1333_v48  ;;  %v1171_v20 = vadd.f32 %v28457_v4, %v1018_v51  ;;  %v762_v40 = vadd.f32 %v28464_v31, %v639_v52  ;;  %v28471_v9 = vld [vmem:[#allocation47_spill] sm:$0xff] }
 0x2a8   :  { %3395 = vrot.lane.b32.xlu1 %v3350_v21, %s22342_s7  ;;  %v28460_v21 = vld [vmem:[#allocation40_spill] sm:$0xff] }
 0x2a9   :  { %v1441_v14 = vadd.f32 %v28448_v25, %v1321_v38  ;;  %v1309_v30 = vadd.f32 %v28462_v12, %v1171_v20  ;;  %v892_v26 = vadd.f32 %v28467_v7, %v762_v40 }
 0x2aa   :  { %3393 = vrot.lane.b32.xlu0 %v3344_v49, %s22342_s7  ;;  %v1584_v49 = vadd.f32 %v28460_v21, %v1455_v0 }
 0x2ab   :  { %v1568_v22 = vadd.f32 %v28451_v29, %v1441_v14  ;;  %v1427_v37 = vadd.f32 %v28465_v47, %v1309_v30  ;;  %v1006_v44 = vadd.f32 %v28470_v34, %v892_v26 }
 0x2ac   :  { %3391 = vrot.lane.b32.xlu1 %v3338_v63, %s22342_s7  ;;  %v28461_v63 = vld [vmem:[#allocation51_spill] sm:$0xff]  ;;  %v1702_v5 = vadd.f32 %v28463_v42, %v1584_v49 }
 0x2ad   :  { %v1690_v3 = vadd.f32 %v28454_v10, %v1568_v22  ;;  %v1552_v15 = vadd.f32 %v28469_v59, %v1427_v37  ;;  %v1151_v28 = vadd.f32 %v28472_v61, %v1006_v44 }
 0x2ae   :  { %v1816_v11 = vadd.f32 %v28468_v8, %v1702_v5 }
 0x2af   :  { %v1804_v53 = vadd.f32 %v28459_v18, %v1690_v3  ;;  %v1678_v38 = vadd.f32 %v28471_v9, %v1552_v15  ;;  %v1297_v51 = vadd.f32 %v28475_v16, %v1151_v28  ;;  %v28476_v3 = vld [vmem:[#allocation37_spill] sm:$0xff] }
 0x2b1   :  { %v1792_v55 = vadd.f32 %v28473_v13, %v1678_v38 }
 0x310   :  { %v3406_v39 = vpop.permute.xlu0 %3405 }
 0x311   :  { %v23338_v48 = vsel %vm3415_vm3, %v28474_v43, %v3406_v39 }
 0x312   :  { %v3404_v56 = vpop.permute.xlu1 %3403  ;;  %v3446_v10 = vsel %vm3424_vm4, %v23338_v48, 0.0  ;;  %v3464_v39 = vmul.f32 %v23338_v48, %v23338_v48 }
 0x313   :  { %v23322_v46 = vsel %vm3415_vm3, %v1816_v11, %v3404_v56  ;;  %v1413_v56 = vadd.f32 %v28476_v3, %v1297_v51 }
 0x314   :  { %v3402_v6 = vpop.permute.xlu0 %3401  ;;  %v3443_v41 = vsel %vm3424_vm4, %v23322_v46, 0.0  ;;  %v3463_v23 = vmul.f32 %v23322_v46, %v23322_v46  ;;  %v3486_v20 = vsel %vm3424_vm4, %v3464_v39, 0.0 }
 0x315   :  { %v23297_v50 = vsel %vm3415_vm3, %v28461_v63, %v3402_v6  ;;  %v28478_v6 = vld [vmem:[#allocation34_spill] sm:$0xff] }
 0x316   :  { %v3400_v27 = vpop.permute.xlu1 %3399  ;;  %v3462_v33 = vmul.f32 %v23297_v50, %v23297_v50  ;;  %v3440_v36 = vsel %vm3424_vm4, %v23297_v50, 0.0  ;;  %v3483_v29 = vsel %vm3424_vm4, %v3463_v23, 0.0  ;;  %v1536_v19 = vadd.f32 %v28478_v6, %v1413_v56 }
 0x317   :  { %v23304_v57 = vsel %vm3415_vm3, %v1804_v53, %v3400_v27  ;;  %v28479_v53 = vld [vmem:[#allocation45_spill] sm:$0xff] }
 0x318   :  { %v3398_v60 = vpop.permute.xlu0 %3397  ;;  %v3480_v2 = vsel %vm3424_vm4, %v3462_v33, 0.0  ;;  %v3461_v62 = vmul.f32 %v23304_v57, %v23304_v57  ;;  %v3437_v14 = vsel %vm3424_vm4, %v23304_v57, 0.0  ;;  %v1666_v21 = vadd.f32 %v28479_v53, %v1536_v19  ;;  %v28480_v33 = vld [vmem:[#allocation42_spill] sm:$0xff] }
 0x319   :  { %v23313_v32 = vsel %vm3415_vm3, %v28466_v35, %v3398_v60  ;;  %3481 = vadd.xlane.f32.xlu1 %v3480_v2 }
 0x31a   :  { %v3434_v17 = vsel %vm3424_vm4, %v23313_v32, 0.0  ;;  %v3477_v45 = vsel %vm3424_vm4, %v3461_v62, 0.0  ;;  %v3396_v25 = vpop.permute.xlu1 %3395  ;;  %v3460_v22 = vmul.f32 %v23313_v32, %v23313_v32  ;;  %v1780_v12 = vadd.f32 %v28480_v33, %v1666_v21 }
 0x31b   :  { %3435 = vadd.xlane.f32.xlu0 %v3434_v17  ;;  %v23345_v58 = vsel %vm3415_vm3, %v1792_v55, %v3396_v25 }
 0x31c   :  { %v3394_v0 = vpop.permute.xlu0 %3393  ;;  %v3474_v54 = vsel %vm3424_vm4, %v3460_v22, 0.0  ;;  %v3459_v1 = vmul.f32 %v23345_v58, %v23345_v58  ;;  %v3431_v49 = vsel %vm3424_vm4, %v23345_v58, 0.0 }
 0x31d   :  { %3478 = vadd.xlane.f32.xlu1 %v3477_v45  ;;  %v23357_v4 = vsel %vm3415_vm3, %v28477_v24, %v3394_v0 }
 0x31e   :  { %v3471_v52 = vsel %vm3424_vm4, %v3459_v1, 0.0  ;;  %v3458_v18 = vmul.f32 %v23357_v4, %v23357_v4  ;;  %v3392_v63 = vpop.permute.xlu1 %3391  ;;  %v3428_v30 = vsel %vm3424_vm4, %v23357_v4, 0.0 }
 0x31f   :  { %3441 = vadd.xlane.f32.xlu0 %v3440_v36  ;;  %v23372_v42 = vsel %vm3415_vm3, %v1780_v12, %v3392_v63 }
 0x320   :  { %v3468_v27 = vsel %vm3424_vm4, %v3458_v18, 0.0  ;;  %v3425_v5 = vsel %vm3424_vm4, %v23372_v42, 0.0  ;;  %v3457_v60 = vmul.f32 %v23372_v42, %v23372_v42 }
 0x321   :  { %3444 = vadd.xlane.f32.xlu1 %v3443_v41 }
 0x322   :  { %v3465_v2 = vsel %vm3424_vm4, %v3457_v60, 0.0 }
 0x323   :  { %3438 = vadd.xlane.f32.xlu0 %v3437_v14 }
 0x325   :  { %3484 = vadd.xlane.f32.xlu1 %v3483_v29 }
 0x327   :  { %3447 = vadd.xlane.f32.xlu0 %v3446_v10 }
 0x329   :  { %3475 = vadd.xlane.f32.xlu1 %v3474_v54 }
 0x32b   :  { %3487 = vadd.xlane.f32.xlu0 %v3486_v20 }
 0x32d   :  { %3472 = vadd.xlane.f32.xlu1 %v3471_v52 }
 0x32f   :  { %3432 = vadd.xlane.f32.xlu0 %v3431_v49 }
 0x331   :  { %3469 = vadd.xlane.f32.xlu1 %v3468_v27 }
 0x333   :  { %3429 = vadd.xlane.f32.xlu0 %v3428_v30 }
 0x337   :  { %3426 = vadd.xlane.f32.xlu0 %v3425_v5 }
 0x33b   :  { %3466 = vadd.xlane.f32.xlu0 %v3465_v2 }
 0x3a2   :  { %v3482_v62 = vpop.xlane.xlu1 %3481 }
 0x3a3   :  { %v3494_v8 = vmul.f32 0.041666668, %v3482_v62 }
 0x3a4   :  { %v3436_v31 = vpop.xlane.xlu0 %3435 }
 0x3a5   :  { %v23389_v34 = vmul.f32 0.041666668, %v3436_v31  ;;  %v23406_v31 = vld [vmem:[%s28076_s3 + $0x30] sm:$0xff] }
 0x3a6   :  { %v3479_v40 = vpop.xlane.xlu1 %3478 }
 0x3a7   :  { %v3493_v61 = vmul.f32 0.041666668, %v3479_v40  ;;  %v3500_v14 = vmul.f32 %v23389_v34, %v23389_v34 }
 0x3a8   :  { %v3442_v47 = vpop.xlane.xlu0 %3441 }
 0x3a9   :  { %v23379_v37 = vmul.f32 0.041666668, %v3442_v47 }
 0x3aa   :  { %v3445_v35 = vpop.xlane.xlu1 %3444 }
 0x3ab   :  { %v3502_v17 = vmul.f32 %v23379_v37, %v23379_v37  ;;  %v23383_v7 = vmul.f32 0.041666668, %v3445_v35 }
 0x3ac   :  { %v3439_v26 = vpop.xlane.xlu0 %3438 }
 0x3ad   :  { %v23385_v11 = vmul.f32 0.041666668, %v3439_v26  ;;  %v3510_v59 = vsub.f32 %v3494_v8, %v3502_v17  ;;  %v3503_v15 = vmul.f32 %v23383_v7, %v23383_v7 }
 0x3ae   :  { %v3485_v45 = vpop.xlane.xlu1 %3484 }
 0x3af   :  { %v3495_v36 = vmul.f32 0.041666668, %v3485_v45  ;;  %v3501_v9 = vmul.f32 %v23385_v11, %v23385_v11  ;;  %v3518_v28 = vmax.f32 %v3510_v59, 0.0  ;;  %v23412_v59 = vld [vmem:[%s28076_s3 + $0x18] sm:$0xff] }
 0x3b0   :  { %v3448_v44 = vpop.xlane.xlu0 %3447 }
 0x3b1   :  { %v3511_v38 = vsub.f32 %v3495_v36, %v3503_v15  ;;  %v23393_v41 = vmul.f32 0.041666668, %v3448_v44  ;;  %v3509_v43 = vsub.f32 %v3493_v61, %v3501_v9  ;;  %v3526_v10 = vadd.f32 1e-05, %v3518_v28  ;;  %v3544_v44 = vld [vmem:[%s28076_s3 + $0x38] sm:$0xff]  ;;  %v3542_v61 = vld [vmem:[%s28076_s3 + $0x28] sm:$0xff] }
 0x3b2   :  { %v3476_v23 = vpop.xlane.xlu1 %3475 }
 0x3b3   :  { %v3519_v25 = vmax.f32 %v3511_v38, 0.0  ;;  %v3492_v13 = vmul.f32 0.041666668, %v3476_v23  ;;  %v3504_v22 = vmul.f32 %v23393_v41, %v23393_v41  ;;  %v3517_v54 = vmax.f32 %v3509_v43, 0.0 }
 0x3b4   :  { %v3488_v55 = vpop.xlane.xlu0 %3487 }
 0x3b5   :  { %v3527_v29 = vadd.f32 1e-05, %v3519_v25  ;;  %v3496_v16 = vmul.f32 0.041666668, %v3488_v55  ;;  %v3508_v51 = vsub.f32 %v3492_v13, %v3500_v14  ;;  %v3525_v21 = vadd.f32 1e-05, %v3517_v54 }
 0x3b6   :  { %v3473_v0 = vpop.xlane.xlu1 %3472 }
 0x3b7   :  { %v3512_v39 = vsub.f32 %v3496_v16, %v3504_v22  ;;  %22298 = vrsqrt.f32 %v3527_v29  ;;  %v3516_v3 = vmax.f32 %v3508_v51, 0.0  ;;  %v3491_v19 = vmul.f32 0.041666668, %v3473_v0  ;;  %v3541_v29 = vld [vmem:[%s28076_s3 + $0x20] sm:$0xff] }
 0x3b8   :  { %v3433_v56 = vpop.xlane.xlu0 %3432  ;;  %22300 = vrsqrt.f32 %v3526_v10 }
 0x3b9   :  { %v3520_v1 = vmax.f32 %v3512_v39, 0.0  ;;  %v23399_v24 = vmul.f32 0.041666668, %v3433_v56  ;;  %v3524_v20 = vadd.f32 1e-05, %v3516_v3 }
 0x3ba   :  { %v3470_v18 = vpop.xlane.xlu1 %3469 }
 0x3bb   :  { %v3528_v6 = vadd.f32 1e-05, %v3520_v1  ;;  %v3499_v52 = vmul.f32 %v23399_v24, %v23399_v24  ;;  %22302 = vrsqrt.f32 %v3524_v20  ;;  %v3490_v33 = vmul.f32 0.041666668, %v3470_v18 }
 0x3bc   :  { %v3430_v53 = vpop.xlane.xlu0 %3429 }
 0x3bd   :  { %22304 = vrsqrt.f32 %v3528_v6  ;;  %v3507_v49 = vsub.f32 %v3491_v19, %v3499_v52  ;;  %v3450_v63 = vmul.f32 0.041666668, %v3430_v53 }
 0x3be   :  { %22306 = vrsqrt.f32 %v3525_v21 }
 0x3bf   :  { %v3515_v27 = vmax.f32 %v3507_v49, 0.0  ;;  %v3498_v12 = vmul.f32 %v3450_v63, %v3450_v63 }
 0x3c0   :  { %v3427_v30 = vpop.xlane.xlu0 %3426 }
 0x3c1   :  { %v3523_v5 = vadd.f32 1e-05, %v3515_v27  ;;  %v3506_v60 = vsub.f32 %v3490_v33, %v3498_v12  ;;  %v3449_v2 = vmul.f32 0.041666668, %v3427_v30 }
 0x3c3   :  { %v3514_v62 = vmax.f32 %v3506_v60, 0.0  ;;  %22308 = vrsqrt.f32 %v3523_v5  ;;  %v3497_v17 = vmul.f32 %v3449_v2, %v3449_v2  ;;  %v28482_v60 = vmov 0  }
 0x3c4   :  { %v3467_v40 = vpop.xlane.xlu0 %3466  ;;  %v22299_v47 = vpop.eup %22298 }
 0x3c5   :  { %v3522_v35 = vadd.f32 1e-05, %v3514_v62  ;;  %v3489_v26 = vmul.f32 0.041666668, %v3467_v40  ;;  %v3551_v8 = vmul.f32 %v22299_v47, %v23406_v31  ;;  %v22301_v15 = vpop.eup %22300 }
 0x3c7   :  { %22310 = vrsqrt.f32 %v3522_v35  ;;  %v3505_v45 = vsub.f32 %v3489_v26, %v3497_v17  ;;  %v3559_v36 = vmul.f32 %v3551_v8, %v23383_v7  ;;  %v3550_v7 = vmul.f32 %v22301_v15, %v3542_v61 }
 0x3c8   :  { %v22303_v9 = vpop.eup %22302 }
 0x3c9   :  { %v3513_v38 = vmax.f32 %v3505_v45, 0.0  ;;  %3581 = vrot.lane.b32.xlu0 %v3559_v36, %s22335_s19  ;;  %v3548_v28 = vmul.f32 %v22303_v9, %v23412_v59  ;;  %v3558_v22 = vmul.f32 %v3550_v7, %v23379_v37  ;;  %v3537_v37 = vld [vmem:[%s28076_s3] sm:$0xff] }
 0x3ca   :  { %v22305_v23 = vpop.eup %22304 }
 0x3cb   :  { %v3521_v25 = vadd.f32 1e-05, %v3513_v38  ;;  %v3552_v14 = vmul.f32 %v22305_v23, %v3544_v44  ;;  %v3556_v13 = vmul.f32 %v3548_v28, %v23389_v34  ;;  %v22307_v43 = vpop.eup %22306  ;;  %v3539_v34 = vld [vmem:[%s28076_s3 + $0x10] sm:$0xff] }
 0x3cc   :  { %v3549_v16 = vmul.f32 %v22307_v43, %v3541_v29 }
 0x3cd   :  { %22312 = vrsqrt.f32 %v3521_v25  ;;  %v3560_v55 = vmul.f32 %v3552_v14, %v23393_v41  ;;  %3575 = vrot.lane.b32.xlu0 %v3556_v13, %s22335_s19  ;;  %v3538_v41 = vld [vmem:[%s28076_s3 + $0x8] sm:$0xff] }
 0x3ce   :  { %v3557_v10 = vmul.f32 %v3549_v16, %v23385_v11  ;;  %v28481_v11 = vmov 1  }
 0x3cf   :  { %3583 = vrot.lane.b32.xlu1 %v3560_v55, %s22335_s19 }
 0x3d0   :  { %v22309_v51 = vpop.eup %22308 }
 0x3d1   :  { %v3547_v39 = vmul.f32 %v22309_v51, %v3539_v34 }
 0x3d3   :  { %3579 = vrot.lane.b32.xlu1 %v3558_v22, %s22335_s19  ;;  %v3555_v54 = vmul.f32 %v3547_v39, %v23399_v24 }
 0x3d4   :  { %v22311_v0 = vpop.eup %22310 }
 0x3d5   :  { %v3546_v3 = vmul.f32 %v22311_v0, %v3538_v41 }
 0x3d7   :  { %v3554_v56 = vmul.f32 %v3546_v3, %v3450_v63  ;;  %3577 = vrot.lane.b32.xlu1 %v3557_v10, %s22335_s19 }
 0x3d9   :  { %3571 = vrot.lane.b32.xlu0 %v3554_v56, %s22335_s19 }
 0x3da   :  { %v22313_v1 = vpop.eup %22312 }
 0x3db   :  { %3573 = vrot.lane.b32.xlu1 %v3555_v54, %s22335_s19  ;;  %v3545_v20 = vmul.f32 %v22313_v1, %v3537_v37 }
 0x3dd   :  { %3638 = vperm.xlu0 %22286, %v3552_v14   ;;  %v3553_v6 = vmul.f32 %v3545_v20, %v3449_v2 }
 0x3df   :  { %3569 = vrot.lane.b32.xlu1 %v3553_v6, %s22335_s19 }
 0x3e1   :  { %3628 = vperm.xlu0 %22286, %v3550_v7  }
 0x3e3   :  { %3633 = vperm.xlu1 %22287, %v3551_v8  }
 0x3e5   :  { %3623 = vperm.xlu0 %22286, %v3549_v16  }
 0x3e7   :  { %22288 = vset.pattern.permute.xlu1 %v28481_v11 }
 0x3e9   :  { %3618 = vperm.xlu0 %22286, %v3548_v28  }
 0x3ed   :  { %3613 = vperm.xlu0 %22286, %v3547_v39  }
 0x3f1   :  { %3608 = vperm.xlu0 %22286, %v3546_v3  }
 0x3f5   :  { %3603 = vperm.xlu0 %22286, %v3545_v20  }
 0x3f9   :  { %22289 = vset.pattern.permute.xlu0 %v28481_v11 }
 0x43b   :  { %v3582_v21 = vpop.permute.xlu0 %3581 }
 0x43c   :  { %v3599_v33 = vsub.f32 %v23406_v31, %v3582_v21 }
 0x43f   :  { %v3576_v30 = vpop.permute.xlu0 %3575 }
 0x440   :  { %v3596_v5 = vsub.f32 %v23412_v59, %v3576_v30 }
 0x441   :  { %v3584_v24 = vpop.permute.xlu1 %3583 }
 0x442   :  { %v3600_v63 = vsub.f32 %v3544_v44, %v3584_v24 }
 0x445   :  { %v3580_v19 = vpop.permute.xlu1 %3579 }
 0x446   :  { %v3598_v52 = vsub.f32 %v3542_v61, %v3580_v19 }
 0x448   :  { %3676 = vperm.xlu1 %22288, %v3598_v52  }
 0x449   :  { %v3578_v18 = vpop.permute.xlu1 %3577 }
 0x44a   :  { %v3597_v53 = vsub.f32 %v3541_v29, %v3578_v18 }
 0x44b   :  { %v3572_v62 = vpop.permute.xlu0 %3571 }
 0x44c   :  { %3671 = vperm.xlu1 %22288, %v3597_v53   ;;  %v3594_v40 = vsub.f32 %v3538_v41, %v3572_v62 }
 0x44d   :  { %v3574_v49 = vpop.permute.xlu1 %3573 }
 0x44e   :  { %v3595_v2 = vsub.f32 %v3539_v34, %v3574_v49 }
 0x450   :  { %3686 = vperm.xlu1 %22288, %v3600_v63  }
 0x451   :  { %v3570_v27 = vpop.permute.xlu1 %3569 }
 0x452   :  { %v3593_v12 = vsub.f32 %v3537_v37, %v3570_v27 }
 0x454   :  { %3681 = vperm.xlu1 %22288, %v3599_v33   ;;  %3651 = vperm.xlu0 %22289, %v3593_v12  }
 0x458   :  { %3666 = vperm.xlu1 %22288, %v3596_v5   ;;  %22290 = vset.pattern.permute.xlu0 %v28482_v60  ;;  %v3639_v47 = vpop.permute.xlu0 %3638 }
 0x459   :  { %v3648_v7 = vmul.f32 %v3639_v47, %v23338_v48 }
 0x45c   :  { %3661 = vperm.xlu1 %22288, %v3595_v2   ;;  %v3629_v17 = vpop.permute.xlu0 %3628 }
 0x45d   :  { %v3646_v9 = vmul.f32 %v3629_v17, %v23297_v50 }
 0x45e   :  { %v3634_v35 = vpop.permute.xlu1 %3633 }
 0x460   :  { %3656 = vperm.xlu1 %22288, %v3594_v40   ;;  %v3624_v8 = vpop.permute.xlu0 %3623 }
 0x461   :  { %v3645_v25 = vmul.f32 %v3624_v8, %v23304_v57 }
 0x464   :  { %22291 = vset.pattern.permute.xlu1 %v28482_v60  ;;  %v3619_v15 = vpop.permute.xlu0 %3618 }
 0x465   :  { %v3644_v59 = vmul.f32 %v3619_v15, %v23313_v32  ;;  %v3647_v32 = vmul.f32 %v3634_v35, %v23322_v46 }
 0x468   :  { %v3614_v28 = vpop.permute.xlu0 %3613 }
 0x469   :  { %v3643_v22 = vmul.f32 %v3614_v28, %v23345_v58 }
 0x46c   :  { %v3609_v50 = vpop.permute.xlu0 %3608 }
 0x46d   :  { %v3642_v41 = vmul.f32 %v3609_v50, %v23357_v4 }
 0x470   :  { %v3604_v34 = vpop.permute.xlu0 %3603 }
 0x471   :  { %v3641_v58 = vmul.f32 %v3604_v34, %v23372_v42 }
 0x4c3   :  { %v3677_v31 = vpop.permute.xlu1 %3676 }
 0x4c4   :  { %v3694_v23 = vadd.f32 %v3677_v31, %v3646_v9 }
 0x4c6   :  { %v3702_v14 = vmax.f32 %v3694_v23, 0.0 }
 0x4c7   :  { %v3672_v26 = vpop.permute.xlu1 %3671 }
 0x4c8   :  { %v3693_v13 = vadd.f32 %v3672_v26, %v3645_v25 }
 0x4ca   :  { %v3701_v43 = vmax.f32 %v3693_v13, 0.0 }
 0x4cb   :  { %v3687_v45 = vpop.permute.xlu1 %3686 }
 0x4cc   :  { %v3696_v29 = vadd.f32 %v3687_v45, %v3648_v7 }
 0x4ce   :  { %v3704_v16 = vmax.f32 %v3696_v29, 0.0 }
 0x4cf   :  { %v3682_v36 = vpop.permute.xlu1 %3681  ;;  %v3652_v39 = vpop.permute.xlu0 %3651 }
 0x4d0   :  { %v3695_v57 = vadd.f32 %v3682_v36, %v3647_v32  ;;  %v3689_v3 = vadd.f32 %v3652_v39, %v3641_v58 }
 0x4d2   :  { %v3703_v51 = vmax.f32 %v3695_v57, 0.0  ;;  %v3697_v4 = vmax.f32 %v3689_v3, 0.0 }
 0x4d3   :  { %v3667_v44 = vpop.permute.xlu1 %3666 }
 0x4d4   :  { %v3692_v38 = vadd.f32 %v3667_v44, %v3644_v59 }
 0x4d6   :  { %v3700_v61 = vmax.f32 %v3692_v38, 0.0 }
 0x4d7   :  { %v3662_v55 = vpop.permute.xlu1 %3661 }
 0x4d8   :  { %3761 = vrot.lane.b32.xlu1 %v3700_v61, %s22343_s25  ;;  %3719 = vrot.lane.b32.xlu0 %v3700_v61, %s22335_s19  ;;  %v3691_v48 = vadd.f32 %v3662_v55, %v3643_v22 }
 0x4da   :  { %v3699_v0 = vmax.f32 %v3691_v48, 0.0 }
 0x4db   :  { %v3657_v46 = vpop.permute.xlu1 %3656 }
 0x4dc   :  { %3765 = vrot.lane.b32.xlu1 %v3702_v14, %s22343_s25  ;;  %3723 = vrot.lane.b32.xlu0 %v3702_v14, %s22335_s19  ;;  %v3690_v10 = vadd.f32 %v3657_v46, %v3642_v41 }
 0x4de   :  { %v3698_v56 = vmax.f32 %v3690_v10, 0.0 }
 0x4e0   :  { %3763 = vrot.lane.b32.xlu1 %v3701_v43, %s22343_s25  ;;  %3721 = vrot.lane.b32.xlu0 %v3701_v43, %s22335_s19 }
 0x4e4   :  { %3727 = vrot.lane.b32.xlu1 %v3704_v16, %s22335_s19  ;;  %3725 = vrot.lane.b32.xlu0 %v3703_v51, %s22335_s19 }
 0x4e8   :  { %3769 = vrot.lane.b32.xlu1 %v3704_v16, %s22343_s25  ;;  %3717 = vrot.lane.b32.xlu0 %v3699_v0, %s22335_s19 }
 0x4ec   :  { %3767 = vrot.lane.b32.xlu1 %v3703_v51, %s22343_s25  ;;  %3715 = vrot.lane.b32.xlu0 %v3698_v56, %s22335_s19 }
 0x4f0   :  { %3759 = vrot.lane.b32.xlu1 %v3699_v0, %s22343_s25  ;;  %3713 = vrot.lane.b32.xlu0 %v3697_v4, %s22335_s19 }
 0x4f4   :  { %3757 = vrot.lane.b32.xlu1 %v3698_v56, %s22343_s25 }
 0x4f8   :  { %3755 = vrot.lane.b32.xlu1 %v3697_v4, %s22343_s25 }
 0x54a   :  { %v3720_v42 = vpop.permute.xlu0 %3719  ;;  %v3762_v37 = vpop.permute.xlu1 %3761 }
 0x54b   :  { %v3741_v54 = vsel %vm3737_vm5, 0.0, %v3720_v42  ;;  %v3782_v1 = vsel %vm3737_vm5, 0.0, %v3762_v37 }
 0x54c   :  { %v23480_v20 = vsel %vm3746_vm6, %v3741_v54, 0.0  ;;  %v23483_v6 = vsel %vm3746_vm6, %v3782_v1, 0.0  ;;  %v19107_v54 = vld [vmem:[%s28074_s1 + $0x80] sm:$0xff] }
 0x54d   :  { %3809 = vrot.lane.b32.xlu0 %v23480_v20, %s22335_s19  ;;  %3833 = vrot.lane.b32.xlu1 %v23483_v6, %s22335_s19  ;;  %v23610_v1 = vand.u32 4294901760, %v19107_v54 }
 0x54e   :  { %v3724_v24 = vpop.permute.xlu0 %3723  ;;  %v3766_v19 = vpop.permute.xlu1 %3765 }
 0x54f   :  { %v3743_v52 = vsel %vm3737_vm5, 0.0, %v3724_v24  ;;  %v3784_v18 = vsel %vm3737_vm5, 0.0, %v3766_v19  ;;  %v23617_v24 = vsub.f32 %v19107_v54, %v23610_v1  ;;  %20674 = vmatprep.mubr.f32.mxu1 %v23610_v1 }
 0x550   :  { %v23492_v53 = vsel %vm3746_vm6, %v3743_v52, 0.0  ;;  %v23495_v21 = vsel %vm3746_vm6, %v3784_v18, 0.0 }
 0x551   :  { %3813 = vrot.lane.b32.xlu0 %v23492_v53, %s22335_s19  ;;  %3837 = vrot.lane.b32.xlu1 %v23495_v21, %s22335_s19  ;;  %v4043_v19 = vand.u32 4294901760, %v23617_v24 }
 0x552   :  { %v3722_v49 = vpop.permute.xlu0 %3721  ;;  %v3764_v63 = vpop.permute.xlu1 %3763 }
 0x553   :  { %v3742_v27 = vsel %vm3737_vm5, 0.0, %v3722_v49  ;;  %v3783_v33 = vsel %vm3737_vm5, 0.0, %v3764_v63  ;;  %v4044_v52 = vsub.f32 %v23617_v24, %v4043_v19 }
 0x554   :  { %v23504_v12 = vsel %vm3746_vm6, %v3742_v27, 0.0  ;;  %v23507_v30 = vsel %vm3746_vm6, %v3783_v33, 0.0 }
 0x555   :  { %3811 = vrot.lane.b32.xlu0 %v23504_v12, %s22335_s19  ;;  %3835 = vrot.lane.b32.xlu1 %v23507_v30, %s22335_s19  ;;  %v4045_v18 = vand.u32 4294901760, %v4044_v52 }
 0x556   :  { %v3726_v5 = vpop.permute.xlu0 %3725  ;;  %v3728_v2 = vpop.permute.xlu1 %3727 }
 0x557   :  { %v3745_v62 = vsel %vm3737_vm5, 0.0, %v3728_v2  ;;  %v3744_v47 = vsel %vm3737_vm5, 0.0, %v3726_v5  ;;  %20636 = vmatprep.mubr.f32.mxu0 %v4045_v18 }
 0x558   :  { %v23515_v40 = vsel %vm3746_vm6, %v3745_v62, 0.0  ;;  %v23522_v26 = vsel %vm3746_vm6, %v3744_v47, 0.0 }
 0x559   :  { %3817 = vrot.lane.b32.xlu0 %v23515_v40, %s22335_s19 }
 0x55a   :  { %v3718_v35 = vpop.permute.xlu0 %3717  ;;  %v3770_v17 = vpop.permute.xlu1 %3769 }
 0x55b   :  { %v3786_v31 = vsel %vm3737_vm5, 0.0, %v3770_v17  ;;  %v3740_v45 = vsel %vm3737_vm5, 0.0, %v3718_v35 }
 0x55c   :  { %v23525_v8 = vsel %vm3746_vm6, %v3786_v31, 0.0  ;;  %v23534_v44 = vsel %vm3746_vm6, %v3740_v45, 0.0 }
 0x55d   :  { %3815 = vrot.lane.b32.xlu0 %v23522_v26, %s22335_s19  ;;  %3841 = vrot.lane.b32.xlu1 %v23525_v8, %s22335_s19 }
 0x55e   :  { %v3716_v15 = vpop.permute.xlu0 %3715  ;;  %v3768_v36 = vpop.permute.xlu1 %3767 }
 0x55f   :  { %v3785_v59 = vsel %vm3737_vm5, 0.0, %v3768_v36  ;;  %v3739_v38 = vsel %vm3737_vm5, 0.0, %v3716_v15 }
 0x560   :  { %v23537_v9 = vsel %vm3746_vm6, %v3785_v59, 0.0  ;;  %v23546_v25 = vsel %vm3746_vm6, %v3739_v38, 0.0 }
 0x561   :  { %3807 = vrot.lane.b32.xlu0 %v23534_v44, %s22335_s19  ;;  %3839 = vrot.lane.b32.xlu1 %v23537_v9, %s22335_s19 }
 0x562   :  { %v3714_v23 = vpop.permute.xlu0 %3713  ;;  %v3760_v61 = vpop.permute.xlu1 %3759 }
 0x563   :  { %v3781_v28 = vsel %vm3737_vm5, 0.0, %v3760_v61  ;;  %v3738_v13 = vsel %vm3737_vm5, 0.0, %v3714_v23 }
 0x564   :  { %v23549_v14 = vsel %vm3746_vm6, %v3781_v28, 0.0  ;;  %v23558_v50 = vsel %vm3746_vm6, %v3738_v13, 0.0 }
 0x565   :  { %3805 = vrot.lane.b32.xlu0 %v23546_v25, %s22335_s19  ;;  %3831 = vrot.lane.b32.xlu1 %v23549_v14, %s22335_s19 }
 0x566   :  { %v3758_v7 = vpop.permute.xlu1 %3757 }
 0x567   :  { %v3780_v32 = vsel %vm3737_vm5, 0.0, %v3758_v7 }
 0x568   :  { %v23561_v55 = vsel %vm3746_vm6, %v3780_v32, 0.0 }
 0x569   :  { %3803 = vrot.lane.b32.xlu0 %v23558_v50, %s22335_s19  ;;  %3829 = vrot.lane.b32.xlu1 %v23561_v55, %s22335_s19 }
 0x56a   :  { %v3756_v43 = vpop.permute.xlu1 %3755 }
 0x56b   :  { %v3779_v29 = vsel %vm3737_vm5, 0.0, %v3756_v43 }
 0x56c   :  { %v23569_v57 = vsel %vm3746_vm6, %v3779_v29, 0.0 }
 0x56d   :  { %3857 = vrot.lane.b32.xlu0 %v23515_v40, %s22340_s20  ;;  %3827 = vrot.lane.b32.xlu1 %v23569_v57, %s22335_s19 }
 0x571   :  { %3905 = vrot.lane.b32.xlu1 %v23525_v8, %s22344_s26 }
 0x5bf   :  { %v3810_v22 = vpop.permute.xlu0 %3809  ;;  %v3834_v16 = vpop.permute.xlu1 %3833 }
 0x5c3   :  { %v3814_v51 = vpop.permute.xlu0 %3813  ;;  %v3838_v48 = vpop.permute.xlu1 %3837 }
 0x5c7   :  { %v3812_v34 = vpop.permute.xlu0 %3811  ;;  %v3836_v46 = vpop.permute.xlu1 %3835 }
 0x5cb   :  { %v3818_v41 = vpop.permute.xlu0 %3817 }
 0x5cf   :  { %v3816_v0 = vpop.permute.xlu0 %3815  ;;  %v3842_v10 = vpop.permute.xlu1 %3841 }
 0x5d3   :  { %v3808_v39 = vpop.permute.xlu0 %3807  ;;  %v3840_v58 = vpop.permute.xlu1 %3839 }
 0x5d7   :  { %v3806_v3 = vpop.permute.xlu0 %3805  ;;  %v3832_v56 = vpop.permute.xlu1 %3831 }
 0x5d8   :  { %3861 = vrot.lane.b32.xlu0 %v3806_v3, %s22340_s20 }
 0x5db   :  { %v3804_v4 = vpop.permute.xlu0 %3803  ;;  %v3830_v42 = vpop.permute.xlu1 %3829 }
 0x5dc   :  { %3859 = vrot.lane.b32.xlu0 %v3804_v4, %s22340_s20  ;;  %3909 = vrot.lane.b32.xlu1 %v3830_v42, %s22344_s26 }
 0x5df   :  { %v3828_v37 = vpop.permute.xlu1 %3827  ;;  %v3858_v49 = vpop.permute.xlu0 %3857 }
 0x5e0   :  { %3865 = vrot.lane.b32.xlu0 %v3810_v22, %s22340_s20  ;;  %3907 = vrot.lane.b32.xlu1 %v3828_v37, %s22344_s26 }
 0x5e4   :  { %3863 = vrot.lane.b32.xlu0 %v3808_v39, %s22340_s20  ;;  %3913 = vrot.lane.b32.xlu1 %v3834_v16, %s22344_s26 }
 0x5e8   :  { %3869 = vrot.lane.b32.xlu0 %v3814_v51, %s22340_s20  ;;  %3911 = vrot.lane.b32.xlu1 %v3832_v56, %s22344_s26 }
 0x5ec   :  { %3867 = vrot.lane.b32.xlu0 %v3812_v34, %s22340_s20  ;;  %3917 = vrot.lane.b32.xlu1 %v3838_v48, %s22344_s26 }
 0x5f0   :  { %3873 = vrot.lane.b32.xlu0 %v3818_v41, %s22340_s20  ;;  %3915 = vrot.lane.b32.xlu1 %v3836_v46, %s22344_s26 }
 0x5f4   :  { %3871 = vrot.lane.b32.xlu0 %v3816_v0, %s22340_s20  ;;  %3921 = vrot.lane.b32.xlu1 %v3842_v10, %s22344_s26 }
 0x5f8   :  { %3855 = vrot.lane.b32.xlu0 %v23522_v26, %s22340_s20  ;;  %3919 = vrot.lane.b32.xlu1 %v3840_v58, %s22344_s26 }
 0x5fc   :  { %3853 = vrot.lane.b32.xlu0 %v23492_v53, %s22340_s20  ;;  %3903 = vrot.lane.b32.xlu1 %v23537_v9, %s22344_s26 }
 0x600   :  { %3851 = vrot.lane.b32.xlu0 %v23504_v12, %s22340_s20  ;;  %3901 = vrot.lane.b32.xlu1 %v23495_v21, %s22344_s26 }
 0x604   :  { %3849 = vrot.lane.b32.xlu0 %v23480_v20, %s22340_s20  ;;  %3899 = vrot.lane.b32.xlu1 %v23507_v30, %s22344_s26 }
 0x608   :  { %3847 = vrot.lane.b32.xlu0 %v23534_v44, %s22340_s20  ;;  %3897 = vrot.lane.b32.xlu1 %v23483_v6, %s22344_s26 }
 0x60c   :  { %3845 = vrot.lane.b32.xlu0 %v23546_v25, %s22340_s20  ;;  %3895 = vrot.lane.b32.xlu1 %v23549_v14, %s22344_s26 }
 0x610   :  { %3843 = vrot.lane.b32.xlu0 %v23558_v50, %s22340_s20  ;;  %3893 = vrot.lane.b32.xlu1 %v23561_v55, %s22344_s26 }
 0x614   :  { %4760 = vrot.lane.b32.xlu0 %v3818_v41, %s22337_s5  ;;  %3891 = vrot.lane.b32.xlu1 %v23569_v57, %s22344_s26  ;;  %s22346_s26 = smov 116  }
 0x618   :  { %4756 = vrot.lane.b32.xlu0 %v3814_v51, %s22337_s5  ;;  %4808 = vrot.lane.b32.xlu1 %v3842_v10, %s22345_s29 }
 0x61c   :  { %4754 = vrot.lane.b32.xlu0 %v3812_v34, %s22337_s5  ;;  %4804 = vrot.lane.b32.xlu1 %v3838_v48, %s22345_s29 }
 0x620   :  { %4752 = vrot.lane.b32.xlu0 %v3810_v22, %s22337_s5  ;;  %4802 = vrot.lane.b32.xlu1 %v3836_v46, %s22345_s29 }
 0x624   :  { %4750 = vrot.lane.b32.xlu0 %v3808_v39, %s22337_s5  ;;  %4800 = vrot.lane.b32.xlu1 %v3834_v16, %s22345_s29 }
 0x628   :  { %4748 = vrot.lane.b32.xlu0 %v3806_v3, %s22337_s5  ;;  %4798 = vrot.lane.b32.xlu1 %v3832_v56, %s22345_s29 }
 0x62c   :  { %4746 = vrot.lane.b32.xlu0 %v3804_v4, %s22337_s5  ;;  %4796 = vrot.lane.b32.xlu1 %v3830_v42, %s22345_s29 }
 0x630   :  { %4744 = vrot.lane.b32.xlu0 %v23515_v40, %s22337_s5  ;;  %4794 = vrot.lane.b32.xlu1 %v3828_v37, %s22345_s29 }
 0x634   :  { %4758 = vrot.lane.b32.xlu0 %v3816_v0, %s22337_s5  ;;  %4792 = vrot.lane.b32.xlu1 %v23525_v8, %s22345_s29 }
 0x638   :  { %4742 = vrot.lane.b32.xlu0 %v23522_v26, %s22337_s5  ;;  %4806 = vrot.lane.b32.xlu1 %v3840_v58, %s22345_s29 }
 0x63c   :  { %4740 = vrot.lane.b32.xlu0 %v23492_v53, %s22337_s5  ;;  %4790 = vrot.lane.b32.xlu1 %v23537_v9, %s22345_s29  ;;  %v3906_v53 = vpop.permute.xlu1 %3905 }
 0x63d   :  { %v3946_v43 = vsel %vm3415_vm3, %v3858_v49, %v3906_v53 }
 0x63e   :  { %v23744_v58 = vand.u32 4294901760, %v3946_v43 }
 0x640   :  { %4738 = vrot.lane.b32.xlu0 %v23504_v12, %s22337_s5  ;;  %4788 = vrot.lane.b32.xlu1 %v23495_v21, %s22345_s29 }
 0x644   :  { %4736 = vrot.lane.b32.xlu0 %v23480_v20, %s22337_s5  ;;  %4786 = vrot.lane.b32.xlu1 %v23507_v30, %s22345_s29 }
 0x648   :  { %4734 = vrot.lane.b32.xlu0 %v23534_v44, %s22337_s5  ;;  %4784 = vrot.lane.b32.xlu1 %v23483_v6, %s22345_s29 }
 0x64a   :  { %v3862_v63 = vpop.permute.xlu0 %3861 }
 0x64c   :  { %4732 = vrot.lane.b32.xlu0 %v23546_v25, %s22337_s5  ;;  %4782 = vrot.lane.b32.xlu1 %v23549_v14, %s22345_s29 }
 0x64e   :  { %v3860_v21 = vpop.permute.xlu0 %3859  ;;  %v3910_v20 = vpop.permute.xlu1 %3909 }
 0x64f   :  { %v3948_v9 = vsel %vm3415_vm3, %v3862_v63, %v3910_v20 }
 0x650   :  { %4730 = vrot.lane.b32.xlu0 %v23558_v50, %s22337_s5  ;;  %4780 = vrot.lane.b32.xlu1 %v23561_v55, %s22345_s29  ;;  %v23717_v29 = vand.u32 4294901760, %v3948_v9 }
 0x652   :  { %v3866_v27 = vpop.permute.xlu0 %3865  ;;  %v3908_v33 = vpop.permute.xlu1 %3907  ;;  %v23749_v56 = vsub.f32 %v3948_v9, %v23717_v29 }
 0x653   :  { %v3947_v14 = vsel %vm3415_vm3, %v3860_v21, %v3908_v33 }
 0x654   :  { %4778 = vrot.lane.b32.xlu1 %v23569_v57, %s22345_s29  ;;  %v23731_v46 = vand.u32 4294901760, %v3947_v14  ;;  %s22347_s29 = smov 24  }
 0x656   :  { %v3864_v6 = vpop.permute.xlu0 %3863  ;;  %v3914_v12 = vpop.permute.xlu1 %3913  ;;  %v23760_v18 = vsub.f32 %v3947_v14, %v23731_v46 }
 0x657   :  { %v3950_v45 = vsel %vm3415_vm3, %v3866_v27, %v3914_v12  ;;  %v23773_v27 = vsub.f32 %v3946_v43, %v23744_v58 }
 0x658   :  { %v23694_v38 = vand.u32 4294901760, %v3950_v45 }
 0x659   :  { %v23810_v14 = vand.u32 4294901760, %v23773_v27 }
 0x65a   :  { %v3870_v30 = vpop.permute.xlu0 %3869  ;;  %v3912_v5 = vpop.permute.xlu1 %3911  ;;  %v23720_v57 = vsub.f32 %v3950_v45, %v23694_v38 }
 0x65b   :  { %v3949_v44 = vsel %vm3415_vm3, %v3864_v6, %v3912_v5 }
 0x65c   :  { %v23706_v7 = vand.u32 4294901760, %v3949_v44  ;;  %v23757_v52 = vand.u32 4294901760, %v23720_v57 }
 0x65e   :  { %v3868_v2 = vpop.permute.xlu0 %3867  ;;  %v3918_v62 = vpop.permute.xlu1 %3917  ;;  %v23735_v41 = vsub.f32 %v3949_v44, %v23706_v7  ;;  %v4113_v5 = vsub.f32 %v23720_v57, %v23757_v52 }
 0x65f   :  { %v3952_v35 = vsel %vm3415_vm3, %v3870_v30, %v3918_v62  ;;  %v19108_v62 = vld [vmem:[%s28074_s1 + $0x88] sm:$0xff] }
 0x660   :  { %v23684_v31 = vand.u32 4294901760, %v3952_v35  ;;  %v23770_v20 = vand.u32 4294901760, %v23735_v41  ;;  %v23801_v45 = vand.u32 4294901760, %v19108_v62 }
 0x662   :  { %v3874_v40 = vpop.permute.xlu0 %3873  ;;  %v3916_v47 = vpop.permute.xlu1 %3915  ;;  %v23697_v23 = vsub.f32 %v3952_v35, %v23684_v31 }
 0x663   :  { %v3951_v17 = vsel %vm3415_vm3, %v3868_v2, %v3916_v47  ;;  %v23782_v2 = vand.u32 4294901760, %v23749_v56  ;;  %v23790_v47 = vand.u32 4294901760, %v23760_v18 }
 0x664   :  { %v23688_v36 = vand.u32 4294901760, %v3951_v17  ;;  %v23729_v34 = vand.u32 4294901760, %v23697_v23 }
 0x665   :  { %v4134_v43 = vsub.f32 %v23760_v18, %v23790_v47 }
 0x666   :  { %v3872_v26 = vpop.permute.xlu0 %3871  ;;  %v3922_v8 = vpop.permute.xlu1 %3921  ;;  %v23709_v32 = vsub.f32 %v3951_v17, %v23688_v36  ;;  %v4099_v54 = vsub.f32 %v23697_v23, %v23729_v34 }
 0x667   :  { %v3954_v15 = vsel %vm3415_vm3, %v3874_v40, %v3922_v8  ;;  %v4120_v8 = vsub.f32 %v23735_v41, %v23770_v20 }
 0x668   :  { %v23690_v59 = vand.u32 4294901760, %v3954_v15  ;;  %v23742_v39 = vand.u32 4294901760, %v23709_v32  ;;  %v4100_v30 = vand.u32 4294901760, %v4099_v54  ;;  %v4141_v54 = vsub.f32 %v23773_v27, %v23810_v14 }
 0x66a   :  { %v23700_v61 = vsub.f32 %v3954_v15, %v23690_v59  ;;  %v3856_v28 = vpop.permute.xlu0 %3855  ;;  %20604 = vmatprep.subr.mxu0 %v23690_v59  ;;  %v3920_v25 = vpop.permute.xlu1 %3919  ;;  %v4106_v21 = vsub.f32 %v23709_v32, %v23742_v39 }
 0x66b   :  { %v3953_v13 = vsel %vm3415_vm3, %v3872_v26, %v3920_v25  ;;  %20605 = vmatpush3.msra.mxu0 %v23690_v59  ;;  %v4127_v25 = vsub.f32 %v23749_v56, %v23782_v2 }
 0x66c   :  { %v23711_v50 = vand.u32 4294901760, %v3953_v13  ;;  %v23714_v55 = vand.u32 4294901760, %v23700_v61  ;;  %v4107_v26 = vand.u32 4294901760, %v4106_v21 }
 0x66e   :  { %v23723_v22 = vsub.f32 %v3953_v13, %v23711_v50  ;;  %v3854_v16 = vpop.permute.xlu0 %3853  ;;  %20606 = vmatprep.subr.mxu0 %v23711_v50  ;;  %v3904_v51 = vpop.permute.xlu1 %3903  ;;  %v4085_v48 = vsub.f32 %v23700_v61, %v23714_v55 }
 0x66f   :  { %20607 = vmatpush3.msra.mxu0 %v23711_v50  ;;  %v3945_v3 = vsel %vm3415_vm3, %v3856_v28, %v3904_v51  ;;  %v4114_v28 = vand.u32 4294901760, %v4113_v5 }
 0x670   :  { %20608 = vmatprep.subr.mxu0 %v23684_v31  ;;  %v4086_v0 = vand.u32 4294901760, %v4085_v48  ;;  %v23739_v10 = vand.u32 4294901760, %v23723_v22  ;;  %v23764_v53 = vand.u32 4294901760, %v3945_v3  ;;  %v4121_v48 = vand.u32 4294901760, %v4120_v8 }
 0x671   :  { %20609 = vmatpush3.msra.mxu0 %v23684_v31  ;;  %v4142_v8 = vand.u32 4294901760, %v4141_v54 }
 0x672   :  { %v3852_v4 = vpop.permute.xlu0 %3851  ;;  %20610 = vmatprep.subr.mxu0 %v23688_v36  ;;  %20642 = vmatprep.subr.mxu1 %v4086_v0  ;;  %v3902_v42 = vpop.permute.xlu1 %3901  ;;  %v4092_v37 = vsub.f32 %v23723_v22, %v23739_v10  ;;  %v23793_v35 = vsub.f32 %v3945_v3, %v23764_v53  ;;  %v23827_v3 = vsub.f32 %v19108_v62, %v23801_v45 }
 0x673   :  { %v3944_v49 = vsel %vm3415_vm3, %v3854_v16, %v3902_v42  ;;  %20611 = vmatpush3.msra.mxu0 %v23688_v36  ;;  %20643 = vmatpush3.msra.mxu1 %v4086_v0 }
 0x674   :  { %20612 = vmatprep.subr.mxu0 %v23694_v38  ;;  %v4093_v63 = vand.u32 4294901760, %v4092_v37  ;;  %v23776_v33 = vand.u32 4294901760, %v3944_v49  ;;  %v23823_v0 = vand.u32 4294901760, %v23793_v35  ;;  %v4128_v37 = vand.u32 4294901760, %v4127_v25 }
 0x675   :  { %20613 = vmatpush3.msra.mxu0 %v23694_v38  ;;  %v28084_v62 = vand.u32 4294901760, %v23827_v3 }
 0x676   :  { %v3850_v6 = vpop.permute.xlu0 %3849  ;;  %20614 = vmatprep.subr.mxu0 %v23706_v7  ;;  %20644 = vmatprep.subr.mxu1 %v4093_v63  ;;  %v3900_v12 = vpop.permute.xlu1 %3899  ;;  %v23804_v15 = vsub.f32 %v3944_v49, %v23776_v33 }
 0x677   :  { %v3943_v40 = vsel %vm3415_vm3, %v3852_v4, %v3900_v12  ;;  %20615 = vmatpush3.msra.mxu0 %v23706_v7  ;;  %20645 = vmatpush3.msra.mxu1 %v4093_v63  ;;  %v4135_v12 = vand.u32 4294901760, %v4134_v43 }
 0x678   :  { %v23795_v17 = vand.u32 4294901760, %v3943_v40  ;;  %20616 = vmatprep.subr.mxu0 %v23717_v29  ;;  %20646 = vmatprep.subr.mxu1 %v4100_v30  ;;  %v23836_v49 = vand.u32 4294901760, %v23804_v15 }
 0x679   :  { %20617 = vmatpush3.msra.mxu0 %v23717_v29  ;;  %20647 = vmatpush3.msra.mxu1 %v4100_v30  ;;  %v4148_v30 = vsub.f32 %v23793_v35, %v23823_v0 }
 0x67a   :  { %v3848_v44 = vpop.permute.xlu0 %3847  ;;  %20618 = vmatprep.subr.mxu0 %v23731_v46  ;;  %20648 = vmatprep.subr.mxu1 %v4107_v26  ;;  %v3898_v9 = vpop.permute.xlu1 %3897  ;;  %v23817_v16 = vsub.f32 %v3943_v40, %v23795_v17 }
 0x67b   :  { %v3942_v13 = vsel %vm3415_vm3, %v3850_v6, %v3898_v9  ;;  %20619 = vmatpush3.msra.mxu0 %v23731_v46  ;;  %20649 = vmatpush3.msra.mxu1 %v4107_v26 }
 0x67c   :  { %v23819_v51 = vand.u32 4294901760, %v3942_v13  ;;  %20620 = vmatprep.subr.mxu0 %v23744_v58  ;;  %20650 = vmatprep.subr.mxu1 %v4114_v28  ;;  %v23846_v5 = vand.u32 4294901760, %v23817_v16 }
 0x67d   :  { %20621 = vmatpush3.msra.mxu0 %v23744_v58  ;;  %20651 = vmatpush3.msra.mxu1 %v4114_v28 }
 0x67e   :  { %v23830_v4 = vsub.f32 %v3942_v13, %v23819_v51  ;;  %20622 = vmatprep.subr.mxu0 %v23764_v53  ;;  %20652 = vmatprep.subr.mxu1 %v4121_v48  ;;  %v3896_v42 = vpop.permute.xlu1 %3895  ;;  %v3846_v21 = vpop.permute.xlu0 %3845  ;;  %v4149_v13 = vand.u32 4294901760, %v4148_v30  ;;  %v4162_v43 = vsub.f32 %v23817_v16, %v23846_v5 }
 0x67f   :  { %v3941_v63 = vsel %vm3415_vm3, %v3848_v44, %v3896_v42  ;;  %20623 = vmatpush3.msra.mxu0 %v23764_v53  ;;  %20653 = vmatpush3.msra.mxu1 %v4121_v48  ;;  %v4155_v44 = vsub.f32 %v23804_v15, %v23836_v49  ;;  %v4054_v42 = vsub.f32 %v23827_v3, %v28084_v62 }
 0x680   :  { %v23840_v6 = vand.u32 4294901760, %v3941_v63  ;;  %20624 = vmatprep.subr.mxu0 %v23776_v33  ;;  %20654 = vmatprep.subr.mxu1 %v4128_v37  ;;  %v23857_v9 = vand.u32 4294901760, %v23830_v4 }
 0x681   :  { %20625 = vmatpush3.msra.mxu0 %v23776_v33  ;;  %20655 = vmatpush3.msra.mxu1 %v4128_v37 }
 0x682   :  { %v23851_v40 = vsub.f32 %v3941_v63, %v23840_v6  ;;  %20626 = vmatprep.subr.mxu0 %v23795_v17  ;;  %20656 = vmatprep.subr.mxu1 %v4135_v12  ;;  %v3894_v26 = vpop.permute.xlu1 %3893  ;;  %v3844_v37 = vpop.permute.xlu0 %3843 }
 0x683   :  { %v3940_v28 = vsel %vm3415_vm3, %v3846_v21, %v3894_v26  ;;  %20627 = vmatpush3.msra.mxu0 %v23795_v17  ;;  %20657 = vmatpush3.msra.mxu1 %v4135_v12  ;;  %v4156_v21 = vand.u32 4294901760, %v4155_v44  ;;  %v4169_v12 = vsub.f32 %v23830_v4, %v23857_v9  ;;  %v4055_v44 = vand.u32 4294901760, %v4054_v42 }
 0x684   :  { %v23861_v25 = vand.u32 4294901760, %v3940_v28  ;;  %20628 = vmatprep.subr.mxu0 %v23819_v51  ;;  %20658 = vmatprep.subr.mxu1 %v4142_v8  ;;  %v23867_v48 = vand.u32 4294901760, %v23851_v40 }
 0x685   :  { %20629 = vmatpush3.msra.mxu0 %v23819_v51  ;;  %20659 = vmatpush3.msra.mxu1 %v4142_v8  ;;  %v4163_v8 = vand.u32 4294901760, %v4162_v43 }
 0x686   :  { %v23874_v54 = vsub.f32 %v3940_v28, %v23861_v25  ;;  %20630 = vmatprep.subr.mxu0 %v23840_v6  ;;  %20660 = vmatprep.subr.mxu1 %v4149_v13  ;;  %v3892_v63 = vpop.permute.xlu1 %3891  ;;  %v4176_v28 = vsub.f32 %v23851_v40, %v23867_v48 }
 0x687   :  { %v3939_v30 = vsel %vm3415_vm3, %v3844_v37, %v3892_v63  ;;  %20631 = vmatpush3.msra.mxu0 %v23840_v6  ;;  %20661 = vmatpush3.msra.mxu1 %v4149_v13  ;;  %v4170_v13 = vand.u32 4294901760, %v4169_v12 }
 0x688   :  { %v23881_v26 = vand.u32 4294901760, %v3939_v30  ;;  %20632 = vmatprep.subr.mxu0 %v23861_v25  ;;  %20662 = vmatprep.subr.mxu1 %v4156_v21  ;;  %v23887_v62 = vand.u32 4294901760, %v23874_v54 }
 0x689   :  { %20633 = vmatpush3.msra.mxu0 %v23861_v25  ;;  %20663 = vmatpush3.msra.mxu1 %v4156_v21  ;;  %v4177_v21 = vand.u32 4294901760, %v4176_v28 }
 0x68a   :  { %v23891_v37 = vsub.f32 %v3939_v30, %v23881_v26  ;;  %20634 = vmatprep.subr.mxu0 %v23881_v26  ;;  %20664 = vmatprep.subr.mxu1 %v4163_v8  ;;  %v4183_v43 = vsub.f32 %v23874_v54, %v23887_v62  ;;  %v23897_v63 = vpop.permute.xlu1 %4808  ;;  %v23903_v30 = vpop.permute.xlu0 %4760 }
 0x68b   :  { %20635 = vmatpush3.msra.mxu0 %v23881_v26  ;;  %20665 = vmatpush3.msra.mxu1 %v4163_v8 }
 0x68c   :  { %20666 = vmatprep.subr.mxu1 %v4170_v13  ;;  %20680 = vmatprep.subr.mxu0 %v23700_v61  ;;  %v23901_v42 = vand.u32 4294901760, %v23891_v37  ;;  %v4184_v12 = vand.u32 4294901760, %v4183_v43 }
 0x68d   :  { %20637 = vmatmul.mubr.f32.vlgmr.msra.gmra.mxu0 %v4055_v44  ;;  %20667 = vmatpush3.msra.mxu1 %v4170_v13  ;;  %v19109_v44 = vld [vmem:[%s28074_s1 + $0x90] sm:$0xff]  ;;  %v19110_v13 = vld [vmem:[%s28074_s1 + $0x98] sm:$0xff] }
 0x68e   :  { %20681 = vmatpush3.msra.mxu0 %v23700_v61  ;;  %20668 = vmatprep.subr.mxu1 %v4177_v21  ;;  %v4190_v8 = vsub.f32 %v23891_v37, %v23901_v42  ;;  %v23914_v61 = vpop.permute.xlu1 %4804  ;;  %v23925_v43 = vand.u32 4294901760, %v19109_v44 }
 0x68f   :  { %20682 = vmatprep.subr.mxu0 %v23723_v22  ;;  %20669 = vmatpush3.msra.mxu1 %v4177_v21 }
 0x690   :  { %20683 = vmatpush3.msra.mxu0 %v23723_v22  ;;  %20670 = vmatprep.subr.mxu1 %v4184_v12  ;;  %v4191_v28 = vand.u32 4294901760, %v4190_v8  ;;  %v23921_v22 = vpop.permute.xlu0 %4756 }
 0x691   :  { %20684 = vmatprep.subr.mxu0 %v23697_v23  ;;  %20671 = vmatpush3.msra.mxu1 %v4184_v12 }
 0x692   :  { %20685 = vmatpush3.msra.mxu0 %v23697_v23  ;;  %20672 = vmatprep.subr.mxu1 %v4191_v28  ;;  %v23929_v23 = vand.u32 4294901760, %v19110_v13  ;;  %v23935_v21 = vpop.permute.xlu1 %4802 }
 0x693   :  { %20686 = vmatprep.subr.mxu0 %v23709_v32  ;;  %20673 = vmatpush3.msra.mxu1 %v4191_v28 }
 0x694   :  { %20687 = vmatpush3.msra.mxu0 %v23709_v32  ;;  %20675 = vmatmul.mubr.f32.vlgmr.msra.gmra.mxu1 %v23801_v45  ;;  %v23940_v32 = vsub.f32 %v19109_v44, %v23925_v43  ;;  %v23947_v12 = vpop.permute.xlu0 %4754 }
 0x695   :  { %20688 = vmatprep.subr.mxu0 %v23720_v57  ;;  %20718 = vmatprep.subr.mxu1 %v23690_v59 }
 0x696   :  { %20689 = vmatpush3.msra.mxu0 %v23720_v57  ;;  %20719 = vmatpush3.msra.mxu1 %v23690_v59  ;;  %v23945_v57 = vsub.f32 %v19110_v13, %v23929_v23  ;;  %v23959_v28 = vpop.permute.xlu1 %4800 }
 0x697   :  { %20690 = vmatprep.subr.mxu0 %v23735_v41  ;;  %20720 = vmatprep.subr.mxu1 %v23711_v50 }
 0x698   :  { %20691 = vmatpush3.msra.mxu0 %v23735_v41  ;;  %20721 = vmatpush3.msra.mxu1 %v23711_v50  ;;  %v4063_v41 = vand.u32 4294901760, %v23940_v32  ;;  %v28085_v8 = vand.u32 4294901760, %v23945_v57 }
 0x699   :  { %20692 = vmatprep.subr.mxu0 %v23749_v56  ;;  %20722 = vmatprep.subr.mxu1 %v23684_v31 }
 0x69a   :  { %20693 = vmatpush3.msra.mxu0 %v23749_v56  ;;  %20723 = vmatpush3.msra.mxu1 %v23684_v31  ;;  %v23965_v56 = vpop.permute.xlu0 %4752 }
 0x69b   :  { %20694 = vmatprep.subr.mxu0 %v23760_v18  ;;  %20724 = vmatprep.subr.mxu1 %v23688_v36 }
 0x69c   :  { %20695 = vmatpush3.msra.mxu0 %v23760_v18  ;;  %20725 = vmatpush3.msra.mxu1 %v23688_v36  ;;  %v4064_v18 = vsub.f32 %v23940_v32, %v4063_v41 }
 0x69d   :  { %20696 = vmatprep.subr.mxu0 %v23773_v27  ;;  %20726 = vmatprep.subr.mxu1 %v23694_v38 }
 0x69e   :  { %20697 = vmatpush3.msra.mxu0 %v23773_v27  ;;  %20727 = vmatpush3.msra.mxu1 %v23694_v38  ;;  %v4074_v27 = vsub.f32 %v23945_v57, %v28085_v8  ;;  %v4065_v44 = vand.u32 4294901760, %v4064_v18  ;;  %v23987_v8 = vpop.permute.xlu0 %4750 }
 0x69f   :  { %20698 = vmatprep.subr.mxu0 %v23793_v35  ;;  %20728 = vmatprep.subr.mxu1 %v23706_v7 }
 0x6a0   :  { %20699 = vmatpush3.msra.mxu0 %v23793_v35  ;;  %20729 = vmatpush3.msra.mxu1 %v23706_v7  ;;  %v23981_v35 = vpop.permute.xlu1 %4798  ;;  %v4075_v13 = vand.u32 4294901760, %v4074_v27 }
 0x6a1   :  { %20700 = vmatprep.subr.mxu0 %v23804_v15  ;;  %20730 = vmatprep.subr.mxu1 %v23717_v29 }
 0x6a2   :  { %20701 = vmatpush3.msra.mxu0 %v23804_v15  ;;  %20731 = vmatpush3.msra.mxu1 %v23717_v29 }
 0x6a3   :  { %20702 = vmatprep.subr.mxu0 %v23817_v16  ;;  %20732 = vmatprep.subr.mxu1 %v23731_v46 }
 0x6a4   :  { %20703 = vmatpush3.msra.mxu0 %v23817_v16  ;;  %20733 = vmatpush3.msra.mxu1 %v23731_v46  ;;  %v23995_v15 = vpop.permute.xlu1 %4796  ;;  %v24001_v16 = vpop.permute.xlu0 %4748 }
 0x6a5   :  { %20704 = vmatprep.subr.mxu0 %v23830_v4  ;;  %20734 = vmatprep.subr.mxu1 %v23744_v58 }
 0x6a6   :  { %20705 = vmatpush3.msra.mxu0 %v23830_v4  ;;  %20735 = vmatpush3.msra.mxu1 %v23744_v58 }
 0x6a7   :  { %20706 = vmatprep.subr.mxu0 %v23851_v40  ;;  %20736 = vmatprep.subr.mxu1 %v23764_v53 }
 0x6a8   :  { %20639 = vmatprep.mubr.f32.mxu0 %v4065_v44  ;;  %20707 = vmatpush3.msra.mxu0 %v23851_v40  ;;  %v24011_v4 = vpop.permute.xlu1 %4794  ;;  %v24017_v40 = vpop.permute.xlu0 %4746 }
 0x6a9   :  { %20737 = vmatpush3.msra.mxu1 %v23764_v53  ;;  %20640 = vmatmul.mubr.f32.gmra.mxu0 %v4075_v13 }
 0x6aa   :  { %20708 = vmatprep.subr.mxu0 %v23874_v54  ;;  %20738 = vmatprep.subr.mxu1 %v23776_v33 }
 0x6ab   :  { %20709 = vmatpush3.msra.mxu0 %v23874_v54  ;;  %20739 = vmatpush3.msra.mxu1 %v23776_v33 }
 0x6ac   :  { %20710 = vmatprep.subr.mxu0 %v23891_v37  ;;  %20740 = vmatprep.subr.mxu1 %v23795_v17  ;;  %v24027_v54 = vpop.permute.xlu1 %4792 }
 0x6ad   :  { %20711 = vmatpush3.msra.mxu0 %v23891_v37  ;;  %20712 = vmatprep.mubr.f32.mxu0 %v23617_v24 }
 0x6ae   :  { %20741 = vmatpush3.msra.mxu1 %v23795_v17  ;;  %20677 = vmatprep.mubr.f32.mxu1 %v23925_v43 }
 0x6af   :  { %20713 = vmatmul.mubr.f32.vlgmr.msra.gmra.mxu0 %v23827_v3  ;;  %20742 = vmatprep.subr.mxu1 %v23819_v51 }
 0x6b0   :  { %20756 = vmatprep.subr.mxu0 %v23714_v55  ;;  %20678 = vmatmul.mubr.f32.gmra.mxu1 %v23929_v23 }
 0x6b1   :  { %20743 = vmatpush3.msra.mxu1 %v23819_v51  ;;  %20757 = vmatpush3.msra.mxu0 %v23714_v55  ;;  %v24033_v55 = vpop.permute.xlu0 %4744 }
 0x6b2   :  { %20744 = vmatprep.subr.mxu1 %v23840_v6  ;;  %20758 = vmatprep.subr.mxu0 %v23739_v10 }
 0x6b3   :  { %20715 = vmatprep.mubr.f32.mxu0 %v23940_v32  ;;  %20745 = vmatpush3.msra.mxu1 %v23840_v6 }
 0x6b4   :  { %20759 = vmatpush3.msra.mxu0 %v23739_v10  ;;  %20746 = vmatprep.subr.mxu1 %v23861_v25  ;;  %v28483_v10 = vand.u32 4294901760, %v23827_v3 }
 0x6b5   :  { %20716 = vmatmul.mubr.f32.gmra.mxu0 %v23945_v57  ;;  %20760 = vmatprep.subr.mxu0 %v23729_v34  ;;  %v4759_v24 = vpop.permute.xlu0 %4758 }
 0x6b6   :  { %20747 = vmatpush3.msra.mxu1 %v23861_v25  ;;  %20761 = vmatpush3.msra.mxu0 %v23729_v34  ;;  %v4807_v34 = vpop.permute.xlu1 %4806 }
 0x6b7   :  { %20748 = vmatprep.subr.mxu1 %v23881_v26  ;;  %20762 = vmatprep.subr.mxu0 %v23742_v39 }
 0x6b8   :  { %20749 = vmatpush3.msra.mxu1 %v23881_v26  ;;  %20750 = vmatprep.mubr.f32.mxu1 %v4043_v19  ;;  %v28484_v19 = vand.u32 4294901760, %v23945_v57 }
 0x6b9   :  { %20763 = vmatpush3.msra.mxu0 %v23742_v39  ;;  %20751 = vmatmul.mubr.f32.vlgmr.msra.gmra.mxu1 %v28483_v10 }
 0x6ba   :  { %20764 = vmatprep.subr.mxu0 %v23757_v52  ;;  %20794 = vmatprep.subr.mxu1 %v23690_v59 }
 0x6bb   :  { %20765 = vmatpush3.msra.mxu0 %v23757_v52  ;;  %20795 = vmatpush3.msra.mxu1 %v23690_v59  ;;  %v24059_v59 = vpop.permute.xlu1 %4790 }
 0x6bc   :  { %20766 = vmatprep.subr.mxu0 %v23770_v20  ;;  %20796 = vmatprep.subr.mxu1 %v23711_v50 }
 0x6bd   :  { %20753 = vmatprep.mubr.f32.mxu1 %v4063_v41  ;;  %20767 = vmatpush3.msra.mxu0 %v23770_v20  ;;  %v4838_v20 = vsel %vm3415_vm3, %v23947_v12, %v23935_v21  ;;  %v4833_v21 = vsel %vm3415_vm3, %v24033_v55, %v24027_v54 }
 0x6be   :  { %20797 = vmatpush3.msra.mxu1 %v23711_v50  ;;  %20768 = vmatprep.subr.mxu0 %v23782_v2  ;;  %v24065_v50 = vpop.permute.xlu0 %4742  ;;  %v24211_v27 = vand.u32 4294901760, %v4833_v21 }
 0x6bf   :  { %20754 = vmatmul.mubr.f32.gmra.mxu1 %v28484_v19  ;;  %20798 = vmatprep.subr.mxu1 %v23684_v31  ;;  %v19112_v19 = vld [vmem:[%s28074_s1 + $0xc8] sm:$0xff] }
 0x6c0   :  { %20769 = vmatpush3.msra.mxu0 %v23782_v2  ;;  %20799 = vmatpush3.msra.mxu1 %v23684_v31  ;;  %v24075_v31 = vpop.permute.xlu1 %4788  ;;  %v24245_v10 = vsub.f32 %v4833_v21, %v24211_v27 }
 0x6c1   :  { %20770 = vmatprep.subr.mxu0 %v23790_v47  ;;  %20800 = vmatprep.subr.mxu1 %v23688_v36 }
 0x6c2   :  { %20771 = vmatpush3.msra.mxu0 %v23790_v47  ;;  %20801 = vmatpush3.msra.mxu1 %v23688_v36  ;;  %v4841_v36 = vsel %vm3415_vm3, %v23903_v30, %v23897_v63  ;;  %v4834_v30 = vsel %vm3415_vm3, %v24017_v40, %v24011_v4 }
 0x6c3   :  { %20772 = vmatprep.subr.mxu0 %v23810_v14  ;;  %20802 = vmatprep.subr.mxu1 %v23694_v38  ;;  %v24193_v12 = vand.u32 4294901760, %v4834_v30 }
 0x6c4   :  { %20773 = vmatpush3.msra.mxu0 %v23810_v14  ;;  %20803 = vmatpush3.msra.mxu1 %v23694_v38  ;;  %v24084_v38 = vpop.permute.xlu0 %4740  ;;  %v24102_v52 = vpop.permute.xlu1 %4786 }
 0x6c5   :  { %20774 = vmatprep.subr.mxu0 %v23823_v0  ;;  %20804 = vmatprep.subr.mxu1 %v23706_v7  ;;  %v4831_v44 = vsel %vm3415_vm3, %v24084_v38, %v24075_v31  ;;  %v24225_v13 = vsub.f32 %v4834_v30, %v24193_v12 }
 0x6c6   :  { %20775 = vmatpush3.msra.mxu0 %v23823_v0  ;;  %20805 = vmatpush3.msra.mxu1 %v23706_v7  ;;  %v4840_v7 = vsel %vm3415_vm3, %v4759_v24, %v4807_v34  ;;  %v24130_v0 = vand.u32 4294901760, %v4838_v20  ;;  %v24247_v34 = vand.u32 4294901760, %v4831_v44 }
 0x6c7   :  { %20776 = vmatprep.subr.mxu0 %v23836_v49  ;;  %20806 = vmatprep.subr.mxu1 %v23717_v29  ;;  %v24100_v39 = vand.u32 4294901760, %v4840_v7 }
 0x6c8   :  { %20777 = vmatpush3.msra.mxu0 %v23836_v49  ;;  %20807 = vmatpush3.msra.mxu1 %v23717_v29  ;;  %v24091_v29 = vand.u32 4294901760, %v4841_v36  ;;  %v24114_v2 = vpop.permute.xlu0 %4738  ;;  %v24139_v49 = vpop.permute.xlu1 %4784  ;;  %v24162_v63 = vsub.f32 %v4838_v20, %v24130_v0 }
 0x6c9   :  { %20778 = vmatprep.subr.mxu0 %v23846_v5  ;;  %20808 = vmatprep.subr.mxu1 %v23731_v46  ;;  %v24126_v14 = vsub.f32 %v4840_v7, %v24100_v39  ;;  %v4830_v4 = vsel %vm3415_vm3, %v24114_v2, %v24102_v52  ;;  %v24273_v2 = vand.u32 4294901760, %v19112_v19 }
 0x6ca   :  { %20779 = vmatpush3.msra.mxu0 %v23846_v5  ;;  %20809 = vmatpush3.msra.mxu1 %v23731_v46  ;;  %v4839_v46 = vsel %vm3415_vm3, %v23921_v22, %v23914_v61  ;;  %v24198_v41 = vand.u32 4294901760, %v24162_v63  ;;  %v24264_v38 = vand.u32 4294901760, %v4830_v4 }
 0x6cb   :  { %20780 = vmatprep.subr.mxu0 %v23857_v9  ;;  %20810 = vmatprep.subr.mxu1 %v23744_v58  ;;  %v24118_v47 = vand.u32 4294901760, %v4839_v46  ;;  %v24159_v37 = vand.u32 4294901760, %v24126_v14 }
 0x6cc   :  { %20781 = vmatpush3.msra.mxu0 %v23857_v9  ;;  %20811 = vmatpush3.msra.mxu1 %v23744_v58  ;;  %v24109_v58 = vsub.f32 %v4841_v36, %v24091_v29  ;;  %v4783_v32 = vpop.permute.xlu1 %4782 }
 0x6cd   :  { %20782 = vmatprep.subr.mxu0 %v23867_v48  ;;  %20812 = vmatprep.subr.mxu1 %v23764_v53  ;;  %v4979_v57 = vsub.f32 %v24126_v14, %v24159_v37 }
 0x6ce   :  { %20783 = vmatpush3.msra.mxu0 %v23867_v48  ;;  %20813 = vmatpush3.msra.mxu1 %v23764_v53  ;;  %v4837_v53 = vsel %vm3415_vm3, %v23965_v56, %v23959_v28  ;;  %v24144_v5 = vand.u32 4294901760, %v24109_v58  ;;  %v4737_v48 = vpop.permute.xlu0 %4736 }
 0x6cf   :  { %20784 = vmatprep.subr.mxu0 %v23887_v62  ;;  %20814 = vmatprep.subr.mxu1 %v23776_v33  ;;  %v24137_v3 = vand.u32 4294901760, %v4837_v53 }
 0x6d0   :  { %20785 = vmatpush3.msra.mxu0 %v23887_v62  ;;  %20815 = vmatpush3.msra.mxu1 %v23776_v33  ;;  %v4836_v33 = vsel %vm3415_vm3, %v23987_v8, %v23981_v35  ;;  %v24147_v62 = vsub.f32 %v4839_v46, %v24118_v47  ;;  %v4972_v61 = vsub.f32 %v24109_v58, %v24144_v5  ;;  %v4781_v40 = vpop.permute.xlu1 %4780  ;;  %v24268_v46 = vand.u32 4294901760, %v24225_v13 }
 0x6d1   :  { %20786 = vmatprep.subr.mxu0 %v23901_v42  ;;  %20816 = vmatprep.subr.mxu1 %v23795_v17  ;;  %v24154_v9 = vand.u32 4294901760, %v4836_v33 }
 0x6d2   :  { %20787 = vmatpush3.msra.mxu0 %v23901_v42  ;;  %20788 = vmatprep.mubr.f32.mxu0 %v23610_v1  ;;  %v4735_v28 = vpop.permute.xlu0 %4734  ;;  %v4973_v56 = vand.u32 4294901760, %v4972_v61  ;;  %v24290_v61 = vsub.f32 %v4830_v4, %v24264_v38 }
 0x6d3   :  { %20817 = vmatpush3.msra.mxu1 %v23795_v17  ;;  %20789 = vmatmul.mubr.f32.vlgmr.msra.gmra.mxu0 %v23801_v45  ;;  %v4835_v17 = vsel %vm3415_vm3, %v24001_v16, %v23995_v15  ;;  %v24184_v22 = vsub.f32 %v4836_v33, %v24154_v9  ;;  %v19111_v16 = vld [vmem:[%s28074_s1 + $0xc0] sm:$0xff] }
 0x6d4   :  { %20818 = vmatprep.subr.mxu1 %v23819_v51  ;;  %20832 = vmatprep.subr.mxu0 %v24091_v29  ;;  %v24169_v42 = vand.u32 4294901760, %v4835_v17  ;;  %v24259_v36 = vand.u32 4294901760, %v19111_v16 }
 0x6d5   :  { %20819 = vmatpush3.msra.mxu1 %v23819_v51  ;;  %20833 = vmatpush3.msra.mxu0 %v24091_v29  ;;  %v24167_v51 = vsub.f32 %v4837_v53, %v24137_v3  ;;  %v24276_v53 = vsub.f32 %v4831_v44, %v24247_v34 }
 0x6d6   :  { %20820 = vmatprep.subr.mxu1 %v23840_v6  ;;  %20834 = vmatprep.subr.mxu0 %v24100_v39  ;;  %v24201_v8 = vsub.f32 %v4835_v17, %v24169_v42  ;;  %v4779_v17 = vpop.permute.xlu1 %4778  ;;  %v24287_v30 = vsub.f32 %v19111_v16, %v24259_v36 }
 0x6d7   :  { %20791 = vmatprep.mubr.f32.mxu0 %v23925_v43  ;;  %20821 = vmatpush3.msra.mxu1 %v23840_v6  ;;  %v24181_v6 = vand.u32 4294901760, %v24147_v62  ;;  %v24209_v18 = vand.u32 4294901760, %v24167_v51  ;;  %v24313_v16 = vand.u32 4294901760, %v24276_v53 }
 0x6d8   :  { %20835 = vmatpush3.msra.mxu0 %v24100_v39  ;;  %20822 = vmatprep.subr.mxu1 %v23861_v25  ;;  %v24242_v55 = vand.u32 4294901760, %v24201_v8 }
 0x6d9   :  { %20792 = vmatmul.mubr.f32.gmra.mxu0 %v23929_v23  ;;  %20836 = vmatprep.subr.mxu0 %v24118_v47  ;;  %v4986_v35 = vsub.f32 %v24147_v62, %v24181_v6  ;;  %v5000_v54 = vsub.f32 %v24167_v51, %v24209_v18 }
 0x6da   :  { %20823 = vmatpush3.msra.mxu1 %v23861_v25  ;;  %20837 = vmatpush3.msra.mxu0 %v24118_v47  ;;  %v4832_v25 = vsel %vm3415_vm3, %v24065_v50, %v24059_v59  ;;  %v4829_v59 = vsel %vm3415_vm3, %v4737_v48, %v24139_v49  ;;  %v4733_v50 = vpop.permute.xlu0 %4732  ;;  %v5014_v20 = vsub.f32 %v24201_v8, %v24242_v55  ;;  %v24283_v49 = vand.u32 4294901760, %v24245_v10 }
 0x6db   :  { %20824 = vmatprep.subr.mxu1 %v23881_v26  ;;  %20838 = vmatprep.subr.mxu0 %v24130_v0  ;;  %v24227_v15 = vand.u32 4294901760, %v4832_v25  ;;  %v4987_v24 = vand.u32 4294901760, %v4986_v35  ;;  %v5001_v52 = vand.u32 4294901760, %v5000_v54  ;;  %v24278_v33 = vand.u32 4294901760, %v4829_v59 }
 0x6dc   :  { %20825 = vmatpush3.msra.mxu1 %v23881_v26  ;;  %20826 = vmatprep.mubr.f32.mxu1 %v23610_v1  ;;  %v4980_v1 = vand.u32 4294901760, %v4979_v57  ;;  %v24222_v26 = vand.u32 4294901760, %v24184_v22  ;;  %v4827_v21 = vsel %vm3415_vm3, %v4733_v50, %v4781_v40  ;;  %v24303_v35 = vsub.f32 %v19112_v19, %v24273_v2 }
 0x6dd   :  { %20839 = vmatpush3.msra.mxu0 %v24130_v0  ;;  %20827 = vmatmul.mubr.f32.vlgmr.msra.gmra.mxu1 %v23801_v45  ;;  %v4993_v45 = vsub.f32 %v24162_v63, %v24198_v41  ;;  %v24306_v44 = vsub.f32 %v4829_v59, %v24278_v33  ;;  %v24315_v4 = vand.u32 4294901760, %v4827_v21  ;;  %v28087_v19 = vand.u32 4294901760, %v24287_v30 }
 0x6de   :  { %20840 = vmatprep.subr.mxu0 %v24137_v3  ;;  %20870 = vmatprep.subr.mxu1 %v4973_v56  ;;  %v5007_v31 = vsub.f32 %v24184_v22, %v24222_v26 }
 0x6df   :  { %20841 = vmatpush3.msra.mxu0 %v24137_v3  ;;  %20871 = vmatpush3.msra.mxu1 %v4973_v56  ;;  %v4994_v7 = vand.u32 4294901760, %v4993_v45  ;;  %v5015_v56 = vand.u32 4294901760, %v5014_v20  ;;  %v5028_v45 = vsub.f32 %v24245_v10, %v24283_v49  ;;  %v24336_v20 = vand.u32 4294901760, %v24306_v44 }
 0x6e0   :  { %20842 = vmatprep.subr.mxu0 %v24154_v9  ;;  %20872 = vmatprep.subr.mxu1 %v4980_v1  ;;  %v5008_v48 = vand.u32 4294901760, %v5007_v31  ;;  %v28086_v31 = vand.u32 4294901760, %v24303_v35 }
 0x6e1   :  { %20829 = vmatprep.mubr.f32.mxu1 %v23925_v43  ;;  %20843 = vmatpush3.msra.mxu0 %v24154_v9  ;;  %v24262_v43 = vsub.f32 %v4832_v25, %v24227_v15 }
 0x6e2   :  { %20873 = vmatpush3.msra.mxu1 %v4980_v1  ;;  %20844 = vmatprep.subr.mxu0 %v24169_v42 }
 0x6e3   :  { %20830 = vmatmul.mubr.f32.gmra.mxu1 %v23929_v23  ;;  %20874 = vmatprep.subr.mxu1 %v4987_v24  ;;  %v4828_v23 = vsel %vm3415_vm3, %v4735_v28, %v4783_v32  ;;  %v5021_v32 = vsub.f32 %v24225_v13, %v24268_v46  ;;  %v24297_v57 = vand.u32 4294901760, %v24262_v43  ;;  %v4731_v28 = vpop.permute.xlu0 %4730 }
 0x6e4   :  { %20845 = vmatpush3.msra.mxu0 %v24169_v42  ;;  %20875 = vmatpush3.msra.mxu1 %v4987_v24  ;;  %v24299_v25 = vand.u32 4294901760, %v4828_v23  ;;  %v4826_v1 = vsel %vm3415_vm3, %v4731_v28, %v4779_v17  ;;  %v24322_v24 = vand.u32 4294901760, %v24290_v61 }
 0x6e5   :  { %20846 = vmatprep.subr.mxu0 %v24193_v12  ;;  %20876 = vmatprep.subr.mxu1 %v4994_v7  ;;  %v5022_v40 = vand.u32 4294901760, %v5021_v32  ;;  %v5035_v54 = vsub.f32 %v24262_v43, %v24297_v57  ;;  %v24328_v50 = vand.u32 4294901760, %v4826_v1  ;;  %v4931_v32 = vsub.f32 %v24287_v30, %v28087_v19 }
 0x6e6   :  { %20847 = vmatpush3.msra.mxu0 %v24193_v12  ;;  %20877 = vmatpush3.msra.mxu1 %v4994_v7  ;;  %v24326_v59 = vsub.f32 %v4828_v23, %v24299_v25  ;;  %v5029_v7 = vand.u32 4294901760, %v5028_v45  ;;  %v24339_v23 = vsub.f32 %v4827_v21, %v24315_v4  ;;  %v4941_v21 = vsub.f32 %v24303_v35, %v28086_v31 }
 0x6e7   :  { %20848 = vmatprep.subr.mxu0 %v24211_v27  ;;  %20878 = vmatprep.subr.mxu1 %v5001_v52  ;;  %v5036_v17 = vand.u32 4294901760, %v5035_v54  ;;  %v24349_v28 = vsub.f32 %v4826_v1, %v24328_v50 }
 0x6e8   :  { %20849 = vmatpush3.msra.mxu0 %v24211_v27  ;;  %20879 = vmatpush3.msra.mxu1 %v5001_v52  ;;  %v5042_v52 = vsub.f32 %v24276_v53, %v24313_v16  ;;  %v24363_v1 = vand.u32 4294901760, %v24339_v23  ;;  %v4942_v31 = vand.u32 4294901760, %v4941_v21 }
 0x6e9   :  { %20850 = vmatprep.subr.mxu0 %v24227_v15  ;;  %20880 = vmatprep.subr.mxu1 %v5008_v48  ;;  %v24370_v19 = vand.u32 4294901760, %v24349_v28 }
 0x6ea   :  { %20851 = vmatpush3.msra.mxu0 %v24227_v15  ;;  %20881 = vmatpush3.msra.mxu1 %v5008_v48  ;;  %v5049_v48 = vsub.f32 %v24290_v61, %v24322_v24  ;;  %v5043_v45 = vand.u32 4294901760, %v5042_v52 }
 0x6eb   :  { %20852 = vmatprep.subr.mxu0 %v24247_v34  ;;  %20882 = vmatprep.subr.mxu1 %v5015_v56  ;;  %v5077_v21 = vsub.f32 %v24349_v28, %v24370_v19 }
 0x6ec   :  { %20853 = vmatpush3.msra.mxu0 %v24247_v34  ;;  %20883 = vmatpush3.msra.mxu1 %v5015_v56  ;;  %v24356_v56 = vand.u32 4294901760, %v24326_v59  ;;  %v5050_v54 = vand.u32 4294901760, %v5049_v48  ;;  %v5070_v48 = vsub.f32 %v24339_v23, %v24363_v1 }
 0x6ed   :  { %20854 = vmatprep.subr.mxu0 %v24264_v38  ;;  %20884 = vmatprep.subr.mxu1 %v5022_v40 }
 0x6ee   :  { %20855 = vmatpush3.msra.mxu0 %v24264_v38  ;;  %20885 = vmatpush3.msra.mxu1 %v5022_v40  ;;  %v5056_v40 = vsub.f32 %v24306_v44, %v24336_v20  ;;  %v5063_v52 = vsub.f32 %v24326_v59, %v24356_v56 }
 0x6ef   :  { %20856 = vmatprep.subr.mxu0 %v24278_v33  ;;  %20886 = vmatprep.subr.mxu1 %v5029_v7 }
 0x6f0   :  { %20857 = vmatpush3.msra.mxu0 %v24278_v33  ;;  %20887 = vmatpush3.msra.mxu1 %v5029_v7  ;;  %v4932_v7 = vand.u32 4294901760, %v4931_v32  ;;  %v5064_v32 = vand.u32 4294901760, %v5063_v52 }
 0x6f1   :  { %20858 = vmatprep.subr.mxu0 %v24299_v25  ;;  %20888 = vmatprep.subr.mxu1 %v5036_v17 }
 0x6f2   :  { %20859 = vmatpush3.msra.mxu0 %v24299_v25  ;;  %20889 = vmatpush3.msra.mxu1 %v5036_v17  ;;  %v5057_v17 = vand.u32 4294901760, %v5056_v40  ;;  %v5078_v40 = vand.u32 4294901760, %v5077_v21 }
 0x6f3   :  { %20860 = vmatprep.subr.mxu0 %v24315_v4  ;;  %20890 = vmatprep.subr.mxu1 %v5043_v45 }
 0x6f4   :  { %20861 = vmatpush3.msra.mxu0 %v24315_v4  ;;  %20891 = vmatpush3.msra.mxu1 %v5043_v45  ;;  %v5071_v45 = vand.u32 4294901760, %v5070_v48 }
 0x6f5   :  { %20862 = vmatprep.subr.mxu0 %v24328_v50  ;;  %20892 = vmatprep.subr.mxu1 %v5050_v54 }
 0x6f6   :  { %20863 = vmatpush3.msra.mxu0 %v24328_v50  ;;  %20893 = vmatpush3.msra.mxu1 %v5050_v54 }
 0x6f7   :  { %20864 = vmatprep.mubr.f32.mxu0 %v4932_v7  ;;  %20894 = vmatprep.subr.mxu1 %v5057_v17 }
 0x6f8   :  { %20908 = vmatprep.subr.mxu0 %v24109_v58  ;;  %20865 = vmatmul.mubr.f32.vlgmr.msra.gmra.mxu0 %v4942_v31  ;;  %v19113_v31 = vld [vmem:[%s28074_s1 + $0xd0] sm:$0xff] }
 0x6f9   :  { %20895 = vmatpush3.msra.mxu1 %v5057_v17  ;;  %20909 = vmatpush3.msra.mxu0 %v24109_v58  ;;  %v19114_v58 = vld [vmem:[%s28074_s1 + $0xd8] sm:$0xff] }
 0x6fa   :  { %20896 = vmatprep.subr.mxu1 %v5064_v32  ;;  %20910 = vmatprep.subr.mxu0 %v24126_v14 }
 0x6fb   :  { %20897 = vmatpush3.msra.mxu1 %v5064_v32  ;;  %20911 = vmatpush3.msra.mxu0 %v24126_v14  ;;  %v24394_v14 = vand.u32 4294901760, %v19113_v31 }
 0x6fc   :  { %20898 = vmatprep.subr.mxu1 %v5071_v45  ;;  %20912 = vmatprep.subr.mxu0 %v24147_v62 }
 0x6fd   :  { %20899 = vmatpush3.msra.mxu1 %v5071_v45  ;;  %20913 = vmatpush3.msra.mxu0 %v24147_v62  ;;  %v24398_v62 = vand.u32 4294901760, %v19114_v58 }
 0x6fe   :  { %20900 = vmatprep.subr.mxu1 %v5078_v40  ;;  %20914 = vmatprep.subr.mxu0 %v24162_v63 }
 0x6ff   :  { %20901 = vmatpush3.msra.mxu1 %v5078_v40  ;;  %20902 = vmatprep.mubr.f32.mxu1 %v24259_v36  ;;  %v24412_v54 = vsub.f32 %v19114_v58, %v24398_v62 }
 0x700   :  { %20915 = vmatpush3.msra.mxu0 %v24162_v63  ;;  %20903 = vmatmul.mubr.f32.vlgmr.msra.gmra.mxu1 %v24273_v2  ;;  %v24407_v63 = vsub.f32 %v19113_v31, %v24394_v14 }
 0x701   :  { %20916 = vmatprep.subr.mxu0 %v24167_v51  ;;  %20946 = vmatprep.subr.mxu1 %v24091_v29 }
 0x702   :  { %20917 = vmatpush3.msra.mxu0 %v24167_v51  ;;  %20947 = vmatpush3.msra.mxu1 %v24091_v29  ;;  %v4950_v51 = vand.u32 4294901760, %v24407_v63 }
 0x703   :  { %20918 = vmatprep.subr.mxu0 %v24184_v22  ;;  %20948 = vmatprep.subr.mxu1 %v24100_v39 }
 0x704   :  { %20919 = vmatpush3.msra.mxu0 %v24184_v22  ;;  %20949 = vmatpush3.msra.mxu1 %v24100_v39  ;;  %v4960_v22 = vand.u32 4294901760, %v24412_v54 }
 0x705   :  { %20920 = vmatprep.subr.mxu0 %v24201_v8  ;;  %20950 = vmatprep.subr.mxu1 %v24118_v47 }
 0x706   :  { %20921 = vmatpush3.msra.mxu0 %v24201_v8  ;;  %20951 = vmatpush3.msra.mxu1 %v24118_v47  ;;  %v4951_v8 = vsub.f32 %v24407_v63, %v4950_v51 }
 0x707   :  { %20922 = vmatprep.subr.mxu0 %v24225_v13  ;;  %20952 = vmatprep.subr.mxu1 %v24130_v0 }
 0x708   :  { %20923 = vmatpush3.msra.mxu0 %v24225_v13  ;;  %20953 = vmatpush3.msra.mxu1 %v24130_v0  ;;  %v4961_v13 = vsub.f32 %v24412_v54, %v4960_v22 }
 0x709   :  { %20924 = vmatprep.subr.mxu0 %v24245_v10  ;;  %20954 = vmatprep.subr.mxu1 %v24137_v3 }
 0x70a   :  { %20925 = vmatpush3.msra.mxu0 %v24245_v10  ;;  %20955 = vmatpush3.msra.mxu1 %v24137_v3  ;;  %v4952_v10 = vand.u32 4294901760, %v4951_v8 }
 0x70b   :  { %20926 = vmatprep.subr.mxu0 %v24262_v43  ;;  %20956 = vmatprep.subr.mxu1 %v24154_v9 }
 0x70c   :  { %20927 = vmatpush3.msra.mxu0 %v24262_v43  ;;  %20957 = vmatpush3.msra.mxu1 %v24154_v9  ;;  %v4962_v43 = vand.u32 4294901760, %v4961_v13 }
 0x70d   :  { %20928 = vmatprep.subr.mxu0 %v24276_v53  ;;  %20958 = vmatprep.subr.mxu1 %v24169_v42 }
 0x70e   :  { %20929 = vmatpush3.msra.mxu0 %v24276_v53  ;;  %20959 = vmatpush3.msra.mxu1 %v24169_v42 }
 0x70f   :  { %20930 = vmatprep.subr.mxu0 %v24290_v61  ;;  %20960 = vmatprep.subr.mxu1 %v24193_v12 }
 0x710   :  { %20931 = vmatpush3.msra.mxu0 %v24290_v61  ;;  %20961 = vmatpush3.msra.mxu1 %v24193_v12 }
 0x711   :  { %20932 = vmatprep.subr.mxu0 %v24306_v44  ;;  %20962 = vmatprep.subr.mxu1 %v24211_v27 }
 0x712   :  { %20933 = vmatpush3.msra.mxu0 %v24306_v44  ;;  %20963 = vmatpush3.msra.mxu1 %v24211_v27 }
 0x713   :  { %20934 = vmatprep.subr.mxu0 %v24326_v59  ;;  %20964 = vmatprep.subr.mxu1 %v24227_v15 }
 0x714   :  { %20867 = vmatprep.mubr.f32.mxu0 %v4952_v10  ;;  %20935 = vmatpush3.msra.mxu0 %v24326_v59 }
 0x715   :  { %20965 = vmatpush3.msra.mxu1 %v24227_v15  ;;  %20868 = vmatmul.mubr.f32.gmra.mxu0 %v4962_v43 }
 0x716   :  { %20936 = vmatprep.subr.mxu0 %v24339_v23  ;;  %20966 = vmatprep.subr.mxu1 %v24247_v34 }
 0x717   :  { %20937 = vmatpush3.msra.mxu0 %v24339_v23  ;;  %20967 = vmatpush3.msra.mxu1 %v24247_v34 }
 0x718   :  { %20938 = vmatprep.subr.mxu0 %v24349_v28  ;;  %20968 = vmatprep.subr.mxu1 %v24264_v38 }
 0x719   :  { %20939 = vmatpush3.msra.mxu0 %v24349_v28  ;;  %20940 = vmatprep.mubr.f32.mxu0 %v24287_v30 }
 0x71a   :  { %20969 = vmatpush3.msra.mxu1 %v24264_v38  ;;  %20905 = vmatprep.mubr.f32.mxu1 %v24394_v14 }
 0x71b   :  { %20941 = vmatmul.mubr.f32.vlgmr.msra.gmra.mxu0 %v24303_v35  ;;  %20970 = vmatprep.subr.mxu1 %v24278_v33 }
 0x71c   :  { %20984 = vmatprep.subr.mxu0 %v24144_v5  ;;  %20906 = vmatmul.mubr.f32.gmra.mxu1 %v24398_v62 }
 0x71d   :  { %20971 = vmatpush3.msra.mxu1 %v24278_v33  ;;  %20985 = vmatpush3.msra.mxu0 %v24144_v5  ;;  %v28485_v5 = vand.u32 4294901760, %v24287_v30 }
 0x71e   :  { %20972 = vmatprep.subr.mxu1 %v24299_v25  ;;  %20986 = vmatprep.subr.mxu0 %v24159_v37 }
 0x71f   :  { %20943 = vmatprep.mubr.f32.mxu0 %v24407_v63  ;;  %20973 = vmatpush3.msra.mxu1 %v24299_v25 }
 0x720   :  { %20987 = vmatpush3.msra.mxu0 %v24159_v37  ;;  %20974 = vmatprep.subr.mxu1 %v24315_v4  ;;  %v28486_v37 = vand.u32 4294901760, %v24303_v35 }
 0x721   :  { %20944 = vmatmul.mubr.f32.gmra.mxu0 %v24412_v54  ;;  %20988 = vmatprep.subr.mxu0 %v24181_v6 }
 0x722   :  { %20975 = vmatpush3.msra.mxu1 %v24315_v4  ;;  %20989 = vmatpush3.msra.mxu0 %v24181_v6 }
 0x723   :  { %20976 = vmatprep.subr.mxu1 %v24328_v50  ;;  %20990 = vmatprep.subr.mxu0 %v24198_v41 }
 0x724   :  { %20977 = vmatpush3.msra.mxu1 %v24328_v50  ;;  %20978 = vmatprep.mubr.f32.mxu1 %v28485_v5 }
 0x725   :  { %20991 = vmatpush3.msra.mxu0 %v24198_v41  ;;  %20979 = vmatmul.mubr.f32.vlgmr.msra.gmra.mxu1 %v28486_v37 }
 0x726   :  { %20992 = vmatprep.subr.mxu0 %v24209_v18  ;;  %21022 = vmatprep.subr.mxu1 %v24091_v29 }
 0x727   :  { %20993 = vmatpush3.msra.mxu0 %v24209_v18  ;;  %21023 = vmatpush3.msra.mxu1 %v24091_v29  ;;  %v19118_v29 = vld [vmem:[%s28075_s2 + $0x250] sm:$0xff] }
 0x728   :  { %20994 = vmatprep.subr.mxu0 %v24222_v26  ;;  %21024 = vmatprep.subr.mxu1 %v24100_v39 }
 0x729   :  { %20981 = vmatprep.mubr.f32.mxu1 %v4950_v51  ;;  %20995 = vmatpush3.msra.mxu0 %v24222_v26 }
 0x72a   :  { %21025 = vmatpush3.msra.mxu1 %v24100_v39  ;;  %20996 = vmatprep.subr.mxu0 %v24242_v55  ;;  %v5637_v39 = vsel %vm5635_vm7, %v19118_v29, 0 }
 0x72b   :  { %20982 = vmatmul.mubr.f32.gmra.mxu1 %v4960_v22  ;;  %21026 = vmatprep.subr.mxu1 %v24118_v47 }
 0x72c   :  { %20997 = vmatpush3.msra.mxu0 %v24242_v55  ;;  %21027 = vmatpush3.msra.mxu1 %v24118_v47  ;;  %v24558_v47 = vand.u32 4294901760, %v5637_v39 }
 0x72d   :  { %20998 = vmatprep.subr.mxu0 %v24268_v46  ;;  %21028 = vmatprep.subr.mxu1 %v24130_v0 }
 0x72e   :  { %20999 = vmatpush3.msra.mxu0 %v24268_v46  ;;  %21029 = vmatpush3.msra.mxu1 %v24130_v0  ;;  %v19117_v0 = vld [vmem:[%s28075_s2 + $0x240] sm:$0xff] }
 0x72f   :  { %21000 = vmatprep.subr.mxu0 %v24283_v49  ;;  %21030 = vmatprep.subr.mxu1 %v24137_v3 }
 0x730   :  { %21001 = vmatpush3.msra.mxu0 %v24283_v49  ;;  %21031 = vmatpush3.msra.mxu1 %v24137_v3  ;;  %v24564_v3 = vsub.f32 %v5637_v39, %v24558_v47 }
 0x731   :  { %21002 = vmatprep.subr.mxu0 %v24297_v57  ;;  %21032 = vmatprep.subr.mxu1 %v24154_v9 }
 0x732   :  { %21003 = vmatpush3.msra.mxu0 %v24297_v57  ;;  %21033 = vmatpush3.msra.mxu1 %v24154_v9  ;;  %v24566_v9 = vand.u32 4294901760, %v19117_v0 }
 0x733   :  { %21004 = vmatprep.subr.mxu0 %v24313_v16  ;;  %21034 = vmatprep.subr.mxu1 %v24169_v42 }
 0x734   :  { %21005 = vmatpush3.msra.mxu0 %v24313_v16  ;;  %21035 = vmatpush3.msra.mxu1 %v24169_v42  ;;  %v24571_v42 = vand.u32 4294901760, %v24564_v3  ;;  %v24574_v6 = vsub.f32 %v19117_v0, %v24566_v9 }
 0x735   :  { %21006 = vmatprep.subr.mxu0 %v24322_v24  ;;  %21036 = vmatprep.subr.mxu1 %v24193_v12 }
 0x736   :  { %21007 = vmatpush3.msra.mxu0 %v24322_v24  ;;  %21037 = vmatpush3.msra.mxu1 %v24193_v12  ;;  %v5778_v12 = vsub.f32 %v24564_v3, %v24571_v42  ;;  %v24581_v41 = vand.u32 4294901760, %v24574_v6 }
 0x737   :  { %21008 = vmatprep.subr.mxu0 %v24336_v20  ;;  %21038 = vmatprep.subr.mxu1 %v24211_v27 }
 0x738   :  { %21009 = vmatpush3.msra.mxu0 %v24336_v20  ;;  %21039 = vmatpush3.msra.mxu1 %v24211_v27  ;;  %v24584_v18 = vand.u32 4294901760, %v5778_v12  ;;  %v5785_v27 = vsub.f32 %v24574_v6, %v24581_v41 }
 0x739   :  { %21010 = vmatprep.subr.mxu0 %v24356_v56  ;;  %21040 = vmatprep.subr.mxu1 %v24227_v15 }
 0x73a   :  { %21011 = vmatpush3.msra.mxu0 %v24356_v56  ;;  %21041 = vmatpush3.msra.mxu1 %v24227_v15  ;;  %v24589_v26 = vand.u32 4294901760, %v5785_v27  ;;  %v19116_v27 = vld [vmem:[%s28075_s2 + $0x190] sm:$0xff] }
 0x73b   :  { %21012 = vmatprep.subr.mxu0 %v24363_v1  ;;  %21042 = vmatprep.subr.mxu1 %v24247_v34 }
 0x73c   :  { %21013 = vmatpush3.msra.mxu0 %v24363_v1  ;;  %21043 = vmatpush3.msra.mxu1 %v24247_v34  ;;  %28487 = vst [vmem:[#allocation57_spill] sm:$0xff] %v24589_v26 }
 0x73d   :  { %21014 = vmatprep.subr.mxu0 %v24370_v19  ;;  %21044 = vmatprep.subr.mxu1 %v24264_v38 }
 0x73e   :  { %21015 = vmatpush3.msra.mxu0 %v24370_v19  ;;  %21016 = vmatprep.mubr.f32.mxu0 %v24259_v36 }
 0x73f   :  { %21045 = vmatpush3.msra.mxu1 %v24264_v38  ;;  %21017 = vmatmul.mubr.f32.vlgmr.msra.gmra.mxu0 %v24273_v2 }
 0x740   :  { %21046 = vmatprep.subr.mxu1 %v24278_v33  ;;  %21019 = vmatprep.mubr.f32.mxu0 %v24394_v14 }
 0x741   :  { %21047 = vmatpush3.msra.mxu1 %v24278_v33  ;;  %21054 = vmatprep.mubr.f32.mxu1 %v24259_v36 }
 0x742   :  { %21048 = vmatprep.subr.mxu1 %v24299_v25  ;;  %21060 = vmatprep.subr.mxu0 %v24558_v47 }
 0x743   :  { %21049 = vmatpush3.msra.mxu1 %v24299_v25  ;;  %21020 = vmatmul.mubr.f32.gmra.mxu0 %v24398_v62 }
 0x744   :  { %21050 = vmatprep.subr.mxu1 %v24315_v4  ;;  %21061 = vmatpush3.msra.mxu0 %v24558_v47 }
 0x745   :  { %21051 = vmatpush3.msra.mxu1 %v24315_v4  ;;  %21062 = vmatprep.subr.mxu0 %v24566_v9 }
 0x746   :  { %21052 = vmatprep.subr.mxu1 %v24328_v50  ;;  %21063 = vmatpush3.msra.mxu0 %v24566_v9 }
 0x747   :  { %21053 = vmatpush3.msra.mxu1 %v24328_v50  ;;  %21080 = vmatprep.subr.mxu0 %v24564_v3 }
 0x748   :  { %21055 = vmatmul.mubr.f32.vlgmr.msra.gmra.mxu1 %v24273_v2  ;;  %21070 = vmatprep.subr.mxu1 %v24584_v18 }
 0x749   :  { %21057 = vmatprep.mubr.f32.mxu1 %v24394_v14  ;;  %21071 = vmatpush3.msra.mxu1 %v24584_v18 }
 0x74a   :  { %21072 = vmatprep.subr.mxu1 %v24589_v26 }
 0x74b   :  { %21073 = vmatpush3.msra.mxu1 %v24589_v26 }
 0x74c   :  { %21058 = vmatmul.mubr.f32.gmra.mxu1 %v24398_v62  ;;  %21090 = vmatprep.subr.mxu1 %v24558_v47 }
 0x74d   :  { %v20638_v15 = vpop.f32.mrf.mxu0 }
 0x74f   :  { %v4047_v55 = vpop.f32.mrf.mxu0 }
 0x754   :  { %v20676_v38 = vpop.f32.mrf.mxu1 }
 0x755   :  { %v4235_v60 = vadd.f32 %v20676_v38, %v20638_v15 }
 0x756   :  { %v4228_v2 = vpop.f32.mrf.mxu1 }
 0x769   :  { %v20641_v34 = vpop.f32.mrf.mxu0 }
 0x76b   :  { %v4067_v36 = vpop.f32.mrf.mxu0 }
 0x76f   :  { %v20714_v46 = vpop.f32.mrf.mxu0 }
 0x770   :  { %v20679_v33 = vpop.f32.mrf.mxu1 }
 0x771   :  { %v24595_v53 = vpop.f32.mrf.mxu0  ;;  %v4247_v11 = vadd.f32 %v20679_v33, %v20641_v34 }
 0x772   :  { %v4240_v30 = vpop.f32.mrf.mxu1 }
 0x775   :  { %v24597_v49 = vpop.f32.mrf.mxu0 }
 0x776   :  { %v4372_v34 = vadd.f32 %v24597_v49, %v4247_v11 }
 0x777   :  { %v24601_v57 = vpop.f32.mrf.mxu0 }
 0x779   :  { %v24599_v61 = vpop.f32.mrf.mxu1 }
 0x77b   :  { %v24605_v35 = vpop.f32.mrf.mxu1 }
 0x77f   :  { %v24609_v16 = vpop.f32.mrf.mxu1 }
 0x781   :  { %v24613_v24 = vpop.f32.mrf.mxu1 }
 0x793   :  { %v24603_v25 = vpop.f32.mrf.mxu0 }
 0x795   :  { %v24607_v44 = vpop.f32.mrf.mxu0 }
 0x799   :  { %v24611_v4 = vpop.f32.mrf.mxu0 }
 0x79b   :  { %v24617_v59 = vpop.f32.mrf.mxu0 }
 0x79d   :  { %v24615_v19 = vpop.f32.mrf.mxu1 }
 0x79f   :  { %v24619_v20 = vpop.f32.mrf.mxu1 }
 0x7a3   :  { %v24621_v28 = vpop.f32.mrf.mxu1 }
 0x7a5   :  { %v24623_v1 = vpop.f32.mrf.mxu1 }
 0x7b8   :  { %v20866_v50 = vpop.f32.mrf.mxu0 }
 0x7ba   :  { %v4934_v23 = vpop.f32.mrf.mxu0 }
 0x7c0   :  { %v20904_v52 = vpop.f32.mrf.mxu1 }
 0x7c1   :  { %v5122_v63 = vadd.f32 %v20904_v52, %v20866_v50 }
 0x7c2   :  { %v5115_v48 = vpop.f32.mrf.mxu1 }
 0x7c3   :  { %v5116_v22 = vadd.f32 %v5115_v48, %v4934_v23  ;;  %v4358_v48 = vadd.f32 %v20714_v46, %v4235_v60 }
 0x7d5   :  { %v20869_v56 = vpop.f32.mrf.mxu0 }
 0x7d7   :  { %v4954_v7 = vpop.f32.mrf.mxu0 }
 0x7db   :  { %v20942_v17 = vpop.f32.mrf.mxu0 }
 0x7dc   :  { %v20907_v32 = vpop.f32.mrf.mxu1  ;;  %v5245_v8 = vadd.f32 %v20942_v17, %v5122_v63 }
 0x7dd   :  { %v5237_v21 = vpop.f32.mrf.mxu0  ;;  %v5134_v13 = vadd.f32 %v20907_v32, %v20869_v56  ;;  %v4229_v56 = vadd.f32 %v4228_v2, %v4047_v55  ;;  %v4469_v55 = vadd.f32 %v24599_v61, %v4358_v48  ;;  %v19115_v61 = vld [vmem:[%s28075_s2 + $0x180] sm:$0xff] }
 0x7de   :  { %v5127_v45 = vpop.f32.mrf.mxu1  ;;  %v5238_v10 = vadd.f32 %v5237_v21, %v5116_v22 }
 0x7df   :  { %v5128_v43 = vadd.f32 %v5127_v45, %v4954_v7  ;;  %v4241_v7 = vadd.f32 %v4240_v30, %v4067_v36  ;;  %v6240_v45 = vsel %vm5635_vm7, %v19116_v27, 0  ;;  %v4351_v15 = vadd.f32 %v24595_v53, %v4229_v56 }
 0x7e0   :  { %v4610_v63 = vadd.f32 %v24603_v25, %v4469_v55 }
 0x7e1   :  { %v20945_v40 = vpop.f32.mrf.mxu0  ;;  %v4365_v33 = vadd.f32 %v24601_v57, %v4241_v7  ;;  %v4461_v30 = vadd.f32 %v24605_v35, %v4351_v15 }
 0x7e2   :  { %v5259_v39 = vadd.f32 %v20945_v40, %v5134_v13  ;;  %v4715_v13 = vadd.f32 %v24615_v19, %v4610_v63 }
 0x7e3   :  { %v5251_v58 = vpop.f32.mrf.mxu0  ;;  %v4604_v57 = vadd.f32 %v24607_v44, %v4461_v30  ;;  %v24667_v44 = vand.u32 4294901760, %v19115_v61 }
 0x7e4   :  { %v5252_v52 = vadd.f32 %v5251_v58, %v5128_v43  ;;  %v4485_v58 = vadd.f32 %v24609_v16, %v4372_v34 }
 0x7e5   :  { %v20980_v31 = vpop.f32.mrf.mxu1 }
 0x7e6   :  { %v5356_v5 = vadd.f32 %v20980_v31, %v5245_v8 }
 0x7e7   :  { %v5347_v14 = vpop.f32.mrf.mxu1 }
 0x7e8   :  { %v5348_v0 = vadd.f32 %v5347_v14, %v5238_v10  ;;  %v4477_v10 = vadd.f32 %v24613_v24, %v4365_v33 }
 0x7ea   :  { %v4616_v27 = vadd.f32 %v24617_v59, %v4477_v10 }
 0x7eb   :  { %v20983_v54 = vpop.f32.mrf.mxu1 }
 0x7ec   :  { %v5372_v26 = vadd.f32 %v20983_v54, %v5259_v39 }
 0x7ed   :  { %v5363_v37 = vpop.f32.mrf.mxu1 }
 0x7ee   :  { %v5364_v40 = vadd.f32 %v5363_v37, %v5252_v52  ;;  %v4622_v37 = vadd.f32 %v24611_v4, %v4485_v58 }
 0x7f0   :  { %v4727_v4 = vadd.f32 %v24621_v28, %v4622_v37 }
 0x7f2   :  { %v6237_v55 = vsel %vm3415_vm3, %v4727_v4, 0 }
 0x7ff   :  { %v21018_v62 = vpop.f32.mrf.mxu0 }
 0x800   :  { %v5497_v12 = vadd.f32 %v21018_v62, %v5356_v5 }
 0x801   :  { %v5490_v51 = vpop.f32.mrf.mxu0 }
 0x802   :  { %v5491_v23 = vadd.f32 %v5490_v51, %v5348_v0 }
 0x803   :  { %v21021_v29 = vpop.f32.mrf.mxu0 }
 0x804   :  { %v5509_v31 = vadd.f32 %v21021_v29, %v5372_v26  ;;  %v24638_v26 = vand.u32 4294901760, %v6240_v45  ;;  %v4709_v29 = vadd.f32 %v24619_v20, %v4604_v57 }
 0x805   :  { %v5502_v32 = vpop.f32.mrf.mxu0 }
 0x806   :  { %v5503_v38 = vadd.f32 %v5502_v32, %v5364_v40  ;;  %v24665_v25 = vsub.f32 %v6240_v45, %v24638_v26  ;;  %v6228_v48 = vsel %vm3415_vm3, %v4709_v29, 0  ;;  %v6231_v45 = vsel %vm3415_vm3, %v4715_v13, 0 }
 0x807   :  { %v24709_v40 = vand.u32 4294901760, %v6228_v48  ;;  %v24718_v15 = vand.u32 4294901760, %v6231_v45 }
 0x808   :  { %v21056_v50 = vpop.f32.mrf.mxu1  ;;  %v24690_v20 = vand.u32 4294901760, %v24665_v25 }
 0x809   :  { %v5602_v17 = vadd.f32 %v21056_v50, %v5497_v12  ;;  %v24693_v50 = vsub.f32 %v19115_v61, %v24667_v44  ;;  %v24723_v34 = vsub.f32 %v6228_v48, %v24709_v40 }
 0x80a   :  { %v5595_v21 = vpop.f32.mrf.mxu1  ;;  %v6381_v7 = vsub.f32 %v24665_v25, %v24690_v20 }
 0x80b   :  { %v5627_v14 = vsel %vm3415_vm3, %v5602_v17, 0  ;;  %v5596_v62 = vadd.f32 %v5595_v21, %v5491_v23  ;;  %6832 = vrot.lane.b32.xlu1 %v5602_v17, %s22346_s26  ;;  %v4721_v17 = vadd.f32 %v24623_v1, %v4616_v27  ;;  %v24704_v32 = vand.u32 4294901760, %v24693_v50 }
 0x80c   :  { %v24634_v60 = vand.u32 4294901760, %v5627_v14  ;;  %v21059_v36 = vpop.f32.mrf.mxu1  ;;  %v6311_v30 = vand.u32 4294901760, %v24723_v34 }
 0x80d   :  { %v5624_v46 = vsel %vm3415_vm3, %v5596_v62, 0  ;;  %v5614_v2 = vadd.f32 %v21059_v36, %v5509_v31  ;;  %6830 = vrot.lane.b32.xlu0 %v5596_v62, %s22346_s26  ;;  %v6234_v31 = vsel %vm3415_vm3, %v4721_v17, 0  ;;  %v6388_v62 = vsub.f32 %v24693_v50, %v24704_v32 }
 0x80e   :  { %v24643_v53 = vsub.f32 %v5627_v14, %v24634_v60  ;;  %v24645_v11 = vand.u32 4294901760, %v5624_v46  ;;  %v5607_v49 = vpop.f32.mrf.mxu1  ;;  %v24714_v14 = vand.u32 4294901760, %v6381_v7  ;;  %v24726_v36 = vand.u32 4294901760, %v6234_v31 }
 0x80f   :  { %v5633_v54 = vsel %vm3415_vm3, %v5614_v2, 0  ;;  %v5608_v51 = vadd.f32 %v5607_v49, %v5503_v38  ;;  %6836 = vrot.lane.b32.xlu1 %v5614_v2, %s22346_s26  ;;  %v24732_v38 = vand.u32 4294901760, %v6388_v62  ;;  %v24736_v2 = vand.u32 4294901760, %v6237_v55 }
 0x810   :  { %v5718_v35 = vand.u32 4294901760, %v24643_v53  ;;  %v5707_v22 = vsub.f32 %v5624_v46, %v24645_v11  ;;  %v24657_v8 = vand.u32 4294901760, %v5633_v54  ;;  %21074 = vmatprep.mubr.f32.mxu1 %v24645_v11  ;;  %v6320_v46 = vsub.f32 %v6231_v45, %v24718_v15 }
 0x811   :  { %v5630_v16 = vsel %vm3415_vm3, %v5608_v51, 0  ;;  %21075 = vmatmul.mubr.f32.vlgmr.msra.gmra.mxu1 %v24634_v60  ;;  %6834 = vrot.lane.b32.xlu0 %v5608_v51, %s22346_s26  ;;  %v6330_v33 = vsub.f32 %v6234_v31, %v24726_v36  ;;  %v6340_v49 = vsub.f32 %v6237_v55, %v24736_v2  ;;  %v6312_v61 = vsub.f32 %v24723_v34, %v6311_v30 }
 0x812   :  { %v24671_v43 = vsub.f32 %v5633_v54, %v24657_v8  ;;  %v24673_v5 = vand.u32 4294901760, %v5630_v16  ;;  %21091 = vmatpush3.msra.mxu1 %v24558_v47  ;;  %v5708_v19 = vand.u32 4294901760, %v5707_v22  ;;  %v5719_v39 = vsub.f32 %v24643_v53, %v5718_v35 }
 0x813   :  { %7436 = vrot.lane.b32.xlu1 %v4715_v13, %s22346_s26  ;;  %21092 = vmatprep.subr.mxu1 %v24566_v9  ;;  %v6331_v58 = vand.u32 4294901760, %v6330_v33  ;;  %v6341_v63 = vand.u32 4294901760, %v6340_v49  ;;  %v6313_v54 = vand.u32 4294901760, %v6312_v61 }
 0x814   :  { %v5738_v24 = vand.u32 4294901760, %v24671_v43  ;;  %v5727_v0 = vsub.f32 %v5630_v16, %v24673_v5  ;;  %21077 = vmatprep.mubr.f32.mxu1 %v24673_v5  ;;  %v5709_v12 = vsub.f32 %v5707_v22, %v5708_v19  ;;  %21093 = vmatpush3.msra.mxu1 %v24566_v9  ;;  %v5720_v59 = vand.u32 4294901760, %v5719_v39 }
 0x815   :  { %7434 = vrot.lane.b32.xlu0 %v4709_v29, %s22346_s26  ;;  %21078 = vmatmul.mubr.f32.gmra.mxu1 %v24657_v8  ;;  %v6332_v51 = vsub.f32 %v6330_v33, %v6331_v58  ;;  %v6342_v57 = vsub.f32 %v6340_v49, %v6341_v63 }
 0x816   :  { %21094 = vmatprep.mubr.f32.mxu1 %v5708_v19  ;;  %v5710_v52 = vand.u32 4294901760, %v5709_v12  ;;  %v5728_v23 = vand.u32 4294901760, %v5727_v0  ;;  %21110 = vmatprep.subr.mxu1 %v24558_v47  ;;  %v5739_v28 = vsub.f32 %v24671_v43, %v5738_v24 }
 0x817   :  { %7440 = vrot.lane.b32.xlu1 %v4727_v4, %s22346_s26 }
 0x818   :  { %21064 = vmatprep.mubr.f32.mxu0 %v5710_v52  ;;  %v5729_v56 = vsub.f32 %v5727_v0, %v5728_v23  ;;  %v5740_v21 = vand.u32 4294901760, %v5739_v28 }
 0x819   :  { %21065 = vmatmul.mubr.f32.vlgmr.msra.gmra.mxu0 %v5720_v59  ;;  %7438 = vrot.lane.b32.xlu0 %v4721_v17, %s22346_s26 }
 0x81a   :  { %21095 = vmatmul.mubr.f32.vlgmr.msra.gmra.mxu1 %v5718_v35  ;;  %v5730_v1 = vand.u32 4294901760, %v5729_v56  ;;  %21081 = vmatpush3.msra.mxu0 %v24564_v3  ;;  %v6333_v35 = vand.u32 4294901760, %v6332_v51 }
 0x81b   :  { %21097 = vmatprep.mubr.f32.mxu1 %v5728_v23  ;;  %21111 = vmatpush3.msra.mxu1 %v24558_v47 }
 0x81c   :  { %21067 = vmatprep.mubr.f32.mxu0 %v5730_v1  ;;  %21082 = vmatprep.subr.mxu0 %v24574_v6 }
 0x81d   :  { %21068 = vmatmul.mubr.f32.gmra.mxu0 %v5740_v21  ;;  %21112 = vmatprep.subr.mxu1 %v24566_v9 }
 0x81e   :  { %21098 = vmatmul.mubr.f32.gmra.mxu1 %v5738_v24  ;;  %21084 = vmatprep.mubr.f32.mxu0 %v5707_v22  ;;  %v6343_v22 = vand.u32 4294901760, %v6342_v57 }
 0x81f   :  { %21114 = vmatprep.mubr.f32.mxu1 %v24645_v11  ;;  %21083 = vmatpush3.msra.mxu0 %v24574_v6 }
 0x820   :  { %21113 = vmatpush3.msra.mxu1 %v24566_v9  ;;  %21100 = vmatprep.subr.mxu0 %v24571_v42 }
 0x821   :  { %21085 = vmatmul.mubr.f32.vlgmr.msra.gmra.mxu0 %v24643_v53  ;;  %21130 = vmatprep.subr.mxu1 %v24714_v14  ;;  %v6321_v53 = vand.u32 4294901760, %v6320_v46 }
 0x822   :  { %21115 = vmatmul.mubr.f32.vlgmr.msra.gmra.mxu1 %v24634_v60  ;;  %21087 = vmatprep.mubr.f32.mxu0 %v5727_v0 }
 0x823   :  { %21117 = vmatprep.mubr.f32.mxu1 %v24673_v5  ;;  %21101 = vmatpush3.msra.mxu0 %v24571_v42 }
 0x824   :  { %21131 = vmatpush3.msra.mxu1 %v24714_v14  ;;  %21102 = vmatprep.subr.mxu0 %v24581_v41 }
 0x825   :  { %21088 = vmatmul.mubr.f32.gmra.mxu0 %v24671_v43  ;;  %21132 = vmatprep.subr.mxu1 %v24732_v38 }
 0x826   :  { %21118 = vmatmul.mubr.f32.gmra.mxu1 %v24657_v8  ;;  %21104 = vmatprep.mubr.f32.mxu0 %v24645_v11  ;;  %v6322_v11 = vsub.f32 %v6320_v46, %v6321_v53 }
 0x827   :  { %21134 = vmatprep.mubr.f32.mxu1 %v24709_v40  ;;  %21103 = vmatpush3.msra.mxu0 %v24581_v41 }
 0x828   :  { %21133 = vmatpush3.msra.mxu1 %v24732_v38  ;;  %21120 = vmatprep.subr.mxu0 %v24638_v26 }
 0x829   :  { %21105 = vmatmul.mubr.f32.vlgmr.msra.gmra.mxu0 %v24634_v60  ;;  %21150 = vmatprep.subr.mxu1 %v24638_v26  ;;  %v6323_v60 = vand.u32 4294901760, %v6322_v11 }
 0x82a   :  { %21135 = vmatmul.mubr.f32.vlgmr.msra.gmra.mxu1 %v24718_v15  ;;  %21107 = vmatprep.mubr.f32.mxu0 %v24673_v5 }
 0x82b   :  { %21137 = vmatprep.mubr.f32.mxu1 %v24726_v36  ;;  %21121 = vmatpush3.msra.mxu0 %v24638_v26 }
 0x82c   :  { %21151 = vmatpush3.msra.mxu1 %v24638_v26  ;;  %21122 = vmatprep.subr.mxu0 %v24667_v44 }
 0x82d   :  { %21108 = vmatmul.mubr.f32.gmra.mxu0 %v24657_v8  ;;  %21152 = vmatprep.subr.mxu1 %v24667_v44  ;;  %v28488_v8 = vld [vmem:[#allocation57_spill] sm:$0xff] }
 0x82e   :  { %21138 = vmatmul.mubr.f32.gmra.mxu1 %v24736_v2  ;;  %21124 = vmatprep.mubr.f32.mxu0 %v6313_v54 }
 0x82f   :  { %21154 = vmatprep.mubr.f32.mxu1 %v6311_v30  ;;  %21123 = vmatpush3.msra.mxu0 %v24667_v44 }
 0x830   :  { %21153 = vmatpush3.msra.mxu1 %v24667_v44  ;;  %21140 = vmatprep.subr.mxu0 %v24665_v25 }
 0x831   :  { %21125 = vmatmul.mubr.f32.vlgmr.msra.gmra.mxu0 %v6323_v60  ;;  %21170 = vmatprep.subr.mxu1 %v24638_v26 }
 0x832   :  { %21155 = vmatmul.mubr.f32.vlgmr.msra.gmra.mxu1 %v6321_v53  ;;  %21127 = vmatprep.mubr.f32.mxu0 %v6333_v35 }
 0x833   :  { %21157 = vmatprep.mubr.f32.mxu1 %v6331_v58  ;;  %21141 = vmatpush3.msra.mxu0 %v24665_v25 }
 0x834   :  { %21171 = vmatpush3.msra.mxu1 %v24638_v26  ;;  %21142 = vmatprep.subr.mxu0 %v24693_v50 }
 0x835   :  { %21128 = vmatmul.mubr.f32.gmra.mxu0 %v6343_v22  ;;  %21172 = vmatprep.subr.mxu1 %v24667_v44 }
 0x836   :  { %21158 = vmatmul.mubr.f32.gmra.mxu1 %v6341_v63  ;;  %21144 = vmatprep.mubr.f32.mxu0 %v24723_v34 }
 0x837   :  { %21174 = vmatprep.mubr.f32.mxu1 %v24709_v40  ;;  %21143 = vmatpush3.msra.mxu0 %v24693_v50 }
 0x838   :  { %21173 = vmatpush3.msra.mxu1 %v24667_v44  ;;  %21160 = vmatprep.subr.mxu0 %v24690_v20 }
 0x839   :  { %21145 = vmatmul.mubr.f32.vlgmr.msra.gmra.mxu0 %v6320_v46  ;;  %21190 = vmatprep.subr.mxu1 %v24584_v18 }
 0x83a   :  { %21175 = vmatmul.mubr.f32.vlgmr.msra.gmra.mxu1 %v24718_v15  ;;  %21147 = vmatprep.mubr.f32.mxu0 %v6330_v33 }
 0x83b   :  { %21177 = vmatprep.mubr.f32.mxu1 %v24726_v36  ;;  %21161 = vmatpush3.msra.mxu0 %v24690_v20 }
 0x83c   :  { %21162 = vmatprep.subr.mxu0 %v24704_v32  ;;  %21191 = vmatpush3.msra.mxu1 %v24584_v18 }
 0x83d   :  { %21148 = vmatmul.mubr.f32.gmra.mxu0 %v6340_v49  ;;  %21192 = vmatprep.subr.mxu1 %v28488_v8 }
 0x83e   :  { %21178 = vmatmul.mubr.f32.gmra.mxu1 %v24736_v2  ;;  %21164 = vmatprep.mubr.f32.mxu0 %v24709_v40 }
 0x83f   :  { %21163 = vmatpush3.msra.mxu0 %v24704_v32  ;;  %21193 = vmatpush3.msra.mxu1 %v28488_v8 }
 0x840   :  { %21180 = vmatprep.subr.mxu0 %v24558_v47  ;;  %21210 = vmatprep.subr.mxu1 %v24558_v47 }
 0x841   :  { %21165 = vmatmul.mubr.f32.vlgmr.msra.gmra.mxu0 %v24718_v15 }
 0x842   :  { %21167 = vmatprep.mubr.f32.mxu0 %v24726_v36  ;;  %21181 = vmatpush3.msra.mxu0 %v24558_v47 }
 0x843   :  { %21182 = vmatprep.subr.mxu0 %v24566_v9 }
 0x844   :  { %21183 = vmatpush3.msra.mxu0 %v24566_v9 }
 0x845   :  { %21168 = vmatmul.mubr.f32.gmra.mxu0 %v24736_v2  ;;  %21200 = vmatprep.subr.mxu0 %v24564_v3 }
 0x87d   :  { %v6833_v18 = vpop.permute.xlu1 %6832 }
 0x87e   :  { %v6840_v13 = vsel %vm3415_vm3, %v6833_v18, 0 }
 0x87f   :  { %v24799_v16 = vand.u32 4294901760, %v6840_v13  ;;  %v6831_v10 = vpop.permute.xlu0 %6830 }
 0x880   :  { %v6838_v43 = vsel %vm3415_vm3, %v6831_v10, 0 }
 0x881   :  { %v6924_v5 = vsub.f32 %v6840_v13, %v24799_v16  ;;  %v24803_v19 = vand.u32 4294901760, %v6838_v43  ;;  %v6837_v37 = vpop.permute.xlu1 %6836 }
 0x882   :  { %v6844_v29 = vsel %vm3415_vm3, %v6837_v37, 0 }
 0x883   :  { %v6925_v39 = vand.u32 4294901760, %v6924_v5  ;;  %v6914_v24 = vsub.f32 %v6838_v43, %v24803_v19  ;;  %v24807_v0 = vand.u32 4294901760, %v6844_v29  ;;  %v6835_v12 = vpop.permute.xlu0 %6834  ;;  %21194 = vmatprep.mubr.f32.mxu1 %v24803_v19 }
 0x884   :  { %v6842_v27 = vsel %vm3415_vm3, %v6835_v12, 0  ;;  %21195 = vmatmul.mubr.f32.vlgmr.msra.gmra.mxu1 %v24799_v16 }
 0x885   :  { %v6944_v4 = vsub.f32 %v6844_v29, %v24807_v0  ;;  %v24813_v52 = vand.u32 4294901760, %v6842_v27  ;;  %21211 = vmatpush3.msra.mxu1 %v24558_v47  ;;  %v6915_v23 = vand.u32 4294901760, %v6914_v24  ;;  %v6926_v17 = vsub.f32 %v6924_v5, %v6925_v39  ;;  %v7437_v40 = vpop.permute.xlu1 %7436 }
 0x886   :  { %21212 = vmatprep.subr.mxu1 %v24566_v9  ;;  %v7444_v36 = vsel %vm3415_vm3, %v7437_v40, 0 }
 0x887   :  { %v6945_v59 = vand.u32 4294901760, %v6944_v4  ;;  %v6934_v28 = vsub.f32 %v6842_v27, %v24813_v52  ;;  %21197 = vmatprep.mubr.f32.mxu1 %v24813_v52  ;;  %21213 = vmatpush3.msra.mxu1 %v24566_v9  ;;  %v7435_v56 = vpop.permute.xlu0 %7434  ;;  %v6916_v48 = vsub.f32 %v6914_v24, %v6915_v23  ;;  %v6927_v21 = vand.u32 4294901760, %v6926_v17 }
 0x888   :  { %21198 = vmatmul.mubr.f32.gmra.mxu1 %v24807_v0  ;;  %21230 = vmatprep.subr.mxu1 %v24558_v47  ;;  %v7442_v62 = vsel %vm3415_vm3, %v7435_v56, 0 }
 0x889   :  { %21214 = vmatprep.mubr.f32.mxu1 %v6915_v23  ;;  %v6935_v7 = vand.u32 4294901760, %v6934_v28  ;;  %v6917_v1 = vand.u32 4294901760, %v6916_v48  ;;  %v6946_v45 = vsub.f32 %v6944_v4, %v6945_v59  ;;  %v24827_v46 = vand.u32 4294901760, %v7442_v62  ;;  %v7441_v2 = vpop.permute.xlu1 %7440 }
 0x88a   :  { %v7448_v30 = vsel %vm3415_vm3, %v7441_v2, 0 }
 0x88b   :  { %v6936_v31 = vsub.f32 %v6934_v28, %v6935_v7  ;;  %21184 = vmatprep.mubr.f32.mxu0 %v6917_v1  ;;  %v7439_v34 = vpop.permute.xlu0 %7438  ;;  %v6947_v55 = vand.u32 4294901760, %v6946_v45  ;;  %v24846_v53 = vand.u32 4294901760, %v7448_v30 }
 0x88c   :  { %21215 = vmatmul.mubr.f32.vlgmr.msra.gmra.mxu1 %v6925_v39  ;;  %21185 = vmatmul.mubr.f32.vlgmr.msra.gmra.mxu0 %v6927_v21  ;;  %v7446_v33 = vsel %vm3415_vm3, %v7439_v34, 0 }
 0x88d   :  { %21217 = vmatprep.mubr.f32.mxu1 %v6935_v7  ;;  %v6937_v15 = vand.u32 4294901760, %v6936_v31  ;;  %21201 = vmatpush3.msra.mxu0 %v24564_v3  ;;  %v7518_v3 = vsub.f32 %v7442_v62, %v24827_v46  ;;  %v7548_v58 = vsub.f32 %v7448_v30, %v24846_v53 }
 0x88e   :  { %21231 = vmatpush3.msra.mxu1 %v24558_v47  ;;  %21202 = vmatprep.subr.mxu0 %v24574_v6  ;;  %v24833_v47 = vand.u32 4294901760, %v7444_v36 }
 0x88f   :  { %21187 = vmatprep.mubr.f32.mxu0 %v6937_v15  ;;  %21203 = vmatpush3.msra.mxu0 %v24574_v6  ;;  %v24839_v6 = vand.u32 4294901760, %v7446_v33  ;;  %v7519_v61 = vand.u32 4294901760, %v7518_v3  ;;  %v7549_v63 = vand.u32 4294901760, %v7548_v58 }
 0x890   :  { %21218 = vmatmul.mubr.f32.gmra.mxu1 %v6945_v59  ;;  %21188 = vmatmul.mubr.f32.gmra.mxu0 %v6947_v55 }
 0x891   :  { %21234 = vmatprep.mubr.f32.mxu1 %v24803_v19  ;;  %21204 = vmatprep.mubr.f32.mxu0 %v6914_v24  ;;  %v7538_v49 = vsub.f32 %v7446_v33, %v24839_v6  ;;  %v7550_v60 = vsub.f32 %v7548_v58, %v7549_v63 }
 0x892   :  { %21232 = vmatprep.subr.mxu1 %v24566_v9  ;;  %21220 = vmatprep.subr.mxu0 %v24571_v42 }
 0x893   :  { %21233 = vmatpush3.msra.mxu1 %v24566_v9  ;;  %v7528_v9 = vsub.f32 %v7444_v36, %v24833_v47  ;;  %v7551_v35 = vand.u32 4294901760, %v7550_v60 }
 0x894   :  { %21235 = vmatmul.mubr.f32.vlgmr.msra.gmra.mxu1 %v24799_v16  ;;  %21250 = vmatprep.subr.mxu1 %v24714_v14 }
 0x895   :  { %21205 = vmatmul.mubr.f32.vlgmr.msra.gmra.mxu0 %v6924_v5  ;;  %21237 = vmatprep.mubr.f32.mxu1 %v24813_v52 }
 0x896   :  { %21207 = vmatprep.mubr.f32.mxu0 %v6934_v28  ;;  %21221 = vmatpush3.msra.mxu0 %v24571_v42  ;;  %v7529_v42 = vand.u32 4294901760, %v7528_v9 }
 0x897   :  { %21222 = vmatprep.subr.mxu0 %v24581_v41  ;;  %21251 = vmatpush3.msra.mxu1 %v24714_v14  ;;  %v7539_v14 = vand.u32 4294901760, %v7538_v49 }
 0x898   :  { %21238 = vmatmul.mubr.f32.gmra.mxu1 %v24807_v0  ;;  %21223 = vmatpush3.msra.mxu0 %v24581_v41  ;;  %v7520_v41 = vsub.f32 %v7518_v3, %v7519_v61  ;;  %v7530_v11 = vsub.f32 %v7528_v9, %v7529_v42 }
 0x899   :  { %21208 = vmatmul.mubr.f32.gmra.mxu0 %v6944_v4  ;;  %21254 = vmatprep.mubr.f32.mxu1 %v24827_v46  ;;  %v7540_v54 = vsub.f32 %v7538_v49, %v7539_v14 }
 0x89a   :  { %21224 = vmatprep.mubr.f32.mxu0 %v24803_v19  ;;  %21252 = vmatprep.subr.mxu1 %v24732_v38  ;;  %v7531_v51 = vand.u32 4294901760, %v7530_v11 }
 0x89b   :  { %21253 = vmatpush3.msra.mxu1 %v24732_v38  ;;  %21240 = vmatprep.subr.mxu0 %v24638_v26  ;;  %v7521_v38 = vand.u32 4294901760, %v7520_v41  ;;  %v7541_v57 = vand.u32 4294901760, %v7540_v54 }
 0x89c   :  { %21255 = vmatmul.mubr.f32.vlgmr.msra.gmra.mxu1 %v24833_v47  ;;  %21270 = vmatprep.subr.mxu1 %v24638_v26 }
 0x89d   :  { %21225 = vmatmul.mubr.f32.vlgmr.msra.gmra.mxu0 %v24799_v16  ;;  %21257 = vmatprep.mubr.f32.mxu1 %v24839_v6 }
 0x89e   :  { %21227 = vmatprep.mubr.f32.mxu0 %v24813_v52  ;;  %21241 = vmatpush3.msra.mxu0 %v24638_v26 }
 0x89f   :  { %21242 = vmatprep.subr.mxu0 %v24667_v44  ;;  %21271 = vmatpush3.msra.mxu1 %v24638_v26 }
 0x8a0   :  { %21258 = vmatmul.mubr.f32.gmra.mxu1 %v24846_v53  ;;  %21243 = vmatpush3.msra.mxu0 %v24667_v44 }
 0x8a1   :  { %21228 = vmatmul.mubr.f32.gmra.mxu0 %v24807_v0  ;;  %21274 = vmatprep.mubr.f32.mxu1 %v7519_v61 }
 0x8a2   :  { %21244 = vmatprep.mubr.f32.mxu0 %v7521_v38  ;;  %21272 = vmatprep.subr.mxu1 %v24667_v44 }
 0x8a3   :  { %21273 = vmatpush3.msra.mxu1 %v24667_v44  ;;  %21260 = vmatprep.subr.mxu0 %v24665_v25 }
 0x8a4   :  { %21275 = vmatmul.mubr.f32.vlgmr.msra.gmra.mxu1 %v7529_v42  ;;  %21290 = vmatprep.subr.mxu1 %v24638_v26 }
 0x8a5   :  { %21245 = vmatmul.mubr.f32.vlgmr.msra.gmra.mxu0 %v7531_v51  ;;  %21277 = vmatprep.mubr.f32.mxu1 %v7539_v14 }
 0x8a6   :  { %21247 = vmatprep.mubr.f32.mxu0 %v7541_v57  ;;  %21261 = vmatpush3.msra.mxu0 %v24665_v25 }
 0x8a7   :  { %21262 = vmatprep.subr.mxu0 %v24693_v50  ;;  %21291 = vmatpush3.msra.mxu1 %v24638_v26 }
 0x8a8   :  { %21278 = vmatmul.mubr.f32.gmra.mxu1 %v7549_v63  ;;  %21263 = vmatpush3.msra.mxu0 %v24693_v50 }
 0x8a9   :  { %21248 = vmatmul.mubr.f32.gmra.mxu0 %v7551_v35  ;;  %21294 = vmatprep.mubr.f32.mxu1 %v24827_v46 }
 0x8aa   :  { %21264 = vmatprep.mubr.f32.mxu0 %v7518_v3  ;;  %21292 = vmatprep.subr.mxu1 %v24667_v44 }
 0x8ab   :  { %21293 = vmatpush3.msra.mxu1 %v24667_v44  ;;  %21280 = vmatprep.subr.mxu0 %v24690_v20 }
 0x8ac   :  { %21295 = vmatmul.mubr.f32.vlgmr.msra.gmra.mxu1 %v24833_v47 }
 0x8ad   :  { %21265 = vmatmul.mubr.f32.vlgmr.msra.gmra.mxu0 %v7528_v9  ;;  %21297 = vmatprep.mubr.f32.mxu1 %v24839_v6 }
 0x8ae   :  { %21267 = vmatprep.mubr.f32.mxu0 %v7538_v49  ;;  %21281 = vmatpush3.msra.mxu0 %v24690_v20 }
 0x8af   :  { %21282 = vmatprep.subr.mxu0 %v24704_v32 }
 0x8b0   :  { %21298 = vmatmul.mubr.f32.gmra.mxu1 %v24846_v53  ;;  %21283 = vmatpush3.msra.mxu0 %v24704_v32 }
 0x8b1   :  { %21268 = vmatmul.mubr.f32.gmra.mxu0 %v7548_v58 }
 0x8b2   :  { %21284 = vmatprep.mubr.f32.mxu0 %v24827_v46 }
 0x8b5   :  { %21285 = vmatmul.mubr.f32.vlgmr.msra.gmra.mxu0 %v24833_v47 }
 0x8b6   :  { %21287 = vmatprep.mubr.f32.mxu0 %v24839_v6 }
 0x8b9   :  { %21288 = vmatmul.mubr.f32.gmra.mxu0 %v24846_v53 }
 0x8d1   :  { %v21076_v26 = vpop.f32.mrf.mxu1 }
 0x8d3   :  { %v24892_v25 = vpop.f32.mrf.mxu1 }
 0x8d5   :  { %v21079_v44 = vpop.f32.mrf.mxu1 }
 0x8d7   :  { %v24894_v20 = vpop.f32.mrf.mxu1 }
 0x8d9   :  { %v21066_v50 = vpop.f32.mrf.mxu0 }
 0x8da   :  { %v5830_v22 = vadd.f32 %v21076_v26, %v21066_v50  ;;  %v21096_v8 = vpop.f32.mrf.mxu1 }
 0x8db   :  { %v24896_v18 = vpop.f32.mrf.mxu0 }
 0x8dc   :  { %v24898_v32 = vpop.f32.mrf.mxu1 }
 0x8dd   :  { %v21069_v13 = vpop.f32.mrf.mxu0 }
 0x8de   :  { %v5842_v16 = vadd.f32 %v21079_v44, %v21069_v13  ;;  %v21099_v10 = vpop.f32.mrf.mxu1 }
 0x8df   :  { %v24900_v43 = vpop.f32.mrf.mxu0 }
 0x8e0   :  { %v24902_v5 = vpop.f32.mrf.mxu1 }
 0x8e1   :  { %v21086_v19 = vpop.f32.mrf.mxu0 }
 0x8e2   :  { %v5925_v37 = vadd.f32 %v21086_v19, %v5830_v22  ;;  %v21116_v29 = vpop.f32.mrf.mxu1 }
 0x8e3   :  { %v24904_v39 = vpop.f32.mrf.mxu0 }
 0x8e4   :  { %v24906_v24 = vpop.f32.mrf.mxu1  ;;  %v6022_v0 = vadd.f32 %v21096_v8, %v5925_v37 }
 0x8e5   :  { %v21089_v12 = vpop.f32.mrf.mxu0 }
 0x8e6   :  { %v5939_v27 = vadd.f32 %v21089_v12, %v5842_v16  ;;  %v21119_v4 = vpop.f32.mrf.mxu1 }
 0x8e7   :  { %v24908_v52 = vpop.f32.mrf.mxu0 }
 0x8e8   :  { %v24910_v23 = vpop.f32.mrf.mxu1  ;;  %v6038_v17 = vadd.f32 %v21099_v10, %v5939_v27 }
 0x8e9   :  { %v21106_v59 = vpop.f32.mrf.mxu0 }
 0x8ea   :  { %v6121_v28 = vadd.f32 %v21106_v59, %v6022_v0  ;;  %v21136_v56 = vpop.f32.mrf.mxu1 }
 0x8eb   :  { %v24912_v48 = vpop.f32.mrf.mxu0 }
 0x8ec   :  { %v24914_v7 = vpop.f32.mrf.mxu1  ;;  %v6212_v1 = vadd.f32 %v21116_v29, %v6121_v28 }
 0x8ed   :  { %v21109_v21 = vpop.f32.mrf.mxu0 }
 0x8ee   :  { %v6133_v45 = vadd.f32 %v21109_v21, %v6038_v17  ;;  %v21139_v40 = vpop.f32.mrf.mxu1 }
 0x8ef   :  { %v24916_v31 = vpop.f32.mrf.mxu0 }
 0x8f0   :  { %v24918_v62 = vpop.f32.mrf.mxu1  ;;  %v6224_v15 = vadd.f32 %v21119_v4, %v6133_v45 }
 0x8f1   :  { %v21126_v34 = vpop.f32.mrf.mxu0 }
 0x8f2   :  { %v6326_v55 = vadd.f32 %v21126_v34, %v6212_v1  ;;  %v21156_v36 = vpop.f32.mrf.mxu1 }
 0x8f3   :  { %v24920_v46 = vpop.f32.mrf.mxu0 }
 0x8f4   :  { %v24922_v2 = vpop.f32.mrf.mxu1  ;;  %v6433_v33 = vadd.f32 %v21136_v56, %v6326_v55 }
 0x8f5   :  { %28489 = vst [vmem:[#allocation59_spill] sm:$0xff] %v24922_v2  ;;  %v21129_v47 = vpop.f32.mrf.mxu0 }
 0x8f6   :  { %v6346_v3 = vadd.f32 %v21129_v47, %v6224_v15  ;;  %v21159_v30 = vpop.f32.mrf.mxu1 }
 0x8f7   :  { %v24924_v6 = vpop.f32.mrf.mxu0 }
 0x8f8   :  { %v6445_v9 = vadd.f32 %v21139_v40, %v6346_v3  ;;  %v24926_v61 = vpop.f32.mrf.mxu1 }
 0x8f9   :  { %v21146_v53 = vpop.f32.mrf.mxu0 }
 0x8fa   :  { %v6528_v49 = vadd.f32 %v21146_v53, %v6433_v33  ;;  %v21176_v11 = vpop.f32.mrf.mxu1 }
 0x8fb   :  { %v24928_v42 = vpop.f32.mrf.mxu0 }
 0x8fc   :  { %28490 = vst [vmem:[#allocation58_spill] sm:$0xff] %v24928_v42  ;;  %v6625_v58 = vadd.f32 %v21156_v36, %v6528_v49  ;;  %v24932_v60 = vpop.f32.mrf.mxu1 }
 0x8fd   :  { %v21149_v41 = vpop.f32.mrf.mxu0  ;;  %28491 = vst [vmem:[#allocation68_spill] sm:$0xff] %v24932_v60 }
 0x8fe   :  { %v6542_v14 = vadd.f32 %v21149_v41, %v6445_v9  ;;  %v21179_v50 = vpop.f32.mrf.mxu1 }
 0x8ff   :  { %v24930_v63 = vpop.f32.mrf.mxu0 }
 0x900   :  { %v6641_v38 = vadd.f32 %v21159_v30, %v6542_v14  ;;  %v24940_v8 = vpop.f32.mrf.mxu1 }
 0x901   :  { %v21166_v54 = vpop.f32.mrf.mxu0  ;;  %28495 = vst [vmem:[#allocation67_spill] sm:$0xff] %v24940_v8 }
 0x902   :  { %v6724_v51 = vadd.f32 %v21166_v54, %v6625_v58 }
 0x903   :  { %v24934_v57 = vpop.f32.mrf.mxu0 }
 0x904   :  { %28492 = vst [vmem:[#allocation65_spill] sm:$0xff] %v24934_v57  ;;  %v24936_v35 = vadd.f32 %v21176_v11, %v6724_v51 }
 0x905   :  { %v21169_v26 = vpop.f32.mrf.mxu0 }
 0x906   :  { %28493 = vst [vmem:[#allocation55_spill] sm:$0xff] %v24936_v35  ;;  %v6736_v44 = vadd.f32 %v21169_v26, %v6641_v38 }
 0x907   :  { %v24942_v37 = vpop.f32.mrf.mxu0 }
 0x908   :  { %v24938_v22 = vadd.f32 %v21179_v50, %v6736_v44 }
 0x90a   :  { %28494 = vst [vmem:[#allocation69_spill] sm:$0xff] %v24938_v22 }
 0x944   :  { %v21196_v13 = vpop.f32.mrf.mxu1 }
 0x946   :  { %v7030_v16 = vpop.f32.mrf.mxu1 }
 0x948   :  { %v21199_v10 = vpop.f32.mrf.mxu1 }
 0x94a   :  { %v7042_v19 = vpop.f32.mrf.mxu1 }
 0x94c   :  { %v21216_v29 = vpop.f32.mrf.mxu1  ;;  %v21186_v0 = vpop.f32.mrf.mxu0 }
 0x94d   :  { %v7037_v49 = vadd.f32 %v21196_v13, %v21186_v0 }
 0x94e   :  { %v7220_v12 = vpop.f32.mrf.mxu1  ;;  %v6919_v27 = vpop.f32.mrf.mxu0 }
 0x94f   :  { %v7031_v38 = vadd.f32 %v7030_v16, %v6919_v27 }
 0x950   :  { %v21219_v4 = vpop.f32.mrf.mxu1  ;;  %v21189_v17 = vpop.f32.mrf.mxu0 }
 0x951   :  { %v7049_v30 = vadd.f32 %v21199_v10, %v21189_v17 }
 0x952   :  { %v7236_v59 = vpop.f32.mrf.mxu1  ;;  %v6939_v28 = vpop.f32.mrf.mxu0 }
 0x953   :  { %v7043_v58 = vadd.f32 %v7042_v19, %v6939_v28 }
 0x954   :  { %v21236_v56 = vpop.f32.mrf.mxu1 }
 0x955   :  { %v21206_v1 = vpop.f32.mrf.mxu0 }
 0x956   :  { %v7412_v21 = vpop.f32.mrf.mxu1  ;;  %v7132_v54 = vadd.f32 %v21206_v1, %v7037_v49 }
 0x957   :  { %v7124_v45 = vpop.f32.mrf.mxu0 }
 0x958   :  { %v21239_v40 = vpop.f32.mrf.mxu1  ;;  %v7125_v50 = vadd.f32 %v7124_v45, %v7031_v38  ;;  %v7229_v2 = vadd.f32 %v21216_v29, %v7132_v54 }
 0x959   :  { %v21209_v15 = vpop.f32.mrf.mxu0 }
 0x95a   :  { %v7424_v34 = vpop.f32.mrf.mxu1  ;;  %v7146_v41 = vadd.f32 %v21209_v15, %v7049_v30  ;;  %v7221_v13 = vadd.f32 %v7220_v12, %v7125_v50 }
 0x95b   :  { %v7138_v55 = vpop.f32.mrf.mxu0 }
 0x95c   :  { %v21256_v36 = vpop.f32.mrf.mxu1  ;;  %v7139_v51 = vadd.f32 %v7138_v55, %v7043_v58  ;;  %v7245_v60 = vadd.f32 %v21219_v4, %v7146_v41 }
 0x95d   :  { %v21226_v33 = vpop.f32.mrf.mxu0 }
 0x95e   :  { %v7634_v47 = vpop.f32.mrf.mxu1  ;;  %v7237_v42 = vadd.f32 %v7236_v59, %v7139_v51  ;;  %v7328_v8 = vadd.f32 %v21226_v33, %v7229_v2 }
 0x95f   :  { %v7321_v3 = vpop.f32.mrf.mxu0 }
 0x960   :  { %v21259_v9 = vpop.f32.mrf.mxu1  ;;  %v7322_v28 = vadd.f32 %v7321_v3, %v7221_v13  ;;  %v7419_v1 = vadd.f32 %v21236_v56, %v7328_v8 }
 0x961   :  { %v21229_v53 = vpop.f32.mrf.mxu0 }
 0x962   :  { %v7646_v14 = vpop.f32.mrf.mxu1  ;;  %v7340_v35 = vadd.f32 %v21229_v53, %v7245_v60  ;;  %v7413_v49 = vadd.f32 %v7412_v21, %v7322_v28 }
 0x963   :  { %v7333_v11 = vpop.f32.mrf.mxu0 }
 0x964   :  { %v21276_v26 = vpop.f32.mrf.mxu1  ;;  %v7334_v19 = vadd.f32 %v7333_v11, %v7237_v42  ;;  %v7431_v15 = vadd.f32 %v21239_v40, %v7340_v35 }
 0x965   :  { %v21246_v44 = vpop.f32.mrf.mxu0 }
 0x966   :  { %v7824_v57 = vpop.f32.mrf.mxu1  ;;  %v7425_v30 = vadd.f32 %v7424_v34, %v7334_v19  ;;  %v7534_v4 = vadd.f32 %v21246_v44, %v7419_v1 }
 0x967   :  { %v7523_v22 = vpop.f32.mrf.mxu0 }
 0x968   :  { %v21279_v17 = vpop.f32.mrf.mxu1  ;;  %v7524_v59 = vadd.f32 %v7523_v22, %v7413_v49  ;;  %v7641_v2 = vadd.f32 %v21256_v36, %v7534_v4  ;;  %v28499_v4 = vld [vmem:[#allocation59_spill] sm:$0xff] }
 0x969   :  { %v21249_v10 = vpop.f32.mrf.mxu0 }
 0x96a   :  { %v7840_v16 = vpop.f32.mrf.mxu1  ;;  %v7554_v55 = vadd.f32 %v21249_v10, %v7431_v15  ;;  %v7635_v40 = vadd.f32 %v7634_v47, %v7524_v59  ;;  %v5824_v15 = vadd.f32 %v24892_v25, %v24896_v18 }
 0x96b   :  { %v7543_v0 = vpop.f32.mrf.mxu0 }
 0x96c   :  { %v7544_v58 = vadd.f32 %v7543_v0, %v7425_v30  ;;  %v21296_v29 = vpop.f32.mrf.mxu1  ;;  %v7653_v53 = vadd.f32 %v21259_v9, %v7554_v55 }
 0x96d   :  { %v21266_v27 = vpop.f32.mrf.mxu0 }
 0x96e   :  { %v7647_v42 = vadd.f32 %v7646_v14, %v7544_v58  ;;  %v8016_v33 = vpop.f32.mrf.mxu1  ;;  %v7736_v35 = vadd.f32 %v21266_v27, %v7641_v2  ;;  %v5918_v27 = vadd.f32 %v24904_v39, %v5824_v15  ;;  %v28500_v58 = vld [vmem:[#allocation69_spill] sm:$0xff] }
 0x96f   :  { %v7728_v45 = vpop.f32.mrf.mxu0 }
 0x970   :  { %v7729_v56 = vadd.f32 %v7728_v45, %v7635_v40  ;;  %v21299_v38 = vpop.f32.mrf.mxu1  ;;  %v7833_v21 = vadd.f32 %v21276_v26, %v7736_v35  ;;  %v5836_v26 = vadd.f32 %v24894_v20, %v24900_v43  ;;  %v6014_v55 = vadd.f32 %v24898_v32, %v5918_v27  ;;  %v28497_v45 = vld [vmem:[#allocation58_spill] sm:$0xff] }
 0x971   :  { %v21269_v60 = vpop.f32.mrf.mxu0 }
 0x972   :  { %v7750_v12 = vadd.f32 %v21269_v60, %v7653_v53  ;;  %v7825_v9 = vadd.f32 %v7824_v57, %v7729_v56  ;;  %v8028_v13 = vpop.f32.mrf.mxu1  ;;  %v6115_v20 = vadd.f32 %v24912_v48, %v6014_v55  ;;  %v28501_v53 = vld [vmem:[#allocation65_spill] sm:$0xff] }
 0x973   :  { %v7742_v41 = vpop.f32.mrf.mxu0 }
 0x974   :  { %v7743_v11 = vadd.f32 %v7742_v41, %v7647_v42  ;;  %v7849_v34 = vadd.f32 %v21279_v17, %v7750_v12  ;;  %v5932_v17 = vadd.f32 %v24908_v52, %v5836_v26 }
 0x975   :  { %v21286_v3 = vpop.f32.mrf.mxu0 }
 0x976   :  { %v7841_v44 = vadd.f32 %v7840_v16, %v7743_v11  ;;  %v7932_v22 = vadd.f32 %v21286_v3, %v7833_v21  ;;  %v6030_v28 = vadd.f32 %v24902_v5, %v5932_v17  ;;  %v6206_v5 = vadd.f32 %v24906_v24, %v6115_v20  ;;  %v28502_v3 = vld [vmem:[#allocation68_spill] sm:$0xff] }
 0x977   :  { %v7925_v8 = vpop.f32.mrf.mxu0 }
 0x978   :  { %v7926_v14 = vadd.f32 %v7925_v8, %v7825_v9  ;;  %v8023_v47 = vadd.f32 %v21296_v29, %v7932_v22  ;;  %v6127_v57 = vadd.f32 %v24916_v31, %v6030_v28  ;;  %v6316_v25 = vadd.f32 %v24920_v46, %v6206_v5  ;;  %v28496_v31 = vld [vmem:[#allocation67_spill] sm:$0xff] }
 0x979   :  { %v21289_v54 = vpop.f32.mrf.mxu0 }
 0x97a   :  { %v7944_v51 = vadd.f32 %v21289_v54, %v7849_v34  ;;  %v8017_v0 = vadd.f32 %v8016_v33, %v7926_v14  ;;  %v6218_v16 = vadd.f32 %v24910_v23, %v6127_v57  ;;  %v6427_v39 = vadd.f32 %v24914_v7, %v6316_v25 }
 0x97b   :  { %v7937_v50 = vpop.f32.mrf.mxu0 }
 0x97c   :  { %v8035_v10 = vadd.f32 %v21299_v38, %v7944_v51  ;;  %v7938_v36 = vadd.f32 %v7937_v50, %v7841_v44  ;;  %v6336_v1 = vadd.f32 %v24924_v6, %v6218_v16 }
 0x97e   :  { %v8029_v19 = vadd.f32 %v8028_v13, %v7938_v36  ;;  %8048 = vrot.lane.b32.xlu0 %v8035_v10, %s22347_s29  ;;  %v6439_v30 = vadd.f32 %v24918_v62, %v6336_v1  ;;  %v6521_v62 = vadd.f32 %v28497_v45, %v6427_v39  ;;  %v19122_v45 = vld [vmem:[%s28076_s3 + $0x58] sm:$0xff] }
 0x980   :  { %8046 = vrot.lane.b32.xlu1 %v8029_v19, %s22347_s29  ;;  %v6535_v43 = vadd.f32 %v24930_v63, %v6439_v30  ;;  %v6617_v49 = vadd.f32 %v28499_v4, %v6521_v62  ;;  %v19119_v4 = vld [vmem:[%s28076_s3 + $0x40] sm:$0xff] }
 0x982   :  { %8044 = vrot.lane.b32.xlu0 %v8023_v47, %s22347_s29  ;;  %v6633_v52 = vadd.f32 %v24926_v61, %v6535_v43  ;;  %v28498_v61 = vld [vmem:[#allocation55_spill] sm:$0xff]  ;;  %v6718_v41 = vadd.f32 %v28501_v53, %v6617_v49  ;;  %v28503_v53 = vmov 1  }
 0x984   :  { %8042 = vrot.lane.b32.xlu1 %v8017_v0, %s22347_s29  ;;  %v6730_v18 = vadd.f32 %v24942_v37, %v6633_v52  ;;  %v6809_v35 = vadd.f32 %v28502_v3, %v6718_v41 }
 0x986   :  { %v6821_v6 = vadd.f32 %v28496_v31, %v6730_v18 }
 0x9f0   :  { %v8049_v23 = vpop.permute.xlu0 %8048 }
 0x9f1   :  { %v24981_v29 = vsel %vm3424_vm4, %v28500_v58, %v8049_v23  ;;  %v19121_v23 = vld [vmem:[%s28076_s3 + $0x50] sm:$0xff] }
 0x9f2   :  { %v8047_v32 = vpop.permute.xlu1 %8046  ;;  %v8068_v2 = vsel %vm8058_vm8, %v24981_v29, 0.0  ;;  %v8078_v12 = vmul.f32 %v24981_v29, %v24981_v29 }
 0x9f3   :  { %v24966_v48 = vsel %vm3424_vm4, %v6821_v6, %v8047_v32 }
 0x9f4   :  { %v8045_v63 = vpop.permute.xlu0 %8044  ;;  %v8065_v24 = vsel %vm8058_vm8, %v24966_v48, 0.0  ;;  %v8077_v46 = vmul.f32 %v24966_v48, %v24966_v48  ;;  %v8088_v40 = vsel %vm8058_vm8, %v8078_v12, 0.0 }
 0x9f5   :  { %v24974_v37 = vsel %vm3424_vm4, %v28498_v61, %v8045_v63  ;;  %8066 = vadd.xlane.f32.xlu1 %v8065_v24  ;;  %v19120_v24 = vld [vmem:[%s28076_s3 + $0x48] sm:$0xff] }
 0x9f6   :  { %v8062_v7 = vsel %vm8058_vm8, %v24974_v37, 0.0  ;;  %v8085_v60 = vsel %vm8058_vm8, %v8077_v46, 0.0  ;;  %v8076_v59 = vmul.f32 %v24974_v37, %v24974_v37  ;;  %v8043_v42 = vpop.permute.xlu1 %8042 }
 0x9f7   :  { %8063 = vadd.xlane.f32.xlu0 %v8062_v7  ;;  %v24995_v11 = vsel %vm3424_vm4, %v6809_v35, %v8043_v42 }
 0x9f8   :  { %v8082_v33 = vsel %vm8058_vm8, %v8076_v59, 0.0  ;;  %v8059_v8 = vsel %vm8058_vm8, %v24995_v11, 0.0  ;;  %v8075_v56 = vmul.f32 %v24995_v11, %v24995_v11 }
 0x9f9   :  { %8086 = vadd.xlane.f32.xlu1 %v8085_v60 }
 0x9fa   :  { %v8079_v34 = vsel %vm8058_vm8, %v8075_v56, 0.0 }
 0x9fb   :  { %8069 = vadd.xlane.f32.xlu0 %v8068_v2 }
 0x9fd   :  { %8083 = vadd.xlane.f32.xlu1 %v8082_v33 }
 0x9ff   :  { %8089 = vadd.xlane.f32.xlu0 %v8088_v40 }
 0xa03   :  { %8060 = vadd.xlane.f32.xlu0 %v8059_v8  ;;  %v28504_v8 = vmov 0  }
 0xa07   :  { %8080 = vadd.xlane.f32.xlu0 %v8079_v34 }
 0xa7e   :  { %v8067_v38 = vpop.xlane.xlu1 %8066 }
 0xa7f   :  { %v8073_v54 = vmul.f32 0.020833334, %v8067_v38 }
 0xa80   :  { %v8064_v21 = vpop.xlane.xlu0 %8063 }
 0xa81   :  { %v8097_v44 = vmul.f32 %v8073_v54, %v8073_v54  ;;  %v8072_v50 = vmul.f32 0.020833334, %v8064_v21 }
 0xa82   :  { %v8087_v51 = vpop.xlane.xlu1 %8086 }
 0xa83   :  { %v8093_v22 = vmul.f32 0.020833334, %v8087_v51  ;;  %v8096_v14 = vmul.f32 %v8072_v50, %v8072_v50 }
 0xa84   :  { %v8070_v9 = vpop.xlane.xlu0 %8069 }
 0xa85   :  { %v8101_v10 = vsub.f32 %v8093_v22, %v8097_v44  ;;  %v8074_v36 = vmul.f32 0.020833334, %v8070_v9 }
 0xa86   :  { %v8084_v13 = vpop.xlane.xlu1 %8083 }
 0xa87   :  { %v8105_v19 = vmax.f32 %v8101_v10, 0.0  ;;  %v8092_v47 = vmul.f32 0.020833334, %v8084_v13  ;;  %v8098_v17 = vmul.f32 %v8074_v36, %v8074_v36 }
 0xa88   :  { %v8090_v0 = vpop.xlane.xlu0 %8089 }
 0xa89   :  { %v8109_v26 = vadd.f32 1e-05, %v8105_v19  ;;  %v8100_v28 = vsub.f32 %v8092_v47, %v8096_v14  ;;  %v8094_v57 = vmul.f32 0.020833334, %v8090_v0 }
 0xa8b   :  { %22314 = vrsqrt.f32 %v8109_v26  ;;  %v8104_v15 = vmax.f32 %v8100_v28, 0.0  ;;  %v8102_v16 = vsub.f32 %v8094_v57, %v8098_v17 }
 0xa8c   :  { %v8061_v27 = vpop.xlane.xlu0 %8060 }
 0xa8d   :  { %v8108_v1 = vadd.f32 1e-05, %v8104_v15  ;;  %v8106_v55 = vmax.f32 %v8102_v16, 0.0  ;;  %v8071_v30 = vmul.f32 0.020833334, %v8061_v27 }
 0xa8f   :  { %v8110_v20 = vadd.f32 1e-05, %v8106_v55  ;;  %22316 = vrsqrt.f32 %v8108_v1  ;;  %v8095_v5 = vmul.f32 %v8071_v30, %v8071_v30 }
 0xa90   :  { %v8081_v43 = vpop.xlane.xlu0 %8080 }
 0xa91   :  { %22318 = vrsqrt.f32 %v8110_v20  ;;  %v8091_v52 = vmul.f32 0.020833334, %v8081_v43 }
 0xa93   :  { %v8099_v25 = vsub.f32 %v8091_v52, %v8095_v5 }
 0xa95   :  { %v8103_v18 = vmax.f32 %v8099_v25, 0.0 }
 0xa97   :  { %v8107_v39 = vadd.f32 1e-05, %v8103_v18 }
 0xa98   :  { %v22315_v31 = vpop.eup %22314 }
 0xa99   :  { %22320 = vrsqrt.f32 %v8107_v39  ;;  %v8122_v6 = vmul.f32 %v22315_v31, %v19121_v23 }
 0xa9b   :  { %v8126_v32 = vmul.f32 %v8122_v6, %v8073_v54 }
 0xa9c   :  { %v22317_v62 = vpop.eup %22316 }
 0xa9d   :  { %8136 = vrot.lane.b32.xlu0 %v8126_v32, %s22335_s19  ;;  %v8121_v7 = vmul.f32 %v22317_v62, %v19120_v24 }
 0xa9e   :  { %v22319_v63 = vpop.eup %22318 }
 0xa9f   :  { %v8123_v46 = vmul.f32 %v22319_v63, %v19122_v45  ;;  %v8125_v49 = vmul.f32 %v8121_v7, %v8072_v50 }
 0xaa1   :  { %8165 = vperm.xlu0 %22290, %v8123_v46   ;;  %v8127_v61 = vmul.f32 %v8123_v46, %v8074_v36 }
 0xaa3   :  { %8138 = vrot.lane.b32.xlu1 %v8127_v61, %s22335_s19 }
 0xaa5   :  { %8155 = vperm.xlu0 %22290, %v8121_v7  }
 0xaa6   :  { %v22321_v58 = vpop.eup %22320 }
 0xaa7   :  { %8134 = vrot.lane.b32.xlu1 %v8125_v49, %s22335_s19  ;;  %v8120_v60 = vmul.f32 %v22321_v58, %v19119_v4 }
 0xaa9   :  { %8150 = vperm.xlu0 %22290, %v8120_v60   ;;  %v8124_v59 = vmul.f32 %v8120_v60, %v8071_v30  ;;  %v19123_v60 = vld [vmem:[%s28074_s1 + $0x100] sm:$0xff] }
 0xaab   :  { %8132 = vrot.lane.b32.xlu1 %v8124_v59, %s22335_s19  ;;  %v8330_v59 = vsel %vm8328_vm10, %v19123_v60, 0 }
 0xaad   :  { %22293 = vset.pattern.permute.xlu0 %v28503_v53 }
 0xaaf   :  { %8160 = vperm.xlu1 %22291, %v8122_v6  }
 0xab3   :  { %22292 = vset.pattern.permute.xlu1 %v28503_v53 }
 0xb0f   :  { %v8137_v12 = vpop.permute.xlu0 %8136 }
 0xb10   :  { %v8146_v33 = vsub.f32 %v19121_v23, %v8137_v12 }
 0xb15   :  { %v8139_v41 = vpop.permute.xlu1 %8138 }
 0xb16   :  { %v8147_v2 = vsub.f32 %v19122_v45, %v8139_v41  ;;  %v25070_v41 = vand.u32 4294901760, %v8330_v59 }
 0xb18   :  { %8189 = vperm.xlu1 %22292, %v8147_v2   ;;  %v25075_v2 = vsub.f32 %v8330_v59, %v25070_v41  ;;  %21335 = vmatprep.mubr.f32.mxu1 %v25070_v41 }
 0xb19   :  { %v8135_v42 = vpop.permute.xlu1 %8134 }
 0xb1a   :  { %v8145_v35 = vsub.f32 %v19120_v24, %v8135_v42  ;;  %v8410_v12 = vand.u32 4294901760, %v25075_v2 }
 0xb1c   :  { %8184 = vperm.xlu1 %22292, %v8146_v33   ;;  %v8166_v56 = vpop.permute.xlu0 %8165  ;;  %v8411_v42 = vsub.f32 %v25075_v2, %v8410_v12 }
 0xb1d   :  { %v8133_v3 = vpop.permute.xlu1 %8132  ;;  %v8171_v22 = vmul.f32 %v8166_v56, %v24981_v29 }
 0xb1e   :  { %v8144_v40 = vsub.f32 %v19119_v4, %v8133_v3  ;;  %v8412_v33 = vand.u32 4294901760, %v8411_v42 }
 0xb20   :  { %8179 = vperm.xlu1 %22292, %v8145_v35   ;;  %8174 = vperm.xlu0 %22293, %v8144_v40   ;;  %v8156_v54 = vpop.permute.xlu0 %8155 }
 0xb21   :  { %v8169_v51 = vmul.f32 %v8156_v54, %v24974_v37  ;;  %21316 = vmatprep.mubr.f32.mxu0 %v8412_v33 }
 0xb24   :  { %22294 = vset.pattern.permute.xlu1 %v28504_v8  ;;  %v8151_v44 = vpop.permute.xlu0 %8150 }
 0xb25   :  { %v8168_v47 = vmul.f32 %v8151_v44, %v24995_v11 }
 0xb2a   :  { %v8161_v34 = vpop.permute.xlu1 %8160 }
 0xb2b   :  { %v8170_v9 = vmul.f32 %v8161_v34, %v24966_v48 }
 0xb93   :  { %v8190_v38 = vpop.permute.xlu1 %8189 }
 0xb94   :  { %v8195_v36 = vadd.f32 %v8190_v38, %v8171_v22 }
 0xb96   :  { %v8199_v0 = vmax.f32 %v8195_v36, 0.0 }
 0xb97   :  { %v8185_v21 = vpop.permute.xlu1 %8184 }
 0xb98   :  { %v8194_v13 = vadd.f32 %v8185_v21, %v8170_v9 }
 0xb9a   :  { %v8198_v26 = vmax.f32 %v8194_v13, 0.0 }
 0xb9b   :  { %v8180_v50 = vpop.permute.xlu1 %8179  ;;  %v8175_v19 = vpop.permute.xlu0 %8174 }
 0xb9c   :  { %v8193_v10 = vadd.f32 %v8180_v50, %v8169_v51  ;;  %v8192_v37 = vadd.f32 %v8175_v19, %v8168_v47  ;;  %v19124_v51 = vld [vmem:[%s28074_s1 + $0x108] sm:$0xff] }
 0xb9e   :  { %v8197_v14 = vmax.f32 %v8193_v10, 0.0  ;;  %v8196_v29 = vmax.f32 %v8192_v37, 0.0  ;;  %v8333_v10 = vsel %vm8328_vm10, %v19124_v51, 0 }
 0xb9f   :  { %v25115_v47 = vand.u32 4294901760, %v8333_v10 }
 0xba0   :  { %8227 = vrot.lane.b32.xlu1 %v8197_v14, %s22348_s13  ;;  %8206 = vrot.lane.b32.xlu0 %v8197_v14, %s22335_s19 }
 0xba4   :  { %8210 = vrot.lane.b32.xlu1 %v8199_v0, %s22335_s19  ;;  %8208 = vrot.lane.b32.xlu0 %v8198_v26, %s22335_s19 }
 0xba8   :  { %8231 = vrot.lane.b32.xlu1 %v8199_v0, %s22348_s13  ;;  %8204 = vrot.lane.b32.xlu0 %v8196_v29, %s22335_s19 }
 0xbac   :  { %8229 = vrot.lane.b32.xlu1 %v8198_v26, %s22348_s13 }
 0xbb0   :  { %8225 = vrot.lane.b32.xlu1 %v8196_v29, %s22348_s13  ;;  %s22352_s13 = smov 48  }
 0xc12   :  { %v8228_v48 = vpop.permute.xlu1 %8227  ;;  %v8207_v11 = vpop.permute.xlu0 %8206 }
 0xc13   :  { %v8238_v17 = vsel %vm3737_vm5, 0.0, %v8228_v48  ;;  %v8217_v28 = vsel %vm3737_vm5, 0.0, %v8207_v11 }
 0xc14   :  { %v25032_v57 = vsel %vm8220_vm9, %v8238_v17, 0.0  ;;  %v25035_v15 = vsel %vm8220_vm9, %v8217_v28, 0.0 }
 0xc15   :  { %8263 = vrot.lane.b32.xlu1 %v25032_v57, %s22335_s19  ;;  %8251 = vrot.lane.b32.xlu0 %v25035_v15, %s22335_s19 }
 0xc16   :  { %v8211_v16 = vpop.permute.xlu1 %8210  ;;  %v8209_v27 = vpop.permute.xlu0 %8208 }
 0xc17   :  { %v8219_v1 = vsel %vm3737_vm5, 0.0, %v8211_v16  ;;  %v8218_v30 = vsel %vm3737_vm5, 0.0, %v8209_v27 }
 0xc18   :  { %v8224_v55 = vsel %vm8220_vm9, %v8219_v1, 0.0  ;;  %v8223_v52 = vsel %vm8220_vm9, %v8218_v30, 0.0 }
 0xc19   :  { %8255 = vrot.lane.b32.xlu0 %v8224_v55, %s22335_s19 }
 0xc1a   :  { %v8232_v20 = vpop.permute.xlu1 %8231  ;;  %v8205_v43 = vpop.permute.xlu0 %8204 }
 0xc1b   :  { %v8240_v5 = vsel %vm3737_vm5, 0.0, %v8232_v20  ;;  %v8216_v18 = vsel %vm3737_vm5, 0.0, %v8205_v43 }
 0xc1c   :  { %v8244_v25 = vsel %vm8220_vm9, %v8240_v5, 0.0  ;;  %v8221_v31 = vsel %vm8220_vm9, %v8216_v18, 0.0 }
 0xc1d   :  { %8267 = vrot.lane.b32.xlu1 %v8244_v25, %s22335_s19  ;;  %8253 = vrot.lane.b32.xlu0 %v8223_v52, %s22335_s19 }
 0xc1e   :  { %v8230_v23 = vpop.permute.xlu1 %8229 }
 0xc1f   :  { %v8239_v39 = vsel %vm3737_vm5, 0.0, %v8230_v23 }
 0xc20   :  { %v8243_v6 = vsel %vm8220_vm9, %v8239_v39, 0.0 }
 0xc21   :  { %8265 = vrot.lane.b32.xlu1 %v8243_v6, %s22335_s19  ;;  %8249 = vrot.lane.b32.xlu0 %v8221_v31, %s22335_s19 }
 0xc22   :  { %v8226_v32 = vpop.permute.xlu1 %8225 }
 0xc23   :  { %v8237_v45 = vsel %vm3737_vm5, 0.0, %v8226_v32 }
 0xc24   :  { %v8241_v62 = vsel %vm8220_vm9, %v8237_v45, 0.0 }
 0xc25   :  { %8261 = vrot.lane.b32.xlu1 %v8241_v62, %s22335_s19  ;;  %8275 = vrot.lane.b32.xlu0 %v8224_v55, %s22340_s20 }
 0xc29   :  { %8299 = vrot.lane.b32.xlu1 %v8244_v25, %s22349_s14 }
 0xc87   :  { %v8264_v63 = vpop.permute.xlu1 %8263  ;;  %v8252_v24 = vpop.permute.xlu0 %8251 }
 0xc88   :  { %8303 = vrot.lane.b32.xlu1 %v8264_v63, %s22349_s14  ;;  %8279 = vrot.lane.b32.xlu0 %v8252_v24, %s22340_s20 }
 0xc8b   :  { %v8256_v46 = vpop.permute.xlu0 %8255 }
 0xc8f   :  { %v8268_v61 = vpop.permute.xlu1 %8267  ;;  %v8254_v7 = vpop.permute.xlu0 %8253 }
 0xc93   :  { %v8266_v4 = vpop.permute.xlu1 %8265  ;;  %v8250_v49 = vpop.permute.xlu0 %8249 }
 0xc94   :  { %8277 = vrot.lane.b32.xlu0 %v8250_v49, %s22340_s20 }
 0xc97   :  { %v8262_v58 = vpop.permute.xlu1 %8261  ;;  %v8276_v3 = vpop.permute.xlu0 %8275 }
 0xc98   :  { %8301 = vrot.lane.b32.xlu1 %v8262_v58, %s22349_s14  ;;  %8283 = vrot.lane.b32.xlu0 %v8256_v46, %s22340_s20 }
 0xc9b   :  { %v8300_v35 = vpop.permute.xlu1 %8299 }
 0xc9c   :  { %8307 = vrot.lane.b32.xlu1 %v8268_v61, %s22349_s14  ;;  %8281 = vrot.lane.b32.xlu0 %v8254_v7, %s22340_s20  ;;  %v8320_v36 = vsel %vm3424_vm4, %v8276_v3, %v8300_v35 }
 0xc9d   :  { %v25117_v0 = vand.u32 4294901760, %v8320_v36 }
 0xc9f   :  { %v25140_v16 = vsub.f32 %v8320_v36, %v25117_v0 }
 0xca0   :  { %8305 = vrot.lane.b32.xlu1 %v8266_v4, %s22349_s14  ;;  %8273 = vrot.lane.b32.xlu0 %v8223_v52, %s22340_s20 }
 0xca4   :  { %8297 = vrot.lane.b32.xlu1 %v8243_v6, %s22349_s14  ;;  %8271 = vrot.lane.b32.xlu0 %v25035_v15, %s22340_s20 }
 0xca8   :  { %8295 = vrot.lane.b32.xlu1 %v25032_v57, %s22349_s14  ;;  %8269 = vrot.lane.b32.xlu0 %v8221_v31, %s22340_s20 }
 0xcac   :  { %8293 = vrot.lane.b32.xlu1 %v8241_v62, %s22349_s14  ;;  %8929 = vrot.lane.b32.xlu0 %v8256_v46, %s22337_s5 }
 0xcb0   :  { %8953 = vrot.lane.b32.xlu1 %v8268_v61, %s22350_s17  ;;  %8925 = vrot.lane.b32.xlu0 %v8252_v24, %s22337_s5 }
 0xcb4   :  { %8949 = vrot.lane.b32.xlu1 %v8264_v63, %s22350_s17  ;;  %8923 = vrot.lane.b32.xlu0 %v8250_v49, %s22337_s5 }
 0xcb8   :  { %8947 = vrot.lane.b32.xlu1 %v8262_v58, %s22350_s17  ;;  %8921 = vrot.lane.b32.xlu0 %v8224_v55, %s22337_s5 }
 0xcbc   :  { %8945 = vrot.lane.b32.xlu1 %v8244_v25, %s22350_s17  ;;  %8927 = vrot.lane.b32.xlu0 %v8254_v7, %s22337_s5 }
 0xcc0   :  { %8951 = vrot.lane.b32.xlu1 %v8266_v4, %s22350_s17  ;;  %8919 = vrot.lane.b32.xlu0 %v8223_v52, %s22337_s5 }
 0xcc4   :  { %8943 = vrot.lane.b32.xlu1 %v8243_v6, %s22350_s17  ;;  %8917 = vrot.lane.b32.xlu0 %v25035_v15, %s22337_s5  ;;  %v25137_v15 = vsub.f32 %v8333_v10, %v25115_v47 }
 0xcc6   :  { %v8420_v23 = vand.u32 4294901760, %v25137_v15 }
 0xcc8   :  { %8941 = vrot.lane.b32.xlu1 %v25032_v57, %s22350_s17  ;;  %8915 = vrot.lane.b32.xlu0 %v8221_v31, %s22337_s5  ;;  %v8421_v4 = vsub.f32 %v25137_v15, %v8420_v23 }
 0xccc   :  { %8939 = vrot.lane.b32.xlu1 %v8241_v62, %s22350_s17  ;;  %v25173_v62 = vand.u32 4294901760, %v25140_v16 }
 0xcce   :  { %v8476_v59 = vsub.f32 %v25140_v16, %v25173_v62 }
 0xcfa   :  { %v8280_v40 = vpop.permute.xlu0 %8279  ;;  %v8304_v56 = vpop.permute.xlu1 %8303 }
 0xcfb   :  { %v8322_v21 = vsel %vm3424_vm4, %v8280_v40, %v8304_v56 }
 0xcfc   :  { %v25106_v50 = vand.u32 4294901760, %v8322_v21 }
 0xcfe   :  { %v25120_v26 = vsub.f32 %v8322_v21, %v25106_v50  ;;  %v8477_v21 = vand.u32 4294901760, %v8476_v59 }
 0xd00   :  { %v25149_v20 = vand.u32 4294901760, %v25120_v26 }
 0xd02   :  { %v8462_v45 = vsub.f32 %v25120_v26, %v25149_v20 }
 0xd04   :  { %v8463_v60 = vand.u32 4294901760, %v8462_v45 }
 0xd06   :  { %v8278_v34 = vpop.permute.xlu0 %8277 }
 0xd0a   :  { %v8302_v38 = vpop.permute.xlu1 %8301  ;;  %v8284_v54 = vpop.permute.xlu0 %8283 }
 0xd0b   :  { %v8321_v44 = vsel %vm3424_vm4, %v8278_v34, %v8302_v38  ;;  %v8422_v34 = vand.u32 4294901760, %v8421_v4 }
 0xd0c   :  { %v25111_v14 = vand.u32 4294901760, %v8321_v44 }
 0xd0e   :  { %v8308_v22 = vpop.permute.xlu1 %8307  ;;  %v8282_v9 = vpop.permute.xlu0 %8281  ;;  %v25129_v17 = vsub.f32 %v8321_v44, %v25111_v14 }
 0xd0f   :  { %v8324_v13 = vsel %vm3424_vm4, %v8284_v54, %v8308_v22 }
 0xd10   :  { %v25113_v19 = vand.u32 4294901760, %v8324_v13  ;;  %v25160_v18 = vand.u32 4294901760, %v25129_v17 }
 0xd12   :  { %v25123_v37 = vsub.f32 %v8324_v13, %v25113_v19  ;;  %v8306_v29 = vpop.permute.xlu1 %8305  ;;  %21300 = vmatprep.subr.mxu0 %v25113_v19  ;;  %v8274_v48 = vpop.permute.xlu0 %8273  ;;  %v8469_v61 = vsub.f32 %v25129_v17, %v25160_v18 }
 0xd13   :  { %v8323_v11 = vsel %vm3424_vm4, %v8282_v9, %v8306_v29  ;;  %21301 = vmatpush3.msra.mxu0 %v25113_v19 }
 0xd14   :  { %v25131_v28 = vand.u32 4294901760, %v8323_v11  ;;  %v25134_v57 = vand.u32 4294901760, %v25123_v37  ;;  %v8470_v35 = vand.u32 4294901760, %v8469_v61 }
 0xd16   :  { %v25143_v27 = vsub.f32 %v8323_v11, %v25131_v28  ;;  %v8298_v1 = vpop.permute.xlu1 %8297  ;;  %21302 = vmatprep.subr.mxu0 %v25131_v28  ;;  %v8272_v55 = vpop.permute.xlu0 %8271  ;;  %v8448_v30 = vsub.f32 %v25123_v37, %v25134_v57 }
 0xd17   :  { %v8319_v43 = vsel %vm3424_vm4, %v8274_v48, %v8298_v1  ;;  %21303 = vmatpush3.msra.mxu0 %v25131_v28 }
 0xd18   :  { %v25153_v5 = vand.u32 4294901760, %v8319_v43  ;;  %21304 = vmatprep.subr.mxu0 %v25106_v50  ;;  %v8449_v52 = vand.u32 4294901760, %v8448_v30  ;;  %v25157_v25 = vand.u32 4294901760, %v25143_v27 }
 0xd19   :  { %21305 = vmatpush3.msra.mxu0 %v25106_v50 }
 0xd1a   :  { %v25165_v39 = vsub.f32 %v8319_v43, %v25153_v5  ;;  %v8296_v31 = vpop.permute.xlu1 %8295  ;;  %21306 = vmatprep.subr.mxu0 %v25111_v14  ;;  %21319 = vmatprep.subr.mxu1 %v8449_v52  ;;  %v8270_v6 = vpop.permute.xlu0 %8269  ;;  %v8455_v32 = vsub.f32 %v25143_v27, %v25157_v25 }
 0xd1b   :  { %v8318_v63 = vsel %vm3424_vm4, %v8272_v55, %v8296_v31  ;;  %21307 = vmatpush3.msra.mxu0 %v25111_v14  ;;  %21320 = vmatpush3.msra.mxu1 %v8449_v52 }
 0xd1c   :  { %v25177_v24 = vand.u32 4294901760, %v8318_v63  ;;  %21308 = vmatprep.subr.mxu0 %v25117_v0  ;;  %v8456_v46 = vand.u32 4294901760, %v8455_v32  ;;  %v25183_v7 = vand.u32 4294901760, %v25165_v39 }
 0xd1d   :  { %21309 = vmatpush3.msra.mxu0 %v25117_v0 }
 0xd1e   :  { %v25190_v49 = vsub.f32 %v8318_v63, %v25177_v24  ;;  %v8294_v58 = vpop.permute.xlu1 %8293  ;;  %21310 = vmatprep.subr.mxu0 %v25153_v5  ;;  %21321 = vmatprep.subr.mxu1 %v8456_v46  ;;  %v25199_v3 = vpop.permute.xlu0 %8929  ;;  %v8483_v40 = vsub.f32 %v25165_v39, %v25183_v7 }
 0xd1f   :  { %v8317_v42 = vsel %vm3424_vm4, %v8270_v6, %v8294_v58  ;;  %21311 = vmatpush3.msra.mxu0 %v25153_v5  ;;  %21322 = vmatpush3.msra.mxu1 %v8456_v46 }
 0xd20   :  { %v25197_v33 = vand.u32 4294901760, %v8317_v42  ;;  %21312 = vmatprep.subr.mxu0 %v25177_v24  ;;  %21323 = vmatprep.subr.mxu1 %v8463_v60  ;;  %v25205_v56 = vand.u32 4294901760, %v25190_v49  ;;  %v8484_v44 = vand.u32 4294901760, %v8483_v40 }
 0xd21   :  { %21313 = vmatpush3.msra.mxu0 %v25177_v24  ;;  %21324 = vmatpush3.msra.mxu1 %v8463_v60 }
 0xd22   :  { %v8495_v38 = vsub.f32 %v8317_v42, %v25197_v33  ;;  %v25209_v54 = vpop.permute.xlu1 %8953  ;;  %21314 = vmatprep.subr.mxu0 %v25197_v33  ;;  %21325 = vmatprep.subr.mxu1 %v8470_v35  ;;  %v8490_v51 = vsub.f32 %v25190_v49, %v25205_v56  ;;  %v25218_v9 = vpop.permute.xlu0 %8925 }
 0xd23   :  { %21315 = vmatpush3.msra.mxu0 %v25197_v33  ;;  %21326 = vmatpush3.msra.mxu1 %v8470_v35 }
 0xd24   :  { %21327 = vmatprep.subr.mxu1 %v8477_v21  ;;  %21338 = vmatprep.subr.mxu0 %v25123_v37  ;;  %v25216_v22 = vand.u32 4294901760, %v8495_v38  ;;  %v8491_v36 = vand.u32 4294901760, %v8490_v51 }
 0xd25   :  { %21317 = vmatmul.mubr.f32.vlgmr.msra.gmra.mxu0 %v8422_v34  ;;  %21328 = vmatpush3.msra.mxu1 %v8477_v21 }
 0xd26   :  { %21339 = vmatpush3.msra.mxu0 %v25123_v37  ;;  %v25221_v10 = vpop.permute.xlu1 %8949  ;;  %21329 = vmatprep.subr.mxu1 %v8484_v44  ;;  %v8497_v13 = vsub.f32 %v8495_v38, %v25216_v22  ;;  %v8924_v37 = vpop.permute.xlu0 %8923 }
 0xd27   :  { %21340 = vmatprep.subr.mxu0 %v25143_v27  ;;  %21330 = vmatpush3.msra.mxu1 %v8484_v44 }
 0xd28   :  { %21341 = vmatpush3.msra.mxu0 %v25143_v27  ;;  %21331 = vmatprep.subr.mxu1 %v8491_v36  ;;  %v8498_v29 = vand.u32 4294901760, %v8497_v13 }
 0xd29   :  { %21342 = vmatprep.subr.mxu0 %v25120_v26  ;;  %21332 = vmatpush3.msra.mxu1 %v8491_v36 }
 0xd2a   :  { %21343 = vmatpush3.msra.mxu0 %v25120_v26  ;;  %v25228_v48 = vpop.permute.xlu1 %8947  ;;  %21333 = vmatprep.subr.mxu1 %v8498_v29  ;;  %v8922_v11 = vpop.permute.xlu0 %8921 }
 0xd2b   :  { %21344 = vmatprep.subr.mxu0 %v25129_v17  ;;  %21334 = vmatpush3.msra.mxu1 %v8498_v29  ;;  %v8967_v43 = vsel %vm3424_vm4, %v8924_v37, %v25228_v48 }
 0xd2c   :  { %21345 = vmatpush3.msra.mxu0 %v25129_v17  ;;  %21336 = vmatmul.mubr.f32.vlgmr.msra.gmra.mxu1 %v25115_v47 }
 0xd2d   :  { %21346 = vmatprep.subr.mxu0 %v25140_v16  ;;  %21357 = vmatprep.subr.mxu1 %v25113_v19 }
 0xd2e   :  { %21347 = vmatpush3.msra.mxu0 %v25140_v16  ;;  %21358 = vmatpush3.msra.mxu1 %v25113_v19  ;;  %v8946_v26 = vpop.permute.xlu1 %8945  ;;  %v8928_v16 = vpop.permute.xlu0 %8927 }
 0xd2f   :  { %21348 = vmatprep.subr.mxu0 %v25165_v39  ;;  %21359 = vmatprep.subr.mxu1 %v25131_v28 }
 0xd30   :  { %21349 = vmatpush3.msra.mxu0 %v25165_v39  ;;  %21360 = vmatpush3.msra.mxu1 %v25131_v28  ;;  %v8966_v39 = vsel %vm3424_vm4, %v8922_v11, %v8946_v26 }
 0xd31   :  { %21350 = vmatprep.subr.mxu0 %v25190_v49  ;;  %21361 = vmatprep.subr.mxu1 %v25106_v50 }
 0xd32   :  { %21351 = vmatpush3.msra.mxu0 %v25190_v49  ;;  %21362 = vmatpush3.msra.mxu1 %v25106_v50  ;;  %v8952_v17 = vpop.permute.xlu1 %8951  ;;  %v8920_v55 = vpop.permute.xlu0 %8919 }
 0xd33   :  { %21352 = vmatprep.subr.mxu0 %v8495_v38  ;;  %21363 = vmatprep.subr.mxu1 %v25111_v14  ;;  %v8969_v1 = vsel %vm3424_vm4, %v8928_v16, %v8952_v17 }
 0xd34   :  { %21353 = vmatpush3.msra.mxu0 %v8495_v38  ;;  %21354 = vmatprep.mubr.f32.mxu0 %v25075_v2  ;;  %v8968_v2 = vsel %vm3424_vm4, %v25218_v9, %v25221_v10 }
 0xd35   :  { %21364 = vmatpush3.msra.mxu1 %v25111_v14  ;;  %21355 = vmatmul.mubr.f32.vlgmr.msra.gmra.mxu0 %v25137_v15  ;;  %v25288_v15 = vand.u32 4294901760, %v8969_v1 }
 0xd36   :  { %21365 = vmatprep.subr.mxu1 %v25117_v0  ;;  %21376 = vmatprep.subr.mxu0 %v25134_v57  ;;  %v8944_v27 = vpop.permute.xlu1 %8943  ;;  %v8918_v31 = vpop.permute.xlu0 %8917 }
 0xd37   :  { %21366 = vmatpush3.msra.mxu1 %v25117_v0  ;;  %21377 = vmatpush3.msra.mxu0 %v25134_v57  ;;  %v8970_v57 = vsel %vm3424_vm4, %v25199_v3, %v25209_v54  ;;  %v25311_v6 = vsub.f32 %v8969_v1, %v25288_v15  ;;  %v8965_v63 = vsel %vm3424_vm4, %v8920_v55, %v8944_v27 }
 0xd38   :  { %21367 = vmatprep.subr.mxu1 %v25153_v5  ;;  %21378 = vmatprep.subr.mxu0 %v25157_v25  ;;  %v25273_v30 = vand.u32 4294901760, %v8970_v57  ;;  %v25346_v58 = vand.u32 4294901760, %v8965_v63 }
 0xd39   :  { %21368 = vmatpush3.msra.mxu1 %v25153_v5  ;;  %21379 = vmatpush3.msra.mxu0 %v25157_v25 }
 0xd3a   :  { %21369 = vmatprep.subr.mxu1 %v25177_v24  ;;  %21380 = vmatprep.subr.mxu0 %v25149_v20  ;;  %v8942_v52 = vpop.permute.xlu1 %8941  ;;  %v25298_v25 = vsub.f32 %v8970_v57, %v25273_v30  ;;  %v8916_v60 = vpop.permute.xlu0 %8915  ;;  %v25377_v38 = vsub.f32 %v8965_v63, %v25346_v58 }
 0xd3b   :  { %21370 = vmatpush3.msra.mxu1 %v25177_v24  ;;  %21381 = vmatpush3.msra.mxu0 %v25149_v20  ;;  %v19125_v20 = vld [vmem:[%s28074_s1 + $0x140] sm:$0xff]  ;;  %v8964_v4 = vsel %vm3424_vm4, %v8918_v31, %v8942_v52 }
 0xd3c   :  { %21371 = vmatprep.subr.mxu1 %v25197_v33  ;;  %21382 = vmatprep.subr.mxu0 %v25160_v18  ;;  %v25330_v46 = vand.u32 4294901760, %v25298_v25  ;;  %v25364_v40 = vand.u32 4294901760, %v8964_v4  ;;  %v25410_v36 = vand.u32 4294901760, %v25377_v38 }
 0xd3d   :  { %21372 = vmatpush3.msra.mxu1 %v25197_v33  ;;  %21373 = vmatprep.mubr.f32.mxu1 %v8410_v12  ;;  %v19126_v12 = vld [vmem:[%s28074_s1 + $0x148] sm:$0xff] }
 0xd3e   :  { %21383 = vmatpush3.msra.mxu0 %v25160_v18  ;;  %21374 = vmatmul.mubr.f32.vlgmr.msra.gmra.mxu1 %v8420_v23  ;;  %v25300_v18 = vand.u32 4294901760, %v8968_v2  ;;  %v8978_v23 = vsel %vm8328_vm10, %v19126_v12, 0  ;;  %v8940_v61 = vpop.permute.xlu1 %8939  ;;  %v9093_v3 = vsub.f32 %v25298_v25, %v25330_v46  ;;  %v9128_v17 = vsub.f32 %v25377_v38, %v25410_v36 }
 0xd3f   :  { %21384 = vmatprep.subr.mxu0 %v25173_v62  ;;  %21395 = vmatprep.subr.mxu1 %v25113_v19  ;;  %v25319_v45 = vand.u32 4294901760, %v8978_v23  ;;  %v8963_v42 = vsel %vm3424_vm4, %v8916_v60, %v8940_v61 }
 0xd40   :  { %21385 = vmatpush3.msra.mxu0 %v25173_v62  ;;  %21396 = vmatpush3.msra.mxu1 %v25113_v19  ;;  %v8975_v19 = vsel %vm8328_vm10, %v19125_v20, 0  ;;  %v25322_v62 = vsub.f32 %v8968_v2, %v25300_v18  ;;  %v25379_v54 = vand.u32 4294901760, %v8963_v42  ;;  %v9094_v21 = vand.u32 4294901760, %v9093_v3 }
 0xd41   :  { %21386 = vmatprep.subr.mxu0 %v25183_v7  ;;  %21397 = vmatprep.subr.mxu1 %v25131_v28  ;;  %v25315_v32 = vand.u32 4294901760, %v8975_v19  ;;  %v25351_v59 = vsub.f32 %v8978_v23, %v25319_v45  ;;  %v9129_v1 = vand.u32 4294901760, %v9128_v17 }
 0xd42   :  { %21387 = vmatpush3.msra.mxu0 %v25183_v7  ;;  %21398 = vmatpush3.msra.mxu1 %v25131_v28  ;;  %v25308_v28 = vand.u32 4294901760, %v8967_v43  ;;  %v25362_v35 = vand.u32 4294901760, %v25322_v62  ;;  %v25403_v10 = vsub.f32 %v8963_v42, %v25379_v54 }
 0xd43   :  { %21388 = vmatprep.subr.mxu0 %v25205_v56  ;;  %21399 = vmatprep.subr.mxu1 %v25106_v50  ;;  %v25344_v49 = vsub.f32 %v8975_v19, %v25315_v32  ;;  %v19130_v19 = vld [vmem:[%s28075_s2 + $0x3c0] sm:$0xff] }
 0xd44   :  { %21389 = vmatpush3.msra.mxu0 %v25205_v56  ;;  %21400 = vmatpush3.msra.mxu1 %v25106_v50  ;;  %v25324_v50 = vand.u32 4294901760, %v8966_v39  ;;  %v25335_v7 = vsub.f32 %v8967_v43, %v25308_v28  ;;  %v9107_v51 = vsub.f32 %v25322_v62, %v25362_v35  ;;  %v25424_v16 = vand.u32 4294901760, %v25403_v10 }
 0xd45   :  { %21390 = vmatprep.subr.mxu0 %v25216_v22  ;;  %21401 = vmatprep.subr.mxu1 %v25111_v14  ;;  %v9055_v34 = vand.u32 4294901760, %v25344_v49  ;;  %v25532_v23 = vand.u32 4294901760, %v19130_v19 }
 0xd46   :  { %21391 = vmatpush3.msra.mxu0 %v25216_v22  ;;  %21392 = vmatprep.mubr.f32.mxu0 %v25070_v41  ;;  %v25373_v56 = vand.u32 4294901760, %v25335_v7  ;;  %v25392_v22 = vsub.f32 %v8964_v4, %v25364_v40  ;;  %v9108_v13 = vand.u32 4294901760, %v9107_v51  ;;  %v9142_v55 = vsub.f32 %v25403_v10, %v25424_v16 }
 0xd47   :  { %21402 = vmatpush3.msra.mxu1 %v25111_v14  ;;  %21393 = vmatmul.mubr.f32.vlgmr.msra.gmra.mxu0 %v25115_v47  ;;  %v25341_v14 = vand.u32 4294901760, %v25311_v6  ;;  %v9056_v9 = vsub.f32 %v25344_v49, %v9055_v34 }
 0xd48   :  { %21403 = vmatprep.subr.mxu1 %v25117_v0  ;;  %21414 = vmatprep.subr.mxu0 %v25273_v30  ;;  %v25417_v48 = vand.u32 4294901760, %v25392_v22  ;;  %v9143_v2 = vand.u32 4294901760, %v9142_v55 }
 0xd49   :  { %21404 = vmatpush3.msra.mxu1 %v25117_v0  ;;  %21415 = vmatpush3.msra.mxu0 %v25273_v30  ;;  %v25354_v0 = vsub.f32 %v8966_v39, %v25324_v50  ;;  %v9057_v26 = vand.u32 4294901760, %v9056_v9 }
 0xd4a   :  { %21405 = vmatprep.subr.mxu1 %v25153_v5  ;;  %21416 = vmatprep.subr.mxu0 %v25288_v15  ;;  %v9135_v27 = vsub.f32 %v25392_v22, %v25417_v48 }
 0xd4b   :  { %21406 = vmatpush3.msra.mxu1 %v25153_v5  ;;  %21417 = vmatpush3.msra.mxu0 %v25288_v15  ;;  %v9100_v5 = vsub.f32 %v25311_v6, %v25341_v14  ;;  %v25389_v44 = vand.u32 4294901760, %v25354_v0 }
 0xd4c   :  { %21407 = vmatprep.subr.mxu1 %v25177_v24  ;;  %21418 = vmatprep.subr.mxu0 %v25300_v18  ;;  %v9136_v20 = vand.u32 4294901760, %v9135_v27 }
 0xd4d   :  { %21408 = vmatpush3.msra.mxu1 %v25177_v24  ;;  %21419 = vmatpush3.msra.mxu0 %v25300_v18  ;;  %v9065_v24 = vand.u32 4294901760, %v25351_v59  ;;  %v9121_v29 = vsub.f32 %v25354_v0, %v25389_v44 }
 0xd4e   :  { %21409 = vmatprep.subr.mxu1 %v25197_v33  ;;  %21420 = vmatprep.subr.mxu0 %v25308_v28 }
 0xd4f   :  { %21410 = vmatpush3.msra.mxu1 %v25197_v33  ;;  %21411 = vmatprep.mubr.f32.mxu1 %v25070_v41  ;;  %v9101_v33 = vand.u32 4294901760, %v9100_v5  ;;  %v9114_v41 = vsub.f32 %v25335_v7, %v25373_v56  ;;  %v9122_v57 = vand.u32 4294901760, %v9121_v29 }
 0xd50   :  { %21421 = vmatpush3.msra.mxu0 %v25308_v28  ;;  %21412 = vmatmul.mubr.f32.vlgmr.msra.gmra.mxu1 %v25115_v47  ;;  %v9066_v47 = vsub.f32 %v25351_v59, %v9065_v24 }
 0xd51   :  { %21422 = vmatprep.subr.mxu0 %v25324_v50  ;;  %21433 = vmatprep.subr.mxu1 %v9094_v21  ;;  %v9115_v37 = vand.u32 4294901760, %v9114_v41 }
 0xd52   :  { %21423 = vmatpush3.msra.mxu0 %v25324_v50  ;;  %21434 = vmatpush3.msra.mxu1 %v9094_v21  ;;  %v9067_v11 = vand.u32 4294901760, %v9066_v47 }
 0xd53   :  { %21424 = vmatprep.subr.mxu0 %v25346_v58  ;;  %21435 = vmatprep.subr.mxu1 %v9101_v33 }
 0xd54   :  { %21425 = vmatpush3.msra.mxu0 %v25346_v58  ;;  %21436 = vmatpush3.msra.mxu1 %v9101_v33 }
 0xd55   :  { %21426 = vmatprep.subr.mxu0 %v25364_v40  ;;  %21437 = vmatprep.subr.mxu1 %v9108_v13 }
 0xd56   :  { %21427 = vmatpush3.msra.mxu0 %v25364_v40  ;;  %21438 = vmatpush3.msra.mxu1 %v9108_v13 }
 0xd57   :  { %21428 = vmatprep.subr.mxu0 %v25379_v54  ;;  %21439 = vmatprep.subr.mxu1 %v9115_v37 }
 0xd58   :  { %21429 = vmatpush3.msra.mxu0 %v25379_v54  ;;  %21440 = vmatpush3.msra.mxu1 %v9115_v37 }
 0xd59   :  { %21430 = vmatprep.mubr.f32.mxu0 %v9057_v26  ;;  %21441 = vmatprep.subr.mxu1 %v9122_v57 }
 0xd5a   :  { %21452 = vmatprep.subr.mxu0 %v25298_v25  ;;  %21431 = vmatmul.mubr.f32.vlgmr.msra.gmra.mxu0 %v9067_v11 }
 0xd5b   :  { %21442 = vmatpush3.msra.mxu1 %v9122_v57  ;;  %21453 = vmatpush3.msra.mxu0 %v25298_v25 }
 0xd5c   :  { %21443 = vmatprep.subr.mxu1 %v9129_v1  ;;  %21454 = vmatprep.subr.mxu0 %v25311_v6 }
 0xd5d   :  { %21444 = vmatpush3.msra.mxu1 %v9129_v1  ;;  %21455 = vmatpush3.msra.mxu0 %v25311_v6 }
 0xd5e   :  { %21445 = vmatprep.subr.mxu1 %v9136_v20  ;;  %21456 = vmatprep.subr.mxu0 %v25322_v62 }
 0xd5f   :  { %21446 = vmatpush3.msra.mxu1 %v9136_v20  ;;  %21457 = vmatpush3.msra.mxu0 %v25322_v62 }
 0xd60   :  { %21447 = vmatprep.subr.mxu1 %v9143_v2  ;;  %21458 = vmatprep.subr.mxu0 %v25335_v7 }
 0xd61   :  { %21448 = vmatpush3.msra.mxu1 %v9143_v2  ;;  %21449 = vmatprep.mubr.f32.mxu1 %v25315_v32 }
 0xd62   :  { %21459 = vmatpush3.msra.mxu0 %v25335_v7  ;;  %21450 = vmatmul.mubr.f32.vlgmr.msra.gmra.mxu1 %v25319_v45 }
 0xd63   :  { %21460 = vmatprep.subr.mxu0 %v25354_v0  ;;  %21471 = vmatprep.subr.mxu1 %v25273_v30 }
 0xd64   :  { %21461 = vmatpush3.msra.mxu0 %v25354_v0  ;;  %21472 = vmatpush3.msra.mxu1 %v25273_v30 }
 0xd65   :  { %21462 = vmatprep.subr.mxu0 %v25377_v38  ;;  %21473 = vmatprep.subr.mxu1 %v25288_v15 }
 0xd66   :  { %21463 = vmatpush3.msra.mxu0 %v25377_v38  ;;  %21474 = vmatpush3.msra.mxu1 %v25288_v15 }
 0xd67   :  { %21464 = vmatprep.subr.mxu0 %v25392_v22  ;;  %21475 = vmatprep.subr.mxu1 %v25300_v18 }
 0xd68   :  { %21465 = vmatpush3.msra.mxu0 %v25392_v22  ;;  %21476 = vmatpush3.msra.mxu1 %v25300_v18 }
 0xd69   :  { %21466 = vmatprep.subr.mxu0 %v25403_v10  ;;  %21477 = vmatprep.subr.mxu1 %v25308_v28 }
 0xd6a   :  { %21467 = vmatpush3.msra.mxu0 %v25403_v10  ;;  %21468 = vmatprep.mubr.f32.mxu0 %v25344_v49 }
 0xd6b   :  { %21478 = vmatpush3.msra.mxu1 %v25308_v28  ;;  %21469 = vmatmul.mubr.f32.vlgmr.msra.gmra.mxu0 %v25351_v59 }
 0xd6c   :  { %21479 = vmatprep.subr.mxu1 %v25324_v50  ;;  %21490 = vmatprep.subr.mxu0 %v25330_v46 }
 0xd6d   :  { %21480 = vmatpush3.msra.mxu1 %v25324_v50  ;;  %21491 = vmatpush3.msra.mxu0 %v25330_v46 }
 0xd6e   :  { %21481 = vmatprep.subr.mxu1 %v25346_v58  ;;  %21492 = vmatprep.subr.mxu0 %v25341_v14 }
 0xd6f   :  { %21482 = vmatpush3.msra.mxu1 %v25346_v58  ;;  %21493 = vmatpush3.msra.mxu0 %v25341_v14 }
 0xd70   :  { %21483 = vmatprep.subr.mxu1 %v25364_v40  ;;  %21494 = vmatprep.subr.mxu0 %v25362_v35 }
 0xd71   :  { %21484 = vmatpush3.msra.mxu1 %v25364_v40  ;;  %21495 = vmatpush3.msra.mxu0 %v25362_v35 }
 0xd72   :  { %21485 = vmatprep.subr.mxu1 %v25379_v54  ;;  %21496 = vmatprep.subr.mxu0 %v25373_v56 }
 0xd73   :  { %21486 = vmatpush3.msra.mxu1 %v25379_v54  ;;  %21487 = vmatprep.mubr.f32.mxu1 %v9055_v34 }
 0xd74   :  { %21497 = vmatpush3.msra.mxu0 %v25373_v56  ;;  %21488 = vmatmul.mubr.f32.vlgmr.msra.gmra.mxu1 %v9065_v24 }
 0xd75   :  { %21498 = vmatprep.subr.mxu0 %v25389_v44  ;;  %21509 = vmatprep.subr.mxu1 %v25273_v30 }
 0xd76   :  { %21499 = vmatpush3.msra.mxu0 %v25389_v44  ;;  %21510 = vmatpush3.msra.mxu1 %v25273_v30  ;;  %v19132_v30 = vld [vmem:[%s28075_s2 + $0x3e0] sm:$0xff] }
 0xd77   :  { %21500 = vmatprep.subr.mxu0 %v25410_v36  ;;  %21511 = vmatprep.subr.mxu1 %v25288_v15  ;;  %v25511_v12 = vand.u32 4294901760, %v19132_v30 }
 0xd78   :  { %21501 = vmatpush3.msra.mxu0 %v25410_v36  ;;  %21512 = vmatpush3.msra.mxu1 %v25288_v15  ;;  %v19131_v15 = vld [vmem:[%s28075_s2 + $0x3d0] sm:$0xff] }
 0xd79   :  { %21502 = vmatprep.subr.mxu0 %v25417_v48  ;;  %21513 = vmatprep.subr.mxu1 %v25300_v18  ;;  %v25517_v43 = vsub.f32 %v19132_v30, %v25511_v12  ;;  %v25519_v52 = vand.u32 4294901760, %v19131_v15  ;;  %v19128_v30 = vld [vmem:[%s28075_s2 + $0x310] sm:$0xff] }
 0xd7a   :  { %21503 = vmatpush3.msra.mxu0 %v25417_v48  ;;  %21514 = vmatpush3.msra.mxu1 %v25300_v18  ;;  %v19129_v48 = vld [vmem:[%s28075_s2 + $0x320] sm:$0xff] }
 0xd7b   :  { %21504 = vmatprep.subr.mxu0 %v25424_v16  ;;  %21515 = vmatprep.subr.mxu1 %v25308_v28  ;;  %v25527_v25 = vand.u32 4294901760, %v25517_v43  ;;  %v25530_v18 = vsub.f32 %v19131_v15, %v25519_v52  ;;  %v25570_v27 = vand.u32 4294901760, %v19129_v48 }
 0xd7c   :  { %21505 = vmatpush3.msra.mxu0 %v25424_v16  ;;  %21506 = vmatprep.mubr.f32.mxu0 %v25315_v32 }
 0xd7d   :  { %21516 = vmatpush3.msra.mxu1 %v25308_v28  ;;  %21507 = vmatmul.mubr.f32.vlgmr.msra.gmra.mxu0 %v25319_v45  ;;  %v9692_v39 = vsub.f32 %v25517_v43, %v25527_v25  ;;  %v25539_v31 = vand.u32 4294901760, %v25530_v18  ;;  %v25542_v28 = vsub.f32 %v19130_v19, %v25532_v23 }
 0xd7e   :  { %21517 = vmatprep.subr.mxu1 %v25324_v50  ;;  %21525 = vmatprep.mubr.f32.mxu1 %v25315_v32 }
 0xd7f   :  { %21518 = vmatpush3.msra.mxu1 %v25324_v50  ;;  %21528 = vmatprep.subr.mxu0 %v25511_v12  ;;  %v25546_v6 = vand.u32 4294901760, %v9692_v39  ;;  %v9699_v32 = vsub.f32 %v25530_v18, %v25539_v31 }
 0xd80   :  { %21519 = vmatprep.subr.mxu1 %v25346_v58  ;;  %21529 = vmatpush3.msra.mxu0 %v25511_v12 }
 0xd81   :  { %21520 = vmatpush3.msra.mxu1 %v25346_v58  ;;  %21530 = vmatprep.subr.mxu0 %v25519_v52  ;;  %v25555_v62 = vand.u32 4294901760, %v9699_v32 }
 0xd82   :  { %21521 = vmatprep.subr.mxu1 %v25364_v40  ;;  %21531 = vmatpush3.msra.mxu0 %v25519_v52 }
 0xd83   :  { %21522 = vmatpush3.msra.mxu1 %v25364_v40  ;;  %21532 = vmatprep.subr.mxu0 %v25532_v23 }
 0xd84   :  { %21523 = vmatprep.subr.mxu1 %v25379_v54  ;;  %21533 = vmatpush3.msra.mxu0 %v25532_v23 }
 0xd85   :  { %21524 = vmatpush3.msra.mxu1 %v25379_v54  ;;  %21546 = vmatprep.subr.mxu0 %v25517_v43 }
 0xd86   :  { %21526 = vmatmul.mubr.f32.vlgmr.msra.gmra.mxu1 %v25319_v45  ;;  %v25551_v45 = vand.u32 4294901760, %v25542_v28  ;;  %21537 = vmatprep.subr.mxu1 %v25546_v6 }
 0xd87   :  { %21538 = vmatpush3.msra.mxu1 %v25546_v6 }
 0xd88   :  { %v9706_v50 = vsub.f32 %v25542_v28, %v25551_v45  ;;  %21539 = vmatprep.subr.mxu1 %v25555_v62 }
 0xd89   :  { %21540 = vmatpush3.msra.mxu1 %v25555_v62 }
 0xd8a   :  { %v25561_v63 = vand.u32 4294901760, %v9706_v50  ;;  %v19127_v50 = vld [vmem:[%s28075_s2 + $0x300] sm:$0xff] }
 0xd8c   :  { %21541 = vmatprep.subr.mxu1 %v25561_v63 }
 0xd8d   :  { %21542 = vmatpush3.msra.mxu1 %v25561_v63 }
 0xd8e   :  { %21555 = vmatprep.subr.mxu1 %v25511_v12 }
 0xde5   :  { %v21318_v46 = vpop.f32.mrf.mxu0 }
 0xde7   :  { %v8414_v61 = vpop.f32.mrf.mxu0 }
 0xdec   :  { %v21337_v7 = vpop.f32.mrf.mxu1 }
 0xded   :  { %v8542_v33 = vadd.f32 %v21337_v7, %v21318_v46  ;;  %v25585_v7 = vand.u32 4294901760, %v19128_v30 }
 0xdee   :  { %v8535_v14 = vpop.f32.mrf.mxu1 }
 0xdef   :  { %v8536_v47 = vadd.f32 %v8535_v14, %v8414_v61  ;;  %v25588_v14 = vsub.f32 %v19129_v48, %v25570_v27 }
 0xdf5   :  { %v21356_v4 = vpop.f32.mrf.mxu0 }
 0xdf6   :  { %v8637_v36 = vadd.f32 %v21356_v4, %v8542_v33 }
 0xdf7   :  { %v8629_v49 = vpop.f32.mrf.mxu0 }
 0xdf8   :  { %v8630_v26 = vadd.f32 %v8629_v49, %v8536_v47 }
 0xdfe   :  { %v21375_v58 = vpop.f32.mrf.mxu1 }
 0xdff   :  { %v8726_v11 = vadd.f32 %v21375_v58, %v8637_v36 }
 0xe00   :  { %v8717_v59 = vpop.f32.mrf.mxu1 }
 0xe01   :  { %v8718_v1 = vadd.f32 %v8717_v59, %v8630_v26 }
 0xe07   :  { %v21394_v60 = vpop.f32.mrf.mxu0 }
 0xe08   :  { %v8827_v55 = vadd.f32 %v21394_v60, %v8726_v11  ;;  %v25592_v60 = vand.u32 4294901760, %v19127_v50 }
 0xe09   :  { %v8820_v0 = vpop.f32.mrf.mxu0 }
 0xe0a   :  { %v8821_v19 = vadd.f32 %v8820_v0, %v8718_v1  ;;  %v25597_v0 = vsub.f32 %v19128_v30, %v25585_v7 }
 0xe10   :  { %v21413_v42 = vpop.f32.mrf.mxu1 }
 0xe11   :  { %v8912_v39 = vadd.f32 %v21413_v42, %v8827_v55  ;;  %v25601_v42 = vand.u32 4294901760, %v25588_v14 }
 0xe12   :  { %v8905_v35 = vpop.f32.mrf.mxu1 }
 0xe13   :  { %v8906_v4 = vadd.f32 %v8905_v35, %v8821_v19 }
 0xe1a   :  { %v21432_v3 = vpop.f32.mrf.mxu0 }
 0xe1c   :  { %v9059_v40 = vpop.f32.mrf.mxu0 }
 0xe22   :  { %v21451_v5 = vpop.f32.mrf.mxu1 }
 0xe23   :  { %v9187_v24 = vadd.f32 %v21451_v5, %v21432_v3  ;;  %v10090_v5 = vsel %vm3424_vm4, %v8906_v4, 0 }
 0xe24   :  { %v9180_v34 = vpop.f32.mrf.mxu1 }
 0xe25   :  { %v9181_v51 = vadd.f32 %v9180_v34, %v9059_v40  ;;  %v25605_v40 = vsub.f32 %v19127_v50, %v25592_v60  ;;  %v25611_v34 = vand.u32 4294901760, %v25597_v0 }
 0xe2b   :  { %v21470_v56 = vpop.f32.mrf.mxu0 }
 0xe2c   :  { %v9282_v44 = vadd.f32 %v21470_v56, %v9187_v24  ;;  %v25619_v24 = vand.u32 4294901760, %v25605_v40 }
 0xe2d   :  { %v9274_v38 = vpop.f32.mrf.mxu0 }
 0xe2e   :  { %v9275_v41 = vadd.f32 %v9274_v38, %v9181_v51  ;;  %v10213_v38 = vsub.f32 %v25588_v14, %v25601_v42  ;;  %v10220_v51 = vsub.f32 %v25597_v0, %v25611_v34  ;;  %v10227_v33 = vsub.f32 %v25605_v40, %v25619_v24 }
 0xe30   :  { %v25648_v47 = vand.u32 4294901760, %v10227_v33 }
 0xe34   :  { %v21489_v54 = vpop.f32.mrf.mxu1 }
 0xe35   :  { %v9371_v9 = vadd.f32 %v21489_v54, %v9282_v44  ;;  %v25628_v44 = vand.u32 4294901760, %v10213_v38 }
 0xe36   :  { %v9362_v22 = vpop.f32.mrf.mxu1 }
 0xe37   :  { %v9363_v13 = vadd.f32 %v9362_v22, %v9275_v41  ;;  %v10093_v22 = vsel %vm3424_vm4, %v8912_v39, 0 }
 0xe3d   :  { %v21508_v21 = vpop.f32.mrf.mxu0 }
 0xe3e   :  { %v9472_v29 = vadd.f32 %v21508_v21, %v9371_v9  ;;  %v25621_v21 = vand.u32 4294901760, %v10090_v5  ;;  %v25640_v9 = vand.u32 4294901760, %v10220_v51 }
 0xe3f   :  { %v9465_v10 = vpop.f32.mrf.mxu0 }
 0xe40   :  { %v9466_v17 = vadd.f32 %v9465_v10, %v9363_v13  ;;  %v10164_v41 = vsub.f32 %v10090_v5, %v25621_v21  ;;  %v25642_v10 = vand.u32 4294901760, %v10093_v22 }
 0xe42   :  { %v10165_v36 = vand.u32 4294901760, %v10164_v41  ;;  %v10174_v13 = vsub.f32 %v10093_v22, %v25642_v10 }
 0xe44   :  { %v10175_v48 = vand.u32 4294901760, %v10174_v13 }
 0xe46   :  { %v21527_v37 = vpop.f32.mrf.mxu1  ;;  %v10176_v26 = vsub.f32 %v10174_v13, %v10175_v48 }
 0xe47   :  { %v9557_v16 = vadd.f32 %v21527_v37, %v9472_v29  ;;  %v10166_v29 = vsub.f32 %v10164_v41, %v10165_v36 }
 0xe48   :  { %v9550_v57 = vpop.f32.mrf.mxu1  ;;  %v10177_v11 = vand.u32 4294901760, %v10176_v26 }
 0xe49   :  { %v9572_v20 = vsel %vm3424_vm4, %v9557_v16, 0  ;;  %v9551_v2 = vadd.f32 %v9550_v57, %v9466_v17  ;;  %10612 = vrot.lane.b32.xlu1 %v9557_v16, %s22351_s8  ;;  %v10167_v37 = vand.u32 4294901760, %v10166_v29 }
 0xe4a   :  { %v25576_v15 = vand.u32 4294901760, %v9572_v20 }
 0xe4b   :  { %v9569_v32 = vsel %vm3424_vm4, %v9551_v2, 0  ;;  %10610 = vrot.lane.b32.xlu0 %v9551_v2, %s22351_s8 }
 0xe4c   :  { %v9653_v46 = vsub.f32 %v9572_v20, %v25576_v15  ;;  %v25583_v61 = vand.u32 4294901760, %v9569_v32 }
 0xe4d   :  { %11135 = vrot.lane.b32.xlu1 %v8912_v39, %s22351_s8 }
 0xe4e   :  { %v9654_v49 = vand.u32 4294901760, %v9653_v46  ;;  %v9643_v58 = vsub.f32 %v9569_v32, %v25583_v61  ;;  %21543 = vmatprep.mubr.f32.mxu1 %v25583_v61 }
 0xe4f   :  { %11133 = vrot.lane.b32.xlu0 %v8906_v4, %s22351_s8  ;;  %21544 = vmatmul.mubr.f32.vlgmr.msra.gmra.mxu1 %v25576_v15 }
 0xe50   :  { %21556 = vmatpush3.msra.mxu1 %v25511_v12  ;;  %v9644_v59 = vand.u32 4294901760, %v9643_v58  ;;  %v9655_v3 = vsub.f32 %v9653_v46, %v9654_v49 }
 0xe51   :  { %21557 = vmatprep.subr.mxu1 %v25519_v52 }
 0xe52   :  { %21558 = vmatpush3.msra.mxu1 %v25519_v52  ;;  %21561 = vmatprep.mubr.f32.mxu1 %v9644_v59  ;;  %v9645_v35 = vsub.f32 %v9643_v58, %v9644_v59  ;;  %v9656_v54 = vand.u32 4294901760, %v9655_v3 }
 0xe53   :  { %21559 = vmatprep.subr.mxu1 %v25532_v23 }
 0xe54   :  { %21560 = vmatpush3.msra.mxu1 %v25532_v23  ;;  %v9646_v56 = vand.u32 4294901760, %v9645_v35 }
 0xe55   :  { %21562 = vmatmul.mubr.f32.vlgmr.msra.gmra.mxu1 %v9654_v49  ;;  %21573 = vmatprep.subr.mxu1 %v25511_v12 }
 0xe56   :  { %21574 = vmatpush3.msra.mxu1 %v25511_v12  ;;  %21579 = vmatprep.mubr.f32.mxu1 %v25583_v61 }
 0xe57   :  { %21534 = vmatprep.mubr.f32.mxu0 %v9646_v56  ;;  %21575 = vmatprep.subr.mxu1 %v25519_v52 }
 0xe58   :  { %21535 = vmatmul.mubr.f32.vlgmr.msra.gmra.mxu0 %v9656_v54  ;;  %21576 = vmatpush3.msra.mxu1 %v25519_v52 }
 0xe59   :  { %21547 = vmatpush3.msra.mxu0 %v25517_v43  ;;  %21552 = vmatprep.mubr.f32.mxu0 %v9643_v58 }
 0xe5a   :  { %21548 = vmatprep.subr.mxu0 %v25530_v18  ;;  %21577 = vmatprep.subr.mxu1 %v25532_v23 }
 0xe5b   :  { %21549 = vmatpush3.msra.mxu0 %v25530_v18  ;;  %21578 = vmatpush3.msra.mxu1 %v25532_v23 }
 0xe5c   :  { %21550 = vmatprep.subr.mxu0 %v25542_v28  ;;  %21580 = vmatmul.mubr.f32.vlgmr.msra.gmra.mxu1 %v25576_v15 }
 0xe5d   :  { %21591 = vmatprep.subr.mxu1 %v25628_v44  ;;  %21551 = vmatpush3.msra.mxu0 %v25542_v28 }
 0xe5e   :  { %21592 = vmatpush3.msra.mxu1 %v25628_v44  ;;  %21597 = vmatprep.mubr.f32.mxu1 %v25621_v21 }
 0xe5f   :  { %21553 = vmatmul.mubr.f32.vlgmr.msra.gmra.mxu0 %v9653_v46  ;;  %21564 = vmatprep.subr.mxu0 %v25527_v25 }
 0xe60   :  { %21593 = vmatprep.subr.mxu1 %v25640_v9  ;;  %21565 = vmatpush3.msra.mxu0 %v25527_v25 }
 0xe61   :  { %21570 = vmatprep.mubr.f32.mxu0 %v25583_v61  ;;  %21594 = vmatpush3.msra.mxu1 %v25640_v9 }
 0xe62   :  { %21566 = vmatprep.subr.mxu0 %v25539_v31  ;;  %21595 = vmatprep.subr.mxu1 %v25648_v47 }
 0xe63   :  { %21567 = vmatpush3.msra.mxu0 %v25539_v31  ;;  %21596 = vmatpush3.msra.mxu1 %v25648_v47 }
 0xe64   :  { %21568 = vmatprep.subr.mxu0 %v25551_v45  ;;  %21598 = vmatmul.mubr.f32.vlgmr.msra.gmra.mxu1 %v25642_v10 }
 0xe65   :  { %21609 = vmatprep.subr.mxu1 %v25570_v27  ;;  %21569 = vmatpush3.msra.mxu0 %v25551_v45 }
 0xe66   :  { %21610 = vmatpush3.msra.mxu1 %v25570_v27  ;;  %21615 = vmatprep.mubr.f32.mxu1 %v10165_v36 }
 0xe67   :  { %21571 = vmatmul.mubr.f32.vlgmr.msra.gmra.mxu0 %v25576_v15  ;;  %21582 = vmatprep.subr.mxu0 %v25570_v27 }
 0xe68   :  { %21611 = vmatprep.subr.mxu1 %v25585_v7  ;;  %21583 = vmatpush3.msra.mxu0 %v25570_v27 }
 0xe69   :  { %21588 = vmatprep.mubr.f32.mxu0 %v10167_v37  ;;  %21612 = vmatpush3.msra.mxu1 %v25585_v7 }
 0xe6a   :  { %21584 = vmatprep.subr.mxu0 %v25585_v7  ;;  %21613 = vmatprep.subr.mxu1 %v25592_v60 }
 0xe6b   :  { %21585 = vmatpush3.msra.mxu0 %v25585_v7  ;;  %21614 = vmatpush3.msra.mxu1 %v25592_v60 }
 0xe6c   :  { %21586 = vmatprep.subr.mxu0 %v25592_v60  ;;  %21616 = vmatmul.mubr.f32.vlgmr.msra.gmra.mxu1 %v10175_v48 }
 0xe6d   :  { %21627 = vmatprep.subr.mxu1 %v25570_v27  ;;  %21587 = vmatpush3.msra.mxu0 %v25592_v60 }
 0xe6e   :  { %21628 = vmatpush3.msra.mxu1 %v25570_v27  ;;  %21633 = vmatprep.mubr.f32.mxu1 %v25621_v21 }
 0xe6f   :  { %21589 = vmatmul.mubr.f32.vlgmr.msra.gmra.mxu0 %v10177_v11  ;;  %21600 = vmatprep.subr.mxu0 %v25588_v14 }
 0xe70   :  { %21629 = vmatprep.subr.mxu1 %v25585_v7  ;;  %21601 = vmatpush3.msra.mxu0 %v25588_v14 }
 0xe71   :  { %21606 = vmatprep.mubr.f32.mxu0 %v10164_v41  ;;  %21630 = vmatpush3.msra.mxu1 %v25585_v7 }
 0xe72   :  { %21602 = vmatprep.subr.mxu0 %v25597_v0  ;;  %21631 = vmatprep.subr.mxu1 %v25592_v60 }
 0xe73   :  { %21603 = vmatpush3.msra.mxu0 %v25597_v0  ;;  %21632 = vmatpush3.msra.mxu1 %v25592_v60 }
 0xe74   :  { %21604 = vmatprep.subr.mxu0 %v25605_v40  ;;  %21634 = vmatmul.mubr.f32.vlgmr.msra.gmra.mxu1 %v25642_v10 }
 0xe75   :  { %21605 = vmatpush3.msra.mxu0 %v25605_v40  ;;  %21645 = vmatprep.subr.mxu1 %v25546_v6 }
 0xe76   :  { %21607 = vmatmul.mubr.f32.vlgmr.msra.gmra.mxu0 %v10174_v13  ;;  %21618 = vmatprep.subr.mxu0 %v25601_v42 }
 0xe77   :  { %21619 = vmatpush3.msra.mxu0 %v25601_v42  ;;  %21624 = vmatprep.mubr.f32.mxu0 %v25621_v21 }
 0xe78   :  { %21620 = vmatprep.subr.mxu0 %v25611_v34  ;;  %21646 = vmatpush3.msra.mxu1 %v25546_v6 }
 0xe79   :  { %21621 = vmatpush3.msra.mxu0 %v25611_v34  ;;  %21647 = vmatprep.subr.mxu1 %v25555_v62 }
 0xe7a   :  { %21622 = vmatprep.subr.mxu0 %v25619_v24  ;;  %21648 = vmatpush3.msra.mxu1 %v25555_v62 }
 0xe7b   :  { %21623 = vmatpush3.msra.mxu0 %v25619_v24  ;;  %21649 = vmatprep.subr.mxu1 %v25561_v63 }
 0xe7c   :  { %21625 = vmatmul.mubr.f32.vlgmr.msra.gmra.mxu0 %v25642_v10  ;;  %21650 = vmatpush3.msra.mxu1 %v25561_v63 }
 0xe7d   :  { %21663 = vmatprep.subr.mxu1 %v25511_v12  ;;  %21636 = vmatprep.subr.mxu0 %v25511_v12 }
 0xe7e   :  { %21637 = vmatpush3.msra.mxu0 %v25511_v12 }
 0xe7f   :  { %21638 = vmatprep.subr.mxu0 %v25519_v52 }
 0xe80   :  { %21639 = vmatpush3.msra.mxu0 %v25519_v52 }
 0xe81   :  { %21640 = vmatprep.subr.mxu0 %v25532_v23 }
 0xe82   :  { %21641 = vmatpush3.msra.mxu0 %v25532_v23 }
 0xe83   :  { %21654 = vmatprep.subr.mxu0 %v25517_v43 }
 0xebb   :  { %v10613_v6 = vpop.permute.xlu1 %10612 }
 0xebc   :  { %v10616_v62 = vsel %vm3424_vm4, %v10613_v6, 0 }
 0xebd   :  { %v25713_v63 = vand.u32 4294901760, %v10616_v62  ;;  %v10611_v17 = vpop.permute.xlu0 %10610 }
 0xebe   :  { %v10614_v16 = vsel %vm3424_vm4, %v10611_v17, 0 }
 0xebf   :  { %v10697_v57 = vsub.f32 %v10616_v62, %v25713_v63  ;;  %v10686_v1 = vand.u32 4294901760, %v10614_v16  ;;  %v11136_v46 = vpop.permute.xlu1 %11135 }
 0xec0   :  { %v11139_v4 = vsel %vm3424_vm4, %v11136_v46, 0 }
 0xec1   :  { %v10698_v55 = vand.u32 4294901760, %v10697_v57  ;;  %v10687_v20 = vsub.f32 %v10614_v16, %v10686_v1  ;;  %21651 = vmatprep.mubr.f32.mxu1 %v10686_v1  ;;  %v11134_v30 = vpop.permute.xlu0 %11133 }
 0xec2   :  { %21652 = vmatmul.mubr.f32.vlgmr.msra.gmra.mxu1 %v25713_v63  ;;  %v11137_v39 = vsel %vm3424_vm4, %v11134_v30, 0 }
 0xec3   :  { %21664 = vmatpush3.msra.mxu1 %v25511_v12  ;;  %v10688_v2 = vand.u32 4294901760, %v10687_v20  ;;  %v10699_v15 = vsub.f32 %v10697_v57, %v10698_v55  ;;  %v25726_v61 = vand.u32 4294901760, %v11137_v39 }
 0xec4   :  { %21665 = vmatprep.subr.mxu1 %v25519_v52 }
 0xec5   :  { %21666 = vmatpush3.msra.mxu1 %v25519_v52  ;;  %21669 = vmatprep.mubr.f32.mxu1 %v10688_v2  ;;  %v10689_v19 = vsub.f32 %v10687_v20, %v10688_v2  ;;  %v10700_v50 = vand.u32 4294901760, %v10699_v15 }
 0xec6   :  { %21667 = vmatprep.subr.mxu1 %v25532_v23 }
 0xec7   :  { %21668 = vmatpush3.msra.mxu1 %v25532_v23  ;;  %v10690_v32 = vand.u32 4294901760, %v10689_v19 }
 0xec8   :  { %21670 = vmatmul.mubr.f32.vlgmr.msra.gmra.mxu1 %v10698_v55  ;;  %21681 = vmatprep.subr.mxu1 %v25511_v12 }
 0xec9   :  { %21682 = vmatpush3.msra.mxu1 %v25511_v12  ;;  %21687 = vmatprep.mubr.f32.mxu1 %v10686_v1  ;;  %v11210_v12 = vsub.f32 %v11137_v39, %v25726_v61 }
 0xeca   :  { %21642 = vmatprep.mubr.f32.mxu0 %v10690_v32  ;;  %21683 = vmatprep.subr.mxu1 %v25519_v52 }
 0xecb   :  { %21643 = vmatmul.mubr.f32.vlgmr.msra.gmra.mxu0 %v10700_v50  ;;  %21684 = vmatpush3.msra.mxu1 %v25519_v52  ;;  %v25739_v52 = vand.u32 4294901760, %v11139_v4 }
 0xecc   :  { %21655 = vmatpush3.msra.mxu0 %v25517_v43  ;;  %21660 = vmatprep.mubr.f32.mxu0 %v10687_v20  ;;  %v11211_v43 = vand.u32 4294901760, %v11210_v12 }
 0xecd   :  { %21656 = vmatprep.subr.mxu0 %v25530_v18  ;;  %21685 = vmatprep.subr.mxu1 %v25532_v23 }
 0xece   :  { %21657 = vmatpush3.msra.mxu0 %v25530_v18  ;;  %21686 = vmatpush3.msra.mxu1 %v25532_v23  ;;  %v11220_v18 = vsub.f32 %v11139_v4, %v25739_v52  ;;  %v11212_v23 = vsub.f32 %v11210_v12, %v11211_v43 }
 0xecf   :  { %21658 = vmatprep.subr.mxu0 %v25542_v28  ;;  %21688 = vmatmul.mubr.f32.vlgmr.msra.gmra.mxu1 %v25713_v63 }
 0xed0   :  { %21699 = vmatprep.subr.mxu1 %v25628_v44  ;;  %21659 = vmatpush3.msra.mxu0 %v25542_v28  ;;  %v11221_v28 = vand.u32 4294901760, %v11220_v18 }
 0xed1   :  { %21700 = vmatpush3.msra.mxu1 %v25628_v44  ;;  %21705 = vmatprep.mubr.f32.mxu1 %v25726_v61 }
 0xed2   :  { %21661 = vmatmul.mubr.f32.vlgmr.msra.gmra.mxu0 %v10697_v57  ;;  %21672 = vmatprep.subr.mxu0 %v25527_v25 }
 0xed3   :  { %21701 = vmatprep.subr.mxu1 %v25640_v9  ;;  %21673 = vmatpush3.msra.mxu0 %v25527_v25  ;;  %v11213_v25 = vand.u32 4294901760, %v11212_v23 }
 0xed4   :  { %21678 = vmatprep.mubr.f32.mxu0 %v10686_v1  ;;  %21702 = vmatpush3.msra.mxu1 %v25640_v9 }
 0xed5   :  { %21674 = vmatprep.subr.mxu0 %v25539_v31  ;;  %21703 = vmatprep.subr.mxu1 %v25648_v47 }
 0xed6   :  { %21675 = vmatpush3.msra.mxu0 %v25539_v31  ;;  %21704 = vmatpush3.msra.mxu1 %v25648_v47  ;;  %v11222_v31 = vsub.f32 %v11220_v18, %v11221_v28 }
 0xed7   :  { %21676 = vmatprep.subr.mxu0 %v25551_v45  ;;  %21706 = vmatmul.mubr.f32.vlgmr.msra.gmra.mxu1 %v25739_v52 }
 0xed8   :  { %21717 = vmatprep.subr.mxu1 %v25570_v27  ;;  %21677 = vmatpush3.msra.mxu0 %v25551_v45  ;;  %v11223_v45 = vand.u32 4294901760, %v11222_v31 }
 0xed9   :  { %21718 = vmatpush3.msra.mxu1 %v25570_v27  ;;  %21723 = vmatprep.mubr.f32.mxu1 %v11211_v43 }
 0xeda   :  { %21679 = vmatmul.mubr.f32.vlgmr.msra.gmra.mxu0 %v25713_v63  ;;  %21690 = vmatprep.subr.mxu0 %v25570_v27 }
 0xedb   :  { %21719 = vmatprep.subr.mxu1 %v25585_v7  ;;  %21691 = vmatpush3.msra.mxu0 %v25570_v27 }
 0xedc   :  { %21696 = vmatprep.mubr.f32.mxu0 %v11213_v25  ;;  %21720 = vmatpush3.msra.mxu1 %v25585_v7 }
 0xedd   :  { %21692 = vmatprep.subr.mxu0 %v25585_v7  ;;  %21721 = vmatprep.subr.mxu1 %v25592_v60 }
 0xede   :  { %21693 = vmatpush3.msra.mxu0 %v25585_v7  ;;  %21722 = vmatpush3.msra.mxu1 %v25592_v60 }
 0xedf   :  { %21694 = vmatprep.subr.mxu0 %v25592_v60  ;;  %21724 = vmatmul.mubr.f32.vlgmr.msra.gmra.mxu1 %v11221_v28 }
 0xee0   :  { %21735 = vmatprep.subr.mxu1 %v25570_v27  ;;  %21695 = vmatpush3.msra.mxu0 %v25592_v60 }
 0xee1   :  { %21736 = vmatpush3.msra.mxu1 %v25570_v27  ;;  %21741 = vmatprep.mubr.f32.mxu1 %v25726_v61 }
 0xee2   :  { %21697 = vmatmul.mubr.f32.vlgmr.msra.gmra.mxu0 %v11223_v45  ;;  %21708 = vmatprep.subr.mxu0 %v25588_v14 }
 0xee3   :  { %21737 = vmatprep.subr.mxu1 %v25585_v7  ;;  %21709 = vmatpush3.msra.mxu0 %v25588_v14 }
 0xee4   :  { %21714 = vmatprep.mubr.f32.mxu0 %v11210_v12  ;;  %21738 = vmatpush3.msra.mxu1 %v25585_v7 }
 0xee5   :  { %21710 = vmatprep.subr.mxu0 %v25597_v0  ;;  %21739 = vmatprep.subr.mxu1 %v25592_v60 }
 0xee6   :  { %21711 = vmatpush3.msra.mxu0 %v25597_v0  ;;  %21740 = vmatpush3.msra.mxu1 %v25592_v60 }
 0xee7   :  { %21712 = vmatprep.subr.mxu0 %v25605_v40  ;;  %21742 = vmatmul.mubr.f32.vlgmr.msra.gmra.mxu1 %v25739_v52 }
 0xee8   :  { %21713 = vmatpush3.msra.mxu0 %v25605_v40 }
 0xee9   :  { %21715 = vmatmul.mubr.f32.vlgmr.msra.gmra.mxu0 %v11220_v18  ;;  %21726 = vmatprep.subr.mxu0 %v25601_v42 }
 0xeea   :  { %21727 = vmatpush3.msra.mxu0 %v25601_v42  ;;  %21732 = vmatprep.mubr.f32.mxu0 %v25726_v61 }
 0xeeb   :  { %21728 = vmatprep.subr.mxu0 %v25611_v34 }
 0xeec   :  { %21729 = vmatpush3.msra.mxu0 %v25611_v34 }
 0xeed   :  { %21730 = vmatprep.subr.mxu0 %v25619_v24 }
 0xeee   :  { %21731 = vmatpush3.msra.mxu0 %v25619_v24 }
 0xeef   :  { %21733 = vmatmul.mubr.f32.vlgmr.msra.gmra.mxu0 %v25739_v52 }
 0xf0f   :  { %v21545_v27 = vpop.f32.mrf.mxu1 }
 0xf11   :  { %v9744_v49 = vpop.f32.mrf.mxu1 }
 0xf15   :  { %v21563_v59 = vpop.f32.mrf.mxu1 }
 0xf17   :  { %v9911_v5 = vpop.f32.mrf.mxu1 }
 0xf18   :  { %v21536_v7 = vpop.f32.mrf.mxu0 }
 0xf19   :  { %v9751_v14 = vadd.f32 %v21545_v27, %v21536_v7 }
 0xf1a   :  { %v9648_v58 = vpop.f32.mrf.mxu0 }
 0xf1b   :  { %v9745_v60 = vadd.f32 %v9744_v49, %v9648_v58 }
 0xf1c   :  { %v21581_v34 = vpop.f32.mrf.mxu1 }
 0xf1e   :  { %v10079_v44 = vpop.f32.mrf.mxu1 }
 0xf1f   :  { %v21554_v0 = vpop.f32.mrf.mxu0 }
 0xf20   :  { %v9836_v42 = vadd.f32 %v21554_v0, %v9751_v14 }
 0xf21   :  { %v9828_v3 = vpop.f32.mrf.mxu0 }
 0xf22   :  { %v9829_v35 = vadd.f32 %v9828_v3, %v9745_v60  ;;  %v9920_v40 = vadd.f32 %v21563_v59, %v9836_v42 }
 0xf24   :  { %v9912_v56 = vadd.f32 %v9911_v5, %v9829_v35  ;;  %v21599_v33 = vpop.f32.mrf.mxu1 }
 0xf26   :  { %v10265_v13 = vpop.f32.mrf.mxu1 }
 0xf27   :  { %v21572_v38 = vpop.f32.mrf.mxu0 }
 0xf28   :  { %v10006_v54 = vadd.f32 %v21572_v38, %v9920_v40 }
 0xf29   :  { %v9999_v24 = vpop.f32.mrf.mxu0 }
 0xf2a   :  { %v10000_v21 = vadd.f32 %v9999_v24, %v9912_v56  ;;  %v10086_v51 = vadd.f32 %v21581_v34, %v10006_v54 }
 0xf2c   :  { %v10080_v22 = vadd.f32 %v10079_v44, %v10000_v21  ;;  %v21617_v48 = vpop.f32.mrf.mxu1 }
 0xf2e   :  { %v10432_v63 = vpop.f32.mrf.mxu1 }
 0xf2f   :  { %v21590_v41 = vpop.f32.mrf.mxu0 }
 0xf30   :  { %v10180_v9 = vadd.f32 %v21590_v41, %v10086_v51 }
 0xf31   :  { %v10169_v10 = vpop.f32.mrf.mxu0 }
 0xf32   :  { %v10170_v47 = vadd.f32 %v10169_v10, %v10080_v22  ;;  %v10272_v36 = vadd.f32 %v21599_v33, %v10180_v9 }
 0xf34   :  { %v10266_v29 = vadd.f32 %v10265_v13, %v10170_v47  ;;  %v21635_v1 = vpop.f32.mrf.mxu1 }
 0xf36   :  { %v21608_v37 = vpop.f32.mrf.mxu0  ;;  %v10600_v30 = vpop.f32.mrf.mxu1 }
 0xf37   :  { %v10357_v26 = vadd.f32 %v21608_v37, %v10272_v36 }
 0xf38   :  { %v10349_v11 = vpop.f32.mrf.mxu0 }
 0xf39   :  { %v10350_v6 = vadd.f32 %v10349_v11, %v10266_v29  ;;  %v10441_v62 = vadd.f32 %v21617_v48, %v10357_v26 }
 0xf3b   :  { %v10433_v17 = vadd.f32 %v10432_v63, %v10350_v6 }
 0xf3c   :  { %v21626_v16 = vpop.f32.mrf.mxu0 }
 0xf3d   :  { %v10527_v57 = vadd.f32 %v21626_v16, %v10441_v62 }
 0xf3e   :  { %v10520_v20 = vpop.f32.mrf.mxu0 }
 0xf3f   :  { %v10607_v55 = vadd.f32 %v21635_v1, %v10527_v57  ;;  %v10521_v13 = vadd.f32 %v10520_v20, %v10433_v17 }
 0xf41   :  { %v10601_v48 = vadd.f32 %v10600_v30, %v10521_v13 }
 0xf82   :  { %v21653_v15 = vpop.f32.mrf.mxu1 }
 0xf84   :  { %v10788_v39 = vpop.f32.mrf.mxu1 }
 0xf88   :  { %v21671_v46 = vpop.f32.mrf.mxu1 }
 0xf8a   :  { %v10955_v18 = vpop.f32.mrf.mxu1 }
 0xf8b   :  { %v21644_v2 = vpop.f32.mrf.mxu0 }
 0xf8c   :  { %v10795_v50 = vadd.f32 %v21653_v15, %v21644_v2 }
 0xf8d   :  { %v10692_v19 = vpop.f32.mrf.mxu0 }
 0xf8e   :  { %v10789_v4 = vadd.f32 %v10788_v39, %v10692_v19 }
 0xf8f   :  { %v21689_v28 = vpop.f32.mrf.mxu1 }
 0xf91   :  { %v11123_v7 = vpop.f32.mrf.mxu1 }
 0xf92   :  { %v21662_v32 = vpop.f32.mrf.mxu0 }
 0xf93   :  { %v10880_v12 = vadd.f32 %v21662_v32, %v10795_v50 }
 0xf94   :  { %v10872_v61 = vpop.f32.mrf.mxu0 }
 0xf95   :  { %v10873_v52 = vadd.f32 %v10872_v61, %v10789_v4  ;;  %v10964_v23 = vadd.f32 %v21671_v46, %v10880_v12 }
 0xf97   :  { %v10956_v45 = vadd.f32 %v10955_v18, %v10873_v52  ;;  %v21707_v58 = vpop.f32.mrf.mxu1  ;;  %v19134_v18 = vld [vmem:[%s28076_s3 + $0x88] sm:$0xff] }
 0xf99   :  { %v11311_v3 = vpop.f32.mrf.mxu1 }
 0xf9a   :  { %v21680_v43 = vpop.f32.mrf.mxu0 }
 0xf9b   :  { %v11050_v31 = vadd.f32 %v21680_v43, %v10964_v23 }
 0xf9c   :  { %v11043_v25 = vpop.f32.mrf.mxu0 }
 0xf9d   :  { %v11044_v27 = vadd.f32 %v11043_v25, %v10956_v45  ;;  %v11130_v14 = vadd.f32 %v21689_v28, %v11050_v31  ;;  %v19133_v25 = vld [vmem:[%s28076_s3 + $0x80] sm:$0xff] }
 0xf9f   :  { %v11124_v59 = vadd.f32 %v11123_v7, %v11044_v27  ;;  %v21725_v40 = vpop.f32.mrf.mxu1 }
 0xfa1   :  { %v11478_v24 = vpop.f32.mrf.mxu1 }
 0xfa2   :  { %v21698_v49 = vpop.f32.mrf.mxu0 }
 0xfa3   :  { %v11226_v60 = vadd.f32 %v21698_v49, %v11130_v14 }
 0xfa4   :  { %v11215_v0 = vpop.f32.mrf.mxu0 }
 0xfa5   :  { %v11216_v42 = vadd.f32 %v11215_v0, %v11124_v59  ;;  %v11318_v35 = vadd.f32 %v21707_v58, %v11226_v60 }
 0xfa7   :  { %v11312_v34 = vadd.f32 %v11311_v3, %v11216_v42  ;;  %v21743_v51 = vpop.f32.mrf.mxu1 }
 0xfa9   :  { %v21716_v5 = vpop.f32.mrf.mxu0  ;;  %v11646_v47 = vpop.f32.mrf.mxu1 }
 0xfaa   :  { %v11403_v56 = vadd.f32 %v21716_v5, %v11318_v35 }
 0xfab   :  { %v11395_v38 = vpop.f32.mrf.mxu0 }
 0xfac   :  { %v11396_v54 = vadd.f32 %v11395_v38, %v11312_v34  ;;  %v11487_v21 = vadd.f32 %v21725_v40, %v11403_v56 }
 0xfae   :  { %v11479_v33 = vadd.f32 %v11478_v24, %v11396_v54 }
 0xfaf   :  { %v21734_v44 = vpop.f32.mrf.mxu0 }
 0xfb0   :  { %v11573_v22 = vadd.f32 %v21734_v44, %v11487_v21 }
 0xfb1   :  { %v11566_v41 = vpop.f32.mrf.mxu0 }
 0xfb2   :  { %v11653_v9 = vadd.f32 %v21743_v51, %v11573_v22  ;;  %v11567_v10 = vadd.f32 %v11566_v41, %v11479_v33 }
 0xfb4   :  { %v11647_v36 = vadd.f32 %v11646_v47, %v11567_v10  ;;  %11660 = vrot.lane.b32.xlu0 %v11653_v9, %s22352_s13 }
 0xfb6   :  { %11658 = vrot.lane.b32.xlu1 %v11647_v36, %s22352_s13  ;;  %v28092_v36 = vmov 0.0   ;;  %s22358_s13 = smov 80  }
 0xfb7   :  { %21744 = vmatprep.subr.mxu0 %v28092_v36  ;;  %21755 = vmatprep.subr.mxu1 %v28092_v36 }
 0xfb8   :  { %21752 = vmatprep.mubr.msk.f32.mxu0 %vm22356_vm13, %v28092_v36  ;;  %21763 = vmatprep.mubr.msk.f32.mxu1 %vm22356_vm13, %v28092_v36 }
0x1026   :  { %v11661_v29 = vpop.permute.xlu0 %11660 }
0x1027   :  { %v11665_v37 = vsel %vm8058_vm8, %v10607_v55, %v11661_v29 }
0x1028   :  { %v11659_v26 = vpop.permute.xlu1 %11658  ;;  %v11670_v11 = vsel %vm11666_vm11, %v11665_v37, 0.0  ;;  %v11676_v6 = vmul.f32 %v11665_v37, %v11665_v37 }
0x1029   :  { %v11664_v62 = vsel %vm8058_vm8, %v10601_v48, %v11659_v26  ;;  %11671 = vadd.xlane.f32.xlu0 %v11670_v11  ;;  %v19135_v26 = vld [vmem:[%s28074_s1 + $0x180] sm:$0xff] }
0x102a   :  { %v11667_v63 = vsel %vm11666_vm11, %v11664_v62, 0.0  ;;  %v11680_v16 = vsel %vm11666_vm11, %v11676_v6, 0.0  ;;  %v11675_v57 = vmul.f32 %v11664_v62, %v11664_v62  ;;  %v11805_v11 = vsel %vm11803_vm14, %v19135_v26, 0 }
0x102b   :  { %11668 = vadd.xlane.f32.xlu1 %v11667_v63  ;;  %v25836_v6 = vand.u32 4294901760, %v11805_v11 }
0x102c   :  { %v11677_v17 = vsel %vm11666_vm11, %v11675_v57, 0.0 }
0x102d   :  { %11681 = vadd.xlane.f32.xlu0 %v11680_v16  ;;  %v25840_v57 = vsub.f32 %v11805_v11, %v25836_v6 }
0x1031   :  { %11678 = vadd.xlane.f32.xlu0 %v11677_v17 }
0x10b2   :  { %v11672_v1 = vpop.xlane.xlu0 %11671 }
0x10b3   :  { %v11674_v20 = vmul.f32 0.010416667, %v11672_v1 }
0x10b4   :  { %v11669_v55 = vpop.xlane.xlu1 %11668 }
0x10b5   :  { %v11686_v30 = vmul.f32 %v11674_v20, %v11674_v20  ;;  %v11673_v15 = vmul.f32 0.010416667, %v11669_v55 }
0x10b6   :  { %v11682_v2 = vpop.xlane.xlu0 %11681 }
0x10b7   :  { %v11684_v19 = vmul.f32 0.010416667, %v11682_v2  ;;  %v11685_v50 = vmul.f32 %v11673_v15, %v11673_v15  ;;  %v11878_v2 = vand.u32 4294901760, %v25840_v57 }
0x10b9   :  { %v11688_v39 = vsub.f32 %v11684_v19, %v11686_v30 }
0x10ba   :  { %v11679_v32 = vpop.xlane.xlu0 %11678 }
0x10bb   :  { %v11690_v46 = vmax.f32 %v11688_v39, 0.0  ;;  %v11683_v61 = vmul.f32 0.010416667, %v11679_v32 }
0x10bd   :  { %v11692_v4 = vadd.f32 1e-05, %v11690_v46  ;;  %v11687_v12 = vsub.f32 %v11683_v61, %v11685_v50  ;;  %v11879_v46 = vsub.f32 %v25840_v57, %v11878_v2 }
0x10bf   :  { %22322 = vrsqrt.f32 %v11692_v4  ;;  %v11689_v52 = vmax.f32 %v11687_v12, 0.0 }
0x10c1   :  { %v11691_v43 = vadd.f32 1e-05, %v11689_v52 }
0x10c3   :  { %22324 = vrsqrt.f32 %v11691_v43 }
0x10cc   :  { %v22323_v23 = vpop.eup %22322 }
0x10cd   :  { %v11699_v28 = vmul.f32 %v22323_v23, %v19134_v18 }
0x10cf   :  { %v11701_v31 = vmul.f32 %v11699_v28, %v11674_v20 }
0x10d0   :  { %v22325_v45 = vpop.eup %22324 }
0x10d1   :  { %11706 = vrot.lane.b32.xlu1 %v11701_v31, %s22335_s19  ;;  %v11698_v27 = vmul.f32 %v22325_v45, %v19133_v25 }
0x10d3   :  { %v11700_v7 = vmul.f32 %v11698_v27, %v11673_v15 }
0x10d5   :  { %11719 = vperm.xlu1 %22294, %v11699_v28   ;;  %11704 = vrot.lane.b32.xlu0 %v11700_v7, %s22335_s19 }
0x10d9   :  { %11714 = vperm.xlu1 %22294, %v11698_v27  }
0x10dd   :  { %22295 = vset.pattern.permute.xlu1 %v28503_v53 }
0x1143   :  { %v11707_v14 = vpop.permute.xlu1 %11706 }
0x1144   :  { %v11711_v49 = vsub.f32 %v19134_v18, %v11707_v14 }
0x1146   :  { %11731 = vperm.xlu0 %22293, %v11711_v49  }
0x1147   :  { %v11705_v58 = vpop.permute.xlu0 %11704 }
0x1148   :  { %v11710_v60 = vsub.f32 %v19133_v25, %v11705_v58  ;;  %v11880_v25 = vand.u32 4294901760, %v11879_v46  ;;  %v19147_v46 = vld [vmem:[%s28075_s2 + $0x580] sm:$0xff] }
0x114a   :  { %11726 = vperm.xlu1 %22295, %v11710_v60  }
0x114e   :  { %22296 = vset.pattern.permute.xlu1 %v28504_v8 }
0x1150   :  { %v11720_v59 = vpop.permute.xlu1 %11719 }
0x1151   :  { %v11723_v0 = vmul.f32 %v11720_v59, %v11665_v37 }
0x1154   :  { %v11715_v42 = vpop.permute.xlu1 %11714 }
0x1155   :  { %v11722_v40 = vmul.f32 %v11715_v42, %v11664_v62 }
0x11c1   :  { %v11732_v3 = vpop.permute.xlu0 %11731 }
0x11c2   :  { %v11735_v35 = vadd.f32 %v11732_v3, %v11723_v0 }
0x11c4   :  { %v11737_v5 = vmax.f32 %v11735_v35, 0.0 }
0x11c5   :  { %v11727_v56 = vpop.permute.xlu1 %11726 }
0x11c6   :  { %v11734_v34 = vadd.f32 %v11727_v56, %v11722_v40  ;;  %11753 = vrot.lane.b32.xlu1 %v11737_v5, %s22353_s18  ;;  %11742 = vrot.lane.b32.xlu0 %v11737_v5, %s22335_s19  ;;  %v19136_v5 = vld [vmem:[%s28074_s1 + $0x1c0] sm:$0xff] }
0x11c8   :  { %v11736_v38 = vmax.f32 %v11734_v34, 0.0  ;;  %v12323_v34 = vsel %vm11803_vm14, %v19136_v5, 0 }
0x11ca   :  { %11751 = vrot.lane.b32.xlu1 %v11736_v38, %s22353_s18  ;;  %11740 = vrot.lane.b32.xlu0 %v11736_v38, %s22335_s19 }
0x1238   :  { %v11743_v54 = vpop.permute.xlu0 %11742  ;;  %v11754_v8 = vpop.permute.xlu1 %11753 }
0x1239   :  { %v11747_v24 = vsel %vm3737_vm5, 0.0, %v11743_v54  ;;  %v11758_v21 = vsel %vm3737_vm5, 0.0, %v11754_v8 }
0x123a   :  { %v11750_v51 = vsel %vm11748_vm12, %v11747_v24, 0.0  ;;  %v11760_v44 = vsel %vm11748_vm12, %v11758_v21, 0.0  ;;  %v25898_v24 = vand.u32 4294901760, %v12323_v34 }
0x123b   :  { %11765 = vrot.lane.b32.xlu0 %v11750_v51, %s22335_s19  ;;  %11771 = vrot.lane.b32.xlu1 %v11760_v44, %s22335_s19 }
0x123c   :  { %v11741_v22 = vpop.permute.xlu0 %11740  ;;  %v11752_v33 = vpop.permute.xlu1 %11751 }
0x123d   :  { %v11746_v41 = vsel %vm3737_vm5, 0.0, %v11741_v22  ;;  %v11757_v9 = vsel %vm3737_vm5, 0.0, %v11752_v33 }
0x123e   :  { %v11749_v10 = vsel %vm11748_vm12, %v11746_v41, 0.0  ;;  %v11759_v47 = vsel %vm11748_vm12, %v11757_v9, 0.0  ;;  %v25911_v41 = vsub.f32 %v12323_v34, %v25898_v24 }
0x123f   :  { %11763 = vrot.lane.b32.xlu0 %v11749_v10, %s22335_s19  ;;  %11769 = vrot.lane.b32.xlu1 %v11759_v47, %s22335_s19 }
0x1243   :  { %11775 = vrot.lane.b32.xlu0 %v11750_v51, %s22340_s20  ;;  %11787 = vrot.lane.b32.xlu1 %v11760_v44, %s22354_s0 }
0x12ad   :  { %v11766_v13 = vpop.permute.xlu0 %11765  ;;  %v11772_v29 = vpop.permute.xlu1 %11771 }
0x12ae   :  { %11779 = vrot.lane.b32.xlu0 %v11766_v13, %s22340_s20  ;;  %11791 = vrot.lane.b32.xlu1 %v11772_v29, %s22354_s0 }
0x12b1   :  { %v11764_v48 = vpop.permute.xlu0 %11763  ;;  %v11770_v37 = vpop.permute.xlu1 %11769 }
0x12b2   :  { %11777 = vrot.lane.b32.xlu0 %v11764_v48, %s22340_s20  ;;  %11789 = vrot.lane.b32.xlu1 %v11770_v37, %s22354_s0 }
0x12b5   :  { %v11776_v62 = vpop.permute.xlu0 %11775  ;;  %v11788_v63 = vpop.permute.xlu1 %11787 }
0x12b6   :  { %11773 = vrot.lane.b32.xlu0 %v11749_v10, %s22340_s20  ;;  %11785 = vrot.lane.b32.xlu1 %v11759_v47, %s22354_s0  ;;  %v11798_v16 = vsel %vm8058_vm8, %v11776_v62, %v11788_v63 }
0x12b7   :  { %v25842_v17 = vand.u32 4294901760, %v11798_v16 }
0x12b9   :  { %v25849_v15 = vsub.f32 %v11798_v16, %v25842_v17 }
0x12ba   :  { %12298 = vrot.lane.b32.xlu0 %v11766_v13, %s22337_s5  ;;  %12310 = vrot.lane.b32.xlu1 %v11772_v29, %s22357_s21  ;;  %v12396_v29 = vand.u32 4294901760, %v25911_v41 }
0x12bb   :  { %v11927_v12 = vand.u32 4294901760, %v25849_v15 }
0x12bc   :  { %v12397_v62 = vsub.f32 %v25911_v41, %v12396_v29 }
0x12bd   :  { %v11928_v7 = vsub.f32 %v25849_v15, %v11927_v12 }
0x12be   :  { %12294 = vrot.lane.b32.xlu0 %v11750_v51, %s22337_s5  ;;  %12306 = vrot.lane.b32.xlu1 %v11760_v44, %s22357_s21 }
0x12bf   :  { %v11929_v40 = vand.u32 4294901760, %v11928_v7 }
0x12c2   :  { %12296 = vrot.lane.b32.xlu0 %v11764_v48, %s22337_s5  ;;  %12308 = vrot.lane.b32.xlu1 %v11770_v37, %s22357_s21 }
0x12c6   :  { %12292 = vrot.lane.b32.xlu0 %v11749_v10, %s22337_s5  ;;  %12304 = vrot.lane.b32.xlu1 %v11759_v47, %s22357_s21 }
0x1320   :  { %v11780_v1 = vpop.permute.xlu0 %11779  ;;  %v11792_v20 = vpop.permute.xlu1 %11791 }
0x1321   :  { %v11800_v55 = vsel %vm8058_vm8, %v11780_v1, %v11792_v20  ;;  %v12398_v20 = vand.u32 4294901760, %v12397_v62 }
0x1322   :  { %v25846_v30 = vand.u32 4294901760, %v11800_v55 }
0x1324   :  { %v25852_v19 = vsub.f32 %v11800_v55, %v25846_v30  ;;  %v11778_v39 = vpop.permute.xlu0 %11777  ;;  %21745 = vmatpush3.msra.mxu0 %v25846_v30  ;;  %v11790_v32 = vpop.permute.xlu1 %11789 }
0x1325   :  { %v11799_v50 = vsel %vm8058_vm8, %v11778_v39, %v11790_v32  ;;  %21746 = vmatprep.subr.mxu0 %v28092_v36  ;;  %v19148_v32 = vld [vmem:[%s28075_s2 + $0x590] sm:$0xff] }
0x1326   :  { %v11913_v61 = vand.u32 4294901760, %v25852_v19  ;;  %v25861_v4 = vand.u32 4294901760, %v11799_v50 }
0x1328   :  { %v11914_v52 = vsub.f32 %v25852_v19, %v11913_v61  ;;  %v11919_v43 = vsub.f32 %v11799_v50, %v25861_v4  ;;  %v11774_v18 = vpop.permute.xlu0 %11773  ;;  %21747 = vmatpush3.msra.mxu0 %v25861_v4  ;;  %v11786_v23 = vpop.permute.xlu1 %11785  ;;  %v26030_v50 = vand.u32 4294901760, %v19148_v32 }
0x1329   :  { %v11797_v28 = vsel %vm8058_vm8, %v11774_v18, %v11786_v23  ;;  %21748 = vmatprep.subr.mxu0 %v28092_v36  ;;  %v19145_v23 = vld [vmem:[%s28075_s2 + $0x560] sm:$0xff] }
0x132a   :  { %v11920_v31 = vand.u32 4294901760, %v11919_v43  ;;  %v25869_v45 = vand.u32 4294901760, %v11797_v28  ;;  %21749 = vmatpush3.msra.mxu0 %v25842_v17  ;;  %v11915_v27 = vand.u32 4294901760, %v11914_v52 }
0x132b   :  { %21750 = vmatprep.subr.mxu0 %v28092_v36 }
0x132c   :  { %v11921_v14 = vsub.f32 %v11919_v43, %v11920_v31  ;;  %v11933_v49 = vsub.f32 %v11797_v28, %v25869_v45  ;;  %v12299_v58 = vpop.permute.xlu0 %12298  ;;  %21751 = vmatpush3.msra.mxu0 %v25869_v45  ;;  %21756 = vmatpush3.msra.mxu1 %v11915_v27  ;;  %v12311_v60 = vpop.permute.xlu1 %12310  ;;  %v19144_v27 = vld [vmem:[%s28075_s2 + $0x550] sm:$0xff] }
0x132d   :  { %21766 = vmatprep.subr.mxu0 %v28092_v36  ;;  %21753 = vmatmul.mubr.f32.vlgmr.msra.gmra.mxu0 %v11880_v25  ;;  %v12319_v8 = vsel %vm8058_vm8, %v12299_v58, %v12311_v60  ;;  %v26084_v60 = vand.u32 4294901760, %v19144_v27 }
0x132e   :  { %v11934_v59 = vand.u32 4294901760, %v11933_v49  ;;  %21767 = vmatpush3.msra.mxu0 %v25852_v19  ;;  %21757 = vmatprep.subr.mxu1 %v28092_v36  ;;  %v11922_v0 = vand.u32 4294901760, %v11921_v14  ;;  %v25904_v51 = vand.u32 4294901760, %v12319_v8 }
0x132f   :  { %21768 = vmatprep.subr.mxu0 %v28092_v36  ;;  %21774 = vmatprep.mubr.msk.f32.mxu0 %vm22356_vm13, %v28092_v36 }
0x1330   :  { %v11935_v42 = vsub.f32 %v11933_v49, %v11934_v59  ;;  %v12295_v3 = vpop.permute.xlu0 %12294  ;;  %21758 = vmatpush3.msra.mxu1 %v11922_v0  ;;  %21769 = vmatpush3.msra.mxu0 %v11919_v43  ;;  %v12307_v35 = vpop.permute.xlu1 %12306  ;;  %v25922_v47 = vsub.f32 %v12319_v8, %v25904_v51 }
0x1331   :  { %21759 = vmatprep.subr.mxu1 %v28092_v36  ;;  %21770 = vmatprep.subr.mxu0 %v28092_v36  ;;  %v12317_v33 = vsel %vm8058_vm8, %v12295_v3, %v12307_v35 }
0x1332   :  { %21760 = vmatpush3.msra.mxu1 %v11929_v40  ;;  %21771 = vmatpush3.msra.mxu0 %v25849_v15  ;;  %v11936_v56 = vand.u32 4294901760, %v11935_v42  ;;  %v25924_v13 = vand.u32 4294901760, %v12317_v33  ;;  %v12431_v26 = vand.u32 4294901760, %v25922_v47  ;;  %v26102_v40 = vsub.f32 %v19144_v27, %v26084_v60 }
0x1333   :  { %21761 = vmatprep.subr.mxu1 %v28092_v36  ;;  %21772 = vmatprep.subr.mxu0 %v28092_v36 }
0x1334   :  { %v12297_v38 = vpop.permute.xlu0 %12296  ;;  %21762 = vmatpush3.msra.mxu1 %v11936_v56  ;;  %21773 = vmatpush3.msra.mxu0 %v11933_v49  ;;  %v12309_v54 = vpop.permute.xlu1 %12308  ;;  %v25944_v11 = vsub.f32 %v12317_v33, %v25924_v13 }
0x1335   :  { %21764 = vmatmul.mubr.f32.vlgmr.msra.gmra.mxu1 %v25836_v6  ;;  %21777 = vmatprep.subr.mxu1 %v28092_v36  ;;  %v12318_v21 = vsel %vm8058_vm8, %v12297_v38, %v12309_v54  ;;  %v26116_v38 = vand.u32 4294901760, %v26102_v40 }
0x1336   :  { %21788 = vmatprep.subr.mxu0 %v28092_v36  ;;  %21775 = vmatmul.mubr.f32.vlgmr.msra.gmra.mxu0 %v25840_v57  ;;  %v25913_v9 = vand.u32 4294901760, %v12318_v21  ;;  %v12432_v57 = vsub.f32 %v25922_v47, %v12431_v26  ;;  %v12445_v1 = vand.u32 4294901760, %v25944_v11 }
0x1337   :  { %21778 = vmatpush3.msra.mxu1 %v25846_v30  ;;  %21789 = vmatpush3.msra.mxu0 %v11913_v61  ;;  %v26036_v61 = vsub.f32 %v19148_v32, %v26030_v50 }
0x1338   :  { %21779 = vmatprep.subr.mxu1 %v28092_v36  ;;  %21790 = vmatprep.subr.mxu0 %v28092_v36  ;;  %v12293_v44 = vpop.permute.xlu0 %12292  ;;  %v12305_v22 = vpop.permute.xlu1 %12304  ;;  %v25933_v48 = vsub.f32 %v12318_v21, %v25913_v9 }
0x1339   :  { %21780 = vmatpush3.msra.mxu1 %v25861_v4  ;;  %21791 = vmatpush3.msra.mxu0 %v11920_v31  ;;  %v12316_v10 = vsel %vm8058_vm8, %v12293_v44, %v12305_v22  ;;  %v26046_v52 = vand.u32 4294901760, %v26036_v61 }
0x133a   :  { %21781 = vmatprep.subr.mxu1 %v28092_v36  ;;  %21792 = vmatprep.subr.mxu0 %v28092_v36  ;;  %v25935_v37 = vand.u32 4294901760, %v12316_v10  ;;  %v12438_v63 = vand.u32 4294901760, %v25933_v48 }
0x133b   :  { %21782 = vmatpush3.msra.mxu1 %v25842_v17  ;;  %21793 = vmatpush3.msra.mxu0 %v11927_v12  ;;  %v19146_v12 = vld [vmem:[%s28075_s2 + $0x570] sm:$0xff]  ;;  %v12932_v28 = vsub.f32 %v26036_v61, %v26046_v52 }
0x133c   :  { %21783 = vmatprep.subr.mxu1 %v28092_v36  ;;  %21794 = vmatprep.subr.mxu0 %v28092_v36  ;;  %v12451_v16 = vsub.f32 %v12316_v10, %v25935_v37  ;;  %v12439_v55 = vsub.f32 %v25933_v48, %v12438_v63  ;;  %v26051_v18 = vand.u32 4294901760, %v19146_v12 }
0x133d   :  { %21784 = vmatpush3.msra.mxu1 %v25869_v45  ;;  %21785 = vmatprep.mubr.msk.f32.mxu1 %vm22356_vm13, %v28092_v36  ;;  %v26073_v7 = vand.u32 4294901760, %v12932_v28 }
0x133e   :  { %21795 = vmatpush3.msra.mxu0 %v11934_v59  ;;  %21786 = vmatmul.mubr.f32.vlgmr.msra.gmra.mxu1 %v11878_v2  ;;  %v12452_v2 = vand.u32 4294901760, %v12451_v16  ;;  %v12440_v19 = vand.u32 4294901760, %v12439_v55  ;;  %v26064_v31 = vsub.f32 %v19146_v12, %v26051_v18  ;;  %v19143_v59 = vld [vmem:[%s28075_s2 + $0x540] sm:$0xff] }
0x133f   :  { %21796 = vmatprep.mubr.msk.f32.mxu0 %vm22356_vm13, %v28092_v36  ;;  %21799 = vmatprep.subr.mxu1 %v28092_v36  ;;  %v26098_v35 = vand.u32 4294901760, %v19143_v59 }
0x1340   :  { %21810 = vmatprep.subr.mxu0 %v28092_v36  ;;  %21797 = vmatmul.mubr.f32.vlgmr.msra.gmra.mxu0 %v25836_v6  ;;  %v12453_v15 = vsub.f32 %v12451_v16, %v12452_v2  ;;  %v26078_v49 = vand.u32 4294901760, %v26064_v31 }
0x1341   :  { %21800 = vmatpush3.msra.mxu1 %v25846_v30  ;;  %21811 = vmatpush3.msra.mxu0 %v25904_v51  ;;  %v12433_v30 = vand.u32 4294901760, %v12432_v57  ;;  %v26111_v34 = vsub.f32 %v19143_v59, %v26098_v35 }
0x1342   :  { %21801 = vmatprep.subr.mxu1 %v28092_v36  ;;  %21812 = vmatprep.subr.mxu0 %v28092_v36  ;;  %v12454_v39 = vand.u32 4294901760, %v12453_v15  ;;  %v12946_v42 = vsub.f32 %v26064_v31, %v26078_v49 }
0x1343   :  { %21802 = vmatpush3.msra.mxu1 %v25861_v4  ;;  %21813 = vmatpush3.msra.mxu0 %v25913_v9  ;;  %v26038_v4 = vand.u32 4294901760, %v19147_v46  ;;  %v26123_v8 = vand.u32 4294901760, %v26111_v34 }
0x1344   :  { %21803 = vmatprep.subr.mxu1 %v28092_v36  ;;  %21814 = vmatprep.subr.mxu0 %v28092_v36  ;;  %v26106_v5 = vand.u32 4294901760, %v12946_v42 }
0x1345   :  { %21804 = vmatpush3.msra.mxu1 %v25842_v17  ;;  %21815 = vmatpush3.msra.mxu0 %v25924_v13  ;;  %v12446_v17 = vsub.f32 %v25944_v11, %v12445_v1  ;;  %v26049_v43 = vsub.f32 %v19147_v46, %v26038_v4  ;;  %v12967_v21 = vsub.f32 %v26111_v34, %v26123_v8 }
0x1346   :  { %21805 = vmatprep.subr.mxu1 %v28092_v36  ;;  %21816 = vmatprep.subr.mxu0 %v28092_v36 }
0x1347   :  { %21806 = vmatpush3.msra.mxu1 %v25869_v45  ;;  %21807 = vmatprep.mubr.msk.f32.mxu1 %vm22356_vm13, %v28092_v36  ;;  %v26061_v25 = vand.u32 4294901760, %v26049_v43  ;;  %v26066_v45 = vand.u32 4294901760, %v19145_v23  ;;  %v26135_v44 = vand.u32 4294901760, %v12967_v21 }
0x1348   :  { %21817 = vmatpush3.msra.mxu0 %v25935_v37  ;;  %21808 = vmatmul.mubr.f32.vlgmr.msra.gmra.mxu1 %v25836_v6  ;;  %v12447_v6 = vand.u32 4294901760, %v12446_v17 }
0x1349   :  { %21818 = vmatprep.mubr.msk.f32.mxu0 %vm22356_vm13, %v28092_v36  ;;  %21821 = vmatprep.subr.mxu1 %v28092_v36  ;;  %v12939_v14 = vsub.f32 %v26049_v43, %v26061_v25  ;;  %v26081_v58 = vsub.f32 %v19145_v23, %v26066_v45 }
0x134a   :  { %21832 = vmatprep.subr.mxu0 %v28092_v36  ;;  %21819 = vmatmul.mubr.f32.vlgmr.msra.gmra.mxu0 %v12398_v20 }
0x134b   :  { %21822 = vmatpush3.msra.mxu1 %v12433_v30  ;;  %21833 = vmatpush3.msra.mxu0 %v25922_v47  ;;  %v26091_v0 = vand.u32 4294901760, %v12939_v14  ;;  %v26096_v3 = vand.u32 4294901760, %v26081_v58 }
0x134c   :  { %21823 = vmatprep.subr.mxu1 %v28092_v36  ;;  %21834 = vmatprep.subr.mxu0 %v28092_v36 }
0x134d   :  { %21824 = vmatpush3.msra.mxu1 %v12440_v19  ;;  %21835 = vmatpush3.msra.mxu0 %v25933_v48  ;;  %v12953_v56 = vsub.f32 %v26081_v58, %v26096_v3 }
0x134e   :  { %21825 = vmatprep.subr.mxu1 %v28092_v36  ;;  %21836 = vmatprep.subr.mxu0 %v28092_v36 }
0x134f   :  { %21826 = vmatpush3.msra.mxu1 %v12447_v6  ;;  %21837 = vmatpush3.msra.mxu0 %v25944_v11  ;;  %v26120_v54 = vand.u32 4294901760, %v12953_v56 }
0x1350   :  { %21827 = vmatprep.subr.mxu1 %v28092_v36  ;;  %21838 = vmatprep.subr.mxu0 %v28092_v36 }
0x1351   :  { %21828 = vmatpush3.msra.mxu1 %v12454_v39  ;;  %21829 = vmatprep.mubr.msk.f32.mxu1 %vm22356_vm13, %v28092_v36 }
0x1352   :  { %21839 = vmatpush3.msra.mxu0 %v12451_v16  ;;  %21830 = vmatmul.mubr.f32.vlgmr.msra.gmra.mxu1 %v25898_v24 }
0x1353   :  { %21840 = vmatprep.mubr.msk.f32.mxu0 %vm22356_vm13, %v28092_v36  ;;  %21843 = vmatprep.subr.mxu1 %v28092_v36 }
0x1354   :  { %21854 = vmatprep.subr.mxu0 %v28092_v36  ;;  %21841 = vmatmul.mubr.f32.vlgmr.msra.gmra.mxu0 %v25911_v41 }
0x1355   :  { %21844 = vmatpush3.msra.mxu1 %v25904_v51  ;;  %21855 = vmatpush3.msra.mxu0 %v12431_v26 }
0x1356   :  { %21845 = vmatprep.subr.mxu1 %v28092_v36  ;;  %21856 = vmatprep.subr.mxu0 %v28092_v36 }
0x1357   :  { %21846 = vmatpush3.msra.mxu1 %v25913_v9  ;;  %21857 = vmatpush3.msra.mxu0 %v12438_v63 }
0x1358   :  { %21847 = vmatprep.subr.mxu1 %v28092_v36  ;;  %21858 = vmatprep.subr.mxu0 %v28092_v36 }
0x1359   :  { %21848 = vmatpush3.msra.mxu1 %v25924_v13  ;;  %21859 = vmatpush3.msra.mxu0 %v12445_v1 }
0x135a   :  { %21849 = vmatprep.subr.mxu1 %v28092_v36  ;;  %21860 = vmatprep.subr.mxu0 %v28092_v36 }
0x135b   :  { %21850 = vmatpush3.msra.mxu1 %v25935_v37  ;;  %21851 = vmatprep.mubr.msk.f32.mxu1 %vm22356_vm13, %v28092_v36 }
0x135c   :  { %21861 = vmatpush3.msra.mxu0 %v12452_v2  ;;  %21852 = vmatmul.mubr.f32.vlgmr.msra.gmra.mxu1 %v12396_v29 }
0x135d   :  { %21865 = vmatprep.subr.mxu1 %v28092_v36  ;;  %21862 = vmatprep.mubr.msk.f32.mxu0 %vm22356_vm13, %v28092_v36 }
0x135e   :  { %21866 = vmatpush3.msra.mxu1 %v25904_v51  ;;  %21863 = vmatmul.mubr.f32.vlgmr.msra.gmra.mxu0 %v25898_v24 }
0x135f   :  { %21867 = vmatprep.subr.mxu1 %v28092_v36  ;;  %21873 = vmatprep.mubr.msk.f32.mxu1 %vm22356_vm13, %v28092_v36 }
0x1360   :  { %21868 = vmatpush3.msra.mxu1 %v25913_v9  ;;  %21876 = vmatprep.subr.mxu0 %v28092_v36 }
0x1361   :  { %21869 = vmatprep.subr.mxu1 %v28092_v36  ;;  %21888 = vmatprep.mubr.msk.f32.mxu0 %vm22356_vm13, %v28092_v36 }
0x1362   :  { %21870 = vmatpush3.msra.mxu1 %v25924_v13  ;;  %21877 = vmatpush3.msra.mxu0 %v26030_v50 }
0x1363   :  { %21871 = vmatprep.subr.mxu1 %v28092_v36  ;;  %21878 = vmatprep.subr.mxu0 %v28092_v36 }
0x1364   :  { %21872 = vmatpush3.msra.mxu1 %v25935_v37  ;;  %21879 = vmatpush3.msra.mxu0 %v26038_v4 }
0x1365   :  { %21874 = vmatmul.mubr.f32.vlgmr.msra.gmra.mxu1 %v25898_v24  ;;  %21891 = vmatprep.subr.mxu1 %v28092_v36  ;;  %v12960_v24 = vsub.f32 %v26102_v40, %v26116_v38 }
0x1366   :  { %21903 = vmatprep.mubr.msk.f32.mxu1 %vm22356_vm13, %v28092_v36  ;;  %21880 = vmatprep.subr.mxu0 %v28092_v36 }
0x1367   :  { %21881 = vmatpush3.msra.mxu0 %v26051_v18  ;;  %21892 = vmatpush3.msra.mxu1 %v26073_v7  ;;  %v26133_v51 = vand.u32 4294901760, %v12960_v24 }
0x1368   :  { %21882 = vmatprep.subr.mxu0 %v28092_v36  ;;  %21893 = vmatprep.subr.mxu1 %v28092_v36 }
0x1369   :  { %21883 = vmatpush3.msra.mxu0 %v26066_v45  ;;  %21894 = vmatpush3.msra.mxu1 %v26091_v0 }
0x136a   :  { %21884 = vmatprep.subr.mxu0 %v28092_v36  ;;  %21895 = vmatprep.subr.mxu1 %v28092_v36 }
0x136b   :  { %21885 = vmatpush3.msra.mxu0 %v26084_v60  ;;  %21896 = vmatpush3.msra.mxu1 %v26106_v5 }
0x136c   :  { %21886 = vmatprep.subr.mxu0 %v28092_v36  ;;  %21897 = vmatprep.subr.mxu1 %v28092_v36 }
0x136d   :  { %21887 = vmatpush3.msra.mxu0 %v26098_v35  ;;  %21898 = vmatpush3.msra.mxu1 %v26120_v54 }
0x136e   :  { %21906 = vmatprep.subr.mxu0 %v28092_v36  ;;  %21899 = vmatprep.subr.mxu1 %v28092_v36 }
0x136f   :  { %21900 = vmatpush3.msra.mxu1 %v26133_v51 }
0x1370   :  { %21901 = vmatprep.subr.mxu1 %v28092_v36 }
0x1371   :  { %21902 = vmatpush3.msra.mxu1 %v26135_v44 }
0x1372   :  { %21921 = vmatprep.subr.mxu1 %v28092_v36 }
0x13ed   :  { %v11882_v22 = vpop.f32.mrf.mxu0 }
0x13ef   :  { %v21754_v33 = vpop.f32.mrf.mxu0 }
0x13f0   :  { %v19142_v33 = vld [vmem:[%s28075_s2 + $0x4d0] sm:$0xff] }
0x13f5   :  { %v11973_v41 = vpop.f32.mrf.mxu1 }
0x13f6   :  { %v12053_v9 = vpop.f32.mrf.mxu0  ;;  %v11974_v13 = vadd.f32 %v11973_v41, %v11882_v22 }
0x13f7   :  { %v21765_v10 = vpop.f32.mrf.mxu1 }
0x13f8   :  { %v21776_v47 = vpop.f32.mrf.mxu0  ;;  %v12054_v26 = vadd.f32 %v12053_v9, %v11974_v13  ;;  %v19141_v9 = vld [vmem:[%s28075_s2 + $0x4c0] sm:$0xff]  ;;  %v26165_v10 = vand.u32 4294901760, %v19142_v33 }
0x13f9   :  { %v19140_v47 = vld [vmem:[%s28075_s2 + $0x4b0] sm:$0xff]  ;;  %v26174_v13 = vand.u32 4294901760, %v19141_v9 }
0x13fe   :  { %v12130_v29 = vpop.f32.mrf.mxu1 }
0x13ff   :  { %v12131_v62 = vadd.f32 %v12130_v29, %v12054_v26  ;;  %v19139_v29 = vld [vmem:[%s28075_s2 + $0x4a0] sm:$0xff]  ;;  %v26192_v26 = vsub.f32 %v19141_v9, %v26174_v13 }
0x1400   :  { %v21787_v48 = vpop.f32.mrf.mxu1  ;;  %v12213_v37 = vpop.f32.mrf.mxu0 }
0x1401   :  { %v12214_v63 = vadd.f32 %v12213_v37, %v12131_v62  ;;  %v26183_v48 = vsub.f32 %v19142_v33, %v26165_v10  ;;  %v26185_v37 = vand.u32 4294901760, %v19140_v47  ;;  %v19138_v62 = vld [vmem:[%s28075_s2 + $0x490] sm:$0xff] }
0x1402   :  { %v21798_v11 = vpop.f32.mrf.mxu0 }
0x1403   :  { %v26194_v11 = vand.u32 4294901760, %v19139_v29 }
0x1408   :  { %v12288_v16 = vpop.f32.mrf.mxu1 }
0x1409   :  { %v26141_v57 = vadd.f32 %v12288_v16, %v12214_v63  ;;  %v26204_v63 = vand.u32 4294901760, %v26183_v48  ;;  %v26207_v16 = vsub.f32 %v19140_v47, %v26185_v37 }
0x140a   :  { %v21809_v1 = vpop.f32.mrf.mxu1  ;;  %v12400_v20 = vpop.f32.mrf.mxu0 }
0x140b   :  { %14367 = vrot.lane.b32.xlu1 %v26141_v57, %s22358_s13  ;;  %v19137_v1 = vld [vmem:[%s28075_s2 + $0x480] sm:$0xff] }
0x140c   :  { %v21820_v55 = vpop.f32.mrf.mxu0 }
0x140d   :  { %v26219_v55 = vand.u32 4294901760, %v26192_v26 }
0x1412   :  { %v12491_v2 = vpop.f32.mrf.mxu1 }
0x1413   :  { %v12492_v19 = vadd.f32 %v12491_v2, %v12400_v20  ;;  %v26214_v20 = vand.u32 4294901760, %v19138_v62  ;;  %v26222_v2 = vsub.f32 %v19139_v29, %v26194_v11 }
0x1414   :  { %v21831_v17 = vpop.f32.mrf.mxu1  ;;  %v12571_v30 = vpop.f32.mrf.mxu0 }
0x1415   :  { %v12572_v39 = vadd.f32 %v12571_v30, %v12492_v19  ;;  %v26226_v17 = vand.u32 4294901760, %v19137_v1  ;;  %v13446_v30 = vsub.f32 %v26183_v48, %v26204_v63  ;;  %v26238_v19 = vsub.f32 %v19138_v62, %v26214_v20 }
0x1416   :  { %v21842_v15 = vpop.f32.mrf.mxu0 }
0x1417   :  { %v26234_v15 = vand.u32 4294901760, %v26207_v16 }
0x141c   :  { %v12648_v6 = vpop.f32.mrf.mxu1 }
0x141d   :  { %v12649_v12 = vadd.f32 %v12648_v6, %v12572_v39  ;;  %v13453_v6 = vsub.f32 %v26192_v26, %v26219_v55  ;;  %v26245_v39 = vand.u32 4294901760, %v26222_v2 }
0x141e   :  { %v21853_v32 = vpop.f32.mrf.mxu1  ;;  %v12731_v46 = vpop.f32.mrf.mxu0 }
0x141f   :  { %v12732_v28 = vadd.f32 %v12731_v46, %v12649_v12  ;;  %v26250_v32 = vsub.f32 %v19137_v1, %v26226_v17  ;;  %v26254_v46 = vand.u32 4294901760, %v13446_v30  ;;  %v13460_v12 = vsub.f32 %v26207_v16, %v26234_v15 }
0x1420   :  { %v21864_v23 = vpop.f32.mrf.mxu0 }
0x1421   :  { %v26262_v23 = vand.u32 4294901760, %v26238_v19 }
0x1425   :  { %v12806_v27 = vpop.f32.mrf.mxu1 }
0x1426   :  { %v12807_v14 = vadd.f32 %v12806_v27, %v12732_v28  ;;  %v26266_v28 = vand.u32 4294901760, %v13453_v6  ;;  %v13467_v27 = vsub.f32 %v26222_v2, %v26245_v39 }
0x1427   :  { %v21875_v59 = vpop.f32.mrf.mxu1 }
0x1428   :  { %v12825_v42 = vsel %vm8058_vm8, %v12807_v14, 0  ;;  %13852 = vrot.lane.b32.xlu0 %v12807_v14, %s22358_s13  ;;  %v26273_v14 = vand.u32 4294901760, %v26250_v32  ;;  %v13339_v59 = vsel %vm8058_vm8, %v26141_v57, 0 }
0x1429   :  { %v26145_v56 = vand.u32 4294901760, %v12825_v42  ;;  %v26289_v57 = vand.u32 4294901760, %v13339_v59 }
0x142b   :  { %v12899_v24 = vsub.f32 %v12825_v42, %v26145_v56  ;;  %21904 = vmatmul.mubr.f32.vlgmr.msra.gmra.mxu1 %v26145_v56  ;;  %v26279_v42 = vand.u32 4294901760, %v13460_v12 }
0x142c   :  { %21922 = vmatpush3.msra.mxu1 %v26030_v50  ;;  %21933 = vmatprep.mubr.msk.f32.mxu1 %vm22356_vm13, %v28092_v36 }
0x142d   :  { %v12900_v21 = vand.u32 4294901760, %v12899_v24  ;;  %21923 = vmatprep.subr.mxu1 %v28092_v36 }
0x142e   :  { %21924 = vmatpush3.msra.mxu1 %v26038_v4 }
0x142f   :  { %v12901_v22 = vsub.f32 %v12899_v24, %v12900_v21  ;;  %21925 = vmatprep.subr.mxu1 %v28092_v36 }
0x1430   :  { %21926 = vmatpush3.msra.mxu1 %v26051_v18 }
0x1431   :  { %v12902_v41 = vand.u32 4294901760, %v12901_v22  ;;  %21927 = vmatprep.subr.mxu1 %v28092_v36  ;;  %v13481_v22 = vsub.f32 %v26250_v32, %v26273_v14 }
0x1432   :  { %21928 = vmatpush3.msra.mxu1 %v26066_v45 }
0x1433   :  { %21929 = vmatprep.subr.mxu1 %v28092_v36  ;;  %21889 = vmatmul.mubr.f32.vlgmr.msra.gmra.mxu0 %v12902_v41  ;;  %v13413_v41 = vsub.f32 %v13339_v59, %v26289_v57  ;;  %v26307_v9 = vand.u32 4294901760, %v13481_v22 }
0x1434   :  { %21907 = vmatpush3.msra.mxu0 %v26036_v61  ;;  %21930 = vmatpush3.msra.mxu1 %v26084_v60 }
0x1435   :  { %21908 = vmatprep.subr.mxu0 %v28092_v36  ;;  %21931 = vmatprep.subr.mxu1 %v28092_v36  ;;  %v13414_v47 = vand.u32 4294901760, %v13413_v41 }
0x1436   :  { %21909 = vmatpush3.msra.mxu0 %v26049_v43  ;;  %21932 = vmatpush3.msra.mxu1 %v26098_v35 }
0x1437   :  { %21910 = vmatprep.subr.mxu0 %v28092_v36  ;;  %21934 = vmatmul.mubr.f32.vlgmr.msra.gmra.mxu1 %v12900_v21  ;;  %v26287_v21 = vand.u32 4294901760, %v13467_v27 }
0x1438   :  { %21951 = vmatprep.subr.mxu1 %v28092_v36  ;;  %21911 = vmatpush3.msra.mxu0 %v26064_v31 }
0x1439   :  { %21952 = vmatpush3.msra.mxu1 %v26030_v50  ;;  %21912 = vmatprep.subr.mxu0 %v28092_v36 }
0x143a   :  { %21953 = vmatprep.subr.mxu1 %v28092_v36  ;;  %21913 = vmatpush3.msra.mxu0 %v26081_v58 }
0x143b   :  { %21954 = vmatpush3.msra.mxu1 %v26038_v4  ;;  %21914 = vmatprep.subr.mxu0 %v28092_v36 }
0x143c   :  { %21955 = vmatprep.subr.mxu1 %v28092_v36  ;;  %21915 = vmatpush3.msra.mxu0 %v26102_v40 }
0x143d   :  { %21956 = vmatpush3.msra.mxu1 %v26051_v18  ;;  %21916 = vmatprep.subr.mxu0 %v28092_v36 }
0x143e   :  { %21957 = vmatprep.subr.mxu1 %v28092_v36  ;;  %21917 = vmatpush3.msra.mxu0 %v26111_v34 }
0x143f   :  { %21918 = vmatprep.mubr.msk.f32.mxu0 %vm22356_vm13, %v28092_v36  ;;  %21958 = vmatpush3.msra.mxu1 %v26066_v45 }
0x1440   :  { %21919 = vmatmul.mubr.f32.vlgmr.msra.gmra.mxu0 %v12899_v24  ;;  %21936 = vmatprep.subr.mxu0 %v28092_v36  ;;  %v13474_v24 = vsub.f32 %v26238_v19, %v26262_v23 }
0x1441   :  { %21959 = vmatprep.subr.mxu1 %v28092_v36  ;;  %21937 = vmatpush3.msra.mxu0 %v26046_v52 }
0x1442   :  { %21960 = vmatpush3.msra.mxu1 %v26084_v60  ;;  %21938 = vmatprep.subr.mxu0 %v28092_v36  ;;  %v26299_v33 = vand.u32 4294901760, %v13474_v24 }
0x1443   :  { %21961 = vmatprep.subr.mxu1 %v28092_v36  ;;  %21939 = vmatpush3.msra.mxu0 %v26061_v25 }
0x1444   :  { %21962 = vmatpush3.msra.mxu1 %v26098_v35  ;;  %21963 = vmatprep.mubr.msk.f32.mxu1 %vm22356_vm13, %v28092_v36 }
0x1445   :  { %21940 = vmatprep.subr.mxu0 %v28092_v36  ;;  %21964 = vmatmul.mubr.f32.vlgmr.msra.gmra.mxu1 %v26145_v56 }
0x1446   :  { %21981 = vmatprep.subr.mxu1 %v28092_v36  ;;  %21941 = vmatpush3.msra.mxu0 %v26078_v49 }
0x1447   :  { %21982 = vmatpush3.msra.mxu1 %v26254_v46  ;;  %21942 = vmatprep.subr.mxu0 %v28092_v36 }
0x1448   :  { %21983 = vmatprep.subr.mxu1 %v28092_v36  ;;  %21943 = vmatpush3.msra.mxu0 %v26096_v3 }
0x1449   :  { %21984 = vmatpush3.msra.mxu1 %v26266_v28  ;;  %21944 = vmatprep.subr.mxu0 %v28092_v36 }
0x144a   :  { %21985 = vmatprep.subr.mxu1 %v28092_v36  ;;  %21945 = vmatpush3.msra.mxu0 %v26116_v38 }
0x144b   :  { %21986 = vmatpush3.msra.mxu1 %v26279_v42  ;;  %21946 = vmatprep.subr.mxu0 %v28092_v36 }
0x144c   :  { %21987 = vmatprep.subr.mxu1 %v28092_v36  ;;  %21947 = vmatpush3.msra.mxu0 %v26123_v8 }
0x144d   :  { %21948 = vmatprep.mubr.msk.f32.mxu0 %vm22356_vm13, %v28092_v36  ;;  %21988 = vmatpush3.msra.mxu1 %v26287_v21 }
0x144e   :  { %21949 = vmatmul.mubr.f32.vlgmr.msra.gmra.mxu0 %v26145_v56  ;;  %21966 = vmatprep.subr.mxu0 %v28092_v36  ;;  %v13415_v56 = vsub.f32 %v13413_v41, %v13414_v47 }
0x144f   :  { %21989 = vmatprep.subr.mxu1 %v28092_v36  ;;  %21967 = vmatpush3.msra.mxu0 %v26165_v10 }
0x1450   :  { %21990 = vmatpush3.msra.mxu1 %v26299_v33  ;;  %21968 = vmatprep.subr.mxu0 %v28092_v36  ;;  %v13416_v29 = vand.u32 4294901760, %v13415_v56 }
0x1451   :  { %21991 = vmatprep.subr.mxu1 %v28092_v36  ;;  %21969 = vmatpush3.msra.mxu0 %v26174_v13 }
0x1452   :  { %21992 = vmatpush3.msra.mxu1 %v26307_v9  ;;  %21993 = vmatprep.mubr.msk.f32.mxu1 %vm22356_vm13, %v28092_v36 }
0x1453   :  { %21970 = vmatprep.subr.mxu0 %v28092_v36  ;;  %21994 = vmatmul.mubr.f32.vlgmr.msra.gmra.mxu1 %v26289_v57 }
0x1454   :  { %22011 = vmatprep.subr.mxu1 %v28092_v36  ;;  %21971 = vmatpush3.msra.mxu0 %v26185_v37 }
0x1455   :  { %22012 = vmatpush3.msra.mxu1 %v26165_v10  ;;  %21972 = vmatprep.subr.mxu0 %v28092_v36 }
0x1456   :  { %22013 = vmatprep.subr.mxu1 %v28092_v36  ;;  %21973 = vmatpush3.msra.mxu0 %v26194_v11 }
0x1457   :  { %22014 = vmatpush3.msra.mxu1 %v26174_v13  ;;  %21974 = vmatprep.subr.mxu0 %v28092_v36 }
0x1458   :  { %22015 = vmatprep.subr.mxu1 %v28092_v36  ;;  %21975 = vmatpush3.msra.mxu0 %v26214_v20 }
0x1459   :  { %22016 = vmatpush3.msra.mxu1 %v26185_v37  ;;  %21976 = vmatprep.subr.mxu0 %v28092_v36 }
0x145a   :  { %22017 = vmatprep.subr.mxu1 %v28092_v36  ;;  %21977 = vmatpush3.msra.mxu0 %v26226_v17 }
0x145b   :  { %21978 = vmatprep.mubr.msk.f32.mxu0 %vm22356_vm13, %v28092_v36  ;;  %22018 = vmatpush3.msra.mxu1 %v26194_v11 }
0x145c   :  { %21979 = vmatmul.mubr.f32.vlgmr.msra.gmra.mxu0 %v13416_v29  ;;  %21996 = vmatprep.subr.mxu0 %v28092_v36 }
0x145d   :  { %22019 = vmatprep.subr.mxu1 %v28092_v36  ;;  %21997 = vmatpush3.msra.mxu0 %v26183_v48 }
0x145e   :  { %22020 = vmatpush3.msra.mxu1 %v26214_v20  ;;  %21998 = vmatprep.subr.mxu0 %v28092_v36 }
0x145f   :  { %22021 = vmatprep.subr.mxu1 %v28092_v36  ;;  %21999 = vmatpush3.msra.mxu0 %v26192_v26 }
0x1460   :  { %22022 = vmatpush3.msra.mxu1 %v26226_v17  ;;  %22023 = vmatprep.mubr.msk.f32.mxu1 %vm22356_vm13, %v28092_v36 }
0x1461   :  { %22000 = vmatprep.subr.mxu0 %v28092_v36  ;;  %22024 = vmatmul.mubr.f32.vlgmr.msra.gmra.mxu1 %v13414_v47 }
0x1462   :  { %22041 = vmatprep.subr.mxu1 %v28092_v36  ;;  %22001 = vmatpush3.msra.mxu0 %v26207_v16 }
0x1463   :  { %22042 = vmatpush3.msra.mxu1 %v26165_v10  ;;  %22002 = vmatprep.subr.mxu0 %v28092_v36 }
0x1464   :  { %22043 = vmatprep.subr.mxu1 %v28092_v36  ;;  %22003 = vmatpush3.msra.mxu0 %v26222_v2 }
0x1465   :  { %22044 = vmatpush3.msra.mxu1 %v26174_v13  ;;  %22004 = vmatprep.subr.mxu0 %v28092_v36 }
0x1466   :  { %22045 = vmatprep.subr.mxu1 %v28092_v36  ;;  %22005 = vmatpush3.msra.mxu0 %v26238_v19 }
0x1467   :  { %22046 = vmatpush3.msra.mxu1 %v26185_v37  ;;  %22006 = vmatprep.subr.mxu0 %v28092_v36 }
0x1468   :  { %22047 = vmatprep.subr.mxu1 %v28092_v36  ;;  %22007 = vmatpush3.msra.mxu0 %v26250_v32 }
0x1469   :  { %22008 = vmatprep.mubr.msk.f32.mxu0 %vm22356_vm13, %v28092_v36  ;;  %22048 = vmatpush3.msra.mxu1 %v26194_v11 }
0x146a   :  { %22009 = vmatmul.mubr.f32.vlgmr.msra.gmra.mxu0 %v13413_v41  ;;  %22026 = vmatprep.subr.mxu0 %v28092_v36 }
0x146b   :  { %22049 = vmatprep.subr.mxu1 %v28092_v36  ;;  %22027 = vmatpush3.msra.mxu0 %v26204_v63 }
0x146c   :  { %22050 = vmatpush3.msra.mxu1 %v26214_v20  ;;  %22028 = vmatprep.subr.mxu0 %v28092_v36 }
0x146d   :  { %22051 = vmatprep.subr.mxu1 %v28092_v36  ;;  %22029 = vmatpush3.msra.mxu0 %v26219_v55 }
0x146e   :  { %22052 = vmatpush3.msra.mxu1 %v26226_v17  ;;  %22053 = vmatprep.mubr.msk.f32.mxu1 %vm22356_vm13, %v28092_v36 }
0x146f   :  { %22030 = vmatprep.subr.mxu0 %v28092_v36  ;;  %22054 = vmatmul.mubr.f32.vlgmr.msra.gmra.mxu1 %v26289_v57 }
0x1470   :  { %22031 = vmatpush3.msra.mxu0 %v26234_v15  ;;  %22038 = vmatprep.mubr.msk.f32.mxu0 %vm22356_vm13, %v28092_v36 }
0x1471   :  { %22032 = vmatprep.subr.mxu0 %v28092_v36  ;;  %22071 = vmatprep.subr.mxu1 %v28092_v36 }
0x1472   :  { %22033 = vmatpush3.msra.mxu0 %v26245_v39  ;;  %22072 = vmatpush3.msra.mxu1 %v26073_v7 }
0x1473   :  { %22034 = vmatprep.subr.mxu0 %v28092_v36  ;;  %22073 = vmatprep.subr.mxu1 %v28092_v36 }
0x1474   :  { %22035 = vmatpush3.msra.mxu0 %v26262_v23  ;;  %22074 = vmatpush3.msra.mxu1 %v26091_v0 }
0x1475   :  { %22036 = vmatprep.subr.mxu0 %v28092_v36  ;;  %22075 = vmatprep.subr.mxu1 %v28092_v36 }
0x1476   :  { %22037 = vmatpush3.msra.mxu0 %v26273_v14  ;;  %22076 = vmatpush3.msra.mxu1 %v26106_v5 }
0x1477   :  { %22039 = vmatmul.mubr.f32.vlgmr.msra.gmra.mxu0 %v26289_v57  ;;  %22077 = vmatprep.subr.mxu1 %v28092_v36 }
0x1478   :  { %22078 = vmatpush3.msra.mxu1 %v26120_v54  ;;  %22056 = vmatprep.subr.mxu0 %v28092_v36 }
0x1479   :  { %22079 = vmatprep.subr.mxu1 %v28092_v36  ;;  %22057 = vmatpush3.msra.mxu0 %v26030_v50 }
0x147a   :  { %22080 = vmatpush3.msra.mxu1 %v26133_v51  ;;  %22058 = vmatprep.subr.mxu0 %v28092_v36 }
0x147b   :  { %22081 = vmatprep.subr.mxu1 %v28092_v36  ;;  %22059 = vmatpush3.msra.mxu0 %v26038_v4 }
0x147c   :  { %22082 = vmatpush3.msra.mxu1 %v26135_v44  ;;  %22060 = vmatprep.subr.mxu0 %v28092_v36 }
0x147d   :  { %22083 = vmatprep.mubr.msk.f32.mxu1 %vm22356_vm13, %v28092_v36  ;;  %22101 = vmatprep.subr.mxu1 %v28092_v36 }
0x147e   :  { %22061 = vmatpush3.msra.mxu0 %v26051_v18  ;;  %22068 = vmatprep.mubr.msk.f32.mxu0 %vm22356_vm13, %v28092_v36 }
0x147f   :  { %22062 = vmatprep.subr.mxu0 %v28092_v36 }
0x1480   :  { %22063 = vmatpush3.msra.mxu0 %v26066_v45 }
0x1481   :  { %22064 = vmatprep.subr.mxu0 %v28092_v36 }
0x1482   :  { %22065 = vmatpush3.msra.mxu0 %v26084_v60 }
0x1483   :  { %22066 = vmatprep.subr.mxu0 %v28092_v36 }
0x1484   :  { %22067 = vmatpush3.msra.mxu0 %v26098_v35 }
0x1485   :  { %22086 = vmatprep.subr.mxu0 %v28092_v36 }
0x149a   :  { %v13853_v7 = vpop.permute.xlu0 %13852 }
0x149b   :  { %v13854_v0 = vsel %vm8058_vm8, %v13853_v7, 0 }
0x149c   :  { %v26418_v5 = vand.u32 4294901760, %v13854_v0 }
0x149e   :  { %v13928_v54 = vsub.f32 %v13854_v0, %v26418_v5  ;;  %22084 = vmatmul.mubr.f32.vlgmr.msra.gmra.mxu1 %v26418_v5 }
0x149f   :  { %22102 = vmatpush3.msra.mxu1 %v26030_v50  ;;  %22113 = vmatprep.mubr.msk.f32.mxu1 %vm22356_vm13, %v28092_v36 }
0x14a0   :  { %v13929_v51 = vand.u32 4294901760, %v13928_v54  ;;  %22103 = vmatprep.subr.mxu1 %v28092_v36 }
0x14a1   :  { %22104 = vmatpush3.msra.mxu1 %v26038_v4 }
0x14a2   :  { %v13930_v44 = vsub.f32 %v13928_v54, %v13929_v51  ;;  %22105 = vmatprep.subr.mxu1 %v28092_v36 }
0x14a3   :  { %22106 = vmatpush3.msra.mxu1 %v26051_v18 }
0x14a4   :  { %v13931_v62 = vand.u32 4294901760, %v13930_v44  ;;  %22107 = vmatprep.subr.mxu1 %v28092_v36 }
0x14a5   :  { %22108 = vmatpush3.msra.mxu1 %v26066_v45 }
0x14a6   :  { %22109 = vmatprep.subr.mxu1 %v28092_v36  ;;  %22069 = vmatmul.mubr.f32.vlgmr.msra.gmra.mxu0 %v13931_v62 }
0x14a7   :  { %22087 = vmatpush3.msra.mxu0 %v26036_v61  ;;  %22110 = vmatpush3.msra.mxu1 %v26084_v60 }
0x14a8   :  { %22088 = vmatprep.subr.mxu0 %v28092_v36  ;;  %22111 = vmatprep.subr.mxu1 %v28092_v36 }
0x14a9   :  { %22089 = vmatpush3.msra.mxu0 %v26049_v43  ;;  %22112 = vmatpush3.msra.mxu1 %v26098_v35 }
0x14aa   :  { %22090 = vmatprep.subr.mxu0 %v28092_v36  ;;  %22114 = vmatmul.mubr.f32.vlgmr.msra.gmra.mxu1 %v13929_v51 }
0x14ab   :  { %22131 = vmatprep.subr.mxu1 %v28092_v36  ;;  %22091 = vmatpush3.msra.mxu0 %v26064_v31 }
0x14ac   :  { %22132 = vmatpush3.msra.mxu1 %v26030_v50  ;;  %22092 = vmatprep.subr.mxu0 %v28092_v36  ;;  %v14368_v50 = vpop.permute.xlu1 %14367 }
0x14ad   :  { %22133 = vmatprep.subr.mxu1 %v28092_v36  ;;  %22093 = vmatpush3.msra.mxu0 %v26081_v58  ;;  %v14369_v61 = vsel %vm8058_vm8, %v14368_v50, 0 }
0x14ae   :  { %22134 = vmatpush3.msra.mxu1 %v26038_v4  ;;  %22094 = vmatprep.subr.mxu0 %v28092_v36  ;;  %v26477_v4 = vand.u32 4294901760, %v14369_v61 }
0x14af   :  { %22135 = vmatprep.subr.mxu1 %v28092_v36  ;;  %22095 = vmatpush3.msra.mxu0 %v26102_v40 }
0x14b0   :  { %22136 = vmatpush3.msra.mxu1 %v26051_v18  ;;  %22096 = vmatprep.subr.mxu0 %v28092_v36 }
0x14b1   :  { %22137 = vmatprep.subr.mxu1 %v28092_v36  ;;  %22097 = vmatpush3.msra.mxu0 %v26111_v34 }
0x14b2   :  { %22098 = vmatprep.mubr.msk.f32.mxu0 %vm22356_vm13, %v28092_v36  ;;  %22138 = vmatpush3.msra.mxu1 %v26066_v45 }
0x14b3   :  { %22099 = vmatmul.mubr.f32.vlgmr.msra.gmra.mxu0 %v13928_v54  ;;  %22116 = vmatprep.subr.mxu0 %v28092_v36 }
0x14b4   :  { %22139 = vmatprep.subr.mxu1 %v28092_v36  ;;  %22117 = vmatpush3.msra.mxu0 %v26046_v52  ;;  %v14443_v52 = vsub.f32 %v14369_v61, %v26477_v4 }
0x14b5   :  { %22140 = vmatpush3.msra.mxu1 %v26084_v60  ;;  %22118 = vmatprep.subr.mxu0 %v28092_v36 }
0x14b6   :  { %22141 = vmatprep.subr.mxu1 %v28092_v36  ;;  %22119 = vmatpush3.msra.mxu0 %v26061_v25  ;;  %v14444_v43 = vand.u32 4294901760, %v14443_v52 }
0x14b7   :  { %22142 = vmatpush3.msra.mxu1 %v26098_v35  ;;  %22143 = vmatprep.mubr.msk.f32.mxu1 %vm22356_vm13, %v28092_v36 }
0x14b8   :  { %22120 = vmatprep.subr.mxu0 %v28092_v36  ;;  %22144 = vmatmul.mubr.f32.vlgmr.msra.gmra.mxu1 %v26418_v5  ;;  %v14445_v18 = vsub.f32 %v14443_v52, %v14444_v43 }
0x14b9   :  { %22161 = vmatprep.subr.mxu1 %v28092_v36  ;;  %22121 = vmatpush3.msra.mxu0 %v26078_v49 }
0x14ba   :  { %22162 = vmatpush3.msra.mxu1 %v26254_v46  ;;  %22122 = vmatprep.subr.mxu0 %v28092_v36  ;;  %v14446_v25 = vand.u32 4294901760, %v14445_v18 }
0x14bb   :  { %22163 = vmatprep.subr.mxu1 %v28092_v36  ;;  %22123 = vmatpush3.msra.mxu0 %v26096_v3 }
0x14bc   :  { %22164 = vmatpush3.msra.mxu1 %v26266_v28  ;;  %22124 = vmatprep.subr.mxu0 %v28092_v36 }
0x14bd   :  { %22165 = vmatprep.subr.mxu1 %v28092_v36  ;;  %22125 = vmatpush3.msra.mxu0 %v26116_v38 }
0x14be   :  { %22166 = vmatpush3.msra.mxu1 %v26279_v42  ;;  %22126 = vmatprep.subr.mxu0 %v28092_v36 }
0x14bf   :  { %22167 = vmatprep.subr.mxu1 %v28092_v36  ;;  %22127 = vmatpush3.msra.mxu0 %v26123_v8 }
0x14c0   :  { %22128 = vmatprep.mubr.msk.f32.mxu0 %vm22356_vm13, %v28092_v36  ;;  %22168 = vmatpush3.msra.mxu1 %v26287_v21 }
0x14c1   :  { %22129 = vmatmul.mubr.f32.vlgmr.msra.gmra.mxu0 %v26418_v5  ;;  %22146 = vmatprep.subr.mxu0 %v28092_v36 }
0x14c2   :  { %22169 = vmatprep.subr.mxu1 %v28092_v36  ;;  %22147 = vmatpush3.msra.mxu0 %v26165_v10 }
0x14c3   :  { %22170 = vmatpush3.msra.mxu1 %v26299_v33  ;;  %22148 = vmatprep.subr.mxu0 %v28092_v36 }
0x14c4   :  { %22171 = vmatprep.subr.mxu1 %v28092_v36  ;;  %22149 = vmatpush3.msra.mxu0 %v26174_v13 }
0x14c5   :  { %22172 = vmatpush3.msra.mxu1 %v26307_v9  ;;  %22173 = vmatprep.mubr.msk.f32.mxu1 %vm22356_vm13, %v28092_v36 }
0x14c6   :  { %22150 = vmatprep.subr.mxu0 %v28092_v36  ;;  %22174 = vmatmul.mubr.f32.vlgmr.msra.gmra.mxu1 %v26477_v4 }
0x14c7   :  { %22191 = vmatprep.subr.mxu1 %v28092_v36  ;;  %22151 = vmatpush3.msra.mxu0 %v26185_v37 }
0x14c8   :  { %22192 = vmatpush3.msra.mxu1 %v26165_v10  ;;  %22152 = vmatprep.subr.mxu0 %v28092_v36 }
0x14c9   :  { %22193 = vmatprep.subr.mxu1 %v28092_v36  ;;  %22153 = vmatpush3.msra.mxu0 %v26194_v11 }
0x14ca   :  { %22194 = vmatpush3.msra.mxu1 %v26174_v13  ;;  %22154 = vmatprep.subr.mxu0 %v28092_v36 }
0x14cb   :  { %22195 = vmatprep.subr.mxu1 %v28092_v36  ;;  %22155 = vmatpush3.msra.mxu0 %v26214_v20 }
0x14cc   :  { %22196 = vmatpush3.msra.mxu1 %v26185_v37  ;;  %22156 = vmatprep.subr.mxu0 %v28092_v36 }
0x14cd   :  { %22197 = vmatprep.subr.mxu1 %v28092_v36  ;;  %22157 = vmatpush3.msra.mxu0 %v26226_v17 }
0x14ce   :  { %22158 = vmatprep.mubr.msk.f32.mxu0 %vm22356_vm13, %v28092_v36  ;;  %22198 = vmatpush3.msra.mxu1 %v26194_v11 }
0x14cf   :  { %22159 = vmatmul.mubr.f32.vlgmr.msra.gmra.mxu0 %v14446_v25  ;;  %22176 = vmatprep.subr.mxu0 %v28092_v36 }
0x14d0   :  { %22199 = vmatprep.subr.mxu1 %v28092_v36  ;;  %22177 = vmatpush3.msra.mxu0 %v26183_v48 }
0x14d1   :  { %22200 = vmatpush3.msra.mxu1 %v26214_v20  ;;  %22178 = vmatprep.subr.mxu0 %v28092_v36 }
0x14d2   :  { %22201 = vmatprep.subr.mxu1 %v28092_v36  ;;  %22179 = vmatpush3.msra.mxu0 %v26192_v26 }
0x14d3   :  { %22202 = vmatpush3.msra.mxu1 %v26226_v17  ;;  %22203 = vmatprep.mubr.msk.f32.mxu1 %vm22356_vm13, %v28092_v36 }
0x14d4   :  { %22180 = vmatprep.subr.mxu0 %v28092_v36  ;;  %22204 = vmatmul.mubr.f32.vlgmr.msra.gmra.mxu1 %v14444_v43 }
0x14d5   :  { %22221 = vmatprep.subr.mxu1 %v28092_v36  ;;  %22181 = vmatpush3.msra.mxu0 %v26207_v16 }
0x14d6   :  { %22222 = vmatpush3.msra.mxu1 %v26165_v10  ;;  %22182 = vmatprep.subr.mxu0 %v28092_v36 }
0x14d7   :  { %22223 = vmatprep.subr.mxu1 %v28092_v36  ;;  %22183 = vmatpush3.msra.mxu0 %v26222_v2 }
0x14d8   :  { %22224 = vmatpush3.msra.mxu1 %v26174_v13  ;;  %22184 = vmatprep.subr.mxu0 %v28092_v36 }
0x14d9   :  { %22225 = vmatprep.subr.mxu1 %v28092_v36  ;;  %22185 = vmatpush3.msra.mxu0 %v26238_v19 }
0x14da   :  { %22226 = vmatpush3.msra.mxu1 %v26185_v37  ;;  %22186 = vmatprep.subr.mxu0 %v28092_v36 }
0x14db   :  { %22227 = vmatprep.subr.mxu1 %v28092_v36  ;;  %22187 = vmatpush3.msra.mxu0 %v26250_v32 }
0x14dc   :  { %22188 = vmatprep.mubr.msk.f32.mxu0 %vm22356_vm13, %v28092_v36  ;;  %22228 = vmatpush3.msra.mxu1 %v26194_v11 }
0x14dd   :  { %22189 = vmatmul.mubr.f32.vlgmr.msra.gmra.mxu0 %v14443_v52  ;;  %22206 = vmatprep.subr.mxu0 %v28092_v36 }
0x14de   :  { %22229 = vmatprep.subr.mxu1 %v28092_v36  ;;  %22207 = vmatpush3.msra.mxu0 %v26204_v63 }
0x14df   :  { %22230 = vmatpush3.msra.mxu1 %v26214_v20  ;;  %22208 = vmatprep.subr.mxu0 %v28092_v36 }
0x14e0   :  { %22231 = vmatprep.subr.mxu1 %v28092_v36  ;;  %22209 = vmatpush3.msra.mxu0 %v26219_v55 }
0x14e1   :  { %22232 = vmatpush3.msra.mxu1 %v26226_v17  ;;  %22233 = vmatprep.mubr.msk.f32.mxu1 %vm22356_vm13, %v28092_v36 }
0x14e2   :  { %22210 = vmatprep.subr.mxu0 %v28092_v36  ;;  %22234 = vmatmul.mubr.f32.vlgmr.msra.gmra.mxu1 %v26477_v4 }
0x14e3   :  { %22211 = vmatpush3.msra.mxu0 %v26234_v15  ;;  %22218 = vmatprep.mubr.msk.f32.mxu0 %vm22356_vm13, %v28092_v36 }
0x14e4   :  { %22212 = vmatprep.subr.mxu0 %v28092_v36  ;;  %15136 = vmatprep.mubr.f32.mxu1 %v28092_v36 }
0x14e5   :  { %22213 = vmatpush3.msra.mxu0 %v26245_v39 }
0x14e6   :  { %22214 = vmatprep.subr.mxu0 %v28092_v36 }
0x14e7   :  { %22215 = vmatpush3.msra.mxu0 %v26262_v23 }
0x14e8   :  { %22216 = vmatprep.subr.mxu0 %v28092_v36 }
0x14e9   :  { %22217 = vmatpush3.msra.mxu0 %v26273_v14 }
0x14ea   :  { %22219 = vmatmul.mubr.f32.vlgmr.msra.gmra.mxu0 %v26477_v4 }
0x14eb   :  { %v13005_v31 = vpop.f32.mrf.mxu1  ;;  %15040 = vmatprep.mubr.f32.mxu0 %v28092_v36 }
0x14ed   :  { %v21905_v45 = vpop.f32.mrf.mxu1 }
0x14f3   :  { %v12904_v49 = vpop.f32.mrf.mxu0 }
0x14f4   :  { %v13006_v58 = vadd.f32 %v13005_v31, %v12904_v49 }
0x14f5   :  { %v21890_v60 = vpop.f32.mrf.mxu0 }
0x14f7   :  { %v13168_v3 = vpop.f32.mrf.mxu1 }
0x14f9   :  { %v21935_v35 = vpop.f32.mrf.mxu1 }
0x1500   :  { %v13089_v40 = vpop.f32.mrf.mxu0 }
0x1501   :  { %v13090_v34 = vadd.f32 %v13089_v40, %v13006_v58 }
0x1502   :  { %v21920_v38 = vpop.f32.mrf.mxu0 }
0x1503   :  { %v13169_v8 = vadd.f32 %v13168_v3, %v13090_v34 }
0x1505   :  { %v13334_v10 = vpop.f32.mrf.mxu1 }
0x1507   :  { %v21965_v13 = vpop.f32.mrf.mxu1 }
0x150e   :  { %v13257_v48 = vpop.f32.mrf.mxu0 }
0x150f   :  { %v13258_v37 = vadd.f32 %v13257_v48, %v13169_v8 }
0x1510   :  { %v21950_v26 = vpop.f32.mrf.mxu0 }
0x1511   :  { %v13335_v11 = vadd.f32 %v13334_v10, %v13258_v37 }
0x1513   :  { %v13519_v63 = vpop.f32.mrf.mxu1 }
0x1515   :  { %v21995_v16 = vpop.f32.mrf.mxu1 }
0x151c   :  { %v13418_v1 = vpop.f32.mrf.mxu0 }
0x151d   :  { %v13419_v20 = vadd.f32 %v13418_v1, %v13335_v11 }
0x151e   :  { %v21980_v55 = vpop.f32.mrf.mxu0 }
0x151f   :  { %v13520_v2 = vadd.f32 %v13519_v63, %v13419_v20 }
0x1521   :  { %v13682_v17 = vpop.f32.mrf.mxu1 }
0x1523   :  { %v22025_v30 = vpop.f32.mrf.mxu1 }
0x1524   :  { %v19149_v30 = vld [vmem:[%s28076_s3 + $0xc0] sm:$0xff]  ;;  %s22360_s3 = smov 33  }
0x152a   :  { %v13603_v15 = vpop.f32.mrf.mxu0 }
0x152b   :  { %v13604_v19 = vadd.f32 %v13603_v15, %v13520_v2 }
0x152c   :  { %v22010_v6 = vpop.f32.mrf.mxu0 }
0x152d   :  { %v13683_v39 = vadd.f32 %v13682_v17, %v13604_v19 }
0x152f   :  { %v13848_v32 = vpop.f32.mrf.mxu1 }
0x1531   :  { %v22055_v46 = vpop.f32.mrf.mxu1 }
0x1537   :  { %v13771_v12 = vpop.f32.mrf.mxu0 }
0x1538   :  { %v13772_v23 = vadd.f32 %v13771_v12, %v13683_v39 }
0x1539   :  { %v22040_v28 = vpop.f32.mrf.mxu0 }
0x153a   :  { %v13849_v27 = vadd.f32 %v13848_v32, %v13772_v23 }
0x155e   :  { %v14034_v14 = vpop.f32.mrf.mxu1 }
0x1560   :  { %v22085_v59 = vpop.f32.mrf.mxu1 }
0x1566   :  { %v13933_v42 = vpop.f32.mrf.mxu0 }
0x1567   :  { %v14035_v5 = vadd.f32 %v14034_v14, %v13933_v42 }
0x1568   :  { %v22070_v24 = vpop.f32.mrf.mxu0 }
0x156a   :  { %v14197_v21 = vpop.f32.mrf.mxu1 }
0x156c   :  { %v22115_v57 = vpop.f32.mrf.mxu1 }
0x1573   :  { %v14118_v22 = vpop.f32.mrf.mxu0 }
0x1574   :  { %v14119_v51 = vadd.f32 %v14118_v22, %v14035_v5 }
0x1575   :  { %v22100_v33 = vpop.f32.mrf.mxu0 }
0x1576   :  { %v14198_v50 = vadd.f32 %v14197_v21, %v14119_v51 }
0x1578   :  { %v14363_v41 = vpop.f32.mrf.mxu1 }
0x157a   :  { %v22145_v9 = vpop.f32.mrf.mxu1 }
0x1581   :  { %v14286_v47 = vpop.f32.mrf.mxu0 }
0x1582   :  { %v14287_v61 = vadd.f32 %v14286_v47, %v14198_v50 }
0x1583   :  { %v22130_v56 = vpop.f32.mrf.mxu0 }
0x1584   :  { %v14364_v4 = vadd.f32 %v14363_v41, %v14287_v61 }
0x1586   :  { %v14549_v29 = vpop.f32.mrf.mxu1 }
0x1588   :  { %v22175_v7 = vpop.f32.mrf.mxu1 }
0x158f   :  { %v14448_v0 = vpop.f32.mrf.mxu0 }
0x1590   :  { %v14449_v43 = vadd.f32 %v14448_v0, %v14364_v4 }
0x1591   :  { %v22160_v54 = vpop.f32.mrf.mxu0 }
0x1592   :  { %v14550_v31 = vadd.f32 %v14549_v29, %v14449_v43  ;;  %v19150_v29 = vld [vmem:[%s28074_s1 + $0x200] sm:$0xff] }
0x1593   :  { %v14970_v7 = vsel %vm14968_vm1, %v19150_v29, 0 }
0x1594   :  { %v14712_v44 = vpop.f32.mrf.mxu1  ;;  %v26592_v0 = vand.u32 4294901760, %v14970_v7 }
0x1596   :  { %v22205_v62 = vpop.f32.mrf.mxu1  ;;  %v26595_v5 = vsub.f32 %v14970_v7, %v26592_v0 }
0x1597   :  { %v19151_v62 = vld [vmem:[%s28074_s1 + $0x240] sm:$0xff] }
0x1598   :  { %v15043_v51 = vand.u32 4294901760, %v26595_v5 }
0x159a   :  { %v15044_v43 = vsub.f32 %v26595_v5, %v15043_v51 }
0x159d   :  { %v14633_v52 = vpop.f32.mrf.mxu0 }
0x159e   :  { %v14634_v49 = vadd.f32 %v14633_v52, %v14550_v31 }
0x159f   :  { %v22190_v18 = vpop.f32.mrf.mxu0 }
0x15a0   :  { %v14713_v58 = vadd.f32 %v14712_v44, %v14634_v49 }
0x15a2   :  { %v14878_v25 = vpop.f32.mrf.mxu1 }
0x15a4   :  { %v22235_v45 = vpop.f32.mrf.mxu1 }
0x15a5   :  { %v15480_v45 = vsel %vm14968_vm1, %v19151_v62, 0  ;;  %v19197_v62 = vld [vmem:[%s28075_s2 + $0x768] sm:$0xff] }
0x15aa   :  { %v14801_v60 = vpop.f32.mrf.mxu0 }
0x15ab   :  { %v14802_v3 = vadd.f32 %v14801_v60, %v14713_v58 }
0x15ac   :  { %v22220_v35 = vpop.f32.mrf.mxu0 }
0x15ad   :  { %v14879_v40 = vadd.f32 %v14878_v25, %v14802_v3 }
0x15af   :  { %14883 = vrot.lane.b32.xlu0 %v14879_v40, %s22359_s27  ;;  %s22363_s27 = smov 32  }
0x1621   :  { %v14884_v34 = vpop.permute.xlu0 %14883 }
0x1622   :  { %v14886_v38 = vsel %vm11666_vm11, %v13849_v27, %v14884_v34  ;;  %v14893_v8 = vmul.f32 %v14884_v34, %v14884_v34  ;;  %v14887_v10 = vsel %vm8328_vm10, %v14884_v34, 0.0 }
0x1623   :  { %v14888_v13 = vadd.f32 %v14887_v10, %v14886_v38  ;;  %v14892_v48 = vmul.f32 %v14886_v38, %v14886_v38 }
0x1624   :  { %v14894_v37 = vsel %vm8328_vm10, %v14893_v8, 0.0 }
0x1625   :  { %14889 = vadd.xlane.f32.xlu1 %v14888_v13  ;;  %v14895_v26 = vadd.f32 %v14894_v37, %v14892_v48 }
0x1627   :  { %14896 = vadd.xlane.f32.xlu0 %v14895_v26 }
0x16ae   :  { %v14890_v11 = vpop.xlane.xlu1 %14889 }
0x16af   :  { %v14891_v63 = vmul.f32 0.0052083335, %v14890_v11 }
0x16b0   :  { %v14897_v16 = vpop.xlane.xlu0 %14896 }
0x16b1   :  { %v14899_v1 = vmul.f32 %v14891_v63, %v14891_v63  ;;  %v14898_v20 = vmul.f32 0.0052083335, %v14897_v16 }
0x16b3   :  { %v14900_v55 = vsub.f32 %v14898_v20, %v14899_v1 }
0x16b5   :  { %v14901_v2 = vmax.f32 %v14900_v55, 0.0 }
0x16b7   :  { %v14902_v17 = vadd.f32 1e-05, %v14901_v2 }
0x16b9   :  { %22326 = vrsqrt.f32 %v14902_v17 }
0x16c6   :  { %v22327_v15 = vpop.eup %22326 }
0x16c7   :  { %v14906_v19 = vmul.f32 %v22327_v15, %v19149_v30 }
0x16c9   :  { %14915 = vperm.xlu1 %22296, %v14906_v19   ;;  %v14907_v6 = vmul.f32 %v14906_v19, %v14891_v63 }
0x16cb   :  { %14909 = vrot.lane.b32.xlu0 %v14907_v6, %s22335_s19 }
0x16cd   :  { %22297 = vset.pattern.permute.xlu1 %v28503_v53 }
0x173d   :  { %v14910_v39 = vpop.permute.xlu0 %14909 }
0x173e   :  { %v14912_v32 = vsub.f32 %v19149_v30, %v14910_v39 }
0x1740   :  { %14922 = vperm.xlu1 %22297, %v14912_v32  }
0x1744   :  { %v14916_v46 = vpop.permute.xlu1 %14915 }
0x1745   :  { %v14918_v12 = vmul.f32 %v14916_v46, %v14886_v38  ;;  %v14919_v23 = vmul.f32 %v14916_v46, %v14884_v34  ;;  %v15045_v34 = vand.u32 4294901760, %v15044_v43  ;;  %v26619_v38 = vand.u32 4294901760, %v15480_v45 }
0x1747   :  { %v26626_v16 = vsub.f32 %v15480_v45, %v26619_v38 }
0x1749   :  { %v15553_v32 = vand.u32 4294901760, %v26626_v16 }
0x17bb   :  { %v14923_v28 = vpop.permute.xlu1 %14922 }
0x17bc   :  { %v14925_v27 = vadd.f32 %v14923_v28, %v14918_v12  ;;  %v14926_v14 = vadd.f32 %v14923_v28, %v14919_v23 }
0x17be   :  { %v14927_v59 = vmax.f32 %v14925_v27, 0.0  ;;  %v14928_v42 = vmax.f32 %v14926_v14, 0.0  ;;  %v15554_v14 = vsub.f32 %v26626_v16, %v15553_v32 }
0x17c0   :  { %14939 = vrot.lane.b32.xlu1 %v14928_v42, %s22360_s3  ;;  %14937 = vrot.lane.b32.xlu0 %v14927_v59, %s22360_s3 }
0x17c4   :  { %14930 = vrot.lane.b32.xlu0 %v14927_v59, %s22335_s19 }
0x1832   :  { %v14940_v24 = vpop.permute.xlu1 %14939  ;;  %v14938_v21 = vpop.permute.xlu0 %14937 }
0x1833   :  { %v14942_v53 = vsel %vm14941_vm15, %v14938_v21, %v14940_v24 }
0x1834   :  { %v14944_v57 = vsel %vm3737_vm5, 0.0, %v14942_v53  ;;  %v15555_v53 = vand.u32 4294901760, %v15554_v14 }
0x1835   :  { %v14945_v22 = vsel %vm14934_vm0, %v14944_v57, 0.0 }
0x1836   :  { %14950 = vrot.lane.b32.xlu0 %v14945_v22, %s22335_s19  ;;  %v14931_v33 = vpop.permute.xlu0 %14930 }
0x1837   :  { %v14933_v41 = vsel %vm3737_vm5, 0.0, %v14931_v33 }
0x1838   :  { %v14935_v9 = vsel %vm14934_vm0, %v14933_v41, 0.0 }
0x1839   :  { %14947 = vrot.lane.b32.xlu1 %v14935_v9, %s22335_s19 }
0x18a8   :  { %v14951_v47 = vpop.permute.xlu0 %14950 }
0x18a9   :  { %14960 = vrot.lane.b32.xlu0 %v14951_v47, %s22361_s30 }
0x18ab   :  { %v14948_v56 = vpop.permute.xlu1 %14947 }
0x18ac   :  { %14954 = vrot.lane.b32.xlu1 %v14948_v56, %s22340_s20 }
0x18ad   :  { %14958 = vrot.lane.b32.xlu0 %v14945_v22, %s22361_s30 }
0x18b0   :  { %14952 = vrot.lane.b32.xlu1 %v14935_v9, %s22340_s20 }
0x18b1   :  { %15471 = vrot.lane.b32.xlu0 %v14951_v47, %s22362_s6 }
0x18b4   :  { %15465 = vrot.lane.b32.xlu1 %v14948_v56, %s22337_s5 }
0x18b5   :  { %15469 = vrot.lane.b32.xlu0 %v14945_v22, %s22362_s6 }
0x18b8   :  { %15463 = vrot.lane.b32.xlu1 %v14935_v9, %s22337_s5 }
0x191b   :  { %v14961_v54 = vpop.permute.xlu0 %14960 }
0x191c   :  { %v26598_v44 = vand.u32 4294901760, %v14961_v54 }
0x191e   :  { %v15081_v50 = vsub.f32 %v14961_v54, %v26598_v44  ;;  %v14955_v61 = vpop.permute.xlu1 %14954  ;;  %15001 = vmatprep.subr.mxu0 %v26598_v44 }
0x191f   :  { %v14965_v4 = vsel %vm11666_vm11, %v14955_v61, %v14961_v54  ;;  %v14959_v52 = vpop.permute.xlu0 %14958  ;;  %v26706_v61 = vand.u32 4294901760, %v19197_v62 }
0x1920   :  { %v26609_v18 = vand.u32 4294901760, %v14965_v4  ;;  %v26611_v25 = vand.u32 4294901760, %v14959_v52  ;;  %v15082_v31 = vand.u32 4294901760, %v15081_v50 }
0x1921   :  { %28508 = vst [vmem:[#allocation66_spill] sm:$0xff] %v26706_v61 }
0x1922   :  { %v15087_v49 = vsub.f32 %v14965_v4, %v26609_v18  ;;  %v15093_v58 = vsub.f32 %v14959_v52, %v26611_v25  ;;  %v14953_v60 = vpop.permute.xlu1 %14952  ;;  %15003 = vmatpush1.msra.mxu0 %v26609_v18  ;;  %v15083_v3 = vsub.f32 %v15081_v50, %v15082_v31  ;;  %v19196_v4 = vld [vmem:[%s28075_s2 + $0x760] sm:$0xff] }
0x1923   :  { %v14964_v35 = vsel %vm11666_vm11, %v14953_v60, %v14959_v52  ;;  %15005 = vmatprep.subr.mxu0 %v26611_v25  ;;  %v15472_v40 = vpop.permute.xlu0 %15471  ;;  %v26715_v43 = vand.u32 4294901760, %v19196_v4 }
0x1924   :  { %v15088_v8 = vand.u32 4294901760, %v15087_v49  ;;  %v26621_v10 = vand.u32 4294901760, %v14964_v35  ;;  %v15084_v13 = vand.u32 4294901760, %v15083_v3  ;;  %v15094_v48 = vand.u32 4294901760, %v15093_v58 }
0x1925   :  { %v26630_v2 = vand.u32 4294901760, %v15472_v40  ;;  %28510 = vst [vmem:[#allocation60_spill] sm:$0xff] %v26715_v43  ;;  %v26737_v60 = vsub.f32 %v19196_v4, %v26715_v43 }
0x1926   :  { %v15089_v37 = vsub.f32 %v15087_v49, %v15088_v8  ;;  %v15099_v26 = vsub.f32 %v14964_v35, %v26621_v10  ;;  %v15466_v11 = vpop.permute.xlu1 %15465  ;;  %15007 = vmatpush1.msra.mxu0 %v26621_v10  ;;  %15085 = vmatprep.subr.mxu1 %v15084_v13  ;;  %v15095_v63 = vsub.f32 %v15093_v58, %v15094_v48  ;;  %v19193_v35 = vld [vmem:[%s28075_s2 + $0x748] sm:$0xff] }
0x1927   :  { %15174 = vmatprep.subr.mxu0 %v15081_v50  ;;  %15046 = vmatmul.mubr.f32.vlgmr.msra.gmra.mxu0 %v15045_v34  ;;  %v15476_v20 = vsel %vm11666_vm11, %v15466_v11, %v15472_v40  ;;  %v15470_v17 = vpop.permute.xlu0 %15469  ;;  %v15591_v23 = vsub.f32 %v15472_v40, %v26630_v2  ;;  %28515 = vst [vmem:[#allocation11_spill] sm:$0xff] %v26737_v60  ;;  %v19191_v11 = vld [vmem:[%s28075_s2 + $0x738] sm:$0xff] }
0x1928   :  { %v15100_v1 = vand.u32 4294901760, %v15099_v26  ;;  %15177 = vmatpush1.msra.mxu0 %v15087_v49  ;;  %v15090_v55 = vand.u32 4294901760, %v15089_v37  ;;  %15216 = vmatprep.mubr.f32.mxu0 %v28092_v36  ;;  %v15096_v30 = vand.u32 4294901760, %v15095_v63  ;;  %v26632_v6 = vand.u32 4294901760, %v15476_v20  ;;  %v19194_v49 = vld [vmem:[%s28075_s2 + $0x750] sm:$0xff] }
0x1929   :  { %15180 = vmatprep.subr.mxu0 %v15093_v58  ;;  %v26636_v46 = vand.u32 4294901760, %v15470_v17  ;;  %v15592_v24 = vand.u32 4294901760, %v15591_v23  ;;  %v26739_v3 = vand.u32 4294901760, %v19194_v49 }
0x192a   :  { %v15101_v15 = vsub.f32 %v15099_v26, %v15100_v1  ;;  %v15464_v19 = vpop.permute.xlu1 %15463  ;;  %15091 = vmatpush1.msra.mxu1 %v15090_v55  ;;  %15183 = vmatpush1.msra.mxu0 %v15099_v26  ;;  %v15597_v27 = vsub.f32 %v15476_v20, %v26632_v6  ;;  %v19190_v55 = vld [vmem:[%s28075_s2 + $0x730] sm:$0xff] }
0x192b   :  { %v15475_v39 = vsel %vm11666_vm11, %v15464_v19, %v15470_v17  ;;  %15097 = vmatprep.subr.mxu1 %v15096_v30  ;;  %15334 = vmatprep.subr.mxu0 %v15082_v31  ;;  %v15603_v59 = vsub.f32 %v15470_v17, %v26636_v46  ;;  %v15593_v33 = vsub.f32 %v15591_v23, %v15592_v24  ;;  %v19189_v19 = vld [vmem:[%s28075_s2 + $0x728] sm:$0xff]  ;;  %v26822_v14 = vand.u32 4294901760, %v19190_v55 }
0x192c   :  { %15219 = vmatmul.mubr.f32.vlgmr.msra.gmra.mxu0 %v26595_v5  ;;  %v15102_v12 = vand.u32 4294901760, %v15101_v15  ;;  %v26640_v28 = vand.u32 4294901760, %v15475_v39  ;;  %v15598_v21 = vand.u32 4294901760, %v15597_v27  ;;  %v26725_v31 = vsub.f32 %v19197_v62, %v26706_v61  ;;  %28516 = vst [vmem:[#allocation8_spill] sm:$0xff] %v26739_v3 }
0x192d   :  { %15338 = vmatpush1.msra.mxu0 %v15088_v8  ;;  %15379 = vmatprep.mubr.f32.mxu0 %v28092_v36  ;;  %v15604_v57 = vand.u32 4294901760, %v15603_v59  ;;  %v15594_v56 = vand.u32 4294901760, %v15593_v33  ;;  %v26753_v8 = vand.u32 4294901760, %v19193_v35  ;;  %v26765_v37 = vsub.f32 %v19194_v49, %v26739_v3  ;;  %28534 = vst [vmem:[#allocation38_spill] sm:$0xff] %v26822_v14 }
0x192e   :  { %15342 = vmatprep.subr.mxu0 %v15094_v48  ;;  %15103 = vmatpush1.msra.mxu1 %v15102_v12  ;;  %v15609_v42 = vsub.f32 %v15475_v39, %v26640_v28  ;;  %v15599_v41 = vsub.f32 %v15597_v27, %v15598_v21  ;;  %28512 = vst [vmem:[#allocation9_spill] sm:$0xff] %v26725_v31  ;;  %v26748_v34 = vand.u32 4294901760, %v26725_v31  ;;  %v26762_v48 = vand.u32 4294901760, %v26737_v60  ;;  %v19188_v12 = vld [vmem:[%s28075_s2 + $0x720] sm:$0xff] }
0x192f   :  { %15346 = vmatpush1.msra.mxu0 %v15100_v1  ;;  %15138 = vmatmul.mubr.f32.vlgmr.msra.gmra.mxu1 %v26592_v0  ;;  %v15605_v9 = vsub.f32 %v15603_v59, %v15604_v57  ;;  %28519 = vst [vmem:[#allocation25_spill] sm:$0xff] %v26753_v8  ;;  %28521 = vst [vmem:[#allocation22_spill] sm:$0xff] %v26765_v37  ;;  %v26781_v20 = vsub.f32 %v19193_v35, %v26753_v8  ;;  %v26792_v30 = vand.u32 4294901760, %v26765_v37 }
0x1930   :  { %15254 = vmatprep.subr.mxu1 %v26598_v44  ;;  %15511 = vmatprep.subr.mxu0 %v26630_v2  ;;  %v15610_v22 = vand.u32 4294901760, %v15609_v42  ;;  %v15600_v29 = vand.u32 4294901760, %v15599_v41  ;;  %28517 = vst [vmem:[#allocation14_spill] sm:$0xff] %v26748_v34  ;;  %28520 = vst [vmem:[#allocation16_spill] sm:$0xff] %v26762_v48  ;;  %v16155_v17 = vsub.f32 %v26737_v60, %v26762_v48 }
0x1931   :  { %15256 = vmatpush1.msra.mxu1 %v26609_v18  ;;  %15381 = vmatmul.mubr.f32.vlgmr.msra.gmra.mxu0 %v26592_v0  ;;  %v15606_v7 = vand.u32 4294901760, %v15605_v9  ;;  %28525 = vst [vmem:[#allocation33_spill] sm:$0xff] %v26781_v20  ;;  %28527 = vst [vmem:[#allocation24_spill] sm:$0xff] %v26792_v30  ;;  %v26847_v41 = vsub.f32 %v19190_v55, %v26822_v14  ;;  %v26849_v9 = vand.u32 4294901760, %v19188_v12 }
0x1932   :  { %15513 = vmatpush1.msra.mxu0 %v26632_v6  ;;  %15258 = vmatprep.subr.mxu1 %v26611_v25  ;;  %v15611_v47 = vsub.f32 %v15609_v42, %v15610_v22 }
0x1933   :  { %15515 = vmatprep.subr.mxu0 %v26636_v46  ;;  %15260 = vmatpush1.msra.mxu1 %v26621_v10  ;;  %28539 = vst [vmem:[#allocation3_spill] sm:$0xff] %v26847_v41  ;;  %28540 = vst [vmem:[#allocation30_spill] sm:$0xff] %v26849_v9  ;;  %v26874_v62 = vand.u32 4294901760, %v26847_v41  ;;  %v26877_v4 = vsub.f32 %v19188_v12, %v26849_v9 }
0x1934   :  { %15293 = vmatprep.mubr.f32.mxu1 %v28092_v36  ;;  %15517 = vmatpush1.msra.mxu0 %v26640_v28  ;;  %v15612_v5 = vand.u32 4294901760, %v15611_v47  ;;  %v19185_v47 = vld [vmem:[%s28075_s2 + $0x708] sm:$0xff] }
0x1935   :  { %15297 = vmatmul.mubr.f32.vlgmr.msra.gmra.mxu1 %v15043_v51  ;;  %15416 = vmatprep.subr.mxu1 %v26598_v44  ;;  %v19198_v51 = vld [vmem:[%s28075_s2 + $0x770] sm:$0xff]  ;;  %28546 = vst [vmem:[#allocation54_spill] sm:$0xff] %v26874_v62  ;;  %28547 = vst [vmem:[#allocation10_spill] sm:$0xff] %v26877_v4 }
0x1936   :  { %15550 = vmatprep.mubr.f32.mxu0 %v28092_v36  ;;  %15684 = vmatprep.subr.mxu0 %v15591_v23  ;;  %v26698_v44 = vand.u32 4294901760, %v19198_v51  ;;  %v26815_v23 = vand.u32 4294901760, %v16155_v17  ;;  %v19183_v17 = vld [vmem:[%s28075_s2 + $0x6f8] sm:$0xff] }
0x1937   :  { %15418 = vmatpush1.msra.mxu1 %v26609_v18  ;;  %15556 = vmatmul.mubr.f32.vlgmr.msra.gmra.mxu0 %v15555_v53  ;;  %v19195_v18 = vld [vmem:[%s28075_s2 + $0x758] sm:$0xff]  ;;  %v26835_v53 = vand.u32 4294901760, %v19189_v19 }
0x1938   :  { %15687 = vmatpush1.msra.mxu0 %v15597_v27  ;;  %15420 = vmatprep.subr.mxu1 %v26611_v25  ;;  %28506 = vst [vmem:[#allocation64_spill] sm:$0xff] %v26698_v44  ;;  %v26713_v52 = vsub.f32 %v19198_v51, %v26698_v44  ;;  %v26727_v45 = vand.u32 4294901760, %v19195_v18  ;;  %28532 = vst [vmem:[#allocation23_spill] sm:$0xff] %v26815_v23 }
0x1939   :  { %15690 = vmatprep.subr.mxu0 %v15603_v59  ;;  %15422 = vmatpush1.msra.mxu1 %v26621_v10  ;;  %v19192_v10 = vld [vmem:[%s28075_s2 + $0x740] sm:$0xff]  ;;  %v19187_v59 = vld [vmem:[%s28075_s2 + $0x718] sm:$0xff]  ;;  %28537 = vst [vmem:[#allocation50_spill] sm:$0xff] %v26835_v53 }
0x193a   :  { %15455 = vmatprep.mubr.f32.mxu1 %v28092_v36  ;;  %15693 = vmatpush1.msra.mxu0 %v15609_v42  ;;  %28509 = vst [vmem:[#allocation63_spill] sm:$0xff] %v26713_v52  ;;  %28513 = vst [vmem:[#allocation6_spill] sm:$0xff] %v26727_v45  ;;  %v26734_v58 = vand.u32 4294901760, %v26713_v52  ;;  %v26767_v26 = vand.u32 4294901760, %v19192_v10 }
0x193b   :  { %15457 = vmatmul.mubr.f32.vlgmr.msra.gmra.mxu1 %v26592_v0  ;;  %15595 = vmatprep.subr.mxu1 %v15594_v56  ;;  %v19199_v0 = vld [vmem:[%s28075_s2 + $0x778] sm:$0xff] }
0x193c   :  { %15726 = vmatprep.mubr.f32.mxu0 %v28092_v36  ;;  %15844 = vmatprep.subr.mxu0 %v15592_v24  ;;  %v26693_v54 = vand.u32 4294901760, %v19199_v0  ;;  %28514 = vst [vmem:[#allocation17_spill] sm:$0xff] %v26734_v58  ;;  %v16143_v13 = vsub.f32 %v26713_v52, %v26734_v58  ;;  %28522 = vst [vmem:[#allocation7_spill] sm:$0xff] %v26767_v26  ;;  %v26795_v15 = vsub.f32 %v19192_v10, %v26767_v26 }
0x193d   :  { %15601 = vmatpush1.msra.mxu1 %v15600_v29  ;;  %15729 = vmatmul.mubr.f32.vlgmr.msra.gmra.mxu0 %v26626_v16  ;;  %v16149_v16 = vsub.f32 %v26725_v31, %v26748_v34  ;;  %v26891_v10 = vand.u32 4294901760, %v19185_v47 }
0x193e   :  { %15848 = vmatpush1.msra.mxu0 %v15598_v21  ;;  %15607 = vmatprep.subr.mxu1 %v15606_v7  ;;  %28505 = vst [vmem:[#allocation56_spill] sm:$0xff] %v26693_v54  ;;  %v26704_v50 = vsub.f32 %v19199_v0, %v26693_v54  ;;  %28528 = vst [vmem:[#allocation31_spill] sm:$0xff] %v26795_v15  ;;  %v26820_v27 = vand.u32 4294901760, %v26795_v15  ;;  %v26862_v7 = vsub.f32 %v19189_v19, %v26835_v53  ;;  %v19184_v0 = vld [vmem:[%s28075_s2 + $0x700] sm:$0xff] }
0x193f   :  { %15852 = vmatprep.subr.mxu0 %v15604_v57  ;;  %15613 = vmatpush1.msra.mxu1 %v15612_v5  ;;  %v19186_v57 = vld [vmem:[%s28075_s2 + $0x710] sm:$0xff]  ;;  %v26864_v5 = vand.u32 4294901760, %v19187_v59  ;;  %28551 = vst [vmem:[#allocation53_spill] sm:$0xff] %v26891_v10  ;;  %v26903_v55 = vand.u32 4294901760, %v19184_v0 }
0x1940   :  { %15646 = vmatprep.mubr.f32.mxu1 %v28092_v36  ;;  %15856 = vmatpush1.msra.mxu0 %v15610_v22  ;;  %28507 = vst [vmem:[#allocation62_spill] sm:$0xff] %v26704_v50  ;;  %v26722_v25 = vand.u32 4294901760, %v26704_v50  ;;  %28533 = vst [vmem:[#allocation32_spill] sm:$0xff] %v26820_v27  ;;  %v16179_v33 = vsub.f32 %v26795_v15, %v26820_v27  ;;  %v26886_v35 = vand.u32 4294901760, %v26862_v7 }
0x1941   :  { %15648 = vmatmul.mubr.f32.vlgmr.msra.gmra.mxu1 %v26619_v38  ;;  %15764 = vmatprep.subr.mxu1 %v26630_v2  ;;  %28543 = vst [vmem:[#allocation40_spill] sm:$0xff] %v26862_v7  ;;  %28544 = vst [vmem:[#allocation51_spill] sm:$0xff] %v26864_v5 }
0x1942   :  { %15766 = vmatpush1.msra.mxu1 %v26632_v6  ;;  %15803 = vmatprep.mubr.f32.mxu1 %v28092_v36  ;;  %28511 = vst [vmem:[#allocation61_spill] sm:$0xff] %v26722_v25  ;;  %v16137_v40 = vsub.f32 %v26704_v50, %v26722_v25  ;;  %v26871_v51 = vand.u32 4294901760, %v16179_v33  ;;  %28549 = vst [vmem:[#allocation48_spill] sm:$0xff] %v26886_v35 }
0x1943   :  { %15768 = vmatprep.subr.mxu1 %v26636_v46  ;;  %15889 = vmatprep.mubr.f32.mxu0 %v28092_v36  ;;  %28554 = vst [vmem:[#allocation47_spill] sm:$0xff] %v26903_v55 }
0x1944   :  { %15770 = vmatpush1.msra.mxu1 %v26640_v28  ;;  %15891 = vmatmul.mubr.f32.vlgmr.msra.gmra.mxu0 %v26619_v38  ;;  %v26773_v63 = vand.u32 4294901760, %v16137_v40  ;;  %28545 = vst [vmem:[#allocation28_spill] sm:$0xff] %v26871_v51  ;;  %v26889_v40 = vsub.f32 %v19187_v59, %v26864_v5  ;;  %v19182_v59 = vld [vmem:[%s28075_s2 + $0x6f0] sm:$0xff] }
0x1945   :  { %15807 = vmatmul.mubr.f32.vlgmr.msra.gmra.mxu1 %v15553_v32  ;;  %15926 = vmatprep.subr.mxu1 %v26630_v2  ;;  %v26787_v2 = vand.u32 4294901760, %v16143_v13  ;;  %v26807_v32 = vand.u32 4294901760, %v26781_v20  ;;  %v16191_v13 = vsub.f32 %v26847_v41, %v26874_v62 }
0x1946   :  { %15928 = vmatpush1.msra.mxu1 %v26632_v6  ;;  %15965 = vmatprep.mubr.f32.mxu1 %v28092_v36  ;;  %28523 = vst [vmem:[#allocation4_spill] sm:$0xff] %v26773_v63  ;;  %v26802_v6 = vand.u32 4294901760, %v16149_v16  ;;  %28550 = vst [vmem:[#allocation21_spill] sm:$0xff] %v26889_v40  ;;  %v26914_v12 = vand.u32 4294901760, %v26889_v40 }
0x1947   :  { %15930 = vmatprep.subr.mxu1 %v26636_v46  ;;  %16114 = vmatprep.mubr.f32.mxu0 %v28092_v36  ;;  %28526 = vst [vmem:[#allocation15_spill] sm:$0xff] %v26787_v2  ;;  %28530 = vst [vmem:[#allocation35_spill] sm:$0xff] %v26807_v32  ;;  %v26809_v46 = vand.u32 4294901760, %v19191_v11  ;;  %v16173_v24 = vsub.f32 %v26781_v20, %v26807_v32 }
0x1948   :  { %15932 = vmatpush1.msra.mxu1 %v26640_v28  ;;  %16035 = vmatprep.subr.mxu0 %v26693_v54  ;;  %28529 = vst [vmem:[#allocation12_spill] sm:$0xff] %v26802_v6  ;;  %v16167_v28 = vsub.f32 %v26765_v37, %v26792_v30  ;;  %28556 = vst [vmem:[#allocation44_spill] sm:$0xff] %v26914_v12 }
0x1949   :  { %15967 = vmatmul.mubr.f32.vlgmr.msra.gmra.mxu1 %v26619_v38  ;;  %16037 = vmatpush1.msra.mxu0 %v26698_v44  ;;  %v26751_v38 = vsub.f32 %v19195_v18, %v26727_v45  ;;  %28531 = vst [vmem:[#allocation41_spill] sm:$0xff] %v26809_v46  ;;  %v26833_v21 = vsub.f32 %v19191_v11, %v26809_v46  ;;  %v26856_v56 = vand.u32 4294901760, %v16173_v24  ;;  %v26879_v18 = vand.u32 4294901760, %v19186_v57 }
0x194a   :  { %16310 = vmatprep.mubr.f32.mxu1 %v28092_v36  ;;  %16039 = vmatprep.subr.mxu0 %v26706_v61  ;;  %v26842_v22 = vand.u32 4294901760, %v16167_v28  ;;  %v26898_v11 = vand.u32 4294901760, %v26877_v4  ;;  %v26917_v28 = vsub.f32 %v19185_v47, %v26891_v10  ;;  %v26923_v24 = vand.u32 4294901760, %v16191_v13  ;;  %v19181_v47 = vld [vmem:[%s28075_s2 + $0x6e8] sm:$0xff] }
0x194b   :  { %16041 = vmatpush1.msra.mxu0 %v26715_v43  ;;  %28518 = vst [vmem:[#allocation19_spill] sm:$0xff] %v26751_v38  ;;  %v26778_v1 = vand.u32 4294901760, %v26751_v38  ;;  %16139 = vmatprep.subr.mxu1 %v26773_v63  ;;  %28536 = vst [vmem:[#allocation43_spill] sm:$0xff] %v26833_v21  ;;  %v26859_v29 = vand.u32 4294901760, %v26833_v21  ;;  %v26901_v16 = vsub.f32 %v19186_v57, %v26879_v18  ;;  %v19178_v63 = vld [vmem:[%s28075_s2 + $0x6d0] sm:$0xff] }
0x194c   :  { %16043 = vmatprep.subr.mxu0 %v26727_v45  ;;  %16145 = vmatpush1.msra.mxu1 %v26787_v2  ;;  %28538 = vst [vmem:[#allocation5_spill] sm:$0xff] %v26842_v22  ;;  %28541 = vst [vmem:[#allocation13_spill] sm:$0xff] %v26856_v56  ;;  %v16203_v57 = vsub.f32 %v26877_v4, %v26898_v11  ;;  %v16209_v13 = vsub.f32 %v26889_v40, %v26914_v12  ;;  %v26971_v2 = vand.u32 4294901760, %v19181_v47 }
0x194d   :  { %16045 = vmatpush1.msra.mxu0 %v26739_v3  ;;  %28524 = vst [vmem:[#allocation27_spill] sm:$0xff] %v26778_v1  ;;  %v16161_v39 = vsub.f32 %v26751_v38, %v26778_v1  ;;  %16151 = vmatprep.subr.mxu1 %v26802_v6  ;;  %28542 = vst [vmem:[#allocation49_spill] sm:$0xff] %v26859_v29  ;;  %v16185_v49 = vsub.f32 %v26833_v21, %v26859_v29  ;;  %v26928_v33 = vand.u32 4294901760, %v26901_v16 }
0x194e   :  { %16047 = vmatprep.subr.mxu0 %v26753_v8  ;;  %16157 = vmatpush1.msra.mxu1 %v26815_v23  ;;  %28548 = vst [vmem:[#allocation39_spill] sm:$0xff] %v26879_v18  ;;  %28552 = vst [vmem:[#allocation36_spill] sm:$0xff] %v26898_v11  ;;  %v19179_v23 = vld [vmem:[%s28075_s2 + $0x6d8] sm:$0xff]  ;;  %v26964_v6 = vand.u32 4294901760, %v16209_v13 }
0x194f   :  { %16049 = vmatpush1.msra.mxu0 %v26767_v26  ;;  %v26828_v42 = vand.u32 4294901760, %v16161_v39  ;;  %28553 = vst [vmem:[#allocation18_spill] sm:$0xff] %v26901_v16  ;;  %v26909_v19 = vand.u32 4294901760, %v16185_v49  ;;  %v16197_v39 = vsub.f32 %v26862_v7, %v26886_v35  ;;  %28557 = vst [vmem:[#allocation52_spill] sm:$0xff] %v26917_v28  ;;  %v26931_v49 = vsub.f32 %v19184_v0, %v26903_v55  ;;  %v19180_v0 = vld [vmem:[%s28075_s2 + $0x6e0] sm:$0xff] }
0x1950   :  { %16051 = vmatprep.subr.mxu0 %v26809_v46  ;;  %28558 = vst [vmem:[#allocation26_spill] sm:$0xff] %v26923_v24  ;;  %28559 = vst [vmem:[#allocation37_spill] sm:$0xff] %v26928_v33 }
0x1951   :  { %28535 = vst [vmem:[#allocation20_spill] sm:$0xff] %v26828_v42  ;;  %16053 = vmatpush1.msra.mxu0 %v26822_v14  ;;  %16163 = vmatprep.subr.mxu1 %v26828_v42  ;;  %28555 = vst [vmem:[#allocation29_spill] sm:$0xff] %v26909_v19  ;;  %v26938_v36 = vand.u32 4294901760, %v16197_v39  ;;  %v16215_v39 = vsub.f32 %v26901_v16, %v26928_v33  ;;  %v26958_v42 = vand.u32 4294901760, %v19182_v59 }
0x1952   :  { %16055 = vmatprep.subr.mxu0 %v26835_v53  ;;  %16169 = vmatpush1.msra.mxu1 %v26842_v22  ;;  %28560 = vst [vmem:[#allocation46_spill] sm:$0xff] %v26931_v49  ;;  %v26951_v22 = vand.u32 4294901760, %v16203_v57  ;;  %28567 = vst [vmem:[#allocation55_spill] sm:$0xff] %v26964_v6 }
0x1953   :  { %16057 = vmatpush1.msra.mxu0 %v26849_v9  ;;  %16175 = vmatprep.subr.mxu1 %v26856_v56  ;;  %28561 = vst [vmem:[#allocation34_spill] sm:$0xff] %v26938_v36  ;;  %v26945_v56 = vand.u32 4294901760, %v19183_v17  ;;  %28566 = vst [vmem:[#allocation58_spill] sm:$0xff] %v26958_v42  ;;  %v26978_v33 = vand.u32 4294901760, %v16215_v39 }
0x1954   :  { %16059 = vmatprep.subr.mxu0 %v26864_v5  ;;  %16181 = vmatpush1.msra.mxu1 %v26871_v51  ;;  %v26943_v51 = vand.u32 4294901760, %v26917_v28  ;;  %28564 = vst [vmem:[#allocation57_spill] sm:$0xff] %v26951_v22  ;;  %28569 = vst [vmem:[#allocation69_spill] sm:$0xff] %v26971_v2 }
0x1955   :  { %16061 = vmatpush1.msra.mxu0 %v26879_v18  ;;  %16187 = vmatprep.subr.mxu1 %v26909_v19  ;;  %28563 = vst [vmem:[#allocation42_spill] sm:$0xff] %v26945_v56  ;;  %v26956_v19 = vand.u32 4294901760, %v26931_v49  ;;  %28570 = vst [vmem:[#allocation65_spill] sm:$0xff] %v26978_v33 }
0x1956   :  { %16063 = vmatprep.subr.mxu0 %v26891_v10  ;;  %28562 = vst [vmem:[#allocation45_spill] sm:$0xff] %v26943_v51  ;;  %16193 = vmatpush1.msra.mxu1 %v26923_v24  ;;  %v16221_v57 = vsub.f32 %v26917_v28, %v26943_v51  ;;  %v26969_v24 = vsub.f32 %v19183_v17, %v26945_v56  ;;  %v26985_v17 = vand.u32 4294901760, %v19180_v0  ;;  %v19177_v51 = vld [vmem:[%s28075_s2 + $0x6c8] sm:$0xff] }
0x1957   :  { %16065 = vmatpush1.msra.mxu0 %v26903_v55  ;;  %28565 = vst [vmem:[#allocation67_spill] sm:$0xff] %v26956_v19  ;;  %16199 = vmatprep.subr.mxu1 %v26938_v36  ;;  %v16227_v13 = vsub.f32 %v26931_v49, %v26956_v19  ;;  %v26983_v36 = vsub.f32 %v19182_v59, %v26958_v42  ;;  %v27000_v59 = vand.u32 4294901760, %v19179_v23  ;;  %v19176_v19 = vld [vmem:[%s28075_s2 + $0x6c0] sm:$0xff] }
0x1958   :  { %28568 = vst [vmem:[#allocation59_spill] sm:$0xff] %v26969_v24  ;;  %16067 = vmatprep.subr.mxu0 %v26945_v56  ;;  %16205 = vmatpush1.msra.mxu1 %v26951_v22  ;;  %28572 = vst [vmem:[#allocation70_spill] sm:$0xff] %v26985_v17  ;;  %v26992_v12 = vand.u32 4294901760, %v16221_v57  ;;  %v26995_v39 = vand.u32 4294901760, %v26969_v24  ;;  %v26998_v22 = vsub.f32 %v19181_v47, %v26971_v2  ;;  %v27015_v47 = vand.u32 4294901760, %v19178_v63 }
0x1959   :  { %28571 = vst [vmem:[#allocation68_spill] sm:$0xff] %v26983_v36  ;;  %16069 = vmatpush1.msra.mxu0 %v26958_v42  ;;  %16211 = vmatprep.subr.mxu1 %v26964_v6  ;;  %28576 = vst [vmem:[#allocation74_spill] sm:$0xff] %v27000_v59  ;;  %v27007_v11 = vand.u32 4294901760, %v16227_v13  ;;  %v27010_v57 = vand.u32 4294901760, %v26983_v36  ;;  %v27013_v6 = vsub.f32 %v19180_v0, %v26985_v17  ;;  %v27039_v29 = vand.u32 4294901760, %v19176_v19 }
0x195a   :  { %28573 = vst [vmem:[#allocation71_spill] sm:$0xff] %v26992_v12  ;;  %28574 = vst [vmem:[#allocation72_spill] sm:$0xff] %v26995_v39  ;;  %16071 = vmatprep.subr.mxu0 %v26971_v2  ;;  %16217 = vmatpush1.msra.mxu1 %v26978_v33  ;;  %v16233_v35 = vsub.f32 %v26969_v24, %v26995_v39  ;;  %v27022_v62 = vand.u32 4294901760, %v26998_v22  ;;  %v27025_v13 = vsub.f32 %v19179_v23, %v27000_v59 }
0x195b   :  { %28575 = vst [vmem:[#allocation73_spill] sm:$0xff] %v26998_v22  ;;  %28577 = vst [vmem:[#allocation75_spill] sm:$0xff] %v27007_v11  ;;  %16073 = vmatpush1.msra.mxu0 %v26985_v17  ;;  %16223 = vmatprep.subr.mxu1 %v26992_v12  ;;  %v27027_v33 = vand.u32 4294901760, %v19177_v51  ;;  %v16239_v0 = vsub.f32 %v26983_v36, %v27010_v57  ;;  %v27034_v12 = vand.u32 4294901760, %v27013_v6 }
0x195c   :  { %28578 = vst [vmem:[#allocation76_spill] sm:$0xff] %v27010_v57  ;;  %28579 = vst [vmem:[#allocation77_spill] sm:$0xff] %v27013_v6  ;;  %16075 = vmatprep.subr.mxu0 %v27000_v59  ;;  %16229 = vmatpush1.msra.mxu1 %v27007_v11  ;;  %v27037_v39 = vsub.f32 %v19178_v63, %v27015_v47  ;;  %v27042_v23 = vand.u32 4294901760, %v16233_v35  ;;  %v16245_v27 = vsub.f32 %v26998_v22, %v27022_v62 }
0x195d   :  { %28580 = vst [vmem:[#allocation78_spill] sm:$0xff] %v27015_v47  ;;  %28581 = vst [vmem:[#allocation79_spill] sm:$0xff] %v27022_v62  ;;  %16077 = vmatpush1.msra.mxu0 %v27015_v47  ;;  %v27047_v11 = vand.u32 4294901760, %v27025_v13  ;;  %v27050_v57 = vsub.f32 %v19177_v51, %v27027_v33  ;;  %v27053_v32 = vand.u32 4294901760, %v16239_v0  ;;  %v16251_v63 = vsub.f32 %v27013_v6, %v27034_v12 }
0x195e   :  { %28582 = vst [vmem:[#allocation80_spill] sm:$0xff] %v27025_v13  ;;  %28583 = vst [vmem:[#allocation81_spill] sm:$0xff] %v27027_v33  ;;  %16079 = vmatprep.subr.mxu0 %v27027_v33  ;;  %v27058_v30 = vand.u32 4294901760, %v27037_v39  ;;  %v27061_v35 = vsub.f32 %v19176_v19, %v27039_v29  ;;  %16235 = vmatprep.subr.mxu1 %v27042_v23  ;;  %v27065_v62 = vand.u32 4294901760, %v16245_v27 }
0x195f   :  { %28584 = vst [vmem:[#allocation82_spill] sm:$0xff] %v27034_v12  ;;  %28585 = vst [vmem:[#allocation83_spill] sm:$0xff] %v27037_v39  ;;  %16081 = vmatpush1.msra.mxu0 %v27039_v29  ;;  %v16257_v51 = vsub.f32 %v27025_v13, %v27047_v11  ;;  %v27070_v0 = vand.u32 4294901760, %v27050_v57  ;;  %16241 = vmatpush1.msra.mxu1 %v27053_v32  ;;  %v27074_v12 = vand.u32 4294901760, %v16251_v63 }
0x1960   :  { %28586 = vst [vmem:[#allocation84_spill] sm:$0xff] %v27039_v29  ;;  %28587 = vst [vmem:[#allocation85_spill] sm:$0xff] %v27042_v23  ;;  %16328 = vmatprep.subr.mxu0 %v26704_v50  ;;  %v16263_v19 = vsub.f32 %v27037_v39, %v27058_v30  ;;  %v27079_v1 = vand.u32 4294901760, %v27061_v35  ;;  %16247 = vmatprep.subr.mxu1 %v27065_v62 }
0x1961   :  { %28588 = vst [vmem:[#allocation86_spill] sm:$0xff] %v27047_v11  ;;  %28589 = vst [vmem:[#allocation87_spill] sm:$0xff] %v27050_v57  ;;  %v27082_v27 = vand.u32 4294901760, %v16257_v51  ;;  %v16269_v23 = vsub.f32 %v27050_v57, %v27070_v0  ;;  %16253 = vmatpush1.msra.mxu1 %v27074_v12 }
0x1962   :  { %28590 = vst [vmem:[#allocation88_spill] sm:$0xff] %v27053_v32  ;;  %28591 = vst [vmem:[#allocation89_spill] sm:$0xff] %v27058_v30  ;;  %v27087_v50 = vand.u32 4294901760, %v16263_v19  ;;  %v16275_v63 = vsub.f32 %v27061_v35, %v27079_v1 }
0x1963   :  { %28592 = vst [vmem:[#allocation90_spill] sm:$0xff] %v27061_v35  ;;  %28593 = vst [vmem:[#allocation91_spill] sm:$0xff] %v27065_v62  ;;  %16259 = vmatprep.subr.mxu1 %v27082_v27  ;;  %v27092_v32 = vand.u32 4294901760, %v16269_v23 }
0x1964   :  { %28594 = vst [vmem:[#allocation92_spill] sm:$0xff] %v27070_v0  ;;  %28595 = vst [vmem:[#allocation93_spill] sm:$0xff] %v27074_v12  ;;  %16265 = vmatpush1.msra.mxu1 %v27087_v50  ;;  %v27095_v30 = vand.u32 4294901760, %v16275_v63 }
0x1965   :  { %28596 = vst [vmem:[#allocation94_spill] sm:$0xff] %v27079_v1  ;;  %28597 = vst [vmem:[#allocation95_spill] sm:$0xff] %v27082_v27  ;;  %16271 = vmatprep.subr.mxu1 %v27092_v32 }
0x1966   :  { %28598 = vst [vmem:[#allocation96_spill] sm:$0xff] %v27087_v50  ;;  %28599 = vst [vmem:[#allocation97_spill] sm:$0xff] %v27092_v32  ;;  %16277 = vmatpush1.msra.mxu1 %v27095_v30 }
0x1967   :  { %28600 = vst [vmem:[#allocation98_spill] sm:$0xff] %v27095_v30  ;;  %16448 = vmatprep.subr.mxu1 %v26693_v54 }
0x19e7   :  { %v15047_v51 = vpop.f32.mrf.mxu0 }
0x19e9   :  { %v15049_v19 = vpop.f32.mrf.mxu0 }
0x19ec   :  { %v15220_v12 = vpop.f32.mrf.mxu0 }
0x19ee   :  { %v15222_v62 = vpop.f32.mrf.mxu0 }
0x19ef   :  { %v15139_v0 = vpop.f32.mrf.mxu1 }
0x19f0   :  { %v15140_v32 = vadd.f32 %v15139_v0, %v15047_v51 }
0x19f1   :  { %v15141_v1 = vpop.f32.mrf.mxu1  ;;  %v15382_v11 = vpop.f32.mrf.mxu0 }
0x19f2   :  { %v15142_v35 = vadd.f32 %v15141_v1, %v15049_v19  ;;  %v15221_v39 = vadd.f32 %v15220_v12, %v15140_v32  ;;  %v28606_v12 = vld [vmem:[#allocation78_spill] sm:$0xff] }
0x19f3   :  { %v15384_v27 = vpop.f32.mrf.mxu0 }
0x19f4   :  { %v15223_v22 = vadd.f32 %v15222_v62, %v15142_v35  ;;  %v28602_v62 = vld [vmem:[#allocation70_spill] sm:$0xff]  ;;  %v28615_v35 = vld [vmem:[#allocation77_spill] sm:$0xff] }
0x19f5   :  { %v15298_v23 = vpop.f32.mrf.mxu1 }
0x19f6   :  { %v15299_v49 = vadd.f32 %v15298_v23, %v15221_v39  ;;  %v28612_v39 = vld [vmem:[#allocation56_spill] sm:$0xff] }
0x19f7   :  { %v15300_v48 = vpop.f32.mrf.mxu1  ;;  %v15557_v34 = vpop.f32.mrf.mxu0  ;;  %v28616_v23 = vld [vmem:[#allocation80_spill] sm:$0xff] }
0x19f8   :  { %v15301_v16 = vadd.f32 %v15300_v48, %v15223_v22  ;;  %v15383_v1 = vadd.f32 %v15382_v11, %v15299_v49  ;;  %v28601_v22 = vmov 0.0   ;;  %v28604_v11 = vld [vmem:[#allocation74_spill] sm:$0xff]  ;;  %v28610_v49 = vld [vmem:[#allocation84_spill] sm:$0xff] }
0x19f9   :  { %v15559_v50 = vpop.f32.mrf.mxu0 }
0x19fb   :  { %v15458_v63 = vpop.f32.mrf.mxu1 }
0x19fd   :  { %v15460_v58 = vpop.f32.mrf.mxu1  ;;  %v15730_v25 = vpop.f32.mrf.mxu0 }
0x19ff   :  { %v15732_v57 = vpop.f32.mrf.mxu0 }
0x1a01   :  { %v15649_v30 = vpop.f32.mrf.mxu1 }
0x1a02   :  { %v15650_v13 = vadd.f32 %v15649_v30, %v15557_v34  ;;  %v15385_v34 = vadd.f32 %v15384_v27, %v15301_v16  ;;  %v28605_v16 = vld [vmem:[#allocation18_spill] sm:$0xff]  ;;  %v19173_v27 = vld [vmem:[%s28075_s2 + $0x6a8] sm:$0xff] }
0x1a03   :  { %v15651_v6 = vpop.f32.mrf.mxu1 }
0x1a04   :  { %v15731_v36 = vadd.f32 %v15730_v25, %v15650_v13  ;;  %v15652_v54 = vadd.f32 %v15651_v6, %v15559_v50  ;;  %v15892_v29 = vpop.f32.mrf.mxu0  ;;  %v15461_v48 = vadd.f32 %v15460_v58, %v15385_v34  ;;  %v19174_v13 = vld [vmem:[%s28075_s2 + $0x6b0] sm:$0xff]  ;;  %v27183_v34 = vand.u32 4294901760, %v19173_v27 }
0x1a05   :  { %v15808_v24 = vpop.f32.mrf.mxu1 }
0x1a06   :  { %v15733_v33 = vadd.f32 %v15732_v57, %v15652_v54  ;;  %v15809_v28 = vadd.f32 %v15808_v24, %v15731_v36  ;;  %v15894_v17 = vpop.f32.mrf.mxu0  ;;  %v27103_v54 = vadd.f32 %v15458_v63, %v15383_v1  ;;  %v28608_v24 = vld [vmem:[#allocation81_spill] sm:$0xff]  ;;  %v28617_v1 = vld [vmem:[#allocation83_spill] sm:$0xff] }
0x1a07   :  { %v15810_v47 = vpop.f32.mrf.mxu1  ;;  %v19175_v57 = vld [vmem:[%s28075_s2 + $0x6b8] sm:$0xff] }
0x1a08   :  { %v15893_v59 = vadd.f32 %v15892_v29, %v15809_v28  ;;  %v15811_v40 = vadd.f32 %v15810_v47, %v15733_v33  ;;  %v28607_v28 = vld [vmem:[#allocation52_spill] sm:$0xff]  ;;  %v28609_v33 = vld [vmem:[#allocation46_spill] sm:$0xff]  ;;  %v28614_v47 = vld [vmem:[#allocation73_spill] sm:$0xff]  ;;  %v27169_v63 = vand.u32 4294901760, %v19175_v57 }
0x1a09   :  { %v15968_v0 = vpop.f32.mrf.mxu1 }
0x1a0a   :  { %v15895_v51 = vadd.f32 %v15894_v17, %v15811_v40  ;;  %v15969_v19 = vadd.f32 %v15968_v0, %v15893_v59  ;;  %v28603_v40 = vld [vmem:[#allocation21_spill] sm:$0xff]  ;;  %v28611_v17 = vld [vmem:[#allocation59_spill] sm:$0xff]  ;;  %v28613_v59 = vld [vmem:[#allocation68_spill] sm:$0xff] }
0x1a0b   :  { %v15970_v32 = vpop.f32.mrf.mxu1  ;;  %v19172_v0 = vld [vmem:[%s28075_s2 + $0x6a0] sm:$0xff] }
0x1a0c   :  { %v16024_v30 = vsel %vm11666_vm11, %v15969_v19, 0  ;;  %v15971_v25 = vadd.f32 %v15970_v32, %v15895_v51  ;;  %17532 = vrot.lane.b32.xlu1 %v15969_v19, %s22363_s27  ;;  %v27176_v51 = vand.u32 4294901760, %v19174_v13  ;;  %v19171_v19 = vld [vmem:[%s28075_s2 + $0x698] sm:$0xff]  ;;  %v28618_v32 = vld [vmem:[#allocation87_spill] sm:$0xff] }
0x1a0d   :  { %v27101_v50 = vand.u32 4294901760, %v16024_v30 }
0x1a0e   :  { %17534 = vrot.lane.b32.xlu0 %v15971_v25, %s22363_s27  ;;  %v28619_v25 = vld [vmem:[#allocation90_spill] sm:$0xff] }
0x1a0f   :  { %v27106_v36 = vsub.f32 %v16024_v30, %v27101_v50  ;;  %16312 = vmatmul.mubr.f32.vlgmr.msra.gmra.mxu1 %v27101_v50  ;;  %v19170_v30 = vld [vmem:[%s28075_s2 + $0x690] sm:$0xff] }
0x1a10   :  { %16450 = vmatpush1.msra.mxu1 %v26698_v44  ;;  %18291 = vrot.lane.b32.xlu1 %v27103_v54, %s22363_s27 }
0x1a11   :  { %v16117_v6 = vand.u32 4294901760, %v27106_v36  ;;  %16452 = vmatprep.subr.mxu1 %v26706_v61  ;;  %16527 = vmatprep.mubr.f32.mxu1 %v28601_v22 }
0x1a12   :  { %16454 = vmatpush1.msra.mxu1 %v26715_v43  ;;  %18293 = vrot.lane.b32.xlu0 %v15461_v48, %s22363_s27  ;;  %v27190_v48 = vand.u32 4294901760, %v19172_v0 }
0x1a13   :  { %v16118_v29 = vsub.f32 %v27106_v36, %v16117_v6  ;;  %16456 = vmatprep.subr.mxu1 %v26727_v45 }
0x1a14   :  { %16458 = vmatpush1.msra.mxu1 %v26739_v3 }
0x1a15   :  { %v16119_v58 = vand.u32 4294901760, %v16118_v29  ;;  %16460 = vmatprep.subr.mxu1 %v26753_v8  ;;  %v27198_v29 = vsub.f32 %v19175_v57, %v27169_v63  ;;  %v27215_v57 = vsub.f32 %v19173_v27, %v27183_v34 }
0x1a16   :  { %16462 = vmatpush1.msra.mxu1 %v26767_v26 }
0x1a17   :  { %16464 = vmatprep.subr.mxu1 %v26809_v46  ;;  %16120 = vmatmul.mubr.f32.vlgmr.msra.gmra.mxu0 %v16119_v58  ;;  %28620 = vst [vmem:[#allocation99_spill] sm:$0xff] %v27198_v29  ;;  %v27200_v58 = vand.u32 4294901760, %v19171_v19  ;;  %28624 = vst [vmem:[#allocation101_spill] sm:$0xff] %v27215_v57 }
0x1a18   :  { %16331 = vmatpush1.msra.mxu0 %v26713_v52  ;;  %16466 = vmatpush1.msra.mxu1 %v26822_v14  ;;  %v28645_v52 = vld [vmem:[#allocation48_spill] sm:$0xff] }
0x1a19   :  { %16334 = vmatprep.subr.mxu0 %v26725_v31  ;;  %16468 = vmatprep.subr.mxu1 %v26835_v53  ;;  %v19162_v31 = vld [vmem:[%s28075_s2 + $0x650] sm:$0xff] }
0x1a1a   :  { %16337 = vmatpush1.msra.mxu0 %v26737_v60  ;;  %16470 = vmatpush1.msra.mxu1 %v26849_v9 }
0x1a1b   :  { %16340 = vmatprep.subr.mxu0 %v26751_v38  ;;  %16472 = vmatprep.subr.mxu1 %v26864_v5 }
0x1a1c   :  { %16343 = vmatpush1.msra.mxu0 %v26765_v37  ;;  %16474 = vmatpush1.msra.mxu1 %v26879_v18  ;;  %v28643_v37 = vld [vmem:[#allocation54_spill] sm:$0xff] }
0x1a1d   :  { %16346 = vmatprep.subr.mxu0 %v26781_v20  ;;  %16476 = vmatprep.subr.mxu1 %v26891_v10 }
0x1a1e   :  { %16349 = vmatpush1.msra.mxu0 %v26795_v15  ;;  %16478 = vmatpush1.msra.mxu1 %v26903_v55 }
0x1a1f   :  { %16352 = vmatprep.subr.mxu0 %v26833_v21  ;;  %16480 = vmatprep.subr.mxu1 %v26945_v56  ;;  %v28641_v21 = vld [vmem:[#allocation49_spill] sm:$0xff] }
0x1a20   :  { %16355 = vmatpush1.msra.mxu0 %v26847_v41  ;;  %16482 = vmatpush1.msra.mxu1 %v26958_v42  ;;  %v19164_v41 = vld [vmem:[%s28075_s2 + $0x660] sm:$0xff] }
0x1a21   :  { %16358 = vmatprep.subr.mxu0 %v26862_v7  ;;  %16484 = vmatprep.subr.mxu1 %v26971_v2 }
0x1a22   :  { %16361 = vmatpush1.msra.mxu0 %v26877_v4  ;;  %16486 = vmatpush1.msra.mxu1 %v28602_v62 }
0x1a23   :  { %16364 = vmatprep.subr.mxu0 %v28603_v40  ;;  %16488 = vmatprep.subr.mxu1 %v28604_v11 }
0x1a24   :  { %16367 = vmatpush1.msra.mxu0 %v28605_v16  ;;  %16490 = vmatpush1.msra.mxu1 %v28606_v12  ;;  %v28636_v16 = vld [vmem:[#allocation35_spill] sm:$0xff] }
0x1a25   :  { %16370 = vmatprep.subr.mxu0 %v28607_v28  ;;  %16492 = vmatprep.subr.mxu1 %v28608_v24 }
0x1a26   :  { %16373 = vmatpush1.msra.mxu0 %v28609_v33  ;;  %16494 = vmatpush1.msra.mxu1 %v28610_v49  ;;  %v27248_v33 = vand.u32 4294901760, %v27215_v57 }
0x1a27   :  { %16376 = vmatprep.subr.mxu0 %v28611_v17  ;;  %16531 = vmatmul.mubr.f32.vlgmr.msra.gmra.mxu1 %v16117_v6  ;;  %v19169_v6 = vld [vmem:[%s28075_s2 + $0x688] sm:$0xff]  ;;  %v19167_v17 = vld [vmem:[%s28075_s2 + $0x678] sm:$0xff] }
0x1a28   :  { %16690 = vmatprep.subr.mxu1 %v28612_v39  ;;  %16379 = vmatpush1.msra.mxu0 %v28613_v59  ;;  %v27227_v59 = vand.u32 4294901760, %v27198_v29  ;;  %28634 = vst [vmem:[#allocation107_spill] sm:$0xff] %v27248_v33  ;;  %v27261_v40 = vand.u32 4294901760, %v19167_v17  ;;  %v16903_v38 = vsub.f32 %v27215_v57, %v27248_v33  ;;  %v28666_v39 = vld [vmem:[#allocation72_spill] sm:$0xff] }
0x1a29   :  { %16692 = vmatpush1.msra.mxu1 %v26698_v44  ;;  %16382 = vmatprep.subr.mxu0 %v28614_v47  ;;  %v27217_v47 = vand.u32 4294901760, %v19169_v6  ;;  %v19155_v44 = vld [vmem:[%s28075_s2 + $0x618] sm:$0xff] }
0x1a2a   :  { %16694 = vmatprep.subr.mxu1 %v26706_v61  ;;  %16385 = vmatpush1.msra.mxu0 %v28615_v35  ;;  %v28623_v35 = vld [vmem:[#allocation17_spill] sm:$0xff]  ;;  %28628 = vst [vmem:[#allocation103_spill] sm:$0xff] %v27227_v59  ;;  %v16891_v4 = vsub.f32 %v27198_v29, %v27227_v59  ;;  %v19156_v61 = vld [vmem:[%s28075_s2 + $0x620] sm:$0xff] }
0x1a2b   :  { %16696 = vmatpush1.msra.mxu1 %v26715_v43  ;;  %16388 = vmatprep.subr.mxu0 %v28616_v23  ;;  %v19168_v23 = vld [vmem:[%s28075_s2 + $0x680] sm:$0xff]  ;;  %v27251_v28 = vsub.f32 %v19169_v6, %v27217_v47  ;;  %v28638_v6 = vld [vmem:[#allocation32_spill] sm:$0xff]  ;;  %v28660_v43 = vld [vmem:[#allocation67_spill] sm:$0xff] }
0x1a2c   :  { %16698 = vmatprep.subr.mxu1 %v26727_v45  ;;  %16391 = vmatpush1.msra.mxu0 %v28617_v1  ;;  %v27207_v1 = vand.u32 4294901760, %v19170_v30  ;;  %v27232_v27 = vand.u32 4294901760, %v19168_v23  ;;  %v19157_v45 = vld [vmem:[%s28075_s2 + $0x628] sm:$0xff]  ;;  %v28677_v59 = vld [vmem:[#allocation82_spill] sm:$0xff] }
0x1a2d   :  { %16700 = vmatpush1.msra.mxu1 %v26739_v3  ;;  %16394 = vmatprep.subr.mxu0 %v28618_v32  ;;  %v28621_v32 = vld [vmem:[#allocation61_spill] sm:$0xff]  ;;  %28635 = vst [vmem:[#allocation108_spill] sm:$0xff] %v27251_v28 }
0x1a2e   :  { %16702 = vmatprep.subr.mxu1 %v26753_v8  ;;  %16397 = vmatpush1.msra.mxu0 %v28619_v25  ;;  %v27205_v25 = vsub.f32 %v19174_v13, %v27176_v51  ;;  %v27222_v13 = vsub.f32 %v19172_v0, %v27190_v48  ;;  %v28630_v0 = vld [vmem:[#allocation27_spill] sm:$0xff]  ;;  %v19158_v8 = vld [vmem:[%s28075_s2 + $0x630] sm:$0xff]  ;;  %v28656_v3 = vld [vmem:[#allocation45_spill] sm:$0xff] }
0x1a2f   :  { %16430 = vmatprep.mubr.f32.mxu0 %v28601_v22  ;;  %16704 = vmatpush1.msra.mxu1 %v26767_v26  ;;  %v28653_v26 = vld [vmem:[#allocation37_spill] sm:$0xff] }
0x1a30   :  { %16433 = vmatmul.mubr.f32.vlgmr.msra.gmra.mxu0 %v27106_v36  ;;  %16548 = vmatprep.subr.mxu0 %v28621_v32  ;;  %28622 = vst [vmem:[#allocation100_spill] sm:$0xff] %v27205_v25  ;;  %v28625_v36 = vld [vmem:[#allocation14_spill] sm:$0xff]  ;;  %28626 = vst [vmem:[#allocation102_spill] sm:$0xff] %v27222_v13  ;;  %v28627_v32 = vld [vmem:[#allocation16_spill] sm:$0xff] }
0x1a31   :  { %16706 = vmatprep.subr.mxu1 %v26809_v46  ;;  %16552 = vmatpush1.msra.mxu0 %v28623_v35  ;;  %v27230_v35 = vsub.f32 %v19171_v19, %v27200_v58  ;;  %v28633_v19 = vld [vmem:[#allocation24_spill] sm:$0xff]  ;;  %v19159_v46 = vld [vmem:[%s28075_s2 + $0x638] sm:$0xff] }
0x1a32   :  { %16708 = vmatpush1.msra.mxu1 %v26822_v14  ;;  %16556 = vmatprep.subr.mxu0 %v28625_v36  ;;  %v27240_v36 = vand.u32 4294901760, %v27205_v25  ;;  %v27338_v14 = vand.u32 4294901760, %v19162_v31 }
0x1a33   :  { %16710 = vmatprep.subr.mxu1 %v26835_v53  ;;  %16560 = vmatpush1.msra.mxu0 %v28627_v32  ;;  %28629 = vst [vmem:[#allocation104_spill] sm:$0xff] %v27230_v35  ;;  %v27243_v32 = vsub.f32 %v19170_v30, %v27207_v1  ;;  %v27259_v30 = vand.u32 4294901760, %v27222_v13  ;;  %v27271_v7 = vand.u32 4294901760, %v27230_v35  ;;  %v28650_v53 = vld [vmem:[#allocation44_spill] sm:$0xff] }
0x1a34   :  { %16712 = vmatpush1.msra.mxu1 %v26849_v9  ;;  %16564 = vmatprep.subr.mxu0 %v28630_v0  ;;  %28631 = vst [vmem:[#allocation105_spill] sm:$0xff] %v27240_v36  ;;  %v19166_v0 = vld [vmem:[%s28075_s2 + $0x670] sm:$0xff]  ;;  %v19160_v9 = vld [vmem:[%s28075_s2 + $0x640] sm:$0xff] }
0x1a35   :  { %28632 = vst [vmem:[#allocation106_spill] sm:$0xff] %v27243_v32  ;;  %16714 = vmatprep.subr.mxu1 %v26864_v5  ;;  %16568 = vmatpush1.msra.mxu0 %v28633_v19  ;;  %28637 = vst [vmem:[#allocation109_spill] sm:$0xff] %v27259_v30  ;;  %v19165_v19 = vld [vmem:[%s28075_s2 + $0x668] sm:$0xff]  ;;  %v27284_v15 = vand.u32 4294901760, %v27243_v32  ;;  %v27286_v20 = vand.u32 4294901760, %v19166_v0  ;;  %v27317_v5 = vand.u32 4294901760, %v16891_v4 }
0x1a36   :  { %16716 = vmatpush1.msra.mxu1 %v26879_v18  ;;  %16572 = vmatprep.subr.mxu0 %v28636_v16  ;;  %28639 = vst [vmem:[#allocation110_spill] sm:$0xff] %v27271_v7  ;;  %v27274_v16 = vsub.f32 %v19168_v23, %v27232_v27  ;;  %v19163_v23 = vld [vmem:[%s28075_s2 + $0x658] sm:$0xff]  ;;  %v27298_v60 = vand.u32 4294901760, %v19165_v19  ;;  %v28647_v18 = vld [vmem:[#allocation36_spill] sm:$0xff] }
0x1a37   :  { %16718 = vmatprep.subr.mxu1 %v26891_v10  ;;  %16576 = vmatpush1.msra.mxu0 %v28638_v6  ;;  %v16897_v6 = vsub.f32 %v27205_v25, %v27240_v36  ;;  %28642 = vst [vmem:[#allocation112_spill] sm:$0xff] %v27284_v15  ;;  %v19161_v10 = vld [vmem:[%s28075_s2 + $0x648] sm:$0xff]  ;;  %28648 = vst [vmem:[#allocation115_spill] sm:$0xff] %v27317_v5  ;;  %v16921_v4 = vsub.f32 %v27243_v32, %v27284_v15  ;;  %v28670_v15 = vld [vmem:[#allocation76_spill] sm:$0xff] }
0x1a38   :  { %28640 = vst [vmem:[#allocation111_spill] sm:$0xff] %v27274_v16  ;;  %16720 = vmatpush1.msra.mxu1 %v26903_v55  ;;  %16580 = vmatprep.subr.mxu0 %v28641_v21  ;;  %v27296_v21 = vand.u32 4294901760, %v27251_v28  ;;  %v27310_v55 = vand.u32 4294901760, %v19164_v41  ;;  %v19152_v36 = vld [vmem:[%s28075_s2 + $0x600] sm:$0xff] }
0x1a39   :  { %16722 = vmatprep.subr.mxu1 %v26945_v56  ;;  %16584 = vmatpush1.msra.mxu0 %v28643_v37  ;;  %v16909_v56 = vsub.f32 %v27222_v13, %v27259_v30  ;;  %v27308_v37 = vsub.f32 %v19167_v17, %v27261_v40  ;;  %v27324_v17 = vand.u32 4294901760, %v19163_v23  ;;  %v19153_v30 = vld [vmem:[%s28075_s2 + $0x608] sm:$0xff] }
0x1a3a   :  { %28644 = vst [vmem:[#allocation113_spill] sm:$0xff] %v27296_v21  ;;  %16724 = vmatpush1.msra.mxu1 %v26958_v42  ;;  %16588 = vmatprep.subr.mxu0 %v28645_v52  ;;  %v16915_v52 = vsub.f32 %v27230_v35, %v27271_v7  ;;  %v27322_v42 = vand.u32 4294901760, %v27274_v16 }
0x1a3b   :  { %28646 = vst [vmem:[#allocation114_spill] sm:$0xff] %v27308_v37  ;;  %16726 = vmatprep.subr.mxu1 %v26971_v2  ;;  %16592 = vmatpush1.msra.mxu0 %v28647_v18  ;;  %v27331_v2 = vand.u32 4294901760, %v16897_v6  ;;  %v27336_v18 = vsub.f32 %v19166_v0, %v27286_v20  ;;  %v16927_v6 = vsub.f32 %v27251_v28, %v27296_v21  ;;  %v27352_v0 = vand.u32 4294901760, %v19161_v10  ;;  %v19154_v21 = vld [vmem:[%s28075_s2 + $0x610] sm:$0xff]  ;;  %s22364_s2 = smov 64  }
0x1a3c   :  { %28649 = vst [vmem:[#allocation116_spill] sm:$0xff] %v27322_v42  ;;  %16728 = vmatpush1.msra.mxu1 %v28602_v62  ;;  %16596 = vmatprep.subr.mxu0 %v28650_v53  ;;  %v27345_v62 = vand.u32 4294901760, %v16903_v38  ;;  %v27350_v53 = vsub.f32 %v19165_v19, %v27298_v60  ;;  %v27362_v38 = vand.u32 4294901760, %v27308_v37  ;;  %v27367_v19 = vand.u32 4294901760, %v19160_v9 }
0x1a3d   :  { %28651 = vst [vmem:[#allocation117_spill] sm:$0xff] %v27331_v2  ;;  %28652 = vst [vmem:[#allocation118_spill] sm:$0xff] %v27336_v18  ;;  %16730 = vmatprep.subr.mxu1 %v28604_v11  ;;  %16600 = vmatpush1.msra.mxu0 %v28653_v26  ;;  %v27359_v11 = vand.u32 4294901760, %v16909_v56  ;;  %v27365_v26 = vsub.f32 %v19164_v41, %v27310_v55  ;;  %v16933_v56 = vsub.f32 %v27274_v16, %v27322_v42 }
0x1a3e   :  { %28654 = vst [vmem:[#allocation119_spill] sm:$0xff] %v27345_v62  ;;  %28655 = vst [vmem:[#allocation120_spill] sm:$0xff] %v27350_v53  ;;  %16732 = vmatpush1.msra.mxu1 %v28606_v12  ;;  %16604 = vmatprep.subr.mxu0 %v28656_v3  ;;  %v27374_v12 = vand.u32 4294901760, %v16915_v52  ;;  %v27379_v3 = vsub.f32 %v19163_v23, %v27324_v17  ;;  %v27381_v41 = vand.u32 4294901760, %v19159_v46  ;;  %v27391_v52 = vand.u32 4294901760, %v27336_v18 }
0x1a3f   :  { %28657 = vst [vmem:[#allocation121_spill] sm:$0xff] %v27359_v11  ;;  %28658 = vst [vmem:[#allocation122_spill] sm:$0xff] %v27362_v38  ;;  %16734 = vmatprep.subr.mxu1 %v28608_v24  ;;  %16608 = vmatpush1.msra.mxu0 %v28660_v43  ;;  %v27388_v24 = vand.u32 4294901760, %v16921_v4  ;;  %v27394_v43 = vsub.f32 %v19162_v31, %v27338_v14  ;;  %v27396_v23 = vand.u32 4294901760, %v19158_v8  ;;  %v27406_v4 = vand.u32 4294901760, %v27350_v53 }
0x1a40   :  { %28659 = vst [vmem:[#allocation123_spill] sm:$0xff] %v27365_v26  ;;  %28661 = vst [vmem:[#allocation124_spill] sm:$0xff] %v27374_v12  ;;  %16736 = vmatpush1.msra.mxu1 %v28610_v49  ;;  %16769 = vmatprep.mubr.f32.mxu1 %v28601_v22  ;;  %v27403_v49 = vand.u32 4294901760, %v16927_v6  ;;  %v27409_v42 = vsub.f32 %v19161_v10, %v27352_v0  ;;  %v27411_v31 = vand.u32 4294901760, %v19157_v45  ;;  %v27426_v10 = vand.u32 4294901760, %v19156_v61 }
0x1a41   :  { %28662 = vst [vmem:[#allocation125_spill] sm:$0xff] %v27379_v3  ;;  %28663 = vst [vmem:[#allocation126_spill] sm:$0xff] %v27388_v24  ;;  %16612 = vmatprep.subr.mxu0 %v28666_v39  ;;  %16771 = vmatmul.mubr.f32.vlgmr.msra.gmra.mxu1 %v27101_v50  ;;  %v16939_v6 = vsub.f32 %v27308_v37, %v27362_v38  ;;  %v27421_v39 = vand.u32 4294901760, %v27365_v26  ;;  %v27424_v7 = vsub.f32 %v19160_v9, %v27367_v19  ;;  %v28680_v37 = vld [vmem:[#allocation86_spill] sm:$0xff] }
0x1a42   :  { %28664 = vst [vmem:[#allocation127_spill] sm:$0xff] %v27391_v52  ;;  %28665 = vst [vmem:[#allocation128_spill] sm:$0xff] %v27394_v43  ;;  %16893 = vmatprep.subr.mxu1 %v27317_v5  ;;  %16616 = vmatpush1.msra.mxu0 %v28670_v15  ;;  %v28673_v5 = vld [vmem:[#allocation79_spill] sm:$0xff]  ;;  %v27433_v15 = vand.u32 4294901760, %v16933_v56  ;;  %v27436_v38 = vand.u32 4294901760, %v27379_v3  ;;  %v27439_v33 = vsub.f32 %v19159_v46, %v27381_v41  ;;  %v27441_v9 = vand.u32 4294901760, %v19155_v44 }
0x1a43   :  { %28667 = vst [vmem:[#allocation129_spill] sm:$0xff] %v27403_v49  ;;  %28668 = vst [vmem:[#allocation130_spill] sm:$0xff] %v27406_v4  ;;  %16899 = vmatpush1.msra.mxu1 %v27331_v2  ;;  %16620 = vmatprep.subr.mxu0 %v28673_v5  ;;  %v16945_v56 = vsub.f32 %v27336_v18, %v27391_v52  ;;  %v27451_v5 = vand.u32 4294901760, %v27394_v43  ;;  %v27454_v2 = vsub.f32 %v19158_v8, %v27396_v23  ;;  %v28684_v8 = vld [vmem:[#allocation89_spill] sm:$0xff] }
0x1a44   :  { %28669 = vst [vmem:[#allocation131_spill] sm:$0xff] %v27409_v42  ;;  %28671 = vst [vmem:[#allocation132_spill] sm:$0xff] %v27421_v39  ;;  %16905 = vmatprep.subr.mxu1 %v27345_v62  ;;  %16624 = vmatpush1.msra.mxu0 %v28677_v59  ;;  %v27456_v46 = vand.u32 4294901760, %v19154_v21  ;;  %v16951_v62 = vsub.f32 %v27350_v53, %v27406_v4  ;;  %v27463_v59 = vand.u32 4294901760, %v27409_v42  ;;  %v27468_v18 = vand.u32 4294901760, %v19153_v30 }
0x1a45   :  { %28672 = vst [vmem:[#allocation133_spill] sm:$0xff] %v27424_v7  ;;  %28674 = vst [vmem:[#allocation134_spill] sm:$0xff] %v27433_v15  ;;  %16911 = vmatpush1.msra.mxu1 %v27359_v11  ;;  %16628 = vmatprep.subr.mxu0 %v28680_v37  ;;  %v27466_v52 = vsub.f32 %v19157_v45, %v27411_v31  ;;  %v16957_v11 = vsub.f32 %v27365_v26, %v27421_v39  ;;  %v27475_v37 = vand.u32 4294901760, %v27424_v7  ;;  %v28688_v45 = vld [vmem:[#allocation92_spill] sm:$0xff] }
0x1a46   :  { %28675 = vst [vmem:[#allocation135_spill] sm:$0xff] %v27436_v38  ;;  %28676 = vst [vmem:[#allocation136_spill] sm:$0xff] %v27439_v33  ;;  %16917 = vmatprep.subr.mxu1 %v27374_v12  ;;  %16632 = vmatpush1.msra.mxu0 %v28684_v8  ;;  %v27478_v4 = vsub.f32 %v19156_v61, %v27426_v10  ;;  %v27480_v53 = vand.u32 4294901760, %v19152_v36  ;;  %v27484_v16 = vand.u32 4294901760, %v16939_v6  ;;  %v27489_v12 = vand.u32 4294901760, %v27439_v33  ;;  %v28692_v61 = vld [vmem:[#allocation94_spill] sm:$0xff] }
0x1a47   :  { %28678 = vst [vmem:[#allocation137_spill] sm:$0xff] %v27451_v5  ;;  %28679 = vst [vmem:[#allocation138_spill] sm:$0xff] %v27454_v2  ;;  %16923 = vmatpush1.msra.mxu1 %v27388_v24  ;;  %16636 = vmatprep.subr.mxu0 %v28688_v45  ;;  %v16963_v8 = vsub.f32 %v27379_v3, %v27436_v38  ;;  %v27492_v39 = vsub.f32 %v19155_v44, %v27441_v9  ;;  %v27496_v26 = vand.u32 4294901760, %v16945_v56 }
0x1a48   :  { %28681 = vst [vmem:[#allocation139_spill] sm:$0xff] %v27463_v59  ;;  %28682 = vst [vmem:[#allocation140_spill] sm:$0xff] %v27466_v52  ;;  %16929 = vmatprep.subr.mxu1 %v27403_v49  ;;  %16640 = vmatpush1.msra.mxu0 %v28692_v61  ;;  %v16969_v45 = vsub.f32 %v27394_v43, %v27451_v5  ;;  %v27501_v6 = vand.u32 4294901760, %v27454_v2  ;;  %v27504_v24 = vsub.f32 %v19154_v21, %v27456_v46 }
0x1a49   :  { %28683 = vst [vmem:[#allocation141_spill] sm:$0xff] %v27468_v18  ;;  %28685 = vst [vmem:[#allocation142_spill] sm:$0xff] %v27475_v37  ;;  %16673 = vmatprep.mubr.f32.mxu0 %v28601_v22  ;;  %16935 = vmatpush1.msra.mxu1 %v27433_v15  ;;  %v27508_v44 = vand.u32 4294901760, %v16951_v62  ;;  %v16975_v61 = vsub.f32 %v27409_v42, %v27463_v59  ;;  %v27513_v56 = vand.u32 4294901760, %v27466_v52  ;;  %v27520_v21 = vand.u32 4294901760, %v16957_v11 }
0x1a4a   :  { %28686 = vst [vmem:[#allocation143_spill] sm:$0xff] %v27478_v4  ;;  %28687 = vst [vmem:[#allocation144_spill] sm:$0xff] %v27480_v53  ;;  %v27516_v49 = vsub.f32 %v19153_v30, %v27468_v18  ;;  %16675 = vmatmul.mubr.f32.vlgmr.msra.gmra.mxu0 %v27101_v50  ;;  %16789 = vmatprep.subr.mxu0 %v27169_v63  ;;  %v16981_v15 = vsub.f32 %v27424_v7, %v27475_v37  ;;  %v27525_v62 = vand.u32 4294901760, %v27478_v4 }
0x1a4b   :  { %28689 = vst [vmem:[#allocation145_spill] sm:$0xff] %v27484_v16  ;;  %28690 = vst [vmem:[#allocation146_spill] sm:$0xff] %v27489_v12  ;;  %v27528_v59 = vsub.f32 %v19152_v36, %v27480_v53  ;;  %16941 = vmatprep.subr.mxu1 %v27484_v16  ;;  %16791 = vmatpush1.msra.mxu0 %v27176_v51  ;;  %v27532_v30 = vand.u32 4294901760, %v16963_v8  ;;  %v16987_v50 = vsub.f32 %v27439_v33, %v27489_v12 }
0x1a4c   :  { %28691 = vst [vmem:[#allocation147_spill] sm:$0xff] %v27492_v39  ;;  %28693 = vst [vmem:[#allocation148_spill] sm:$0xff] %v27496_v26  ;;  %v27537_v11 = vand.u32 4294901760, %v27492_v39  ;;  %16947 = vmatpush1.msra.mxu1 %v27496_v26  ;;  %16793 = vmatprep.subr.mxu0 %v27183_v34  ;;  %v27541_v37 = vand.u32 4294901760, %v16969_v45  ;;  %v16993_v36 = vsub.f32 %v27454_v2, %v27501_v6  ;;  %v27546_v16 = vand.u32 4294901760, %v27504_v24 }
0x1a4d   :  { %28694 = vst [vmem:[#allocation149_spill] sm:$0xff] %v27501_v6  ;;  %28695 = vst [vmem:[#allocation150_spill] sm:$0xff] %v27504_v24  ;;  %16953 = vmatprep.subr.mxu1 %v27508_v44  ;;  %16795 = vmatpush1.msra.mxu0 %v27190_v48  ;;  %v27550_v8 = vand.u32 4294901760, %v16975_v61  ;;  %v16999_v12 = vsub.f32 %v27466_v52, %v27513_v56  ;;  %v27555_v26 = vand.u32 4294901760, %v27516_v49  ;;  %v27559_v45 = vand.u32 4294901760, %v16981_v15 }
0x1a4e   :  { %28696 = vst [vmem:[#allocation151_spill] sm:$0xff] %v27508_v44  ;;  %28697 = vst [vmem:[#allocation152_spill] sm:$0xff] %v27513_v56  ;;  %16959 = vmatpush1.msra.mxu1 %v27520_v21  ;;  %16797 = vmatprep.subr.mxu0 %v27200_v58  ;;  %v17005_v6 = vsub.f32 %v27478_v4, %v27525_v62  ;;  %v27564_v44 = vand.u32 4294901760, %v27528_v59  ;;  %v16778_v61 = vsel %vm11666_vm11, %v27103_v54, 0  ;;  %v27570_v56 = vand.u32 4294901760, %v16987_v50 }
0x1a4f   :  { %28698 = vst [vmem:[#allocation153_spill] sm:$0xff] %v27516_v49  ;;  %28699 = vst [vmem:[#allocation154_spill] sm:$0xff] %v27520_v21  ;;  %16965 = vmatprep.subr.mxu1 %v27532_v30  ;;  %16799 = vmatpush1.msra.mxu0 %v27207_v1  ;;  %v17011_v21 = vsub.f32 %v27492_v39, %v27537_v11  ;;  %v27576_v15 = vand.u32 4294901760, %v16993_v36  ;;  %v27582_v54 = vand.u32 4294901760, %v16999_v12 }
0x1a50   :  { %28700 = vst [vmem:[#allocation155_spill] sm:$0xff] %v27525_v62  ;;  %28701 = vst [vmem:[#allocation156_spill] sm:$0xff] %v27528_v59  ;;  %16971 = vmatpush1.msra.mxu1 %v27541_v37  ;;  %16801 = vmatprep.subr.mxu0 %v27217_v47  ;;  %v17017_v62 = vsub.f32 %v27504_v24, %v27546_v16  ;;  %v17023_v50 = vsub.f32 %v27516_v49, %v27555_v26  ;;  %v27590_v36 = vand.u32 4294901760, %v17005_v6 }
0x1a51   :  { %28702 = vst [vmem:[#allocation157_spill] sm:$0xff] %v27532_v30  ;;  %28703 = vst [vmem:[#allocation158_spill] sm:$0xff] %v27537_v11  ;;  %16977 = vmatprep.subr.mxu1 %v27550_v8  ;;  %16803 = vmatpush1.msra.mxu0 %v27232_v27  ;;  %v27586_v30 = vand.u32 4294901760, %v16778_v61  ;;  %v27596_v12 = vand.u32 4294901760, %v17011_v21 }
0x1a52   :  { %28704 = vst [vmem:[#allocation159_spill] sm:$0xff] %v27541_v37  ;;  %28705 = vst [vmem:[#allocation160_spill] sm:$0xff] %v27546_v16  ;;  %16983 = vmatpush1.msra.mxu1 %v27559_v45  ;;  %16805 = vmatprep.subr.mxu0 %v27261_v40  ;;  %v17029_v37 = vsub.f32 %v27528_v59, %v27564_v44  ;;  %v27604_v6 = vand.u32 4294901760, %v17023_v50  ;;  %v28710_v50 = vld [vmem:[#allocation111_spill] sm:$0xff] }
0x1a53   :  { %28706 = vst [vmem:[#allocation161_spill] sm:$0xff] %v27550_v8  ;;  %28707 = vst [vmem:[#allocation162_spill] sm:$0xff] %v27555_v26  ;;  %16989 = vmatprep.subr.mxu1 %v27570_v56  ;;  %16807 = vmatpush1.msra.mxu0 %v27286_v20  ;;  %v27600_v8 = vand.u32 4294901760, %v17017_v62 }
0x1a54   :  { %28708 = vst [vmem:[#allocation163_spill] sm:$0xff] %v27559_v45  ;;  %28709 = vst [vmem:[#allocation164_spill] sm:$0xff] %v27564_v44  ;;  %16995 = vmatpush1.msra.mxu1 %v27576_v15  ;;  %16809 = vmatprep.subr.mxu0 %v27298_v60  ;;  %v27607_v45 = vsub.f32 %v16778_v61, %v27586_v30  ;;  %v27611_v21 = vand.u32 4294901760, %v17029_v37 }
0x1a55   :  { %17001 = vmatprep.subr.mxu1 %v27582_v54  ;;  %16811 = vmatpush1.msra.mxu0 %v27310_v55 }
0x1a56   :  { %17007 = vmatpush1.msra.mxu1 %v27590_v36  ;;  %16813 = vmatprep.subr.mxu0 %v27324_v17  ;;  %v16871_v62 = vand.u32 4294901760, %v27607_v45 }
0x1a57   :  { %17013 = vmatprep.subr.mxu1 %v27596_v12  ;;  %16815 = vmatpush1.msra.mxu0 %v27338_v14 }
0x1a58   :  { %17019 = vmatpush1.msra.mxu1 %v27600_v8  ;;  %16817 = vmatprep.subr.mxu0 %v27352_v0  ;;  %v16872_v37 = vsub.f32 %v27607_v45, %v16871_v62 }
0x1a59   :  { %17025 = vmatprep.subr.mxu1 %v27604_v6  ;;  %16819 = vmatpush1.msra.mxu0 %v27367_v19 }
0x1a5a   :  { %17031 = vmatpush1.msra.mxu1 %v27611_v21  ;;  %17064 = vmatprep.mubr.f32.mxu1 %v28601_v22  ;;  %v16873_v61 = vand.u32 4294901760, %v16872_v37  ;;  %v28711_v37 = vld [vmem:[#allocation114_spill] sm:$0xff] }
0x1a5b   :  { %16821 = vmatprep.subr.mxu0 %v27381_v41  ;;  %17066 = vmatmul.mubr.f32.vlgmr.msra.gmra.mxu1 %v27586_v30 }
0x1a5c   :  { %17202 = vmatprep.subr.mxu1 %v27169_v63  ;;  %16823 = vmatpush1.msra.mxu0 %v27396_v23 }
0x1a5d   :  { %17204 = vmatpush1.msra.mxu1 %v27176_v51  ;;  %16825 = vmatprep.subr.mxu0 %v27411_v31 }
0x1a5e   :  { %17206 = vmatprep.subr.mxu1 %v27183_v34  ;;  %16827 = vmatpush1.msra.mxu0 %v27426_v10 }
0x1a5f   :  { %17208 = vmatpush1.msra.mxu1 %v27190_v48  ;;  %16829 = vmatprep.subr.mxu0 %v27441_v9 }
0x1a60   :  { %17210 = vmatprep.subr.mxu1 %v27200_v58  ;;  %16831 = vmatpush1.msra.mxu0 %v27456_v46 }
0x1a61   :  { %17212 = vmatpush1.msra.mxu1 %v27207_v1  ;;  %16833 = vmatprep.subr.mxu0 %v27468_v18 }
0x1a62   :  { %17214 = vmatprep.subr.mxu1 %v27217_v47  ;;  %16835 = vmatpush1.msra.mxu0 %v27480_v53 }
0x1a63   :  { %16868 = vmatprep.mubr.f32.mxu0 %v28601_v22  ;;  %17216 = vmatpush1.msra.mxu1 %v27232_v27 }
0x1a64   :  { %16874 = vmatmul.mubr.f32.vlgmr.msra.gmra.mxu0 %v16873_v61  ;;  %17082 = vmatprep.subr.mxu0 %v27198_v29  ;;  %v28712_v61 = vld [vmem:[#allocation118_spill] sm:$0xff]  ;;  %v28782_v29 = vld [vmem:[#allocation63_spill] sm:$0xff] }
0x1a65   :  { %17218 = vmatprep.subr.mxu1 %v27261_v40  ;;  %17085 = vmatpush1.msra.mxu0 %v27205_v25  ;;  %v28781_v25 = vld [vmem:[#allocation62_spill] sm:$0xff] }
0x1a66   :  { %17220 = vmatpush1.msra.mxu1 %v27286_v20  ;;  %17088 = vmatprep.subr.mxu0 %v27215_v57  ;;  %v28780_v57 = vld [vmem:[#allocation84_spill] sm:$0xff] }
0x1a67   :  { %17222 = vmatprep.subr.mxu1 %v27298_v60  ;;  %17091 = vmatpush1.msra.mxu0 %v27222_v13 }
0x1a68   :  { %17224 = vmatpush1.msra.mxu1 %v27310_v55  ;;  %17094 = vmatprep.subr.mxu0 %v27230_v35  ;;  %v28713_v35 = vld [vmem:[#allocation120_spill] sm:$0xff] }
0x1a69   :  { %17226 = vmatprep.subr.mxu1 %v27324_v17  ;;  %17097 = vmatpush1.msra.mxu0 %v27243_v32  ;;  %v28714_v32 = vld [vmem:[#allocation123_spill] sm:$0xff] }
0x1a6a   :  { %17228 = vmatpush1.msra.mxu1 %v27338_v14  ;;  %17100 = vmatprep.subr.mxu0 %v27251_v28  ;;  %v28779_v28 = vld [vmem:[#allocation81_spill] sm:$0xff] }
0x1a6b   :  { %17230 = vmatprep.subr.mxu1 %v27352_v0  ;;  %17103 = vmatpush1.msra.mxu0 %v28710_v50  ;;  %v28778_v50 = vld [vmem:[#allocation78_spill] sm:$0xff] }
0x1a6c   :  { %17232 = vmatpush1.msra.mxu1 %v27367_v19  ;;  %17106 = vmatprep.subr.mxu0 %v28711_v37  ;;  %v28776_v37 = vld [vmem:[#allocation70_spill] sm:$0xff] }
0x1a6d   :  { %17234 = vmatprep.subr.mxu1 %v27381_v41  ;;  %17109 = vmatpush1.msra.mxu0 %v28712_v61 }
0x1a6e   :  { %17236 = vmatpush1.msra.mxu1 %v27396_v23  ;;  %17112 = vmatprep.subr.mxu0 %v28713_v35  ;;  %v28770_v35 = vld [vmem:[#allocation97_spill] sm:$0xff] }
0x1a6f   :  { %17238 = vmatprep.subr.mxu1 %v27411_v31  ;;  %17115 = vmatpush1.msra.mxu0 %v28714_v32  ;;  %v28768_v32 = vld [vmem:[#allocation96_spill] sm:$0xff] }
0x1a70   :  { %17240 = vmatpush1.msra.mxu1 %v27426_v10  ;;  %17118 = vmatprep.subr.mxu0 %v27379_v3  ;;  %v28766_v3 = vld [vmem:[#allocation95_spill] sm:$0xff] }
0x1a71   :  { %17242 = vmatprep.subr.mxu1 %v27441_v9  ;;  %17121 = vmatpush1.msra.mxu0 %v27394_v43  ;;  %v28764_v43 = vld [vmem:[#allocation93_spill] sm:$0xff] }
0x1a72   :  { %17244 = vmatpush1.msra.mxu1 %v27456_v46  ;;  %17124 = vmatprep.subr.mxu0 %v27409_v42  ;;  %v28763_v42 = vld [vmem:[#allocation30_spill] sm:$0xff] }
0x1a73   :  { %17246 = vmatprep.subr.mxu1 %v27468_v18  ;;  %17127 = vmatpush1.msra.mxu0 %v27424_v7  ;;  %v28761_v7 = vld [vmem:[#allocation50_spill] sm:$0xff] }
0x1a74   :  { %17248 = vmatpush1.msra.mxu1 %v27480_v53  ;;  %17281 = vmatprep.mubr.f32.mxu1 %v28601_v22 }
0x1a75   :  { %17130 = vmatprep.subr.mxu0 %v27439_v33  ;;  %17285 = vmatmul.mubr.f32.vlgmr.msra.gmra.mxu1 %v16871_v62  ;;  %v28715_v62 = vld [vmem:[#allocation103_spill] sm:$0xff]  ;;  %v28758_v33 = vld [vmem:[#allocation85_spill] sm:$0xff] }
0x1a76   :  { %17444 = vmatprep.subr.mxu1 %v27169_v63  ;;  %17133 = vmatpush1.msra.mxu0 %v27454_v2  ;;  %v28756_v2 = vld [vmem:[#allocation75_spill] sm:$0xff] }
0x1a77   :  { %17446 = vmatpush1.msra.mxu1 %v27176_v51  ;;  %17136 = vmatprep.subr.mxu0 %v27466_v52  ;;  %v28752_v52 = vld [vmem:[#allocation65_spill] sm:$0xff] }
0x1a78   :  { %17448 = vmatprep.subr.mxu1 %v27183_v34  ;;  %17139 = vmatpush1.msra.mxu0 %v27478_v4  ;;  %v28737_v4 = vld [vmem:[#allocation20_spill] sm:$0xff] }
0x1a79   :  { %17450 = vmatpush1.msra.mxu1 %v27190_v48  ;;  %17142 = vmatprep.subr.mxu0 %v27492_v39  ;;  %v28716_v39 = vld [vmem:[#allocation105_spill] sm:$0xff] }
0x1a7a   :  { %17452 = vmatprep.subr.mxu1 %v27200_v58  ;;  %17145 = vmatpush1.msra.mxu0 %v27504_v24  ;;  %v28717_v24 = vld [vmem:[#allocation107_spill] sm:$0xff] }
0x1a7b   :  { %17454 = vmatpush1.msra.mxu1 %v27207_v1  ;;  %17148 = vmatprep.subr.mxu0 %v27516_v49  ;;  %v28718_v49 = vld [vmem:[#allocation109_spill] sm:$0xff] }
0x1a7c   :  { %17456 = vmatprep.subr.mxu1 %v27217_v47  ;;  %17151 = vmatpush1.msra.mxu0 %v27528_v59  ;;  %v28719_v59 = vld [vmem:[#allocation110_spill] sm:$0xff] }
0x1a7d   :  { %17184 = vmatprep.mubr.f32.mxu0 %v28601_v22  ;;  %17458 = vmatpush1.msra.mxu1 %v27232_v27 }
0x1a7e   :  { %17187 = vmatmul.mubr.f32.vlgmr.msra.gmra.mxu0 %v27607_v45  ;;  %17302 = vmatprep.subr.mxu0 %v28715_v62  ;;  %v28720_v45 = vld [vmem:[#allocation112_spill] sm:$0xff]  ;;  %v28721_v62 = vld [vmem:[#allocation113_spill] sm:$0xff] }
0x1a7f   :  { %17460 = vmatprep.subr.mxu1 %v27261_v40  ;;  %17306 = vmatpush1.msra.mxu0 %v28716_v39  ;;  %v28722_v39 = vld [vmem:[#allocation116_spill] sm:$0xff] }
0x1a80   :  { %17462 = vmatpush1.msra.mxu1 %v27286_v20  ;;  %17310 = vmatprep.subr.mxu0 %v28717_v24  ;;  %v28723_v24 = vld [vmem:[#allocation122_spill] sm:$0xff] }
0x1a81   :  { %17464 = vmatprep.subr.mxu1 %v27298_v60  ;;  %17314 = vmatpush1.msra.mxu0 %v28718_v49  ;;  %v28724_v49 = vld [vmem:[#allocation127_spill] sm:$0xff] }
0x1a82   :  { %17466 = vmatpush1.msra.mxu1 %v27310_v55  ;;  %17318 = vmatprep.subr.mxu0 %v28719_v59  ;;  %v28725_v59 = vld [vmem:[#allocation130_spill] sm:$0xff] }
0x1a83   :  { %17468 = vmatprep.subr.mxu1 %v27324_v17  ;;  %17322 = vmatpush1.msra.mxu0 %v28720_v45  ;;  %v28726_v45 = vld [vmem:[#allocation132_spill] sm:$0xff] }
0x1a84   :  { %17470 = vmatpush1.msra.mxu1 %v27338_v14  ;;  %17326 = vmatprep.subr.mxu0 %v28721_v62  ;;  %v28735_v62 = vld [vmem:[#allocation155_spill] sm:$0xff] }
0x1a85   :  { %17472 = vmatprep.subr.mxu1 %v27352_v0  ;;  %17330 = vmatpush1.msra.mxu0 %v28722_v39  ;;  %v28733_v39 = vld [vmem:[#allocation152_spill] sm:$0xff] }
0x1a86   :  { %17474 = vmatpush1.msra.mxu1 %v27367_v19  ;;  %17334 = vmatprep.subr.mxu0 %v28723_v24  ;;  %v28727_v24 = vld [vmem:[#allocation139_spill] sm:$0xff] }
0x1a87   :  { %17476 = vmatprep.subr.mxu1 %v27381_v41  ;;  %17338 = vmatpush1.msra.mxu0 %v28724_v49  ;;  %v28728_v49 = vld [vmem:[#allocation142_spill] sm:$0xff] }
0x1a88   :  { %17478 = vmatpush1.msra.mxu1 %v27396_v23  ;;  %17342 = vmatprep.subr.mxu0 %v28725_v59  ;;  %v28731_v59 = vld [vmem:[#allocation149_spill] sm:$0xff] }
0x1a89   :  { %17480 = vmatprep.subr.mxu1 %v27411_v31  ;;  %17346 = vmatpush1.msra.mxu0 %v28726_v45  ;;  %v28729_v45 = vld [vmem:[#allocation146_spill] sm:$0xff] }
0x1a8a   :  { %17482 = vmatpush1.msra.mxu1 %v27426_v10  ;;  %17350 = vmatprep.subr.mxu0 %v27436_v38  ;;  %v28730_v38 = vld [vmem:[#allocation4_spill] sm:$0xff] }
0x1a8b   :  { %17484 = vmatprep.subr.mxu1 %v27441_v9  ;;  %17354 = vmatpush1.msra.mxu0 %v27451_v5  ;;  %v28732_v5 = vld [vmem:[#allocation15_spill] sm:$0xff] }
0x1a8c   :  { %17486 = vmatpush1.msra.mxu1 %v27456_v46  ;;  %17358 = vmatprep.subr.mxu0 %v28727_v24  ;;  %v28734_v24 = vld [vmem:[#allocation12_spill] sm:$0xff] }
0x1a8d   :  { %17488 = vmatprep.subr.mxu1 %v27468_v18  ;;  %17362 = vmatpush1.msra.mxu0 %v28728_v49  ;;  %v28736_v49 = vld [vmem:[#allocation23_spill] sm:$0xff] }
0x1a8e   :  { %17490 = vmatpush1.msra.mxu1 %v27480_v53  ;;  %17523 = vmatprep.mubr.f32.mxu1 %v28601_v22  ;;  %v28783_v53 = vld [vmem:[#allocation9_spill] sm:$0xff]  ;;  %v28785_v18 = vld [vmem:[#allocation19_spill] sm:$0xff] }
0x1a8f   :  { %17366 = vmatprep.subr.mxu0 %v28729_v45  ;;  %17525 = vmatmul.mubr.f32.vlgmr.msra.gmra.mxu1 %v27586_v30  ;;  %v28738_v45 = vld [vmem:[#allocation5_spill] sm:$0xff] }
0x1a90   :  { %17652 = vmatprep.subr.mxu1 %v28730_v38  ;;  %17370 = vmatpush1.msra.mxu0 %v28731_v59  ;;  %v28739_v38 = vld [vmem:[#allocation13_spill] sm:$0xff]  ;;  %v28750_v59 = vld [vmem:[#allocation55_spill] sm:$0xff] }
0x1a91   :  { %17658 = vmatpush1.msra.mxu1 %v28732_v5  ;;  %17374 = vmatprep.subr.mxu0 %v28733_v39  ;;  %v17535_v5 = vpop.permute.xlu0 %17534 }
0x1a92   :  { %17664 = vmatprep.subr.mxu1 %v28734_v24  ;;  %17378 = vmatpush1.msra.mxu0 %v28735_v62  ;;  %v28740_v24 = vld [vmem:[#allocation28_spill] sm:$0xff] }
0x1a93   :  { %17670 = vmatpush1.msra.mxu1 %v28736_v49  ;;  %17382 = vmatprep.subr.mxu0 %v27537_v11  ;;  %v28741_v49 = vld [vmem:[#allocation56_spill] sm:$0xff]  ;;  %v28742_v11 = vld [vmem:[#allocation29_spill] sm:$0xff] }
0x1a94   :  { %17676 = vmatprep.subr.mxu1 %v28737_v4  ;;  %17386 = vmatpush1.msra.mxu0 %v27546_v16  ;;  %v17533_v4 = vpop.permute.xlu1 %17532  ;;  %v28743_v16 = vld [vmem:[#allocation64_spill] sm:$0xff] }
0x1a95   :  { %17682 = vmatpush1.msra.mxu1 %v28738_v45  ;;  %17390 = vmatprep.subr.mxu0 %v27555_v26  ;;  %v17536_v45 = vsel %vm11803_vm14, %v17533_v4, %v17535_v5  ;;  %v28744_v26 = vld [vmem:[#allocation26_spill] sm:$0xff]  ;;  %v28747_v62 = vld [vmem:[#allocation60_spill] sm:$0xff]  ;;  %v28753_v5 = vld [vmem:[#allocation25_spill] sm:$0xff] }
0x1a96   :  { %17688 = vmatprep.subr.mxu1 %v28739_v38  ;;  %17394 = vmatpush1.msra.mxu0 %v27564_v44  ;;  %v28745_v38 = vld [vmem:[#allocation66_spill] sm:$0xff]  ;;  %v17537_v39 = vsel %vm11666_vm11, %v17536_v45, 0  ;;  %v28755_v4 = vld [vmem:[#allocation7_spill] sm:$0xff] }
0x1a97   :  { %17427 = vmatprep.mubr.f32.mxu0 %v28601_v22  ;;  %17694 = vmatpush1.msra.mxu1 %v28740_v24  ;;  %v28746_v44 = vld [vmem:[#allocation34_spill] sm:$0xff]  ;;  %v28748_v24 = vld [vmem:[#allocation57_spill] sm:$0xff] }
0x1a98   :  { %17429 = vmatmul.mubr.f32.vlgmr.msra.gmra.mxu0 %v27586_v30  ;;  %17548 = vmatprep.subr.mxu0 %v28741_v49  ;;  %v28749_v30 = vld [vmem:[#allocation6_spill] sm:$0xff] }
0x1a99   :  { %17700 = vmatprep.subr.mxu1 %v28742_v11  ;;  %17550 = vmatpush1.msra.mxu0 %v28743_v16  ;;  %v28751_v11 = vld [vmem:[#allocation8_spill] sm:$0xff]  ;;  %v28759_v45 = vld [vmem:[#allocation38_spill] sm:$0xff] }
0x1a9a   :  { %17706 = vmatpush1.msra.mxu1 %v28744_v26  ;;  %17552 = vmatprep.subr.mxu0 %v28745_v38  ;;  %v28754_v26 = vld [vmem:[#allocation71_spill] sm:$0xff] }
0x1a9b   :  { %17712 = vmatprep.subr.mxu1 %v28746_v44  ;;  %17554 = vmatpush1.msra.mxu0 %v28747_v62  ;;  %v27761_v44 = vand.u32 4294901760, %v17537_v39 }
0x1a9c   :  { %17718 = vmatpush1.msra.mxu1 %v28748_v24  ;;  %17556 = vmatprep.subr.mxu0 %v28749_v30  ;;  %v28757_v24 = vld [vmem:[#allocation41_spill] sm:$0xff] }
0x1a9d   :  { %17724 = vmatprep.subr.mxu1 %v28750_v59  ;;  %17558 = vmatpush1.msra.mxu0 %v28751_v11  ;;  %v28760_v59 = vld [vmem:[#allocation88_spill] sm:$0xff] }
0x1a9e   :  { %17730 = vmatpush1.msra.mxu1 %v28752_v52  ;;  %17560 = vmatprep.subr.mxu0 %v28753_v5  ;;  %v28762_v52 = vld [vmem:[#allocation91_spill] sm:$0xff] }
0x1a9f   :  { %17736 = vmatprep.subr.mxu1 %v28754_v26  ;;  %17562 = vmatpush1.msra.mxu0 %v28755_v4  ;;  %v27772_v26 = vsub.f32 %v17537_v39, %v27761_v44  ;;  %v28772_v39 = vld [vmem:[#allocation98_spill] sm:$0xff] }
0x1aa0   :  { %17742 = vmatpush1.msra.mxu1 %v28756_v2  ;;  %17564 = vmatprep.subr.mxu0 %v28757_v24  ;;  %v28765_v2 = vld [vmem:[#allocation51_spill] sm:$0xff] }
0x1aa1   :  { %17748 = vmatprep.subr.mxu1 %v28758_v33  ;;  %17566 = vmatpush1.msra.mxu0 %v28759_v45  ;;  %v28767_v33 = vld [vmem:[#allocation39_spill] sm:$0xff]  ;;  %v17630_v61 = vand.u32 4294901760, %v27772_v26 }
0x1aa2   :  { %17754 = vmatpush1.msra.mxu1 %v28760_v59  ;;  %17568 = vmatprep.subr.mxu0 %v28761_v7  ;;  %v28769_v59 = vld [vmem:[#allocation53_spill] sm:$0xff] }
0x1aa3   :  { %17760 = vmatprep.subr.mxu1 %v28762_v52  ;;  %17570 = vmatpush1.msra.mxu0 %v28763_v42  ;;  %v28771_v52 = vld [vmem:[#allocation47_spill] sm:$0xff] }
0x1aa4   :  { %17766 = vmatpush1.msra.mxu1 %v28764_v43  ;;  %17572 = vmatprep.subr.mxu0 %v28765_v2  ;;  %v28773_v43 = vld [vmem:[#allocation42_spill] sm:$0xff] }
0x1aa5   :  { %17772 = vmatprep.subr.mxu1 %v28766_v3  ;;  %17574 = vmatpush1.msra.mxu0 %v28767_v33  ;;  %v28774_v3 = vld [vmem:[#allocation58_spill] sm:$0xff] }
0x1aa6   :  { %17778 = vmatpush1.msra.mxu1 %v28768_v32  ;;  %17576 = vmatprep.subr.mxu0 %v28769_v59  ;;  %v28775_v32 = vld [vmem:[#allocation69_spill] sm:$0xff] }
0x1aa7   :  { %17784 = vmatprep.subr.mxu1 %v28770_v35  ;;  %17578 = vmatpush1.msra.mxu0 %v28771_v52  ;;  %v17631_v35 = vsub.f32 %v27772_v26, %v17630_v61 }
0x1aa8   :  { %17790 = vmatpush1.msra.mxu1 %v28772_v39  ;;  %17823 = vmatprep.mubr.f32.mxu1 %v28601_v22  ;;  %v28777_v39 = vld [vmem:[#allocation74_spill] sm:$0xff] }
0x1aa9   :  { %17580 = vmatprep.subr.mxu0 %v28773_v43  ;;  %17825 = vmatmul.mubr.f32.vlgmr.msra.gmra.mxu1 %v27761_v44  ;;  %v17632_v13 = vand.u32 4294901760, %v17631_v35  ;;  %v28784_v35 = vld [vmem:[#allocation11_spill] sm:$0xff] }
0x1aaa   :  { %17961 = vmatprep.subr.mxu1 %v28741_v49  ;;  %17582 = vmatpush1.msra.mxu0 %v28774_v3 }
0x1aab   :  { %17963 = vmatpush1.msra.mxu1 %v28743_v16  ;;  %17584 = vmatprep.subr.mxu0 %v28775_v32 }
0x1aac   :  { %17965 = vmatprep.subr.mxu1 %v28745_v38  ;;  %17586 = vmatpush1.msra.mxu0 %v28776_v37 }
0x1aad   :  { %17967 = vmatpush1.msra.mxu1 %v28747_v62  ;;  %17588 = vmatprep.subr.mxu0 %v28777_v39 }
0x1aae   :  { %17969 = vmatprep.subr.mxu1 %v28749_v30  ;;  %17590 = vmatpush1.msra.mxu0 %v28778_v50 }
0x1aaf   :  { %17971 = vmatpush1.msra.mxu1 %v28751_v11  ;;  %17592 = vmatprep.subr.mxu0 %v28779_v28 }
0x1ab0   :  { %17973 = vmatprep.subr.mxu1 %v28753_v5  ;;  %17594 = vmatpush1.msra.mxu0 %v28780_v57 }
0x1ab1   :  { %17627 = vmatprep.mubr.f32.mxu0 %v28601_v22  ;;  %17975 = vmatpush1.msra.mxu1 %v28755_v4 }
0x1ab2   :  { %17633 = vmatmul.mubr.f32.vlgmr.msra.gmra.mxu0 %v17632_v13  ;;  %17841 = vmatprep.subr.mxu0 %v28781_v25  ;;  %v28786_v13 = vld [vmem:[#allocation22_spill] sm:$0xff]  ;;  %v28787_v25 = vld [vmem:[#allocation33_spill] sm:$0xff] }
0x1ab3   :  { %17977 = vmatprep.subr.mxu1 %v28757_v24  ;;  %17844 = vmatpush1.msra.mxu0 %v28782_v29  ;;  %v28788_v29 = vld [vmem:[#allocation31_spill] sm:$0xff] }
0x1ab4   :  { %17979 = vmatpush1.msra.mxu1 %v28759_v45  ;;  %17847 = vmatprep.subr.mxu0 %v28783_v53  ;;  %v28789_v53 = vld [vmem:[#allocation43_spill] sm:$0xff] }
0x1ab5   :  { %17981 = vmatprep.subr.mxu1 %v28761_v7  ;;  %17850 = vmatpush1.msra.mxu0 %v28784_v35  ;;  %v28790_v35 = vld [vmem:[#allocation3_spill] sm:$0xff] }
0x1ab6   :  { %17983 = vmatpush1.msra.mxu1 %v28763_v42  ;;  %17853 = vmatprep.subr.mxu0 %v28785_v18  ;;  %v28791_v18 = vld [vmem:[#allocation40_spill] sm:$0xff] }
0x1ab7   :  { %17985 = vmatprep.subr.mxu1 %v28765_v2  ;;  %17856 = vmatpush1.msra.mxu0 %v28786_v13  ;;  %v28792_v13 = vld [vmem:[#allocation10_spill] sm:$0xff] }
0x1ab8   :  { %17987 = vmatpush1.msra.mxu1 %v28767_v33  ;;  %17859 = vmatprep.subr.mxu0 %v28787_v25  ;;  %v28793_v25 = vld [vmem:[#allocation21_spill] sm:$0xff] }
0x1ab9   :  { %17989 = vmatprep.subr.mxu1 %v28769_v59  ;;  %17862 = vmatpush1.msra.mxu0 %v28788_v29  ;;  %v28794_v29 = vld [vmem:[#allocation18_spill] sm:$0xff] }
0x1aba   :  { %17991 = vmatpush1.msra.mxu1 %v28771_v52  ;;  %17865 = vmatprep.subr.mxu0 %v28789_v53  ;;  %v28795_v53 = vld [vmem:[#allocation52_spill] sm:$0xff] }
0x1abb   :  { %17993 = vmatprep.subr.mxu1 %v28773_v43  ;;  %17868 = vmatpush1.msra.mxu0 %v28790_v35  ;;  %v28796_v35 = vld [vmem:[#allocation46_spill] sm:$0xff] }
0x1abc   :  { %17995 = vmatpush1.msra.mxu1 %v28774_v3  ;;  %17871 = vmatprep.subr.mxu0 %v28791_v18  ;;  %v28797_v18 = vld [vmem:[#allocation59_spill] sm:$0xff] }
0x1abd   :  { %17997 = vmatprep.subr.mxu1 %v28775_v32  ;;  %17874 = vmatpush1.msra.mxu0 %v28792_v13  ;;  %v28798_v13 = vld [vmem:[#allocation68_spill] sm:$0xff] }
0x1abe   :  { %17999 = vmatpush1.msra.mxu1 %v28776_v37  ;;  %17877 = vmatprep.subr.mxu0 %v28793_v25  ;;  %v28799_v25 = vld [vmem:[#allocation73_spill] sm:$0xff] }
0x1abf   :  { %18001 = vmatprep.subr.mxu1 %v28777_v39  ;;  %17880 = vmatpush1.msra.mxu0 %v28794_v29  ;;  %v28800_v29 = vld [vmem:[#allocation77_spill] sm:$0xff] }
0x1ac0   :  { %18003 = vmatpush1.msra.mxu1 %v28778_v50  ;;  %17883 = vmatprep.subr.mxu0 %v28795_v53  ;;  %v28801_v53 = vld [vmem:[#allocation80_spill] sm:$0xff] }
0x1ac1   :  { %18005 = vmatprep.subr.mxu1 %v28779_v28  ;;  %17886 = vmatpush1.msra.mxu0 %v28796_v35  ;;  %v28802_v35 = vld [vmem:[#allocation83_spill] sm:$0xff] }
0x1ac2   :  { %18007 = vmatpush1.msra.mxu1 %v28780_v57  ;;  %18040 = vmatprep.mubr.f32.mxu1 %v28601_v22 }
0x1ac3   :  { %17889 = vmatprep.subr.mxu0 %v28797_v18  ;;  %18044 = vmatmul.mubr.f32.vlgmr.msra.gmra.mxu1 %v17630_v61  ;;  %v28803_v61 = vld [vmem:[#allocation87_spill] sm:$0xff] }
0x1ac4   :  { %18203 = vmatprep.subr.mxu1 %v28741_v49  ;;  %17892 = vmatpush1.msra.mxu0 %v28798_v13  ;;  %v28806_v49 = vld [vmem:[#allocation17_spill] sm:$0xff] }
0x1ac5   :  { %18205 = vmatpush1.msra.mxu1 %v28743_v16  ;;  %17895 = vmatprep.subr.mxu0 %v28799_v25  ;;  %v28804_v16 = vld [vmem:[#allocation90_spill] sm:$0xff] }
0x1ac6   :  { %18207 = vmatprep.subr.mxu1 %v28745_v38  ;;  %17898 = vmatpush1.msra.mxu0 %v28800_v29  ;;  %v28807_v38 = vld [vmem:[#allocation14_spill] sm:$0xff]  ;;  %v28823_v29 = vld [vmem:[#allocation76_spill] sm:$0xff] }
0x1ac7   :  { %18209 = vmatpush1.msra.mxu1 %v28747_v62  ;;  %17901 = vmatprep.subr.mxu0 %v28801_v53  ;;  %v28805_v62 = vld [vmem:[#allocation61_spill] sm:$0xff]  ;;  %v28825_v53 = vld [vmem:[#allocation79_spill] sm:$0xff] }
0x1ac8   :  { %18211 = vmatprep.subr.mxu1 %v28749_v30  ;;  %17904 = vmatpush1.msra.mxu0 %v28802_v35  ;;  %v28808_v30 = vld [vmem:[#allocation16_spill] sm:$0xff]  ;;  %v28826_v35 = vld [vmem:[#allocation119_spill] sm:$0xff] }
0x1ac9   :  { %18213 = vmatpush1.msra.mxu1 %v28751_v11  ;;  %17907 = vmatprep.subr.mxu0 %v28803_v61  ;;  %v28809_v11 = vld [vmem:[#allocation27_spill] sm:$0xff]  ;;  %v28828_v61 = vld [vmem:[#allocation121_spill] sm:$0xff] }
0x1aca   :  { %18215 = vmatprep.subr.mxu1 %v28753_v5  ;;  %17910 = vmatpush1.msra.mxu0 %v28804_v16  ;;  %v28810_v5 = vld [vmem:[#allocation24_spill] sm:$0xff] }
0x1acb   :  { %17943 = vmatprep.mubr.f32.mxu0 %v28601_v22  ;;  %18217 = vmatpush1.msra.mxu1 %v28755_v4  ;;  %v28811_v4 = vld [vmem:[#allocation35_spill] sm:$0xff]  ;;  %v28830_v16 = vld [vmem:[#allocation124_spill] sm:$0xff] }
0x1acc   :  { %17946 = vmatmul.mubr.f32.vlgmr.msra.gmra.mxu0 %v27772_v26  ;;  %18061 = vmatprep.subr.mxu0 %v28805_v62  ;;  %v28815_v26 = vld [vmem:[#allocation48_spill] sm:$0xff]  ;;  %v28831_v62 = vld [vmem:[#allocation89_spill] sm:$0xff] }
0x1acd   :  { %18219 = vmatprep.subr.mxu1 %v28757_v24  ;;  %18065 = vmatpush1.msra.mxu0 %v28806_v49  ;;  %v28812_v24 = vld [vmem:[#allocation32_spill] sm:$0xff]  ;;  %v28832_v49 = vld [vmem:[#allocation126_spill] sm:$0xff] }
0x1ace   :  { %18221 = vmatpush1.msra.mxu1 %v28759_v45  ;;  %18069 = vmatprep.subr.mxu0 %v28807_v38  ;;  %v28833_v38 = vld [vmem:[#allocation92_spill] sm:$0xff] }
0x1acf   :  { %18223 = vmatprep.subr.mxu1 %v28761_v7  ;;  %18073 = vmatpush1.msra.mxu0 %v28808_v30  ;;  %v28813_v7 = vld [vmem:[#allocation49_spill] sm:$0xff]  ;;  %v16313_v45 = vpop.f32.mrf.mxu1 }
0x1ad0   :  { %18225 = vmatpush1.msra.mxu1 %v28763_v42  ;;  %18077 = vmatprep.subr.mxu0 %v28809_v11  ;;  %v28814_v42 = vld [vmem:[#allocation54_spill] sm:$0xff]  ;;  %v28834_v30 = vld [vmem:[#allocation129_spill] sm:$0xff] }
0x1ad1   :  { %18227 = vmatprep.subr.mxu1 %v28765_v2  ;;  %18081 = vmatpush1.msra.mxu0 %v28810_v5  ;;  %v28816_v2 = vld [vmem:[#allocation36_spill] sm:$0xff]  ;;  %v16315_v18 = vpop.f32.mrf.mxu1  ;;  %v28835_v11 = vld [vmem:[#allocation94_spill] sm:$0xff]  ;;  %v18294_v5 = vpop.permute.xlu0 %18293 }
0x1ad2   :  { %18229 = vmatpush1.msra.mxu1 %v28767_v33  ;;  %18085 = vmatprep.subr.mxu0 %v28811_v4  ;;  %v28836_v4 = vld [vmem:[#allocation134_spill] sm:$0xff] }
0x1ad3   :  { %18231 = vmatprep.subr.mxu1 %v28769_v59  ;;  %18089 = vmatpush1.msra.mxu0 %v28812_v24  ;;  %v28817_v59 = vld [vmem:[#allocation44_spill] sm:$0xff]  ;;  %v18292_v24 = vpop.permute.xlu1 %18291 }
0x1ad4   :  { %18233 = vmatpush1.msra.mxu1 %v28771_v52  ;;  %18093 = vmatprep.subr.mxu0 %v28813_v7  ;;  %v28837_v7 = vld [vmem:[#allocation145_spill] sm:$0xff] }
0x1ad5   :  { %18235 = vmatprep.subr.mxu1 %v28773_v43  ;;  %18097 = vmatpush1.msra.mxu0 %v28814_v42  ;;  %v28818_v43 = vld [vmem:[#allocation37_spill] sm:$0xff]  ;;  %v18295_v42 = vsel %vm11803_vm14, %v18292_v24, %v18294_v5  ;;  %v28858_v5 = vld [vmem:[#allocation123_spill] sm:$0xff] }
0x1ad6   :  { %18237 = vmatpush1.msra.mxu1 %v28774_v3  ;;  %18101 = vmatprep.subr.mxu0 %v28815_v26  ;;  %v28819_v3 = vld [vmem:[#allocation45_spill] sm:$0xff]  ;;  %v28839_v26 = vld [vmem:[#allocation151_spill] sm:$0xff] }
0x1ad7   :  { %18239 = vmatprep.subr.mxu1 %v28775_v32  ;;  %18105 = vmatpush1.msra.mxu0 %v28816_v2  ;;  %v16121_v33 = vpop.f32.mrf.mxu0  ;;  %v28820_v32 = vld [vmem:[#allocation67_spill] sm:$0xff]  ;;  %v28840_v2 = vld [vmem:[#allocation154_spill] sm:$0xff]  ;;  %v28859_v24 = vld [vmem:[#allocation125_spill] sm:$0xff] }
0x1ad8   :  { %18241 = vmatpush1.msra.mxu1 %v28776_v37  ;;  %18109 = vmatprep.subr.mxu0 %v28817_v59  ;;  %v16314_v52 = vadd.f32 %v16313_v45, %v16121_v33  ;;  %v28821_v37 = vld [vmem:[#allocation72_spill] sm:$0xff]  ;;  %v28841_v33 = vld [vmem:[#allocation157_spill] sm:$0xff]  ;;  %v28842_v59 = vld [vmem:[#allocation159_spill] sm:$0xff] }
0x1ad9   :  { %18243 = vmatprep.subr.mxu1 %v28777_v39  ;;  %18113 = vmatpush1.msra.mxu0 %v28818_v43  ;;  %v16123_v13 = vpop.f32.mrf.mxu0  ;;  %v28822_v39 = vld [vmem:[#allocation115_spill] sm:$0xff]  ;;  %v28838_v45 = vld [vmem:[#allocation148_spill] sm:$0xff]  ;;  %v28843_v43 = vld [vmem:[#allocation161_spill] sm:$0xff] }
0x1ada   :  { %18245 = vmatpush1.msra.mxu1 %v28778_v50  ;;  %18117 = vmatprep.subr.mxu0 %v28819_v3  ;;  %v16316_v25 = vadd.f32 %v16315_v18, %v16123_v13  ;;  %v28824_v50 = vld [vmem:[#allocation117_spill] sm:$0xff]  ;;  %v28844_v13 = vld [vmem:[#allocation163_spill] sm:$0xff] }
0x1adb   :  { %18247 = vmatprep.subr.mxu1 %v28779_v28  ;;  %18121 = vmatpush1.msra.mxu0 %v28820_v32  ;;  %v28827_v28 = vld [vmem:[#allocation82_spill] sm:$0xff] }
0x1adc   :  { %18249 = vmatpush1.msra.mxu1 %v28780_v57  ;;  %18282 = vmatprep.mubr.f32.mxu1 %v28601_v22  ;;  %v28829_v57 = vld [vmem:[#allocation86_spill] sm:$0xff] }
0x1add   :  { %18125 = vmatprep.subr.mxu0 %v28821_v37  ;;  %18284 = vmatmul.mubr.f32.vlgmr.msra.gmra.mxu1 %v27761_v44 }
0x1ade   :  { %18411 = vmatprep.subr.mxu1 %v28822_v39  ;;  %18129 = vmatpush1.msra.mxu0 %v28823_v29 }
0x1adf   :  { %18417 = vmatpush1.msra.mxu1 %v28824_v50  ;;  %18133 = vmatprep.subr.mxu0 %v28825_v53  ;;  %v28848_v50 = vld [vmem:[#allocation100_spill] sm:$0xff]  ;;  %v28849_v53 = vld [vmem:[#allocation101_spill] sm:$0xff] }
0x1ae0   :  { %18423 = vmatprep.subr.mxu1 %v28826_v35  ;;  %18137 = vmatpush1.msra.mxu0 %v28827_v28  ;;  %v28850_v35 = vld [vmem:[#allocation102_spill] sm:$0xff]  ;;  %v28851_v28 = vld [vmem:[#allocation104_spill] sm:$0xff] }
0x1ae1   :  { %18429 = vmatpush1.msra.mxu1 %v28828_v61  ;;  %18141 = vmatprep.subr.mxu0 %v28829_v57  ;;  %v28852_v61 = vld [vmem:[#allocation106_spill] sm:$0xff]  ;;  %v28853_v57 = vld [vmem:[#allocation108_spill] sm:$0xff] }
0x1ae2   :  { %18435 = vmatprep.subr.mxu1 %v28830_v16  ;;  %18145 = vmatpush1.msra.mxu0 %v28831_v62  ;;  %v28854_v16 = vld [vmem:[#allocation111_spill] sm:$0xff]  ;;  %v28855_v62 = vld [vmem:[#allocation114_spill] sm:$0xff] }
0x1ae3   :  { %18441 = vmatpush1.msra.mxu1 %v28832_v49  ;;  %18149 = vmatprep.subr.mxu0 %v28833_v38  ;;  %v28856_v49 = vld [vmem:[#allocation118_spill] sm:$0xff]  ;;  %v28857_v38 = vld [vmem:[#allocation120_spill] sm:$0xff] }
0x1ae4   :  { %18447 = vmatprep.subr.mxu1 %v28834_v30  ;;  %18153 = vmatpush1.msra.mxu0 %v28835_v11 }
0x1ae5   :  { %18186 = vmatprep.mubr.f32.mxu0 %v28601_v22  ;;  %18453 = vmatpush1.msra.mxu1 %v28836_v4 }
0x1ae6   :  { %18188 = vmatmul.mubr.f32.vlgmr.msra.gmra.mxu0 %v27761_v44  ;;  %18307 = vmatprep.subr.mxu0 %v27169_v63  ;;  %v18296_v44 = vsel %vm11666_vm11, %v18295_v42, 0  ;;  %v28860_v42 = vld [vmem:[#allocation128_spill] sm:$0xff] }
0x1ae7   :  { %18459 = vmatprep.subr.mxu1 %v28837_v7  ;;  %18309 = vmatpush1.msra.mxu0 %v27176_v51  ;;  %v27924_v18 = vand.u32 4294901760, %v18296_v44  ;;  %v16532_v3 = vpop.f32.mrf.mxu1 }
0x1ae8   :  { %18465 = vmatpush1.msra.mxu1 %v28838_v45  ;;  %18311 = vmatprep.subr.mxu0 %v27183_v34 }
0x1ae9   :  { %18471 = vmatprep.subr.mxu1 %v28839_v26  ;;  %18313 = vmatpush1.msra.mxu0 %v27190_v48  ;;  %v27935_v39 = vsub.f32 %v18296_v44, %v27924_v18 }
0x1aea   :  { %18477 = vmatpush1.msra.mxu1 %v28840_v2  ;;  %18315 = vmatprep.subr.mxu0 %v27200_v58  ;;  %v28861_v2 = vld [vmem:[#allocation131_spill] sm:$0xff] }
0x1aeb   :  { %18483 = vmatprep.subr.mxu1 %v28841_v33  ;;  %18317 = vmatpush1.msra.mxu0 %v27207_v1  ;;  %v28862_v33 = vld [vmem:[#allocation133_spill] sm:$0xff] }
0x1aec   :  { %18489 = vmatpush1.msra.mxu1 %v28842_v59  ;;  %18319 = vmatprep.subr.mxu0 %v27217_v47 }
0x1aed   :  { %18495 = vmatprep.subr.mxu1 %v28843_v43  ;;  %18321 = vmatpush1.msra.mxu0 %v27232_v27  ;;  %v28863_v43 = vld [vmem:[#allocation136_spill] sm:$0xff] }
0x1aee   :  { %18501 = vmatpush1.msra.mxu1 %v28844_v13  ;;  %18323 = vmatprep.subr.mxu0 %v27261_v40  ;;  %v28864_v13 = vld [vmem:[#allocation138_spill] sm:$0xff] }
0x1aef   :  { %18507 = vmatprep.subr.mxu1 %v27570_v56  ;;  %18325 = vmatpush1.msra.mxu0 %v27286_v20 }
0x1af0   :  { %18513 = vmatpush1.msra.mxu1 %v27576_v15  ;;  %18327 = vmatprep.subr.mxu0 %v27298_v60  ;;  %v16434_v32 = vpop.f32.mrf.mxu0 }
0x1af1   :  { %18519 = vmatprep.subr.mxu1 %v27582_v54  ;;  %18329 = vmatpush1.msra.mxu0 %v27310_v55  ;;  %v16435_v37 = vadd.f32 %v16434_v32, %v16314_v52  ;;  %v16534_v54 = vpop.f32.mrf.mxu1  ;;  %v28866_v32 = vld [vmem:[#allocation143_spill] sm:$0xff] }
0x1af2   :  { %18525 = vmatpush1.msra.mxu1 %v27590_v36  ;;  %18331 = vmatprep.subr.mxu0 %v27324_v17  ;;  %v16436_v56 = vpop.f32.mrf.mxu0  ;;  %v18389_v36 = vand.u32 4294901760, %v27935_v39 }
0x1af3   :  { %18531 = vmatprep.subr.mxu1 %v27596_v12  ;;  %18333 = vmatpush1.msra.mxu0 %v27338_v14  ;;  %v16437_v15 = vadd.f32 %v16436_v56, %v16316_v25  ;;  %v16533_v29 = vadd.f32 %v16532_v3, %v16435_v37  ;;  %v28845_v12 = vld [vmem:[#allocation141_spill] sm:$0xff]  ;;  %v28847_v25 = vld [vmem:[#allocation99_spill] sm:$0xff]  ;;  %v28865_v3 = vld [vmem:[#allocation140_spill] sm:$0xff] }
0x1af4   :  { %18537 = vmatpush1.msra.mxu1 %v27600_v8  ;;  %18335 = vmatprep.subr.mxu0 %v27352_v0  ;;  %v18390_v8 = vsub.f32 %v27935_v39, %v18389_v36  ;;  %v28867_v37 = vld [vmem:[#allocation147_spill] sm:$0xff]  ;;  %v28868_v56 = vld [vmem:[#allocation150_spill] sm:$0xff] }
0x1af5   :  { %18543 = vmatprep.subr.mxu1 %v27604_v6  ;;  %18337 = vmatpush1.msra.mxu0 %v27367_v19  ;;  %v16535_v52 = vadd.f32 %v16534_v54, %v16437_v15  ;;  %v28882_v15 = vld [vmem:[#allocation132_spill] sm:$0xff] }
0x1af6   :  { %18549 = vmatpush1.msra.mxu1 %v27611_v21  ;;  %18582 = vmatprep.mubr.f32.mxu1 %v28601_v22  ;;  %v18391_v6 = vand.u32 4294901760, %v18390_v8  ;;  %v28846_v21 = vld [vmem:[#allocation144_spill] sm:$0xff] }
0x1af7   :  { %18339 = vmatprep.subr.mxu0 %v27381_v41  ;;  %18584 = vmatmul.mubr.f32.vlgmr.msra.gmra.mxu1 %v27924_v18 }
0x1af8   :  { %18720 = vmatprep.subr.mxu1 %v27169_v63  ;;  %18341 = vmatpush1.msra.mxu0 %v27396_v23 }
0x1af9   :  { %18722 = vmatpush1.msra.mxu1 %v27176_v51  ;;  %18343 = vmatprep.subr.mxu0 %v27411_v31 }
0x1afa   :  { %18724 = vmatprep.subr.mxu1 %v27183_v34  ;;  %18345 = vmatpush1.msra.mxu0 %v27426_v10 }
0x1afb   :  { %18726 = vmatpush1.msra.mxu1 %v27190_v48  ;;  %18347 = vmatprep.subr.mxu0 %v27441_v9 }
0x1afc   :  { %18728 = vmatprep.subr.mxu1 %v27200_v58  ;;  %18349 = vmatpush1.msra.mxu0 %v27456_v46 }
0x1afd   :  { %18730 = vmatpush1.msra.mxu1 %v27207_v1  ;;  %18351 = vmatprep.subr.mxu0 %v28845_v12 }
0x1afe   :  { %18732 = vmatprep.subr.mxu1 %v27217_v47  ;;  %18353 = vmatpush1.msra.mxu0 %v28846_v21 }
0x1aff   :  { %18386 = vmatprep.mubr.f32.mxu0 %v28601_v22  ;;  %18734 = vmatpush1.msra.mxu1 %v27232_v27 }
0x1b00   :  { %18392 = vmatmul.mubr.f32.vlgmr.msra.gmra.mxu0 %v18391_v6  ;;  %18600 = vmatprep.subr.mxu0 %v28847_v25  ;;  %v28890_v6 = vld [vmem:[#allocation155_spill] sm:$0xff]  ;;  %v28892_v25 = vld [vmem:[#allocation160_spill] sm:$0xff] }
0x1b01   :  { %18736 = vmatprep.subr.mxu1 %v27261_v40  ;;  %18603 = vmatpush1.msra.mxu0 %v28848_v50  ;;  %v16772_v30 = vpop.f32.mrf.mxu1  ;;  %v28893_v50 = vld [vmem:[#allocation162_spill] sm:$0xff] }
0x1b02   :  { %18738 = vmatpush1.msra.mxu1 %v27286_v20  ;;  %18606 = vmatprep.subr.mxu0 %v28849_v53 }
0x1b03   :  { %18740 = vmatprep.subr.mxu1 %v27298_v60  ;;  %18609 = vmatpush1.msra.mxu0 %v28850_v35  ;;  %v16774_v44 = vpop.f32.mrf.mxu1 }
0x1b04   :  { %18742 = vmatpush1.msra.mxu1 %v27310_v55  ;;  %18612 = vmatprep.subr.mxu0 %v28851_v28 }
0x1b05   :  { %18744 = vmatprep.subr.mxu1 %v27324_v17  ;;  %18615 = vmatpush1.msra.mxu0 %v28852_v61 }
0x1b06   :  { %18746 = vmatpush1.msra.mxu1 %v27338_v14  ;;  %18618 = vmatprep.subr.mxu0 %v28853_v57 }
0x1b07   :  { %18748 = vmatprep.subr.mxu1 %v27352_v0  ;;  %18621 = vmatpush1.msra.mxu0 %v28854_v16 }
0x1b08   :  { %18750 = vmatpush1.msra.mxu1 %v27367_v19  ;;  %18624 = vmatprep.subr.mxu0 %v28855_v62 }
0x1b09   :  { %18752 = vmatprep.subr.mxu1 %v27381_v41  ;;  %18627 = vmatpush1.msra.mxu0 %v28856_v49 }
0x1b0a   :  { %18754 = vmatpush1.msra.mxu1 %v27396_v23  ;;  %18630 = vmatprep.subr.mxu0 %v28857_v38  ;;  %v16676_v11 = vpop.f32.mrf.mxu0 }
0x1b0b   :  { %18756 = vmatprep.subr.mxu1 %v27411_v31  ;;  %18633 = vmatpush1.msra.mxu0 %v28858_v5  ;;  %v16677_v4 = vadd.f32 %v16676_v11, %v16533_v29 }
0x1b0c   :  { %18758 = vmatpush1.msra.mxu1 %v27426_v10  ;;  %18636 = vmatprep.subr.mxu0 %v28859_v24  ;;  %v16678_v7 = vpop.f32.mrf.mxu0 }
0x1b0d   :  { %18760 = vmatprep.subr.mxu1 %v27441_v9  ;;  %18639 = vmatpush1.msra.mxu0 %v28860_v42  ;;  %v16679_v45 = vadd.f32 %v16678_v7, %v16535_v52  ;;  %v16773_v26 = vadd.f32 %v16772_v30, %v16677_v4  ;;  %v28885_v52 = vld [vmem:[#allocation139_spill] sm:$0xff] }
0x1b0e   :  { %18762 = vmatpush1.msra.mxu1 %v27456_v46  ;;  %18642 = vmatprep.subr.mxu0 %v28861_v2 }
0x1b0f   :  { %18764 = vmatprep.subr.mxu1 %v28845_v12  ;;  %18645 = vmatpush1.msra.mxu0 %v28862_v33  ;;  %v16775_v59 = vadd.f32 %v16774_v44, %v16679_v45 }
0x1b10   :  { %18766 = vmatpush1.msra.mxu1 %v28846_v21  ;;  %18799 = vmatprep.mubr.f32.mxu1 %v28601_v22 }
0x1b11   :  { %18648 = vmatprep.subr.mxu0 %v28863_v43  ;;  %18803 = vmatmul.mubr.f32.vlgmr.msra.gmra.mxu1 %v18389_v36 }
0x1b12   :  { %18962 = vmatprep.subr.mxu1 %v27169_v63  ;;  %18651 = vmatpush1.msra.mxu0 %v28864_v13  ;;  %v28869_v63 = vld [vmem:[#allocation153_spill] sm:$0xff] }
0x1b13   :  { %18964 = vmatpush1.msra.mxu1 %v27176_v51  ;;  %18654 = vmatprep.subr.mxu0 %v28865_v3  ;;  %v28870_v51 = vld [vmem:[#allocation156_spill] sm:$0xff] }
0x1b14   :  { %18966 = vmatprep.subr.mxu1 %v27183_v34  ;;  %18657 = vmatpush1.msra.mxu0 %v28866_v32  ;;  %v28871_v34 = vld [vmem:[#allocation103_spill] sm:$0xff] }
0x1b15   :  { %18968 = vmatpush1.msra.mxu1 %v27190_v48  ;;  %18660 = vmatprep.subr.mxu0 %v28867_v37  ;;  %v28872_v48 = vld [vmem:[#allocation105_spill] sm:$0xff] }
0x1b16   :  { %18970 = vmatprep.subr.mxu1 %v27200_v58  ;;  %18663 = vmatpush1.msra.mxu0 %v28868_v56  ;;  %v28875_v58 = vld [vmem:[#allocation110_spill] sm:$0xff] }
0x1b17   :  { %18972 = vmatpush1.msra.mxu1 %v27207_v1  ;;  %18666 = vmatprep.subr.mxu0 %v28869_v63  ;;  %v28873_v1 = vld [vmem:[#allocation107_spill] sm:$0xff] }
0x1b18   :  { %18974 = vmatprep.subr.mxu1 %v27217_v47  ;;  %18669 = vmatpush1.msra.mxu0 %v28870_v51  ;;  %v28874_v47 = vld [vmem:[#allocation109_spill] sm:$0xff] }
0x1b19   :  { %18702 = vmatprep.mubr.f32.mxu0 %v28601_v22  ;;  %18976 = vmatpush1.msra.mxu1 %v27232_v27  ;;  %v28876_v27 = vld [vmem:[#allocation112_spill] sm:$0xff] }
0x1b1a   :  { %18705 = vmatmul.mubr.f32.vlgmr.msra.gmra.mxu0 %v27935_v39  ;;  %18820 = vmatprep.subr.mxu0 %v28871_v34 }
0x1b1b   :  { %18978 = vmatprep.subr.mxu1 %v27261_v40  ;;  %18824 = vmatpush1.msra.mxu0 %v28872_v48  ;;  %v28877_v40 = vld [vmem:[#allocation113_spill] sm:$0xff]  ;;  %v17067_v39 = vpop.f32.mrf.mxu1 }
0x1b1c   :  { %18980 = vmatpush1.msra.mxu1 %v27286_v20  ;;  %18828 = vmatprep.subr.mxu0 %v28873_v1  ;;  %v28878_v20 = vld [vmem:[#allocation116_spill] sm:$0xff] }
0x1b1d   :  { %18982 = vmatprep.subr.mxu1 %v27298_v60  ;;  %18832 = vmatpush1.msra.mxu0 %v28874_v47  ;;  %v28879_v60 = vld [vmem:[#allocation122_spill] sm:$0xff]  ;;  %v17069_v36 = vpop.f32.mrf.mxu1 }
0x1b1e   :  { %18984 = vmatpush1.msra.mxu1 %v27310_v55  ;;  %18836 = vmatprep.subr.mxu0 %v28875_v58  ;;  %v28880_v55 = vld [vmem:[#allocation127_spill] sm:$0xff] }
0x1b1f   :  { %18986 = vmatprep.subr.mxu1 %v27324_v17  ;;  %18840 = vmatpush1.msra.mxu0 %v28876_v27  ;;  %v28881_v17 = vld [vmem:[#allocation130_spill] sm:$0xff] }
0x1b20   :  { %18988 = vmatpush1.msra.mxu1 %v27338_v14  ;;  %18844 = vmatprep.subr.mxu0 %v28877_v40 }
0x1b21   :  { %18990 = vmatprep.subr.mxu1 %v27352_v0  ;;  %18848 = vmatpush1.msra.mxu0 %v28878_v20 }
0x1b22   :  { %18992 = vmatpush1.msra.mxu1 %v27367_v19  ;;  %18852 = vmatprep.subr.mxu0 %v28879_v60  ;;  %v28883_v19 = vld [vmem:[#allocation135_spill] sm:$0xff] }
0x1b23   :  { %18994 = vmatprep.subr.mxu1 %v27381_v41  ;;  %18856 = vmatpush1.msra.mxu0 %v28880_v55  ;;  %v28884_v41 = vld [vmem:[#allocation137_spill] sm:$0xff] }
0x1b24   :  { %18996 = vmatpush1.msra.mxu1 %v27396_v23  ;;  %18860 = vmatprep.subr.mxu0 %v28881_v17  ;;  %v16875_v14 = vpop.f32.mrf.mxu0 }
0x1b25   :  { %18998 = vmatprep.subr.mxu1 %v27411_v31  ;;  %18864 = vmatpush1.msra.mxu0 %v28882_v15  ;;  %v16876_v0 = vadd.f32 %v16875_v14, %v16773_v26  ;;  %v28886_v31 = vld [vmem:[#allocation142_spill] sm:$0xff] }
0x1b26   :  { %19000 = vmatpush1.msra.mxu1 %v27426_v10  ;;  %18868 = vmatprep.subr.mxu0 %v28883_v19  ;;  %v16877_v29 = vpop.f32.mrf.mxu0  ;;  %v28887_v10 = vld [vmem:[#allocation146_spill] sm:$0xff] }
0x1b27   :  { %19002 = vmatprep.subr.mxu1 %v27441_v9  ;;  %18872 = vmatpush1.msra.mxu0 %v28884_v41  ;;  %v16878_v54 = vadd.f32 %v16877_v29, %v16775_v59  ;;  %v17068_v23 = vadd.f32 %v17067_v39, %v16876_v0  ;;  %v28888_v9 = vld [vmem:[#allocation149_spill] sm:$0xff] }
0x1b28   :  { %19004 = vmatpush1.msra.mxu1 %v27456_v46  ;;  %18876 = vmatprep.subr.mxu0 %v28885_v52  ;;  %v28889_v46 = vld [vmem:[#allocation152_spill] sm:$0xff] }
0x1b29   :  { %19006 = vmatprep.subr.mxu1 %v28845_v12  ;;  %18880 = vmatpush1.msra.mxu0 %v28886_v31  ;;  %v17070_v8 = vadd.f32 %v17069_v36, %v16878_v54  ;;  %v28891_v12 = vld [vmem:[#allocation158_spill] sm:$0xff] }
0x1b2a   :  { %19008 = vmatpush1.msra.mxu1 %v28846_v21  ;;  %19041 = vmatprep.mubr.f32.mxu1 %v28601_v22  ;;  %v28894_v21 = vld [vmem:[#allocation164_spill] sm:$0xff] }
0x1b2b   :  { %18884 = vmatprep.subr.mxu0 %v28887_v10  ;;  %19043 = vmatmul.mubr.f32.vlgmr.msra.gmra.mxu1 %v27924_v18 }
0x1b2c   :  { %18888 = vmatpush1.msra.mxu0 %v28888_v9  ;;  %18945 = vmatprep.mubr.f32.mxu0 %v28601_v22 }
0x1b2d   :  { %18892 = vmatprep.subr.mxu0 %v28889_v46 }
0x1b2e   :  { %18896 = vmatpush1.msra.mxu0 %v28890_v6 }
0x1b2f   :  { %18900 = vmatprep.subr.mxu0 %v28891_v12 }
0x1b30   :  { %18904 = vmatpush1.msra.mxu0 %v28892_v25 }
0x1b31   :  { %18908 = vmatprep.subr.mxu0 %v28893_v50 }
0x1b32   :  { %18912 = vmatpush1.msra.mxu0 %v28894_v21 }
0x1b33   :  { %18947 = vmatmul.mubr.f32.vlgmr.msra.gmra.mxu0 %v27924_v18 }
0x1b35   :  { %v17286_v53 = vpop.f32.mrf.mxu1 }
0x1b37   :  { %v17288_v16 = vpop.f32.mrf.mxu1 }
0x1b3e   :  { %v17188_v35 = vpop.f32.mrf.mxu0 }
0x1b3f   :  { %v17189_v28 = vadd.f32 %v17188_v35, %v17068_v23 }
0x1b40   :  { %v17190_v61 = vpop.f32.mrf.mxu0 }
0x1b41   :  { %v17191_v57 = vadd.f32 %v17190_v61, %v17070_v8  ;;  %v17287_v22 = vadd.f32 %v17286_v53, %v17189_v28  ;;  %v22365_v28 = vmov 1966171168  }
0x1b42   :  { %v19067_v61 = vunpack.c.l.s4 %v22365_v28 }
0x1b43   :  { %v17289_v62 = vadd.f32 %v17288_v16, %v17191_v57  ;;  %v28895_v16 = vld [vmem:[#allocation2_spill] sm:$0xff] }
0x1b44   :  { %v19068_v57 = vunpack.c.0.s8 %v19067_v61 }
0x1b4f   :  { %v17526_v49 = vpop.f32.mrf.mxu1 }
0x1b51   :  { %v17528_v24 = vpop.f32.mrf.mxu1 }
0x1b58   :  { %v17430_v38 = vpop.f32.mrf.mxu0 }
0x1b59   :  { %v17431_v30 = vadd.f32 %v17430_v38, %v17287_v22 }
0x1b5a   :  { %v17432_v11 = vpop.f32.mrf.mxu0 }
0x1b5b   :  { %v17527_v5 = vadd.f32 %v17526_v49, %v17431_v30  ;;  %v17433_v4 = vadd.f32 %v17432_v11, %v17289_v62  ;;  %v19071_v62 = vsub.s32 %v19068_v57, %v28895_v16 }
0x1b5d   :  { %v17529_v7 = vadd.f32 %v17528_v24, %v17433_v4  ;;  %22328 = vtanh.f32 %v17527_v5  ;;  %v28896_v5 = vlaneseq }
0x1b5f   :  { %vm19091_vm2 = vcmp.lt.s32.totalorder %v28896_v5, 384 }
0x1b69   :  { %v17826_v45 = vpop.f32.mrf.mxu1 }
0x1b6a   :  { %v22329_v22 = vpop.eup %22328 }
0x1b6b   :  { %v17828_v2 = vpop.f32.mrf.mxu1 }
0x1b72   :  { %v17634_v42 = vpop.f32.mrf.mxu0 }
0x1b73   :  { %v17827_v44 = vadd.f32 %v17826_v45, %v17634_v42 }
0x1b74   :  { %v17636_v26 = vpop.f32.mrf.mxu0 }
0x1b75   :  { %v17829_v43 = vadd.f32 %v17828_v2, %v17636_v26 }
0x1b83   :  { %v18045_v33 = vpop.f32.mrf.mxu1 }
0x1b85   :  { %v18047_v37 = vpop.f32.mrf.mxu1 }
0x1b8c   :  { %v17947_v18 = vpop.f32.mrf.mxu0 }
0x1b8d   :  { %v17948_v13 = vadd.f32 %v17947_v18, %v17827_v44 }
0x1b8e   :  { %v17949_v59 = vpop.f32.mrf.mxu0 }
0x1b8f   :  { %v17950_v32 = vadd.f32 %v17949_v59, %v17829_v43  ;;  %v18046_v56 = vadd.f32 %v18045_v33, %v17948_v13 }
0x1b91   :  { %v18048_v48 = vadd.f32 %v18047_v37, %v17950_v32 }
0x1b9d   :  { %v18285_v63 = vpop.f32.mrf.mxu1 }
0x1b9f   :  { %v18287_v58 = vpop.f32.mrf.mxu1 }
0x1ba6   :  { %v18189_v3 = vpop.f32.mrf.mxu0 }
0x1ba7   :  { %v18190_v34 = vadd.f32 %v18189_v3, %v18046_v56 }
0x1ba8   :  { %v18191_v51 = vpop.f32.mrf.mxu0 }
0x1ba9   :  { %v18192_v47 = vadd.f32 %v18191_v51, %v18048_v48  ;;  %v18286_v27 = vadd.f32 %v18285_v63, %v18190_v34 }
0x1bab   :  { %v18288_v55 = vadd.f32 %v18287_v58, %v18192_v47 }
0x1bb7   :  { %v18585_v40 = vpop.f32.mrf.mxu1 }
0x1bb9   :  { %v18587_v14 = vpop.f32.mrf.mxu1 }
0x1bc0   :  { %v18393_v1 = vpop.f32.mrf.mxu0 }
0x1bc1   :  { %v18394_v60 = vadd.f32 %v18393_v1, %v18286_v27 }
0x1bc2   :  { %v18395_v20 = vpop.f32.mrf.mxu0 }
0x1bc3   :  { %v18396_v39 = vadd.f32 %v18395_v20, %v18288_v55  ;;  %v18586_v15 = vadd.f32 %v18585_v40, %v18394_v60 }
0x1bc5   :  { %v18588_v41 = vadd.f32 %v18587_v14, %v18396_v39 }
0x1bd1   :  { %v18804_v0 = vpop.f32.mrf.mxu1 }
0x1bd3   :  { %v18806_v23 = vpop.f32.mrf.mxu1 }
0x1bda   :  { %v18706_v17 = vpop.f32.mrf.mxu0 }
0x1bdb   :  { %v18707_v29 = vadd.f32 %v18706_v17, %v18586_v15 }
0x1bdc   :  { %v18708_v19 = vpop.f32.mrf.mxu0 }
0x1bdd   :  { %v18709_v54 = vadd.f32 %v18708_v19, %v18588_v41  ;;  %v18805_v52 = vadd.f32 %v18804_v0, %v18707_v29 }
0x1bdf   :  { %v18807_v10 = vadd.f32 %v18806_v23, %v18709_v54 }
0x1beb   :  { %v19044_v36 = vpop.f32.mrf.mxu1 }
0x1bed   :  { %v19046_v12 = vpop.f32.mrf.mxu1 }
0x1bf3   :  { %v18948_v31 = vpop.f32.mrf.mxu0 }
0x1bf4   :  { %v18949_v8 = vadd.f32 %v18948_v31, %v18805_v52 }
0x1bf5   :  { %v18950_v9 = vpop.f32.mrf.mxu0 }
0x1bf6   :  { %v19045_v46 = vadd.f32 %v19044_v36, %v18949_v8  ;;  %v18951_v6 = vadd.f32 %v18950_v9, %v18807_v10 }
0x1bf8   :  { %v19047_v25 = vadd.f32 %v19046_v12, %v18951_v6  ;;  %19051 = vrot.lane.b32.xlu1 %v19045_v46, %s22364_s2 }
0x1bfa   :  { %19053 = vrot.lane.b32.xlu0 %v19047_v25, %s22364_s2 }
0x1c6a   :  { %v19052_v50 = vpop.permute.xlu1 %19051 }
0x1c6b   :  { %v19058_v21 = vsel %vm8328_vm10, %v17529_v7, %v19052_v50 }
0x1c6c   :  { %22330 = vtanh.f32 %v19058_v21  ;;  %v19054_v53 = vpop.permute.xlu0 %19053 }
0x1c6d   :  { %v19055_v35 = vsel %vm8328_vm10, %v19052_v50, %v19054_v53 }
0x1c6e   :  { %22332 = vtanh.f32 %v19055_v35 }
0x1c79   :  { %v22331_v49 = vpop.eup %22330 }
0x1c7a   :  { %v19065_v38 = vcombine.low %v22329_v22, %v22331_v49 }
0x1c7b   :  { %v22333_v30 = vpop.eup %22332 }
0x1c7c   :  { %v19072_v11 = vrot.slane %v19065_v38, %v19071_v62  ;;  %v19079_v4 = vrot.slane %v22333_v30, %v19071_v62 }
0x1c7e   :  { %v19080_v24 = vcombine.low %v19072_v11, %v19079_v4 }
0x1c80   :  { %v19087_v7 = vrot.slane %v19080_v24, %v19071_v62 }
0x1c82   :  { %19093 = vst.msk [vmem:[%s28077_s4] sm:$0x7] %vm19091_vm2, %v19087_v7 }

</bundles_post_ra>
